<compile_context>
chip_gen: v6e
topology: v6e:2x2x1
jax: 0.10.0
libtpu: 0.0.40
codegen_flags: <defaults>
</compile_context>

<pallas_src>
import numpy as np
import jax
import jax.numpy as jnp
from jax.experimental import pallas as pl
from jax.experimental.pallas import tpu as pltpu

# Small problem sizes consistent with the module's forward.
B = 2
DIM_IN = 32
NV = 16             # number of vertices (fc1 out features / conv1 in-channels)
ND = 8              # Nd
NF = 64             # Nf
H = W = 16          # im_size
HW = H * W
CONV_OUT = 64       # conv1 out channels
EMB = CONV_OUT * 4  # 256 = flattened embedding width


def _texfield_kernel(x_ref, vlm_ref, imgt_ref,
                     fc1_wT_ref, fc1_b_ref, wv_ref, wx_ref, cb_ref,
                     wsamp_ref, bsamp_ref, wsel_ref, bsel_ref,
                     seg_sum_ref, sel_sum_ref, d_exp_ref,
                     out_ref):
    f32 = jnp.float32
    dot = lambda a, b: jnp.dot(a, b, preferred_element_type=f32)

    # fc1: (B, DIM_IN) @ (DIM_IN, NV) -> (B, NV)
    x1 = dot(x_ref[...], fc1_wT_ref[...]) + fc1_b_ref[...]

    # conv1 (kernel_size=1) over the 4 embedding positions, fused into two matmuls
    # with host-prepared block weights:  e[b, l*64+o] == conv1(cat(verts, x1))[b, o, l]
    e = dot(vlm_ref[...], wv_ref[...]) + dot(x1, wx_ref[...]) + cb_ref[...]        # (B, EMB)

    # fc_sampling / fc_selection: one wide K=256 matmul each, bias added once.
    samp = dot(e, wsamp_ref[...]) + bsamp_ref[...]      # (B, ND*HW), col = d*HW + p
    sel = dot(e, wsel_ref[...]) + bsel_ref[...]         # (B, ND*NF), col = d*NF + f

    # Softmax over HW per (b, d) and over ND per (b, f).  Subtracting the per-row
    # global max is exact (constant along the softmax axis); segment sums are
    # indicator matmuls, so the flat lane layout never needs reshaping.
    eS = jnp.exp(samp - jnp.max(samp, axis=-1, keepdims=True))                     # (B, ND*HW)
    inv_ds = pl.reciprocal(dot(eS, seg_sum_ref[...]), approx=True)                 # (B, ND)
    eL = jnp.exp(sel - jnp.max(sel, axis=-1, keepdims=True))                       # (B, ND*NF)
    inv_df = pl.reciprocal(dot(eL, sel_sum_ref[...]), approx=True)                 # (B, NF)

    nb = out_ref.shape[0]
    for b in range(nb):  # tiny static loop; all heavy math above is batch-fused
        # mat1[b] = img[b] @ col_sampling[b]  -> (3, ND)
        mat1 = dot(imgt_ref[b] * eS[b:b + 1, :], seg_sum_ref[...]) * inv_ds[b:b + 1, :]
        # textures[b] = mat1 @ col_selection[b]  -> (3, NF)
        numer = dot(dot(mat1, d_exp_ref[...]) * eL[b:b + 1, :], sel_sum_ref[...])
        out_ref[b] = (numer * inv_df[b:b + 1, :]).astype(out_ref.dtype)


def prepare_params(params):
    """One-time host-side re-layout of module parameters into kernel-ready operands
    (hoisted out of the per-call path).  Pure index bookkeeping; semantics preserved."""
    f32 = np.float32
    fc1_w = np.asarray(params["fc1_w"], f32)                  # (NV, DIM_IN)
    fc1_b = np.asarray(params["fc1_b"], f32)                  # (NV,)
    conv_wT = np.asarray(params["conv1_w"], f32)[:, :, 0].T   # (NV, 64): [i, o]
    conv_b = np.asarray(params["conv1_b"], f32)               # (64,)

    # Block weights so that  e = verts_lmajor @ Wv + x1 @ Wx + cb  gives
    # e[b, l*64+o] = conv1_out[b, o, l]  (l-major flattening; fc weights re-indexed to match).
    wv = np.zeros((3 * NV, EMB), f32)
    for l in range(3):
        wv[l * NV:(l + 1) * NV, l * CONV_OUT:(l + 1) * CONV_OUT] = conv_wT
    wx = np.zeros((NV, EMB), f32)
    wx[:, 3 * CONV_OUT:] = conv_wT
    cb = np.tile(conv_b, 4).reshape(1, EMB)

    # fc_sampling.weight[p*ND+d, o*4+l] -> Wsamp[l*64+o, d*HW+p]
    fcs_w = np.asarray(params["fcs_w"], f32)
    wsamp = fcs_w.reshape(HW, ND, CONV_OUT, 4).transpose(3, 2, 1, 0).reshape(EMB, ND * HW)
    bsamp = np.asarray(params["fcs_b"], f32).reshape(HW, ND).T.reshape(1, ND * HW)

    # fc_selection.weight[d*NF+f, o*4+l] -> Wsel[l*64+o, d*NF+f]
    fcsel_w = np.asarray(params["fcsel_w"], f32)
    wsel = fcsel_w.reshape(ND * NF, CONV_OUT, 4).transpose(2, 1, 0).reshape(EMB, ND * NF)
    bsel = np.asarray(params["fcsel_b"], f32).reshape(1, ND * NF)

    # Constant 0/1 indicator matrices (segment-sum / per-d broadcast as MXU matmuls).
    seg_sum = np.kron(np.eye(ND, dtype=f32), np.ones((HW, 1), f32))    # (ND*HW, ND)
    sel_sum = np.kron(np.ones((ND, 1), f32), np.eye(NF, dtype=f32))    # (ND*NF, NF)
    d_exp = np.kron(np.eye(ND, dtype=f32), np.ones((1, NF), f32))      # (ND, ND*NF)

    prepared = dict(fc1_wT=fc1_w.T, fc1_b=fc1_b.reshape(1, NV), wv=wv, wx=wx, cb=cb,
                    wsamp=wsamp, bsamp=bsamp, wsel=wsel, bsel=bsel,
                    seg_sum=seg_sum, sel_sum=sel_sum, d_exp=d_exp)
    return {k: jnp.asarray(v) for k, v in prepared.items()}


@jax.jit
def tex_field_vanilla_forward(x, verts, img, prep):
    b, c, h, w = img.shape
    hw = h * w
    nv = verts.shape[1]

    # Cheap input re-arrangement (fuses under jit).
    verts_lm = verts.transpose(0, 2, 1).reshape(b, 3 * nv)      # [b, l*NV + i]
    img_tiled = jnp.tile(img.reshape(b, c, hw), (1, 1, ND))     # [b, c, d*HW + p]

    def full(a):
        return pl.BlockSpec(a.shape, lambda i, _n=a.ndim: (0,) * _n)

    args = (x, verts_lm, img_tiled,
            prep["fc1_wT"], prep["fc1_b"], prep["wv"], prep["wx"], prep["cb"],
            prep["wsamp"], prep["bsamp"], prep["wsel"], prep["bsel"],
            prep["seg_sum"], prep["sel_sum"], prep["d_exp"])

    out = pl.pallas_call(
        _texfield_kernel,
        out_shape=jax.ShapeDtypeStruct((b, 3, NF), jnp.float32),
        grid=(1,),
        in_specs=[full(a) for a in args],
        out_specs=pl.BlockSpec((b, 3, NF), lambda i: (0, 0, 0)),
        compiler_params=pltpu.CompilerParams(
            dimension_semantics=("arbitrary",)),
    )(*args)

    # torch: .permute(0, 2, 1) -> (B, NF, 3); kept in the wrapper (tiny, fuses with consumer).
    return out.transpose(0, 2, 1)


def ref_forward_np(x, verts, img, params):
    """float64 numpy mirror of the PyTorch forward (ground truth for the test)."""
    f64 = np.float64
    x = np.asarray(x, f64); verts = np.asarray(verts, f64); img = np.asarray(img, f64)
    p = {k: np.asarray(v, f64) for k, v in params.items()}
    b, c, h, w = img.shape
    x1 = x.reshape(b, -1) @ p["fc1_w"].T + p["fc1_b"]                          # (b, NV)
    emb = np.concatenate([verts, x1[:, :, None]], axis=2)                      # (b, NV, 4)
    conv = np.einsum("oi,bil->bol", p["conv1_w"][:, :, 0], emb) + p["conv1_b"][None, :, None]
    flat = conv.reshape(b, -1)                                                 # (b, 256)

    def softmax(z, axis):
        z = z - z.max(axis=axis, keepdims=True)
        ez = np.exp(z)
        return ez / ez.sum(axis=axis, keepdims=True)

    samp = softmax((flat @ p["fcs_w"].T + p["fcs_b"]).reshape(b, h * w, ND), axis=1)
    sel = softmax((flat @ p["fcsel_w"].T + p["fcsel_b"]).reshape(b, ND, NF), axis=1)
    mat1 = img.reshape(b, 3, h * w) @ samp                                     # (b, 3, ND)
    return (mat1 @ sel).transpose(0, 2, 1)                                     # (b, NF, 3)


if __name__ == "__main__":
    key = jax.random.PRNGKey(0)
    ks = jax.random.split(key, 11)
    x = jax.random.normal(ks[0], (B, DIM_IN), jnp.float32)
    verts = jax.random.normal(ks[1], (B, NV, 3), jnp.float32)
    img = jax.random.normal(ks[2], (B, 3, H, W), jnp.float32)

    s = 0.1  # deterministic synthetic weights (shapes follow the module's __init__)
    params = {
        "fc1_w":   s * jax.random.normal(ks[3], (NV, DIM_IN), jnp.float32),
        "fc1_b":   s * jax.random.normal(ks[4], (NV,), jnp.float32),
        "conv1_w": s * jax.random.normal(ks[5], (CONV_OUT, NV, 1), jnp.float32),
        "conv1_b": s * jax.random.normal(ks[6], (CONV_OUT,), jnp.float32),
        "fcs_w":   s * jax.random.normal(ks[7], (HW * ND, EMB), jnp.float32),
        "fcs_b":   s * jax.random.normal(ks[8], (HW * ND,), jnp.float32),
        "fcsel_w": s * jax.random.normal(ks[9], (ND * NF, EMB), jnp.float32),
        "fcsel_b": s * jax.random.normal(ks[10], (ND * NF,), jnp.float32),
    }

    prep = prepare_params(params)           # one-time host-side re-layout (hoisted)
    out = tex_field_vanilla_forward(x, verts, img, prep)
    out = jax.block_until_ready(out)
    assert out.shape == (B, NF, 3)

    ref = ref_forward_np(x, verts, img, params)
    # Default (non-"highest") MXU precision in the kernel -> compare vs float64 truth
    # with a tolerance that covers bf16-pass matmul rounding.
    np.testing.assert_allclose(np.asarray(out), ref, atol=5e-3, rtol=5e-3)
    print("KERNEL_OK")
</pallas_src>

<mosaic_0001>
module attributes {stable_mosaic.version = 11 : i64} {
  func.func @_texfield_kernel(%arg0: i32, %arg1: memref<2x32xf32, #tpu.memory_space<vmem>>, %arg2: memref<2x48xf32, #tpu.memory_space<vmem>>, %arg3: memref<2x3x2048xf32, #tpu.memory_space<vmem>>, %arg4: memref<32x16xf32, #tpu.memory_space<vmem>>, %arg5: memref<1x16xf32, #tpu.memory_space<vmem>>, %arg6: memref<48x256xf32, #tpu.memory_space<vmem>>, %arg7: memref<16x256xf32, #tpu.memory_space<vmem>>, %arg8: memref<1x256xf32, #tpu.memory_space<vmem>>, %arg9: memref<256x2048xf32, #tpu.memory_space<vmem>>, %arg10: memref<1x2048xf32, #tpu.memory_space<vmem>>, %arg11: memref<256x512xf32, #tpu.memory_space<vmem>>, %arg12: memref<1x512xf32, #tpu.memory_space<vmem>>, %arg13: memref<2048x8xf32, #tpu.memory_space<vmem>>, %arg14: memref<512x64xf32, #tpu.memory_space<vmem>>, %arg15: memref<8x512xf32, #tpu.memory_space<vmem>>, %arg16: memref<2x3x64xf32, #tpu.memory_space<vmem>>) attributes {dimension_semantics = [#tpu.dimension_semantics<arbitrary>], iteration_bounds = array<i64: 1>, scalar_prefetch = 0 : i64, scratch_operands = 0 : i64, tpu.core_type = #tpu.core_type<tc>, window_params = [{pipeline_mode = #tpu.pipeline_mode<synchronous>, transform_indices = @transform_0, window_bounds = array<i64: 2, 32>}, {pipeline_mode = #tpu.pipeline_mode<synchronous>, transform_indices = @transform_1, window_bounds = array<i64: 2, 48>}, {pipeline_mode = #tpu.pipeline_mode<synchronous>, transform_indices = @transform_2, window_bounds = array<i64: 2, 3, 2048>}, {pipeline_mode = #tpu.pipeline_mode<synchronous>, transform_indices = @transform_3, window_bounds = array<i64: 32, 16>}, {pipeline_mode = #tpu.pipeline_mode<synchronous>, transform_indices = @transform_4, window_bounds = array<i64: 1, 16>}, {pipeline_mode = #tpu.pipeline_mode<synchronous>, transform_indices = @transform_5, window_bounds = array<i64: 48, 256>}, {pipeline_mode = #tpu.pipeline_mode<synchronous>, transform_indices = @transform_6, window_bounds = array<i64: 16, 256>}, {pipeline_mode = #tpu.pipeline_mode<synchronous>, transform_indices = @transform_7, window_bounds = array<i64: 1, 256>}, {pipeline_mode = #tpu.pipeline_mode<synchronous>, transform_indices = @transform_8, window_bounds = array<i64: 256, 2048>}, {pipeline_mode = #tpu.pipeline_mode<synchronous>, transform_indices = @transform_9, window_bounds = array<i64: 1, 2048>}, {pipeline_mode = #tpu.pipeline_mode<synchronous>, transform_indices = @transform_10, window_bounds = array<i64: 256, 512>}, {pipeline_mode = #tpu.pipeline_mode<synchronous>, transform_indices = @transform_11, window_bounds = array<i64: 1, 512>}, {pipeline_mode = #tpu.pipeline_mode<synchronous>, transform_indices = @transform_12, window_bounds = array<i64: 2048, 8>}, {pipeline_mode = #tpu.pipeline_mode<synchronous>, transform_indices = @transform_13, window_bounds = array<i64: 512, 64>}, {pipeline_mode = #tpu.pipeline_mode<synchronous>, transform_indices = @transform_14, window_bounds = array<i64: 8, 512>}, {pipeline_mode = #tpu.pipeline_mode<synchronous>, transform_indices = @transform_15, window_bounds = array<i64: 2, 3, 64>}]} {
    %c0 = arith.constant 0 : index
    %c0_0 = arith.constant 0 : index
    %0 = vector.load %arg1[%c0, %c0_0] : memref<2x32xf32, #tpu.memory_space<vmem>>, vector<2x32xf32>
    %c0_1 = arith.constant 0 : index
    %c0_2 = arith.constant 0 : index
    %1 = vector.load %arg4[%c0_1, %c0_2] : memref<32x16xf32, #tpu.memory_space<vmem>>, vector<32x16xf32>
    %cst = arith.constant dense<0.000000e+00> : vector<2x16xf32>
    %2 = tpu.matmul %0, %1, %cst {dimension_numbers = #tpu.dot_dimension_numbers<[1], [0], [0], [1], [0, 0, 1, 1], [], []>} : vector<2x32xf32>, vector<32x16xf32>, vector<2x16xf32> -> vector<2x16xf32>
    %c0_3 = arith.constant 0 : index
    %c0_4 = arith.constant 0 : index
    %3 = vector.load %arg5[%c0_3, %c0_4] : memref<1x16xf32, #tpu.memory_space<vmem>>, vector<1x16xf32>
    %4 = vector.broadcast %3 : vector<1x16xf32> to vector<2x16xf32>
    %5 = arith.addf %2, %4 : vector<2x16xf32>
    %c0_5 = arith.constant 0 : index
    %c0_6 = arith.constant 0 : index
    %6 = vector.load %arg2[%c0_5, %c0_6] : memref<2x48xf32, #tpu.memory_space<vmem>>, vector<2x48xf32>
    %c0_7 = arith.constant 0 : index
    %c0_8 = arith.constant 0 : index
    %7 = vector.load %arg6[%c0_7, %c0_8] : memref<48x256xf32, #tpu.memory_space<vmem>>, vector<48x256xf32>
    %cst_9 = arith.constant dense<0.000000e+00> : vector<2x256xf32>
    %8 = tpu.matmul %6, %7, %cst_9 {dimension_numbers = #tpu.dot_dimension_numbers<[1], [0], [0], [1], [0, 0, 1, 1], [], []>} : vector<2x48xf32>, vector<48x256xf32>, vector<2x256xf32> -> vector<2x256xf32>
    %c0_10 = arith.constant 0 : index
    %c0_11 = arith.constant 0 : index
    %9 = vector.load %arg7[%c0_10, %c0_11] : memref<16x256xf32, #tpu.memory_space<vmem>>, vector<16x256xf32>
    %cst_12 = arith.constant dense<0.000000e+00> : vector<2x256xf32>
    %10 = tpu.matmul %5, %9, %cst_12 {dimension_numbers = #tpu.dot_dimension_numbers<[1], [0], [0], [1], [0, 0, 1, 1], [], []>} : vector<2x16xf32>, vector<16x256xf32>, vector<2x256xf32> -> vector<2x256xf32>
    %11 = arith.addf %8, %10 : vector<2x256xf32>
    %c0_13 = arith.constant 0 : index
    %c0_14 = arith.constant 0 : index
    %12 = vector.load %arg8[%c0_13, %c0_14] : memref<1x256xf32, #tpu.memory_space<vmem>>, vector<1x256xf32>
    %13 = vector.broadcast %12 : vector<1x256xf32> to vector<2x256xf32>
    %14 = arith.addf %11, %13 : vector<2x256xf32>
    %c0_15 = arith.constant 0 : index
    %c0_16 = arith.constant 0 : index
    %15 = vector.load %arg9[%c0_15, %c0_16] : memref<256x2048xf32, #tpu.memory_space<vmem>>, vector<256x2048xf32>
    %cst_17 = arith.constant dense<0.000000e+00> : vector<2x2048xf32>
    %16 = tpu.matmul %14, %15, %cst_17 {dimension_numbers = #tpu.dot_dimension_numbers<[1], [0], [0], [1], [0, 0, 1, 1], [], []>} : vector<2x256xf32>, vector<256x2048xf32>, vector<2x2048xf32> -> vector<2x2048xf32>
    %c0_18 = arith.constant 0 : index
    %c0_19 = arith.constant 0 : index
    %17 = vector.load %arg10[%c0_18, %c0_19] : memref<1x2048xf32, #tpu.memory_space<vmem>>, vector<1x2048xf32>
    %18 = vector.broadcast %17 : vector<1x2048xf32> to vector<2x2048xf32>
    %19 = arith.addf %16, %18 : vector<2x2048xf32>
    %c0_20 = arith.constant 0 : index
    %c0_21 = arith.constant 0 : index
    %20 = vector.load %arg11[%c0_20, %c0_21] : memref<256x512xf32, #tpu.memory_space<vmem>>, vector<256x512xf32>
    %cst_22 = arith.constant dense<0.000000e+00> : vector<2x512xf32>
    %21 = tpu.matmul %14, %20, %cst_22 {dimension_numbers = #tpu.dot_dimension_numbers<[1], [0], [0], [1], [0, 0, 1, 1], [], []>} : vector<2x256xf32>, vector<256x512xf32>, vector<2x512xf32> -> vector<2x512xf32>
    %c0_23 = arith.constant 0 : index
    %c0_24 = arith.constant 0 : index
    %22 = vector.load %arg12[%c0_23, %c0_24] : memref<1x512xf32, #tpu.memory_space<vmem>>, vector<1x512xf32>
    %23 = vector.broadcast %22 : vector<1x512xf32> to vector<2x512xf32>
    %24 = arith.addf %21, %23 : vector<2x512xf32>
    %cst_25 = arith.constant dense<0xFF800000> : vector<2xf32>
    %25 = vector.multi_reduction <maximumf>, %19, %cst_25 [1] : vector<2x2048xf32> to vector<2xf32>
    %26 = vector.shape_cast %25 : vector<2xf32> to vector<2x1xf32>
    %27 = vector.broadcast %26 : vector<2x1xf32> to vector<2x2048xf32>
    %28 = arith.subf %19, %27 : vector<2x2048xf32>
    %29 = math.exp %28 : vector<2x2048xf32>
    %c0_26 = arith.constant 0 : index
    %c0_27 = arith.constant 0 : index
    %30 = vector.load %arg13[%c0_26, %c0_27] : memref<2048x8xf32, #tpu.memory_space<vmem>>, vector<2048x8xf32>
    %cst_28 = arith.constant dense<0.000000e+00> : vector<2x8xf32>
    %31 = tpu.matmul %29, %30, %cst_28 {dimension_numbers = #tpu.dot_dimension_numbers<[1], [0], [0], [1], [0, 0, 1, 1], [], []>} : vector<2x2048xf32>, vector<2048x8xf32>, vector<2x8xf32> -> vector<2x8xf32>
    %32 = tpu.reciprocal %31 {approx = true} : vector<2x8xf32> -> vector<2x8xf32>
    %cst_29 = arith.constant dense<0xFF800000> : vector<2xf32>
    %33 = vector.multi_reduction <maximumf>, %24, %cst_29 [1] : vector<2x512xf32> to vector<2xf32>
    %34 = vector.shape_cast %33 : vector<2xf32> to vector<2x1xf32>
    %35 = vector.broadcast %34 : vector<2x1xf32> to vector<2x512xf32>
    %36 = arith.subf %24, %35 : vector<2x512xf32>
    %37 = math.exp %36 : vector<2x512xf32>
    %c0_30 = arith.constant 0 : index
    %c0_31 = arith.constant 0 : index
    %38 = vector.load %arg14[%c0_30, %c0_31] : memref<512x64xf32, #tpu.memory_space<vmem>>, vector<512x64xf32>
    %cst_32 = arith.constant dense<0.000000e+00> : vector<2x64xf32>
    %39 = tpu.matmul %37, %38, %cst_32 {dimension_numbers = #tpu.dot_dimension_numbers<[1], [0], [0], [1], [0, 0, 1, 1], [], []>} : vector<2x512xf32>, vector<512x64xf32>, vector<2x64xf32> -> vector<2x64xf32>
    %40 = tpu.reciprocal %39 {approx = true} : vector<2x64xf32> -> vector<2x64xf32>
    %c0_33 = arith.constant 0 : index
    %c0_34 = arith.constant 0 : index
    %c0_35 = arith.constant 0 : index
    %41 = vector.load %arg3[%c0_33, %c0_34, %c0_35] : memref<2x3x2048xf32, #tpu.memory_space<vmem>>, vector<1x3x2048xf32>
    %42 = vector.shape_cast %41 : vector<1x3x2048xf32> to vector<3x2048xf32>
    %43 = vector.extract_strided_slice %29 {offsets = [0, 0], sizes = [1, 2048], strides = [1, 1]} : vector<2x2048xf32> to vector<1x2048xf32>
    %44 = vector.broadcast %43 : vector<1x2048xf32> to vector<3x2048xf32>
    %45 = arith.mulf %42, %44 : vector<3x2048xf32>
    %c0_36 = arith.constant 0 : index
    %c0_37 = arith.constant 0 : index
    %46 = vector.load %arg13[%c0_36, %c0_37] : memref<2048x8xf32, #tpu.memory_space<vmem>>, vector<2048x8xf32>
    %cst_38 = arith.constant dense<0.000000e+00> : vector<3x8xf32>
    %47 = tpu.matmul %45, %46, %cst_38 {dimension_numbers = #tpu.dot_dimension_numbers<[1], [0], [0], [1], [0, 0, 1, 1], [], []>} : vector<3x2048xf32>, vector<2048x8xf32>, vector<3x8xf32> -> vector<3x8xf32>
    %48 = vector.extract_strided_slice %32 {offsets = [0, 0], sizes = [1, 8], strides = [1, 1]} : vector<2x8xf32> to vector<1x8xf32>
    %49 = vector.broadcast %48 : vector<1x8xf32> to vector<3x8xf32>
    %50 = arith.mulf %47, %49 : vector<3x8xf32>
    %c0_39 = arith.constant 0 : index
    %c0_40 = arith.constant 0 : index
    %51 = vector.load %arg15[%c0_39, %c0_40] : memref<8x512xf32, #tpu.memory_space<vmem>>, vector<8x512xf32>
    %cst_41 = arith.constant dense<0.000000e+00> : vector<3x512xf32>
    %52 = tpu.matmul %50, %51, %cst_41 {dimension_numbers = #tpu.dot_dimension_numbers<[1], [0], [0], [1], [0, 0, 1, 1], [], []>} : vector<3x8xf32>, vector<8x512xf32>, vector<3x512xf32> -> vector<3x512xf32>
    %53 = vector.extract_strided_slice %37 {offsets = [0, 0], sizes = [1, 512], strides = [1, 1]} : vector<2x512xf32> to vector<1x512xf32>
    %54 = vector.broadcast %53 : vector<1x512xf32> to vector<3x512xf32>
    %55 = arith.mulf %52, %54 : vector<3x512xf32>
    %c0_42 = arith.constant 0 : index
    %c0_43 = arith.constant 0 : index
    %56 = vector.load %arg14[%c0_42, %c0_43] : memref<512x64xf32, #tpu.memory_space<vmem>>, vector<512x64xf32>
    %cst_44 = arith.constant dense<0.000000e+00> : vector<3x64xf32>
    %57 = tpu.matmul %55, %56, %cst_44 {dimension_numbers = #tpu.dot_dimension_numbers<[1], [0], [0], [1], [0, 0, 1, 1], [], []>} : vector<3x512xf32>, vector<512x64xf32>, vector<3x64xf32> -> vector<3x64xf32>
    %58 = vector.extract_strided_slice %40 {offsets = [0, 0], sizes = [1, 64], strides = [1, 1]} : vector<2x64xf32> to vector<1x64xf32>
    %59 = vector.broadcast %58 : vector<1x64xf32> to vector<3x64xf32>
    %60 = arith.mulf %57, %59 : vector<3x64xf32>
    %c0_45 = arith.constant 0 : index
    %c0_46 = arith.constant 0 : index
    %c0_47 = arith.constant 0 : index
    %61 = vector.load %arg16[%c0_45, %c0_46, %c0_47] : memref<2x3x64xf32, #tpu.memory_space<vmem>>, vector<1x3x64xf32>
    %62 = vector.shape_cast %61 : vector<1x3x64xf32> to vector<3x64xf32>
    %63 = vector.shape_cast %60 : vector<3x64xf32> to vector<1x3x64xf32>
    tpu.vector_store %arg16[%c0_45, %c0_46, %c0_47], %63 {strides = array<i32>} : memref<2x3x64xf32, #tpu.memory_space<vmem>>, vector<1x3x64xf32>,
    %c1 = arith.constant 1 : index
    %c0_48 = arith.constant 0 : index
    %c0_49 = arith.constant 0 : index
    %64 = vector.load %arg3[%c1, %c0_48, %c0_49] : memref<2x3x2048xf32, #tpu.memory_space<vmem>>, vector<1x3x2048xf32>
    %65 = vector.shape_cast %64 : vector<1x3x2048xf32> to vector<3x2048xf32>
    %66 = vector.extract_strided_slice %29 {offsets = [1, 0], sizes = [1, 2048], strides = [1, 1]} : vector<2x2048xf32> to vector<1x2048xf32>
    %67 = vector.broadcast %66 : vector<1x2048xf32> to vector<3x2048xf32>
    %68 = arith.mulf %65, %67 : vector<3x2048xf32>
    %c0_50 = arith.constant 0 : index
    %c0_51 = arith.constant 0 : index
    %69 = vector.load %arg13[%c0_50, %c0_51] : memref<2048x8xf32, #tpu.memory_space<vmem>>, vector<2048x8xf32>
    %cst_52 = arith.constant dense<0.000000e+00> : vector<3x8xf32>
    %70 = tpu.matmul %68, %69, %cst_52 {dimension_numbers = #tpu.dot_dimension_numbers<[1], [0], [0], [1], [0, 0, 1, 1], [], []>} : vector<3x2048xf32>, vector<2048x8xf32>, vector<3x8xf32> -> vector<3x8xf32>
    %71 = vector.extract_strided_slice %32 {offsets = [1, 0], sizes = [1, 8], strides = [1, 1]} : vector<2x8xf32> to vector<1x8xf32>
    %72 = vector.broadcast %71 : vector<1x8xf32> to vector<3x8xf32>
    %73 = arith.mulf %70, %72 : vector<3x8xf32>
    %c0_53 = arith.constant 0 : index
    %c0_54 = arith.constant 0 : index
    %74 = vector.load %arg15[%c0_53, %c0_54] : memref<8x512xf32, #tpu.memory_space<vmem>>, vector<8x512xf32>
    %cst_55 = arith.constant dense<0.000000e+00> : vector<3x512xf32>
    %75 = tpu.matmul %73, %74, %cst_55 {dimension_numbers = #tpu.dot_dimension_numbers<[1], [0], [0], [1], [0, 0, 1, 1], [], []>} : vector<3x8xf32>, vector<8x512xf32>, vector<3x512xf32> -> vector<3x512xf32>
    %76 = vector.extract_strided_slice %37 {offsets = [1, 0], sizes = [1, 512], strides = [1, 1]} : vector<2x512xf32> to vector<1x512xf32>
    %77 = vector.broadcast %76 : vector<1x512xf32> to vector<3x512xf32>
    %78 = arith.mulf %75, %77 : vector<3x512xf32>
    %c0_56 = arith.constant 0 : index
    %c0_57 = arith.constant 0 : index
    %79 = vector.load %arg14[%c0_56, %c0_57] : memref<512x64xf32, #tpu.memory_space<vmem>>, vector<512x64xf32>
    %cst_58 = arith.constant dense<0.000000e+00> : vector<3x64xf32>
    %80 = tpu.matmul %78, %79, %cst_58 {dimension_numbers = #tpu.dot_dimension_numbers<[1], [0], [0], [1], [0, 0, 1, 1], [], []>} : vector<3x512xf32>, vector<512x64xf32>, vector<3x64xf32> -> vector<3x64xf32>
    %81 = vector.extract_strided_slice %40 {offsets = [1, 0], sizes = [1, 64], strides = [1, 1]} : vector<2x64xf32> to vector<1x64xf32>
    %82 = vector.broadcast %81 : vector<1x64xf32> to vector<3x64xf32>
    %83 = arith.mulf %80, %82 : vector<3x64xf32>
    %c1_59 = arith.constant 1 : index
    %c0_60 = arith.constant 0 : index
    %c0_61 = arith.constant 0 : index
    %84 = vector.load %arg16[%c1_59, %c0_60, %c0_61] : memref<2x3x64xf32, #tpu.memory_space<vmem>>, vector<1x3x64xf32>
    %85 = vector.shape_cast %84 : vector<1x3x64xf32> to vector<3x64xf32>
    %86 = vector.shape_cast %83 : vector<3x64xf32> to vector<1x3x64xf32>
    tpu.vector_store %arg16[%c1_59, %c0_60, %c0_61], %86 {strides = array<i32>} : memref<2x3x64xf32, #tpu.memory_space<vmem>>, vector<1x3x64xf32>,
    return
  }
  func.func @transform_0(%arg0: i32) -> (i32, i32) {
    %c0_i32 = arith.constant 0 : i32
    %c0_i32_0 = arith.constant 0 : i32
    %c0_i32_1 = arith.constant 0 : i32
    return %c0_i32, %c0_i32_0 : i32, i32
  }
  func.func @transform_1(%arg0: i32) -> (i32, i32) {
    %c0_i32 = arith.constant 0 : i32
    %c0_i32_0 = arith.constant 0 : i32
    %c0_i32_1 = arith.constant 0 : i32
    return %c0_i32, %c0_i32_0 : i32, i32
  }
  func.func @transform_2(%arg0: i32) -> (i32, i32, i32) {
    %c0_i32 = arith.constant 0 : i32
    %c0_i32_0 = arith.constant 0 : i32
    %c0_i32_1 = arith.constant 0 : i32
    %c0_i32_2 = arith.constant 0 : i32
    return %c0_i32, %c0_i32_0, %c0_i32_1 : i32, i32, i32
  }
  func.func @transform_3(%arg0: i32) -> (i32, i32) {
    %c0_i32 = arith.constant 0 : i32
    %c0_i32_0 = arith.constant 0 : i32
    %c0_i32_1 = arith.constant 0 : i32
    return %c0_i32, %c0_i32_0 : i32, i32
  }
  func.func @transform_4(%arg0: i32) -> (i32, i32) {
    %c0_i32 = arith.constant 0 : i32
    %c0_i32_0 = arith.constant 0 : i32
    %c0_i32_1 = arith.constant 0 : i32
    return %c0_i32, %c0_i32_0 : i32, i32
  }
  func.func @transform_5(%arg0: i32) -> (i32, i32) {
    %c0_i32 = arith.constant 0 : i32
    %c0_i32_0 = arith.constant 0 : i32
    %c0_i32_1 = arith.constant 0 : i32
    return %c0_i32, %c0_i32_0 : i32, i32
  }
  func.func @transform_6(%arg0: i32) -> (i32, i32) {
    %c0_i32 = arith.constant 0 : i32
    %c0_i32_0 = arith.constant 0 : i32
    %c0_i32_1 = arith.constant 0 : i32
    return %c0_i32, %c0_i32_0 : i32, i32
  }
  func.func @transform_7(%arg0: i32) -> (i32, i32) {
    %c0_i32 = arith.constant 0 : i32
    %c0_i32_0 = arith.constant 0 : i32
    %c0_i32_1 = arith.constant 0 : i32
    return %c0_i32, %c0_i32_0 : i32, i32
  }
  func.func @transform_8(%arg0: i32) -> (i32, i32) {
    %c0_i32 = arith.constant 0 : i32
    %c0_i32_0 = arith.constant 0 : i32
    %c0_i32_1 = arith.constant 0 : i32
    return %c0_i32, %c0_i32_0 : i32, i32
  }
  func.func @transform_9(%arg0: i32) -> (i32, i32) {
    %c0_i32 = arith.constant 0 : i32
    %c0_i32_0 = arith.constant 0 : i32
    %c0_i32_1 = arith.constant 0 : i32
    return %c0_i32, %c0_i32_0 : i32, i32
  }
  func.func @transform_10(%arg0: i32) -> (i32, i32) {
    %c0_i32 = arith.constant 0 : i32
    %c0_i32_0 = arith.constant 0 : i32
    %c0_i32_1 = arith.constant 0 : i32
    return %c0_i32, %c0_i32_0 : i32, i32
  }
  func.func @transform_11(%arg0: i32) -> (i32, i32) {
    %c0_i32 = arith.constant 0 : i32
    %c0_i32_0 = arith.constant 0 : i32
    %c0_i32_1 = arith.constant 0 : i32
    return %c0_i32, %c0_i32_0 : i32, i32
  }
  func.func @transform_12(%arg0: i32) -> (i32, i32) {
    %c0_i32 = arith.constant 0 : i32
    %c0_i32_0 = arith.constant 0 : i32
    %c0_i32_1 = arith.constant 0 : i32
    return %c0_i32, %c0_i32_0 : i32, i32
  }
  func.func @transform_13(%arg0: i32) -> (i32, i32) {
    %c0_i32 = arith.constant 0 : i32
    %c0_i32_0 = arith.constant 0 : i32
    %c0_i32_1 = arith.constant 0 : i32
    return %c0_i32, %c0_i32_0 : i32, i32
  }
  func.func @transform_14(%arg0: i32) -> (i32, i32) {
    %c0_i32 = arith.constant 0 : i32
    %c0_i32_0 = arith.constant 0 : i32
    %c0_i32_1 = arith.constant 0 : i32
    return %c0_i32, %c0_i32_0 : i32, i32
  }
  func.func @transform_15(%arg0: i32) -> (i32, i32, i32) {
    %c0_i32 = arith.constant 0 : i32
    %c0_i32_0 = arith.constant 0 : i32
    %c0_i32_1 = arith.constant 0 : i32
    %c0_i32_2 = arith.constant 0 : i32
    return %c0_i32, %c0_i32_0, %c0_i32_1 : i32, i32, i32
  }
}

</mosaic_0001>

<bundles_post_ra>
// kernel: tile.7
= control target key start
LH: loop header
LB: loop body
LE: loop exit
PB: predicated region body
PF: predicated region fallthrough
CT: control target
= control target key end

     0   :  { %s747_s0 = inlined_call_operand.vmem [shape: f32[2,3,8,256], index: 0, kind: input, shape index: {}]   ;;  %s748_s1 = inlined_call_operand.vmem [shape: f32[2,3,2048], index: 1, kind: output, shape index: {}]  }
   0x1   :  { %v2_v0 = vld [vmem:[%s747_s0] sm:$0xff]   ;;  %v499_v1 = vld [vmem:[%s747_s0 + $0x8] sm:$0xff]   ;;  %v500_v2 = vld [vmem:[%s747_s0 + $0x10] sm:$0xff]  }
   0x2   :  { %3 = vst [vmem:[#allocation0] ss:$16 sm:$0x3] %v2_v0   ;;  %4 = vst [vmem:[#allocation0] ss:$16 sm:$0xc] %v2_v0  }
   0x3   :  { %5 = vst [vmem:[#allocation0] ss:$16 sm:$0x30] %v2_v0   ;;  %6 = vst [vmem:[#allocation0] ss:$16 sm:$0xc0] %v2_v0  }
   0x4   :  { %10 = vst [vmem:[#allocation0 + $0x8] ss:$16 sm:$0x3] %v499_v1   ;;  %12 = vst [vmem:[#allocation0 + $0x8] ss:$16 sm:$0xc] %v499_v1  }
   0x5   :  { %14 = vst [vmem:[#allocation0 + $0x8] ss:$16 sm:$0x30] %v499_v1   ;;  %16 = vst [vmem:[#allocation0 + $0x8] ss:$16 sm:$0xc0] %v499_v1  }
   0x6   :  { %20 = vst [vmem:[#allocation0 + $0x1] ss:$16 sm:$0x3] %v500_v2   ;;  %22 = vst [vmem:[#allocation0 + $0x1] ss:$16 sm:$0xc] %v500_v2  }
   0x7   :  { %24 = vst [vmem:[#allocation0 + $0x1] ss:$16 sm:$0x30] %v500_v2   ;;  %26 = vst [vmem:[#allocation0 + $0x1] ss:$16 sm:$0xc0] %v500_v2  }
   0x8   :  { %v501_v3 = vld [vmem:[%s747_s0 + $0x18] sm:$0xff]   ;;  %v502_v4 = vld [vmem:[%s747_s0 + $0x20] sm:$0xff]   ;;  %v503_v5 = vld [vmem:[%s747_s0 + $0x28] sm:$0xff]  }
   0x9   :  { %30 = vst [vmem:[#allocation0 + $0x9] ss:$16 sm:$0x3] %v501_v3   ;;  %32 = vst [vmem:[#allocation0 + $0x9] ss:$16 sm:$0xc] %v501_v3  }
   0xa   :  { %34 = vst [vmem:[#allocation0 + $0x9] ss:$16 sm:$0x30] %v501_v3   ;;  %36 = vst [vmem:[#allocation0 + $0x9] ss:$16 sm:$0xc0] %v501_v3  }
   0xb   :  { %40 = vst [vmem:[#allocation0 + $0x80] ss:$16 sm:$0x3] %v502_v4   ;;  %42 = vst [vmem:[#allocation0 + $0x80] ss:$16 sm:$0xc] %v502_v4  }
   0xc   :  { %44 = vst [vmem:[#allocation0 + $0x80] ss:$16 sm:$0x30] %v502_v4   ;;  %46 = vst [vmem:[#allocation0 + $0x80] ss:$16 sm:$0xc0] %v502_v4  }
   0xd   :  { %50 = vst [vmem:[#allocation0 + $0x88] ss:$16 sm:$0x3] %v503_v5   ;;  %52 = vst [vmem:[#allocation0 + $0x88] ss:$16 sm:$0xc] %v503_v5  }
   0xe   :  { %54 = vst [vmem:[#allocation0 + $0x88] ss:$16 sm:$0x30] %v503_v5   ;;  %56 = vst [vmem:[#allocation0 + $0x88] ss:$16 sm:$0xc0] %v503_v5  }
   0xf   :  { %v504_v6 = vld [vmem:[%s747_s0 + $0x30] sm:$0xff]   ;;  %v505_v7 = vld [vmem:[%s747_s0 + $0x38] sm:$0xff]   ;;  %v506_v8 = vld [vmem:[%s747_s0 + $0x40] sm:$0xff]  }
  0x10   :  { %60 = vst [vmem:[#allocation0 + $0x81] ss:$16 sm:$0x3] %v504_v6   ;;  %62 = vst [vmem:[#allocation0 + $0x81] ss:$16 sm:$0xc] %v504_v6  }
  0x11   :  { %64 = vst [vmem:[#allocation0 + $0x81] ss:$16 sm:$0x30] %v504_v6   ;;  %66 = vst [vmem:[#allocation0 + $0x81] ss:$16 sm:$0xc0] %v504_v6  }
  0x12   :  { %70 = vst [vmem:[#allocation0 + $0x89] ss:$16 sm:$0x3] %v505_v7   ;;  %72 = vst [vmem:[#allocation0 + $0x89] ss:$16 sm:$0xc] %v505_v7  }
  0x13   :  { %74 = vst [vmem:[#allocation0 + $0x89] ss:$16 sm:$0x30] %v505_v7   ;;  %76 = vst [vmem:[#allocation0 + $0x89] ss:$16 sm:$0xc0] %v505_v7  }
  0x14   :  { %80 = vst [vmem:[#allocation0 + $0x100] ss:$16 sm:$0x3] %v506_v8   ;;  %82 = vst [vmem:[#allocation0 + $0x100] ss:$16 sm:$0xc] %v506_v8  }
  0x15   :  { %84 = vst [vmem:[#allocation0 + $0x100] ss:$16 sm:$0x30] %v506_v8   ;;  %86 = vst [vmem:[#allocation0 + $0x100] ss:$16 sm:$0xc0] %v506_v8  }
  0x16   :  { %v507_v9 = vld [vmem:[%s747_s0 + $0x48] sm:$0xff]   ;;  %v508_v10 = vld [vmem:[%s747_s0 + $0x50] sm:$0xff]   ;;  %v509_v11 = vld [vmem:[%s747_s0 + $0x58] sm:$0xff]  }
  0x17   :  { %90 = vst [vmem:[#allocation0 + $0x108] ss:$16 sm:$0x3] %v507_v9   ;;  %92 = vst [vmem:[#allocation0 + $0x108] ss:$16 sm:$0xc] %v507_v9  }
  0x18   :  { %94 = vst [vmem:[#allocation0 + $0x108] ss:$16 sm:$0x30] %v507_v9   ;;  %96 = vst [vmem:[#allocation0 + $0x108] ss:$16 sm:$0xc0] %v507_v9  }
  0x19   :  { %100 = vst [vmem:[#allocation0 + $0x101] ss:$16 sm:$0x3] %v508_v10   ;;  %102 = vst [vmem:[#allocation0 + $0x101] ss:$16 sm:$0xc] %v508_v10  }
  0x1a   :  { %104 = vst [vmem:[#allocation0 + $0x101] ss:$16 sm:$0x30] %v508_v10   ;;  %106 = vst [vmem:[#allocation0 + $0x101] ss:$16 sm:$0xc0] %v508_v10  }
  0x1b   :  { %110 = vst [vmem:[#allocation0 + $0x109] ss:$16 sm:$0x3] %v509_v11   ;;  %112 = vst [vmem:[#allocation0 + $0x109] ss:$16 sm:$0xc] %v509_v11  }
  0x1c   :  { %114 = vst [vmem:[#allocation0 + $0x109] ss:$16 sm:$0x30] %v509_v11   ;;  %116 = vst [vmem:[#allocation0 + $0x109] ss:$16 sm:$0xc0] %v509_v11  }
  0x1d   :  { %v121_v12 = vld [vmem:[#allocation0] sm:$0x3]  ;;  %v132_v13 = vld [vmem:[#allocation0 + $0x10] sm:$0x3]  ;;  %v126_v15 = vld [vmem:[#allocation0 + $0x8] sm:$0x3] }
  0x1e   :  { %v146_v14 = vld [vmem:[#allocation0 + $0x20] sm:$0x3]  ;;  %124 = vst [vmem:[%s748_s1] sm:$0x3] %v121_v12  ;;  %511 = vst [vmem:[%s748_s1 + $0x4] sm:$0x3] %v132_v13 }
  0x1f   :  { %v139_v16 = vld [vmem:[#allocation0 + $0x18] sm:$0x3]  ;;  %513 = vst [vmem:[%s748_s1 + $0x8] sm:$0x3] %v146_v14  ;;  %v153_v17 = vld [vmem:[#allocation0 + $0x28] sm:$0x3] }
  0x20   :  { %510 = vst [vmem:[%s748_s1 + $0x2] sm:$0x3] %v126_v15  ;;  %512 = vst [vmem:[%s748_s1 + $0x6] sm:$0x3] %v139_v16  ;;  %v160_v18 = vld [vmem:[#allocation0 + $0x30] sm:$0x3] }
  0x21   :  { %514 = vst [vmem:[%s748_s1 + $0xa] sm:$0x3] %v153_v17  ;;  %v167_v19 = vld [vmem:[#allocation0 + $0x38] sm:$0x3]  ;;  %v174_v20 = vld [vmem:[#allocation0 + $0x40] sm:$0x3] }
  0x22   :  { %515 = vst [vmem:[%s748_s1 + $0xc] sm:$0x3] %v160_v18  ;;  %516 = vst [vmem:[%s748_s1 + $0xe] sm:$0x3] %v167_v19  ;;  %v181_v21 = vld [vmem:[#allocation0 + $0x48] sm:$0x3] }
  0x23   :  { %517 = vst [vmem:[%s748_s1 + $0x10] sm:$0x3] %v174_v20  ;;  %v188_v22 = vld [vmem:[#allocation0 + $0x50] sm:$0x3]  ;;  %v195_v23 = vld [vmem:[#allocation0 + $0x58] sm:$0x3] }
  0x24   :  { %518 = vst [vmem:[%s748_s1 + $0x12] sm:$0x3] %v181_v21  ;;  %519 = vst [vmem:[%s748_s1 + $0x14] sm:$0x3] %v188_v22  ;;  %v202_v24 = vld [vmem:[#allocation0 + $0x60] sm:$0x3] }
  0x25   :  { %520 = vst [vmem:[%s748_s1 + $0x16] sm:$0x3] %v195_v23  ;;  %v209_v25 = vld [vmem:[#allocation0 + $0x68] sm:$0x3]  ;;  %v216_v26 = vld [vmem:[#allocation0 + $0x70] sm:$0x3] }
  0x26   :  { %521 = vst [vmem:[%s748_s1 + $0x18] sm:$0x3] %v202_v24  ;;  %522 = vst [vmem:[%s748_s1 + $0x1a] sm:$0x3] %v209_v25  ;;  %v223_v27 = vld [vmem:[#allocation0 + $0x78] sm:$0x3] }
  0x27   :  { %523 = vst [vmem:[%s748_s1 + $0x1c] sm:$0x3] %v216_v26  ;;  %v230_v28 = vld [vmem:[#allocation0 + $0x80] sm:$0x3]  ;;  %v237_v29 = vld [vmem:[#allocation0 + $0x88] sm:$0x3] }
  0x28   :  { %524 = vst [vmem:[%s748_s1 + $0x1e] sm:$0x3] %v223_v27  ;;  %525 = vst [vmem:[%s748_s1 + $0x20] sm:$0x3] %v230_v28  ;;  %v244_v30 = vld [vmem:[#allocation0 + $0x90] sm:$0x3] }
  0x29   :  { %526 = vst [vmem:[%s748_s1 + $0x22] sm:$0x3] %v237_v29  ;;  %v251_v31 = vld [vmem:[#allocation0 + $0x98] sm:$0x3]  ;;  %v258_v32 = vld [vmem:[#allocation0 + $0xa0] sm:$0x3] }
  0x2a   :  { %527 = vst [vmem:[%s748_s1 + $0x24] sm:$0x3] %v244_v30  ;;  %528 = vst [vmem:[%s748_s1 + $0x26] sm:$0x3] %v251_v31  ;;  %v265_v33 = vld [vmem:[#allocation0 + $0xa8] sm:$0x3] }
  0x2b   :  { %529 = vst [vmem:[%s748_s1 + $0x28] sm:$0x3] %v258_v32  ;;  %v272_v34 = vld [vmem:[#allocation0 + $0xb0] sm:$0x3]  ;;  %v279_v35 = vld [vmem:[#allocation0 + $0xb8] sm:$0x3] }
  0x2c   :  { %530 = vst [vmem:[%s748_s1 + $0x2a] sm:$0x3] %v265_v33  ;;  %531 = vst [vmem:[%s748_s1 + $0x2c] sm:$0x3] %v272_v34  ;;  %v286_v36 = vld [vmem:[#allocation0 + $0xc0] sm:$0x3] }
  0x2d   :  { %532 = vst [vmem:[%s748_s1 + $0x2e] sm:$0x3] %v279_v35  ;;  %v293_v37 = vld [vmem:[#allocation0 + $0xc8] sm:$0x3]  ;;  %v300_v38 = vld [vmem:[#allocation0 + $0xd0] sm:$0x3] }
  0x2e   :  { %533 = vst [vmem:[%s748_s1 + $0x30] sm:$0x3] %v286_v36  ;;  %534 = vst [vmem:[%s748_s1 + $0x32] sm:$0x3] %v293_v37  ;;  %v307_v39 = vld [vmem:[#allocation0 + $0xd8] sm:$0x3] }
  0x2f   :  { %535 = vst [vmem:[%s748_s1 + $0x34] sm:$0x3] %v300_v38  ;;  %v314_v40 = vld [vmem:[#allocation0 + $0xe0] sm:$0x3]  ;;  %v321_v41 = vld [vmem:[#allocation0 + $0xe8] sm:$0x3] }
  0x30   :  { %536 = vst [vmem:[%s748_s1 + $0x36] sm:$0x3] %v307_v39  ;;  %537 = vst [vmem:[%s748_s1 + $0x38] sm:$0x3] %v314_v40  ;;  %v328_v42 = vld [vmem:[#allocation0 + $0xf0] sm:$0x3] }
  0x31   :  { %538 = vst [vmem:[%s748_s1 + $0x3a] sm:$0x3] %v321_v41  ;;  %v335_v43 = vld [vmem:[#allocation0 + $0xf8] sm:$0x3]  ;;  %v342_v44 = vld [vmem:[#allocation0 + $0x100] sm:$0x3] }
  0x32   :  { %539 = vst [vmem:[%s748_s1 + $0x3c] sm:$0x3] %v328_v42  ;;  %540 = vst [vmem:[%s748_s1 + $0x3e] sm:$0x3] %v335_v43  ;;  %v349_v45 = vld [vmem:[#allocation0 + $0x108] sm:$0x3] }
  0x33   :  { %541 = vst [vmem:[%s748_s1 + $0x40] sm:$0x3] %v342_v44  ;;  %v356_v46 = vld [vmem:[#allocation0 + $0x110] sm:$0x3]  ;;  %v363_v47 = vld [vmem:[#allocation0 + $0x118] sm:$0x3] }
  0x34   :  { %542 = vst [vmem:[%s748_s1 + $0x42] sm:$0x3] %v349_v45  ;;  %543 = vst [vmem:[%s748_s1 + $0x44] sm:$0x3] %v356_v46  ;;  %v370_v48 = vld [vmem:[#allocation0 + $0x120] sm:$0x3] }
  0x35   :  { %544 = vst [vmem:[%s748_s1 + $0x46] sm:$0x3] %v363_v47  ;;  %v377_v49 = vld [vmem:[#allocation0 + $0x128] sm:$0x3]  ;;  %v384_v50 = vld [vmem:[#allocation0 + $0x130] sm:$0x3] }
  0x36   :  { %545 = vst [vmem:[%s748_s1 + $0x48] sm:$0x3] %v370_v48  ;;  %546 = vst [vmem:[%s748_s1 + $0x4a] sm:$0x3] %v377_v49  ;;  %v391_v51 = vld [vmem:[#allocation0 + $0x138] sm:$0x3] }
  0x37   :  { %547 = vst [vmem:[%s748_s1 + $0x4c] sm:$0x3] %v384_v50  ;;  %v398_v52 = vld [vmem:[#allocation0 + $0x140] sm:$0x3]  ;;  %v405_v53 = vld [vmem:[#allocation0 + $0x148] sm:$0x3] }
  0x38   :  { %548 = vst [vmem:[%s748_s1 + $0x4e] sm:$0x3] %v391_v51  ;;  %549 = vst [vmem:[%s748_s1 + $0x50] sm:$0x3] %v398_v52  ;;  %v412_v54 = vld [vmem:[#allocation0 + $0x150] sm:$0x3] }
  0x39   :  { %550 = vst [vmem:[%s748_s1 + $0x52] sm:$0x3] %v405_v53  ;;  %v419_v55 = vld [vmem:[#allocation0 + $0x158] sm:$0x3]  ;;  %v426_v56 = vld [vmem:[#allocation0 + $0x160] sm:$0x3] }
  0x3a   :  { %551 = vst [vmem:[%s748_s1 + $0x54] sm:$0x3] %v412_v54  ;;  %552 = vst [vmem:[%s748_s1 + $0x56] sm:$0x3] %v419_v55  ;;  %v433_v57 = vld [vmem:[#allocation0 + $0x168] sm:$0x3] }
  0x3b   :  { %553 = vst [vmem:[%s748_s1 + $0x58] sm:$0x3] %v426_v56  ;;  %v440_v58 = vld [vmem:[#allocation0 + $0x170] sm:$0x3]  ;;  %v447_v59 = vld [vmem:[#allocation0 + $0x178] sm:$0x3] }
  0x3c   :  { %554 = vst [vmem:[%s748_s1 + $0x5a] sm:$0x3] %v433_v57  ;;  %555 = vst [vmem:[%s748_s1 + $0x5c] sm:$0x3] %v440_v58 }
  0x3d   :  { %556 = vst [vmem:[%s748_s1 + $0x5e] sm:$0x3] %v447_v59 }

// kernel: tex_field_vanilla_forward.1
= control target key start
LH: loop header
LB: loop body
LE: loop exit
PB: predicated region body
PF: predicated region fallthrough
CT: control target
= control target key end

     0   :  { %20 = vsyncpa [#allocation3], 0  ;;  %s10934_s0 = inlined_call_operand.hbm [shape: f32[2,32], index: 0, kind: input, shape index: {}]   ;;  %s10935_s1 = inlined_call_operand.vmem [shape: f32[2,48], index: 1, kind: input, shape index: {}]   ;;  %s10936_s2 = inlined_call_operand.vmem [shape: f32[2,3,2048], index: 2, kind: input, shape index: {}]   ;;  %s10937_s3 = inlined_call_operand.vmem [shape: f32[32,16], index: 3, kind: input, shape index: {}]   ;;  %s10938_s4 = inlined_call_operand.hbm [shape: f32[1,16], index: 4, kind: input, shape index: {}]   ;;  %s10939_s5 = inlined_call_operand.hbm [shape: f32[48,256], index: 5, kind: input, shape index: {}]   ;;  %s10940_s6 = inlined_call_operand.hbm [shape: f32[16,256], index: 6, kind: input, shape index: {}]   ;;  %s10941_s7 = inlined_call_operand.hbm [shape: f32[1,256], index: 7, kind: input, shape index: {}]   ;;  %s10942_s8 = inlined_call_operand.hbm [shape: f32[256,2048], index: 8, kind: input, shape index: {}]   ;;  %s10943_s9 = inlined_call_operand.hbm [shape: f32[1,2048], index: 9, kind: input, shape index: {}]   ;;  %s10944_s10 = inlined_call_operand.vmem [shape: f32[256,512], index: 10, kind: input, shape index: {}]   ;;  %s10945_s11 = inlined_call_operand.hbm [shape: f32[1,512], index: 11, kind: input, shape index: {}]   ;;  %s10946_s12 = inlined_call_operand.vmem [shape: f32[2048,8], index: 12, kind: input, shape index: {}]   ;;  %s10947_s13 = inlined_call_operand.vmem [shape: f32[512,64], index: 13, kind: input, shape index: {}]   ;;  %s10948_s14 = inlined_call_operand.hbm [shape: f32[8,512], index: 14, kind: input, shape index: {}]   ;;  %s10949_s15 = inlined_call_operand.vmem [shape: f32[2,3,64], index: 15, kind: output, shape index: {}]  }
   0x1   :  { %21 = vsyncpa [#allocation5], 0 }
   0x2   :  { %22 = vsyncpa [#allocation8], 0 }
   0x3   :  { %23 = vsyncpa [#allocation11], 0 }
   0x4   :  { %24 = vsyncpa [#allocation14], 0  ;;  %s6931_s18 = smov [#allocation4]  }
   0x5   :  { %s47_s19 = sshll.u32 %s6931_s18, 4  ;;  %s48_s19 = int_to_ptr.vmem [resolvable:$true] %s47_s19 }
   0x6   :  { %s6749_s20 = scalar_lea.vmem %s48_s19, 16  ;;  %s6753_s21 = scalar_lea.vmem %s48_s19, 32 }
   0x7   :  { %p6750_p0 = scmp.ne.s32.totalorder %s48_s19, %s6749_s20  ;;  %p6754_p1 = scmp.lt.s32.totalorder %s48_s19, %s48_s19 }
   0x8   :  { %p6755_p2 = scmp.lt.s32.totalorder %s6753_s21, %s6749_s20 }
   0xa   :  { %p6756_p3 = por %p6755_p2, %p6754_p1 }
   0xc   :  { %p6757_p4 = pnand %p6756_p3, %p6750_p0 }
   0xe   :  { %6760 = shalt.err (!%p6757_p4)
}
   0xf   :  { %50 = dma.hbm_to_vmem [thread:$0]  %s10938_s4, 16, %s48_s19, [#allocation5]  }
  0x10   :  { %s6932_s24 = smov [#allocation7]   ;;  %s6933_s26 = smov [#allocation10]  }
  0x11   :  { %s68_s25 = sshll.u32 %s6932_s24, 4  ;;  %s90_s27 = sshll.u32 %s6933_s26, 4  ;;  %s69_s25 = int_to_ptr.vmem [resolvable:$true] %s68_s25  ;;  %s91_s27 = int_to_ptr.vmem [resolvable:$true] %s90_s27 }
  0x12   :  { %s6769_s28 = scalar_lea.vmem %s69_s25, 512  ;;  %p6774_p6 = scmp.lt.s32.totalorder %s69_s25, %s69_s25 }
  0x13   :  { %p6770_p5 = scmp.ne.s32.totalorder %s69_s25, %s6769_s28  ;;  %p6775_p7 = scmp.lt.s32.totalorder %s6769_s28, %s6769_s28 }
  0x15   :  { %p6776_p8 = por %p6775_p7, %p6774_p6 }
  0x17   :  { %p6777_p9 = pnand %p6776_p8, %p6770_p5 }
  0x19   :  { %6780 = shalt.err (!%p6777_p9)
}
  0x1a   :  { %s6934_s29 = smov 256   ;;  %s6935_s30 = smov 16  }
  0x1b   :  { %74 = dma.hbm_to_vmem [thread:$0]  %s10940_s6, 512, %s69_s25, [#allocation8], %s6934_s29, %s6934_s29, %s6935_s30  }
  0x1c   :  { %s6789_s4 = scalar_lea.vmem %s91_s27, 65536  ;;  %p6794_p11 = scmp.lt.s32.totalorder %s91_s27, %s91_s27 }
  0x1d   :  { %p6790_p10 = scmp.ne.s32.totalorder %s91_s27, %s6789_s4  ;;  %p6795_p12 = scmp.lt.s32.totalorder %s6789_s4, %s6789_s4 }
  0x1f   :  { %p6796_p13 = por %p6795_p12, %p6794_p11 }
  0x21   :  { %p6797_p0 = pnand %p6796_p13, %p6790_p10 }
  0x23   :  { %6800 = shalt.err (!%p6797_p0)
}
  0x24   :  { %s6936_s18 = smov 2048   ;;  %s6937_s19 = smov 128  }
  0x25   :  { %96 = dma.hbm_to_vmem [thread:$0]  %s10942_s8, 65536, %s91_s27, [#allocation11], %s6936_s18, %s6936_s18, %s6937_s19  }
  0x26   :  { %s6938_s22 = smov [#allocation13]   ;;  %s6939_s24 = smov [#allocation2]  }
  0x27   :  { %s115_s23 = sshll.u32 %s6938_s22, 4  ;;  %s31_s26 = sshll.u32 %s6939_s24, 4  ;;  %s116_s23 = int_to_ptr.vmem [resolvable:$true] %s115_s23  ;;  %s32_s26 = int_to_ptr.vmem [resolvable:$true] %s31_s26 }
  0x28   :  { %s6809_s6 = scalar_lea.vmem %s116_s23, 64  ;;  %p6814_p2 = scmp.lt.s32.totalorder %s116_s23, %s116_s23 }
  0x29   :  { %p6810_p1 = scmp.ne.s32.totalorder %s116_s23, %s6809_s6  ;;  %p6815_p3 = scmp.lt.s32.totalorder %s6809_s6, %s6809_s6 }
  0x2b   :  { %p6816_p4 = por %p6815_p3, %p6814_p2 }
  0x2d   :  { %p6817_p5 = pnand %p6816_p4, %p6810_p1 }
  0x2f   :  { %6820 = shalt.err (!%p6817_p5)
}
  0x30   :  { %118 = dma.hbm_to_vmem [thread:$0]  %s10945_s11, 64, %s116_s23, [#allocation14]  }
  0x31   :  { %s6829_s16 = scalar_lea.vmem %s32_s26, 32  ;;  %p6834_p7 = scmp.lt.s32.totalorder %s32_s26, %s32_s26 }
  0x32   :  { %p6830_p6 = scmp.ne.s32.totalorder %s32_s26, %s6829_s16  ;;  %p6835_p8 = scmp.lt.s32.totalorder %s6829_s16, %s6829_s16 }
  0x34   :  { %p6836_p9 = por %p6835_p8, %p6834_p7 }
  0x36   :  { %p6837_p10 = pnand %p6836_p9, %p6830_p6 }
  0x38   :  { %6840 = shalt.err (!%p6837_p10)
}
  0x39   :  { %34 = dma.hbm_to_vmem [thread:$0]  %s10934_s0, 32, %s32_s26, [#allocation3]  }
  0x3a   :  { %s6940_s17 = smov [#allocation6]   ;;  %s6941_s18 = smov [#allocation9]  }
  0x3b   :  { %s56_s4 = sshll.u32 %s6940_s17, 4  ;;  %s81_s19 = sshll.u32 %s6941_s18, 4  ;;  %s57_s4 = int_to_ptr.vmem [resolvable:$true] %s56_s4  ;;  %s82_s19 = int_to_ptr.vmem [resolvable:$true] %s81_s19 }
  0x3c   :  { %s6849_s20 = scalar_lea.vmem %s57_s4, 1536  ;;  %p6854_p12 = scmp.lt.s32.totalorder %s57_s4, %s57_s4 }
  0x3d   :  { %p6850_p11 = scmp.ne.s32.totalorder %s57_s4, %s6849_s20  ;;  %p6855_p13 = scmp.lt.s32.totalorder %s6849_s20, %s6849_s20 }
  0x3f   :  { %p6856_p0 = por %p6855_p13, %p6854_p12 }
  0x41   :  { %p6857_p1 = pnand %p6856_p0, %p6850_p11 }
  0x43   :  { %6860 = shalt.err (!%p6857_p1)
}
  0x44   :  { %62 = dma.hbm_to_vmem [thread:$0]  %s10939_s5, 1536, %s57_s4, [#allocation5], %s6934_s29, %s6934_s29, %s6935_s30  }
  0x45   :  { %s6869_s0 = scalar_lea.vmem %s82_s19, 32  ;;  %p6874_p3 = scmp.lt.s32.totalorder %s82_s19, %s82_s19 }
  0x46   :  { %p6870_p2 = scmp.ne.s32.totalorder %s82_s19, %s6869_s0  ;;  %p6875_p4 = scmp.lt.s32.totalorder %s6869_s0, %s6869_s0 }
  0x48   :  { %p6876_p5 = por %p6875_p4, %p6874_p3 }
  0x4a   :  { %p6877_p6 = pnand %p6876_p5, %p6870_p2 }
  0x4c   :  { %6880 = shalt.err (!%p6877_p6)
}
  0x4d   :  { %84 = dma.hbm_to_vmem [thread:$0]  %s10941_s7, 32, %s82_s19, [#allocation8]  }
  0x4e   :  { %s6942_s24 = smov [#allocation12]   ;;  %s6943_s6 = smov [#allocation15]  }
  0x4f   :  { %s103_s26 = sshll.u32 %s6942_s24, 4  ;;  %s129_s25 = sshll.u32 %s6943_s6, 4  ;;  %s104_s26 = int_to_ptr.vmem [resolvable:$true] %s103_s26  ;;  %s130_s25 = int_to_ptr.vmem [resolvable:$true] %s129_s25 }
  0x50   :  { %s6889_s28 = scalar_lea.vmem %s104_s26, 256  ;;  %p6894_p8 = scmp.lt.s32.totalorder %s104_s26, %s104_s26 }
  0x51   :  { %p6890_p7 = scmp.ne.s32.totalorder %s104_s26, %s6889_s28  ;;  %p6895_p9 = scmp.lt.s32.totalorder %s6889_s28, %s6889_s28 }
  0x53   :  { %p6896_p10 = por %p6895_p9, %p6894_p8 }
  0x55   :  { %p6897_p11 = pnand %p6896_p10, %p6890_p7 }
  0x57   :  { %6900 = shalt.err (!%p6897_p11)
}
  0x58   :  { %106 = dma.hbm_to_vmem [thread:$0]  %s10943_s9, 256, %s104_s26, [#allocation11]  }
  0x59   :  { %s6909_s30 = scalar_lea.vmem %s130_s25, 512  ;;  %p6914_p13 = scmp.lt.s32.totalorder %s130_s25, %s130_s25 }
  0x5a   :  { %p6910_p12 = scmp.ne.s32.totalorder %s130_s25, %s6909_s30  ;;  %p6915_p0 = scmp.lt.s32.totalorder %s6909_s30, %s6909_s30 }
  0x5c   :  { %p6916_p1 = por %p6915_p0, %p6914_p13 }
  0x5e   :  { %p6917_p2 = pnand %p6916_p1, %p6910_p12 }
  0x60   :  { %6920 = shalt.err (!%p6917_p2)
}
  0x61   :  { %132 = dma.hbm_to_vmem [thread:$0]  %s10948_s14, 512, %s130_s25, [#allocation14]  }
  0x62   :  { %6921 = dma.done.wait [#allocation3], 32  }
  0x63   :  { %6922 = vsyncadd [#allocation3], 4294967264 }
  0x64   :  { %6923 = dma.done.wait [#allocation5], 1552  }
  0x65   :  { %6924 = vsyncadd [#allocation5], 4294965744 }
  0x66   :  { %6925 = dma.done.wait [#allocation8], 544  }
  0x67   :  { %6926 = vsyncadd [#allocation8], 4294966752 }
  0x68   :  { %6927 = dma.done.wait [#allocation11], 65792  }
  0x69   :  { %6928 = vsyncadd [#allocation11], 4294901504 }
  0x6a   :  { %6929 = dma.done.wait [#allocation14], 576  }
  0x6b   :  { %6930 = vsyncadd [#allocation14], 4294966720  ;;  %v10950_v0 = vmov 0.0   ;;  %vm6945_vm0 = vmmov 0   ;;  %v164_v1 = vld [vmem:[%s10937_s3 + $0x18] sm:$0xff]  ;;  %v163_v2 = vld [vmem:[%s10937_s3 + $0x10] sm:$0xff] }
  0x6c   :  { %6445 = vmatprep.subr.mxu0 %v10950_v0  ;;  %6453 = vmatprep.mubr.msk.f32.mxu0 %vm6945_vm0, %v10950_v0  ;;  %v262_v3 = vld [vmem:[#allocation7 + $0x18] sm:$0xff]  ;;  %v162_v4 = vld [vmem:[%s10937_s3 + $0x8] sm:$0xff]  ;;  %v261_v5 = vld [vmem:[#allocation7 + $0x10] sm:$0xff]  ;;  %vm172_vm1 = vcmask 261120   ;;  %vm263_vm2 = vcmask 130048   ;;  %vm338_vm3 = vcmask 392192  }
  0x6d   :  { %331 = vmatprep.mubr.f32.mxu1 %v10950_v0  ;;  %6446 = vmatpush3.msra.mxu0 %v164_v1  ;;  %v161_v6 = vld [vmem:[%s10937_s3] sm:$0xff]  ;;  %v260_v8 = vld [vmem:[#allocation7 + $0x8] sm:$0xff]  ;;  %v257_v60 = vld [vmem:[#allocation6 + $0x50] sm:$0xff]  ;;  %vm1883_vm4 = vcmask 1041408   ;;  %vm3713_vm5 = vcmask 64512   ;;  %vm4024_vm6 = vcmask 518144  }
  0x6e   :  { %6447 = vmatprep.subr.mxu0 %v10950_v0  ;;  %295 = vmatprep.subr.mxu1 %v262_v3  ;;  %v160_v7 = vld [vmem:[#allocation2] sm:$0x3]  ;;  %v259_v9 = vld [vmem:[#allocation7] sm:$0xff]  ;;  %v668_v11 = vld [vmem:[#allocation10 + $0x788] sm:$0xff] }
  0x6f   :  { %6448 = vmatpush3.msra.mxu0 %v163_v2  ;;  %296 = vmatpush1.msra.mxu1 %v261_v5  ;;  %v258_v10 = vld [vmem:[#allocation6 + $0x58] sm:$0xff]  ;;  %v667_v12 = vld [vmem:[#allocation10 + $0x780] sm:$0xff]  ;;  %v652_v13 = vld [vmem:[#allocation10 + $0x708] sm:$0xff] }
  0x70   :  { %6449 = vmatprep.subr.mxu0 %v10950_v0  ;;  %297 = vmatprep.subr.mxu1 %v260_v8  ;;  %v651_v14 = vld [vmem:[#allocation10 + $0x700] sm:$0xff]  ;;  %v636_v15 = vld [vmem:[#allocation10 + $0x688] sm:$0xff]  ;;  %v5373_v57 = vld [vmem:[#allocation4] ss:$0 sm:$0xff] }
  0x71   :  { %6450 = vmatpush3.msra.mxu0 %v162_v4  ;;  %298 = vmatpush1.msra.mxu1 %v259_v9  ;;  %v635_v16 = vld [vmem:[#allocation10 + $0x680] sm:$0xff]  ;;  %v620_v17 = vld [vmem:[#allocation10 + $0x608] sm:$0xff]  ;;  %v254_v1 = vld [vmem:[#allocation6 + $0x38] sm:$0xff] }
  0x72   :  { %6451 = vmatprep.subr.mxu0 %v10950_v0  ;;  %362 = vmatprep.subr.mxu1 %v258_v10  ;;  %v619_v18 = vld [vmem:[#allocation10 + $0x600] sm:$0xff]  ;;  %v604_v19 = vld [vmem:[#allocation10 + $0x588] sm:$0xff]  ;;  %v250_v5 = vld [vmem:[#allocation6 + $0x18] sm:$0xff] }
  0x73   :  { %6452 = vmatpush3.msra.mxu0 %v161_v6  ;;  %v603_v20 = vld [vmem:[#allocation10 + $0x580] sm:$0xff]  ;;  %v588_v21 = vld [vmem:[#allocation10 + $0x508] sm:$0xff]  ;;  %v246_v9 = vld [vmem:[%s10935_s1] sm:$0x3] }
  0x74   :  { %6454 = vmatmul.mubr.msk.f32.vlgmr.msra.gmra.mxu0 %vm172_vm1, %v160_v7  ;;  %1023 = vmatprep.subr.mxu0 %v668_v11  ;;  %v587_v22 = vld [vmem:[#allocation10 + $0x500] sm:$0xff]  ;;  %v572_v23 = vld [vmem:[#allocation10 + $0x488] sm:$0xff]  ;;  %v670_v10 = vld [vmem:[#allocation10 + $0x798] sm:$0xff] }
  0x75   :  { %1024 = vmatpush1.msra.mxu0 %v667_v12  ;;  %v571_v24 = vld [vmem:[#allocation10 + $0x480] sm:$0xff]  ;;  %v556_v25 = vld [vmem:[#allocation10 + $0x408] sm:$0xff]  ;;  %v669_v11 = vld [vmem:[#allocation10 + $0x790] sm:$0xff] }
  0x76   :  { %1025 = vmatprep.subr.mxu0 %v652_v13  ;;  %v555_v26 = vld [vmem:[#allocation10 + $0x400] sm:$0xff]  ;;  %v540_v27 = vld [vmem:[#allocation10 + $0x388] sm:$0xff]  ;;  %v654_v12 = vld [vmem:[#allocation10 + $0x718] sm:$0xff] }
  0x77   :  { %1026 = vmatpush1.msra.mxu0 %v651_v14  ;;  %v539_v28 = vld [vmem:[#allocation10 + $0x380] sm:$0xff]  ;;  %v524_v29 = vld [vmem:[#allocation10 + $0x308] sm:$0xff]  ;;  %v653_v13 = vld [vmem:[#allocation10 + $0x710] sm:$0xff] }
  0x78   :  { %1027 = vmatprep.subr.mxu0 %v636_v15  ;;  %v523_v30 = vld [vmem:[#allocation10 + $0x300] sm:$0xff]  ;;  %v508_v31 = vld [vmem:[#allocation10 + $0x288] sm:$0xff]  ;;  %v638_v14 = vld [vmem:[#allocation10 + $0x698] sm:$0xff] }
  0x79   :  { %1028 = vmatpush1.msra.mxu0 %v635_v16  ;;  %v507_v32 = vld [vmem:[#allocation10 + $0x280] sm:$0xff]  ;;  %v492_v33 = vld [vmem:[#allocation10 + $0x208] sm:$0xff]  ;;  %v637_v15 = vld [vmem:[#allocation10 + $0x690] sm:$0xff] }
  0x7a   :  { %1029 = vmatprep.subr.mxu0 %v620_v17  ;;  %v491_v34 = vld [vmem:[#allocation10 + $0x200] sm:$0xff]  ;;  %v476_v35 = vld [vmem:[#allocation10 + $0x188] sm:$0xff]  ;;  %v622_v16 = vld [vmem:[#allocation10 + $0x618] sm:$0xff] }
  0x7b   :  { %1030 = vmatpush1.msra.mxu0 %v619_v18  ;;  %v475_v36 = vld [vmem:[#allocation10 + $0x180] sm:$0xff]  ;;  %v460_v37 = vld [vmem:[#allocation10 + $0x108] sm:$0xff]  ;;  %v621_v17 = vld [vmem:[#allocation10 + $0x610] sm:$0xff] }
  0x7c   :  { %1031 = vmatprep.subr.mxu0 %v604_v19  ;;  %v459_v38 = vld [vmem:[#allocation10 + $0x100] sm:$0xff]  ;;  %v444_v39 = vld [vmem:[#allocation10 + $0x88] sm:$0xff]  ;;  %v606_v18 = vld [vmem:[#allocation10 + $0x598] sm:$0xff] }
  0x7d   :  { %1032 = vmatpush1.msra.mxu0 %v603_v20  ;;  %v443_v40 = vld [vmem:[#allocation10 + $0x80] sm:$0xff]  ;;  %v428_v41 = vld [vmem:[#allocation10 + $0x8] sm:$0xff]  ;;  %v605_v19 = vld [vmem:[#allocation10 + $0x590] sm:$0xff] }
  0x7e   :  { %1033 = vmatprep.subr.mxu0 %v588_v21  ;;  %v427_v42 = vld [vmem:[#allocation10] sm:$0xff]  ;;  %v924_v43 = vld [vmem:[#allocation10 + $0xf88] sm:$0xff]  ;;  %v590_v20 = vld [vmem:[#allocation10 + $0x518] sm:$0xff] }
  0x7f   :  { %1034 = vmatpush1.msra.mxu0 %v587_v22  ;;  %v923_v44 = vld [vmem:[#allocation10 + $0xf80] sm:$0xff]  ;;  %v908_v45 = vld [vmem:[#allocation10 + $0xf08] sm:$0xff]  ;;  %v589_v21 = vld [vmem:[#allocation10 + $0x510] sm:$0xff] }
  0x80   :  { %1035 = vmatprep.subr.mxu0 %v572_v23  ;;  %v907_v46 = vld [vmem:[#allocation10 + $0xf00] sm:$0xff]  ;;  %v892_v47 = vld [vmem:[#allocation10 + $0xe88] sm:$0xff]  ;;  %v574_v22 = vld [vmem:[#allocation10 + $0x498] sm:$0xff] }
  0x81   :  { %1036 = vmatpush1.msra.mxu0 %v571_v24  ;;  %v891_v48 = vld [vmem:[#allocation10 + $0xe80] sm:$0xff]  ;;  %v876_v49 = vld [vmem:[#allocation10 + $0xe08] sm:$0xff]  ;;  %v573_v23 = vld [vmem:[#allocation10 + $0x490] sm:$0xff] }
  0x82   :  { %1037 = vmatprep.subr.mxu0 %v556_v25  ;;  %v875_v50 = vld [vmem:[#allocation10 + $0xe00] sm:$0xff]  ;;  %v860_v51 = vld [vmem:[#allocation10 + $0xd88] sm:$0xff]  ;;  %v558_v24 = vld [vmem:[#allocation10 + $0x418] sm:$0xff] }
  0x83   :  { %1038 = vmatpush1.msra.mxu0 %v555_v26  ;;  %v859_v52 = vld [vmem:[#allocation10 + $0xd80] sm:$0xff]  ;;  %v844_v53 = vld [vmem:[#allocation10 + $0xd08] sm:$0xff]  ;;  %v557_v25 = vld [vmem:[#allocation10 + $0x410] sm:$0xff] }
  0x84   :  { %1039 = vmatprep.subr.mxu0 %v540_v27  ;;  %v843_v54 = vld [vmem:[#allocation10 + $0xd00] sm:$0xff]  ;;  %v828_v55 = vld [vmem:[#allocation10 + $0xc88] sm:$0xff]  ;;  %v542_v26 = vld [vmem:[#allocation10 + $0x398] sm:$0xff] }
  0x85   :  { %1040 = vmatpush1.msra.mxu0 %v539_v28  ;;  %v827_v56 = vld [vmem:[#allocation10 + $0xc80] sm:$0xff]  ;;  %v253_v2 = vld [vmem:[#allocation6 + $0x30] sm:$0xff]  ;;  %v526_v28 = vld [vmem:[#allocation10 + $0x318] sm:$0xff] }
  0x86   :  { %1041 = vmatprep.subr.mxu0 %v524_v29  ;;  %v256_v62 = vld [vmem:[#allocation6 + $0x48] sm:$0xff]  ;;  %v255_v63 = vld [vmem:[#allocation6 + $0x40] sm:$0xff]  ;;  %v249_v6 = vld [vmem:[#allocation6 + $0x10] sm:$0xff] }
  0x87   :  { %1042 = vmatpush1.msra.mxu0 %v523_v30  ;;  %v252_v3 = vld [vmem:[#allocation6 + $0x28] sm:$0xff]  ;;  %v251_v4 = vld [vmem:[#allocation6 + $0x20] sm:$0xff]  ;;  %v541_v27 = vld [vmem:[#allocation10 + $0x390] sm:$0xff] }
  0x88   :  { %1043 = vmatprep.subr.mxu0 %v508_v31  ;;  %v248_v7 = vld [vmem:[#allocation6 + $0x8] sm:$0xff]  ;;  %v247_v8 = vld [vmem:[#allocation6] sm:$0xff]  ;;  %v525_v29 = vld [vmem:[#allocation10 + $0x310] sm:$0xff] }
  0x89   :  { %1044 = vmatpush1.msra.mxu0 %v507_v32  ;;  %v510_v30 = vld [vmem:[#allocation10 + $0x298] sm:$0xff]  ;;  %v509_v31 = vld [vmem:[#allocation10 + $0x290] sm:$0xff] }
  0x8a   :  { %1045 = vmatprep.subr.mxu0 %v492_v33  ;;  %v494_v32 = vld [vmem:[#allocation10 + $0x218] sm:$0xff]  ;;  %v493_v33 = vld [vmem:[#allocation10 + $0x210] sm:$0xff] }
  0x8b   :  { %1046 = vmatpush1.msra.mxu0 %v491_v34  ;;  %v478_v34 = vld [vmem:[#allocation10 + $0x198] sm:$0xff] }
  0x8c   :  { %1047 = vmatprep.subr.mxu0 %v476_v35  ;;  %v477_v35 = vld [vmem:[#allocation10 + $0x190] sm:$0xff] }
  0x8d   :  { %1048 = vmatpush1.msra.mxu0 %v475_v36  ;;  %v462_v36 = vld [vmem:[#allocation10 + $0x118] sm:$0xff] }
  0x8e   :  { %1049 = vmatprep.subr.mxu0 %v460_v37  ;;  %v461_v37 = vld [vmem:[#allocation10 + $0x110] sm:$0xff] }
  0x8f   :  { %1050 = vmatpush1.msra.mxu0 %v459_v38  ;;  %v446_v38 = vld [vmem:[#allocation10 + $0x98] sm:$0xff] }
  0x90   :  { %1051 = vmatprep.subr.mxu0 %v444_v39  ;;  %v445_v39 = vld [vmem:[#allocation10 + $0x90] sm:$0xff] }
  0x91   :  { %1052 = vmatpush1.msra.mxu0 %v443_v40  ;;  %v430_v40 = vld [vmem:[#allocation10 + $0x18] sm:$0xff] }
  0x92   :  { %1053 = vmatprep.subr.mxu0 %v428_v41  ;;  %v429_v41 = vld [vmem:[#allocation10 + $0x10] sm:$0xff] }
  0x93   :  { %1054 = vmatpush1.msra.mxu0 %v427_v42  ;;  %v926_v42 = vld [vmem:[#allocation10 + $0xf98] sm:$0xff] }
  0x94   :  { %1055 = vmatprep.subr.mxu0 %v924_v43  ;;  %v925_v43 = vld [vmem:[#allocation10 + $0xf90] sm:$0xff] }
  0x95   :  { %1056 = vmatpush2.msra.mxu0 %v923_v44  ;;  %v910_v44 = vld [vmem:[#allocation10 + $0xf18] sm:$0xff] }
  0x96   :  { %1057 = vmatprep.subr.mxu0 %v908_v45  ;;  %v909_v45 = vld [vmem:[#allocation10 + $0xf10] sm:$0xff] }
  0x97   :  { %1058 = vmatpush2.msra.mxu0 %v907_v46  ;;  %v894_v46 = vld [vmem:[#allocation10 + $0xe98] sm:$0xff] }
  0x98   :  { %1059 = vmatprep.subr.mxu0 %v892_v47  ;;  %v893_v47 = vld [vmem:[#allocation10 + $0xe90] sm:$0xff] }
  0x99   :  { %1060 = vmatpush2.msra.mxu0 %v891_v48  ;;  %v878_v48 = vld [vmem:[#allocation10 + $0xe18] sm:$0xff] }
  0x9a   :  { %1061 = vmatprep.subr.mxu0 %v876_v49  ;;  %v877_v49 = vld [vmem:[#allocation10 + $0xe10] sm:$0xff] }
  0x9b   :  { %1062 = vmatpush2.msra.mxu0 %v875_v50  ;;  %v862_v50 = vld [vmem:[#allocation10 + $0xd98] sm:$0xff] }
  0x9c   :  { %1063 = vmatprep.subr.mxu0 %v860_v51  ;;  %v861_v51 = vld [vmem:[#allocation10 + $0xd90] sm:$0xff] }
  0x9d   :  { %1064 = vmatpush2.msra.mxu0 %v859_v52  ;;  %v846_v52 = vld [vmem:[#allocation10 + $0xd18] sm:$0xff] }
  0x9e   :  { %1065 = vmatprep.subr.mxu0 %v844_v53  ;;  %v845_v53 = vld [vmem:[#allocation10 + $0xd10] sm:$0xff] }
  0x9f   :  { %1066 = vmatpush2.msra.mxu0 %v843_v54  ;;  %v830_v54 = vld [vmem:[#allocation10 + $0xc98] sm:$0xff] }
  0xa0   :  { %1067 = vmatprep.subr.mxu0 %v828_v55  ;;  %v829_v55 = vld [vmem:[#allocation10 + $0xc90] sm:$0xff] }
  0xa1   :  { %1068 = vmatpush2.msra.mxu0 %v827_v56  ;;  %v812_v56 = vld [vmem:[#allocation10 + $0xc08] sm:$0xff] }
  0xa2   :  { %1069 = vmatprep.subr.mxu0 %v812_v56  ;;  %v624_v56 = vld [vmem:[#allocation10 + $0x628] sm:$0xff] }
 0x134   :  { %v242_v58 = vpop.f32.mrf.mxu0 }
 0x135   :  { %v243_v59 = vadd.f32 %v5373_v57, %v242_v58  ;;  %v814_v57 = vld [vmem:[#allocation10 + $0xc18] sm:$0xff]  ;;  %v811_v58 = vld [vmem:[#allocation10 + $0xc00] sm:$0xff] }
 0x136   :  { %v6455_v61 = vpop.f32.mrf.mxu0  ;;  %1070 = vmatpush2.msra.mxu0 %v811_v58  ;;  %v623_v58 = vld [vmem:[#allocation10 + $0x620] sm:$0xff] }
 0x137   :  { %5375 = vmatmul.mubr.msk.f32.vlgmr.msra.gmra.mxu1 %vm263_vm2, %v243_v59  ;;  %v813_v59 = vld [vmem:[#allocation10 + $0xc10] sm:$0xff]  ;;  %v798_v61 = vld [vmem:[#allocation10 + $0xb98] sm:$0xff] }
 0x138   :  { %363 = vmatpush1.msra.mxu1 %v257_v60  ;;  %406 = vmatprep.mubr.f32.mxu1 %v10950_v0  ;;  %v796_v60 = vld [vmem:[#allocation10 + $0xb88] sm:$0xff]  ;;  %v8625_v0 = vld [vmem:[%s10946_s12 + $0x780] sm:$0xff] }
 0x139   :  { %364 = vmatprep.subr.mxu1 %v256_v62  ;;  %v795_v62 = vld [vmem:[#allocation10 + $0xb80] sm:$0xff]  ;;  %1071 = vmatprep.subr.mxu0 %v796_v60  ;;  %v608_v60 = vld [vmem:[#allocation10 + $0x5a8] sm:$0xff]  ;;  %11021 = vst [vmem:[#allocation32_spill] sm:$0xff] %v8625_v0 }
 0x13a   :  { %365 = vmatpush1.msra.mxu1 %v255_v63  ;;  %v797_v63 = vld [vmem:[#allocation10 + $0xb90] sm:$0xff]  ;;  %1072 = vmatpush2.msra.mxu0 %v795_v62  ;;  %v607_v62 = vld [vmem:[#allocation10 + $0x5a0] sm:$0xff] }
 0x13b   :  { %366 = vmatprep.subr.mxu1 %v254_v1  ;;  %v780_v1 = vld [vmem:[#allocation10 + $0xb08] sm:$0xff] }
 0x13c   :  { %367 = vmatpush1.msra.mxu1 %v253_v2  ;;  %v782_v2 = vld [vmem:[#allocation10 + $0xb18] sm:$0xff]  ;;  %1073 = vmatprep.subr.mxu0 %v780_v1  ;;  %v592_v1 = vld [vmem:[#allocation10 + $0x528] sm:$0xff] }
 0x13d   :  { %368 = vmatprep.subr.mxu1 %v252_v3  ;;  %v779_v3 = vld [vmem:[#allocation10 + $0xb00] sm:$0xff] }
 0x13e   :  { %369 = vmatpush1.msra.mxu1 %v251_v4  ;;  %v781_v4 = vld [vmem:[#allocation10 + $0xb10] sm:$0xff]  ;;  %1074 = vmatpush2.msra.mxu0 %v779_v3  ;;  %v591_v3 = vld [vmem:[#allocation10 + $0x520] sm:$0xff] }
 0x13f   :  { %370 = vmatprep.subr.mxu1 %v250_v5  ;;  %v764_v5 = vld [vmem:[#allocation10 + $0xa88] sm:$0xff] }
 0x140   :  { %371 = vmatpush1.msra.mxu1 %v249_v6  ;;  %v766_v6 = vld [vmem:[#allocation10 + $0xa98] sm:$0xff]  ;;  %1075 = vmatprep.subr.mxu0 %v764_v5  ;;  %v576_v5 = vld [vmem:[#allocation10 + $0x4a8] sm:$0xff] }
 0x141   :  { %372 = vmatprep.subr.mxu1 %v248_v7  ;;  %v763_v7 = vld [vmem:[#allocation10 + $0xa80] sm:$0xff] }
 0x142   :  { %373 = vmatpush1.msra.mxu1 %v247_v8  ;;  %v765_v8 = vld [vmem:[#allocation10 + $0xa90] sm:$0xff]  ;;  %1076 = vmatpush2.msra.mxu0 %v763_v7  ;;  %v575_v7 = vld [vmem:[#allocation10 + $0x4a0] sm:$0xff] }
 0x143   :  { %5376 = vmatmul.mubr.msk.f32.vlgmr.msra.gmra.mxu1 %vm338_vm3, %v246_v9  ;;  %1094 = vmatprep.subr.mxu1 %v670_v10  ;;  %v748_v9 = vld [vmem:[#allocation10 + $0xa08] sm:$0xff]  ;;  %v750_v10 = vld [vmem:[#allocation10 + $0xa18] sm:$0xff] }
 0x144   :  { %1095 = vmatpush1.msra.mxu1 %v669_v11  ;;  %v747_v11 = vld [vmem:[#allocation10 + $0xa00] sm:$0xff]  ;;  %1077 = vmatprep.subr.mxu0 %v748_v9  ;;  %v560_v9 = vld [vmem:[#allocation10 + $0x428] sm:$0xff] }
 0x145   :  { %1096 = vmatprep.subr.mxu1 %v654_v12  ;;  %v749_v12 = vld [vmem:[#allocation10 + $0xa10] sm:$0xff]  ;;  %1078 = vmatpush2.msra.mxu0 %v747_v11  ;;  %v559_v11 = vld [vmem:[#allocation10 + $0x420] sm:$0xff] }
 0x146   :  { %1097 = vmatpush1.msra.mxu1 %v653_v13  ;;  %v732_v13 = vld [vmem:[#allocation10 + $0x988] sm:$0xff] }
 0x147   :  { %1098 = vmatprep.subr.mxu1 %v638_v14  ;;  %v734_v14 = vld [vmem:[#allocation10 + $0x998] sm:$0xff]  ;;  %1079 = vmatprep.subr.mxu0 %v732_v13  ;;  %v544_v13 = vld [vmem:[#allocation10 + $0x3a8] sm:$0xff] }
 0x148   :  { %1099 = vmatpush1.msra.mxu1 %v637_v15  ;;  %v731_v15 = vld [vmem:[#allocation10 + $0x980] sm:$0xff] }
 0x149   :  { %1100 = vmatprep.subr.mxu1 %v622_v16  ;;  %v733_v16 = vld [vmem:[#allocation10 + $0x990] sm:$0xff]  ;;  %1080 = vmatpush2.msra.mxu0 %v731_v15  ;;  %v543_v15 = vld [vmem:[#allocation10 + $0x3a0] sm:$0xff] }
 0x14a   :  { %1101 = vmatpush1.msra.mxu1 %v621_v17  ;;  %v716_v17 = vld [vmem:[#allocation10 + $0x908] sm:$0xff] }
 0x14b   :  { %1102 = vmatprep.subr.mxu1 %v606_v18  ;;  %v718_v18 = vld [vmem:[#allocation10 + $0x918] sm:$0xff]  ;;  %1081 = vmatprep.subr.mxu0 %v716_v17  ;;  %v528_v17 = vld [vmem:[#allocation10 + $0x328] sm:$0xff] }
 0x14c   :  { %1103 = vmatpush1.msra.mxu1 %v605_v19  ;;  %v715_v19 = vld [vmem:[#allocation10 + $0x900] sm:$0xff] }
 0x14d   :  { %1104 = vmatprep.subr.mxu1 %v590_v20  ;;  %v717_v20 = vld [vmem:[#allocation10 + $0x910] sm:$0xff]  ;;  %1082 = vmatpush2.msra.mxu0 %v715_v19  ;;  %v527_v19 = vld [vmem:[#allocation10 + $0x320] sm:$0xff] }
 0x14e   :  { %1105 = vmatpush1.msra.mxu1 %v589_v21  ;;  %v700_v21 = vld [vmem:[#allocation10 + $0x888] sm:$0xff] }
 0x14f   :  { %1106 = vmatprep.subr.mxu1 %v574_v22  ;;  %v702_v22 = vld [vmem:[#allocation10 + $0x898] sm:$0xff]  ;;  %1083 = vmatprep.subr.mxu0 %v700_v21  ;;  %v512_v21 = vld [vmem:[#allocation10 + $0x2a8] sm:$0xff] }
 0x150   :  { %1107 = vmatpush1.msra.mxu1 %v573_v23  ;;  %v699_v23 = vld [vmem:[#allocation10 + $0x880] sm:$0xff] }
 0x151   :  { %1108 = vmatprep.subr.mxu1 %v558_v24  ;;  %v701_v24 = vld [vmem:[#allocation10 + $0x890] sm:$0xff]  ;;  %1084 = vmatpush2.msra.mxu0 %v699_v23  ;;  %v511_v23 = vld [vmem:[#allocation10 + $0x2a0] sm:$0xff] }
 0x152   :  { %1109 = vmatpush1.msra.mxu1 %v557_v25  ;;  %v684_v25 = vld [vmem:[#allocation10 + $0x808] sm:$0xff] }
 0x153   :  { %1110 = vmatprep.subr.mxu1 %v542_v26  ;;  %v686_v26 = vld [vmem:[#allocation10 + $0x818] sm:$0xff]  ;;  %1085 = vmatprep.subr.mxu0 %v684_v25  ;;  %v496_v25 = vld [vmem:[#allocation10 + $0x228] sm:$0xff] }
 0x154   :  { %1111 = vmatpush1.msra.mxu1 %v541_v27  ;;  %v683_v27 = vld [vmem:[#allocation10 + $0x800] sm:$0xff] }
 0x155   :  { %1112 = vmatprep.subr.mxu1 %v526_v28  ;;  %v685_v28 = vld [vmem:[#allocation10 + $0x810] sm:$0xff]  ;;  %1086 = vmatpush2.msra.mxu0 %v683_v27  ;;  %v495_v27 = vld [vmem:[#allocation10 + $0x220] sm:$0xff] }
 0x156   :  { %1113 = vmatpush1.msra.mxu1 %v525_v29  ;;  %v672_v29 = vld [vmem:[#allocation10 + $0x7a8] sm:$0xff] }
 0x157   :  { %1114 = vmatprep.subr.mxu1 %v510_v30  ;;  %v674_v30 = vld [vmem:[#allocation10 + $0x7b8] sm:$0xff]  ;;  %1165 = vmatprep.subr.mxu0 %v672_v29  ;;  %v480_v29 = vld [vmem:[#allocation10 + $0x1a8] sm:$0xff] }
 0x158   :  { %1115 = vmatpush1.msra.mxu1 %v509_v31  ;;  %v415_v31 = vlaneseq }
 0x159   :  { %1116 = vmatprep.subr.mxu1 %v494_v32 }
 0x15a   :  { %1117 = vmatpush1.msra.mxu1 %v493_v33  ;;  %v7081_v33 = vshrl.u32 %v415_v31, 7  ;;  %v479_v31 = vld [vmem:[#allocation10 + $0x1a0] sm:$0xff] }
 0x15b   :  { %1118 = vmatprep.subr.mxu1 %v478_v34 }
 0x15c   :  { %1119 = vmatpush1.msra.mxu1 %v477_v35  ;;  %v7084_v34 = vsub.s32 1, %v7081_v33 }
 0x15d   :  { %1120 = vmatprep.subr.mxu1 %v462_v36  ;;  %v7087_v36 = vsub.s32 0, %v7081_v33 }
 0x15e   :  { %1121 = vmatpush1.msra.mxu1 %v461_v37  ;;  %11010 = vst [vmem:[#allocation21_spill] sm:$0xff] %v7084_v34  ;;  %v413_v37 = vld [vmem:[#allocation9] sm:$0x3] }
 0x15f   :  { %1122 = vmatprep.subr.mxu1 %v446_v38 }
 0x160   :  { %1123 = vmatpush1.msra.mxu1 %v445_v39  ;;  %v422_v39 = vrot.slane %v413_v37, %v7084_v34 }
 0x161   :  { %1124 = vmatprep.subr.mxu1 %v430_v40 }
 0x162   :  { %1125 = vmatpush1.msra.mxu1 %v429_v41  ;;  %v418_v41 = vrot.slane %v413_v37, %v7087_v36  ;;  %v466_v37 = vld [vmem:[#allocation10 + $0x138] sm:$0xff] }
 0x163   :  { %1126 = vmatprep.subr.mxu1 %v926_v42 }
 0x164   :  { %1127 = vmatpush2.msra.mxu1 %v925_v43 }
 0x165   :  { %1128 = vmatprep.subr.mxu1 %v910_v44 }
 0x166   :  { %1129 = vmatpush2.msra.mxu1 %v909_v45 }
 0x167   :  { %1130 = vmatprep.subr.mxu1 %v894_v46  ;;  %v671_v46 = vld [vmem:[#allocation10 + $0x7a0] sm:$0xff] }
 0x168   :  { %1131 = vmatpush2.msra.mxu1 %v893_v47  ;;  %v673_v47 = vld [vmem:[#allocation10 + $0x7b0] sm:$0xff] }
 0x169   :  { %1132 = vmatprep.subr.mxu1 %v878_v48  ;;  %v656_v48 = vld [vmem:[#allocation10 + $0x728] sm:$0xff] }
 0x16a   :  { %1133 = vmatpush2.msra.mxu1 %v877_v49  ;;  %v658_v49 = vld [vmem:[#allocation10 + $0x738] sm:$0xff] }
 0x16b   :  { %1134 = vmatprep.subr.mxu1 %v862_v50  ;;  %v655_v50 = vld [vmem:[#allocation10 + $0x720] sm:$0xff] }
 0x16c   :  { %1135 = vmatpush2.msra.mxu1 %v861_v51  ;;  %v657_v51 = vld [vmem:[#allocation10 + $0x730] sm:$0xff] }
 0x16d   :  { %1136 = vmatprep.subr.mxu1 %v846_v52  ;;  %v640_v52 = vld [vmem:[#allocation10 + $0x6a8] sm:$0xff] }
 0x16e   :  { %1137 = vmatpush2.msra.mxu1 %v845_v53  ;;  %v642_v53 = vld [vmem:[#allocation10 + $0x6b8] sm:$0xff] }
 0x16f   :  { %1138 = vmatprep.subr.mxu1 %v830_v54  ;;  %v639_v54 = vld [vmem:[#allocation10 + $0x6a0] sm:$0xff] }
 0x170   :  { %1139 = vmatpush2.msra.mxu1 %v829_v55  ;;  %v641_v55 = vld [vmem:[#allocation10 + $0x6b0] sm:$0xff] }
 0x171   :  { %1140 = vmatprep.subr.mxu1 %v814_v57  ;;  %v626_v57 = vld [vmem:[#allocation10 + $0x638] sm:$0xff] }
 0x172   :  { %1141 = vmatpush2.msra.mxu1 %v813_v59  ;;  %v625_v59 = vld [vmem:[#allocation10 + $0x630] sm:$0xff] }
 0x173   :  { %1142 = vmatprep.subr.mxu1 %v798_v61  ;;  %v610_v61 = vld [vmem:[#allocation10 + $0x5b8] sm:$0xff] }
 0x174   :  { %1143 = vmatpush2.msra.mxu1 %v797_v63  ;;  %v609_v63 = vld [vmem:[#allocation10 + $0x5b0] sm:$0xff] }
 0x175   :  { %1144 = vmatprep.subr.mxu1 %v782_v2  ;;  %v594_v2 = vld [vmem:[#allocation10 + $0x538] sm:$0xff] }
 0x176   :  { %1145 = vmatpush2.msra.mxu1 %v781_v4  ;;  %v593_v4 = vld [vmem:[#allocation10 + $0x530] sm:$0xff] }
 0x177   :  { %1146 = vmatprep.subr.mxu1 %v766_v6  ;;  %v578_v6 = vld [vmem:[#allocation10 + $0x4b8] sm:$0xff] }
 0x178   :  { %1147 = vmatpush2.msra.mxu1 %v765_v8  ;;  %v577_v8 = vld [vmem:[#allocation10 + $0x4b0] sm:$0xff] }
 0x179   :  { %1148 = vmatprep.subr.mxu1 %v750_v10  ;;  %v562_v10 = vld [vmem:[#allocation10 + $0x438] sm:$0xff] }
 0x17a   :  { %1149 = vmatpush2.msra.mxu1 %v749_v12  ;;  %v561_v12 = vld [vmem:[#allocation10 + $0x430] sm:$0xff] }
 0x17b   :  { %1150 = vmatprep.subr.mxu1 %v734_v14  ;;  %v546_v14 = vld [vmem:[#allocation10 + $0x3b8] sm:$0xff] }
 0x17c   :  { %1151 = vmatpush2.msra.mxu1 %v733_v16  ;;  %v545_v16 = vld [vmem:[#allocation10 + $0x3b0] sm:$0xff] }
 0x17d   :  { %1152 = vmatprep.subr.mxu1 %v718_v18  ;;  %v530_v18 = vld [vmem:[#allocation10 + $0x338] sm:$0xff] }
 0x17e   :  { %1153 = vmatpush2.msra.mxu1 %v717_v20  ;;  %v529_v20 = vld [vmem:[#allocation10 + $0x330] sm:$0xff] }
 0x17f   :  { %1154 = vmatprep.subr.mxu1 %v702_v22  ;;  %v514_v22 = vld [vmem:[#allocation10 + $0x2b8] sm:$0xff] }
 0x180   :  { %1155 = vmatpush2.msra.mxu1 %v701_v24  ;;  %v513_v24 = vld [vmem:[#allocation10 + $0x2b0] sm:$0xff] }
 0x181   :  { %1156 = vmatprep.subr.mxu1 %v686_v26  ;;  %v498_v26 = vld [vmem:[#allocation10 + $0x238] sm:$0xff] }
 0x182   :  { %1157 = vmatpush2.msra.mxu1 %v685_v28  ;;  %v497_v28 = vld [vmem:[#allocation10 + $0x230] sm:$0xff] }
 0x183   :  { %1236 = vmatprep.subr.mxu1 %v674_v30  ;;  %v482_v30 = vld [vmem:[#allocation10 + $0x1b8] sm:$0xff] }
 0x1f7   :  { %v333_v32 = vpop.f32.mrf.mxu1 }
 0x1f9   :  { %v335_v35 = vpop.f32.mrf.mxu1 }
 0x203   :  { %v408_v38 = vpop.f32.mrf.mxu1 }
 0x204   :  { %v409_v40 = vadd.f32 %v408_v38, %v333_v32  ;;  %v481_v32 = vld [vmem:[#allocation10 + $0x1b0] sm:$0xff]  ;;  %v463_v38 = vld [vmem:[#allocation10 + $0x120] sm:$0xff] }
 0x205   :  { %v410_v42 = vpop.f32.mrf.mxu1 }
 0x206   :  { %v411_v43 = vadd.f32 %v410_v42, %v335_v35  ;;  %v7093_v45 = vadd.f32 %v418_v41, %v409_v40  ;;  %v464_v35 = vld [vmem:[#allocation10 + $0x128] sm:$0xff]  ;;  %v450_v41 = vld [vmem:[#allocation10 + $0xb8] sm:$0xff]  ;;  %v447_v42 = vld [vmem:[#allocation10 + $0xa0] sm:$0xff] }
 0x207   :  { %v448_v40 = vld [vmem:[#allocation10 + $0xa8] sm:$0xff] }
 0x208   :  { %v7091_v44 = vadd.f32 %v422_v39, %v411_v43  ;;  %v465_v39 = vld [vmem:[#allocation10 + $0x130] sm:$0xff] }
 0x209   :  { %v449_v43 = vld [vmem:[#allocation10 + $0xb0] sm:$0xff] }
 0x20a   :  { %1087 = vmatprep.mubr.f32.mxu0 %v7091_v44  ;;  %1158 = vmatprep.mubr.f32.mxu1 %v7091_v44 }
 0x20b   :  { %1088 = vmatmul.mubr.f32.vlgmr.msra.gmra.mxu0 %v7093_v45  ;;  %1159 = vmatmul.mubr.f32.vlgmr.msra.gmra.mxu1 %v7093_v45 }
 0x20c   :  { %1166 = vmatpush1.msra.mxu0 %v671_v46  ;;  %1237 = vmatpush1.msra.mxu1 %v673_v47  ;;  %v432_v46 = vld [vmem:[#allocation10 + $0x28] sm:$0xff]  ;;  %v434_v47 = vld [vmem:[#allocation10 + $0x38] sm:$0xff] }
 0x20d   :  { %1167 = vmatprep.subr.mxu0 %v656_v48  ;;  %1229 = vmatprep.mubr.f32.mxu0 %v7091_v44  ;;  %v431_v48 = vld [vmem:[#allocation10 + $0x20] sm:$0xff] }
 0x20e   :  { %1238 = vmatprep.subr.mxu1 %v658_v49  ;;  %1300 = vmatprep.mubr.f32.mxu1 %v7091_v44  ;;  %v433_v49 = vld [vmem:[#allocation10 + $0x30] sm:$0xff] }
 0x20f   :  { %1168 = vmatpush1.msra.mxu0 %v655_v50  ;;  %1239 = vmatpush1.msra.mxu1 %v657_v51  ;;  %v928_v50 = vld [vmem:[#allocation10 + $0xfa8] sm:$0xff]  ;;  %v930_v51 = vld [vmem:[#allocation10 + $0xfb8] sm:$0xff] }
 0x210   :  { %1169 = vmatprep.subr.mxu0 %v640_v52  ;;  %1240 = vmatprep.subr.mxu1 %v642_v53  ;;  %v927_v52 = vld [vmem:[#allocation10 + $0xfa0] sm:$0xff]  ;;  %v929_v53 = vld [vmem:[#allocation10 + $0xfb0] sm:$0xff] }
 0x211   :  { %1170 = vmatpush1.msra.mxu0 %v639_v54  ;;  %1241 = vmatpush1.msra.mxu1 %v641_v55  ;;  %v912_v54 = vld [vmem:[#allocation10 + $0xf28] sm:$0xff]  ;;  %v914_v55 = vld [vmem:[#allocation10 + $0xf38] sm:$0xff] }
 0x212   :  { %1171 = vmatprep.subr.mxu0 %v624_v56  ;;  %1242 = vmatprep.subr.mxu1 %v626_v57  ;;  %v911_v56 = vld [vmem:[#allocation10 + $0xf20] sm:$0xff]  ;;  %v913_v57 = vld [vmem:[#allocation10 + $0xf30] sm:$0xff] }
 0x213   :  { %1172 = vmatpush1.msra.mxu0 %v623_v58  ;;  %1243 = vmatpush1.msra.mxu1 %v625_v59  ;;  %v896_v58 = vld [vmem:[#allocation10 + $0xea8] sm:$0xff]  ;;  %v898_v59 = vld [vmem:[#allocation10 + $0xeb8] sm:$0xff] }
 0x214   :  { %1173 = vmatprep.subr.mxu0 %v608_v60  ;;  %1244 = vmatprep.subr.mxu1 %v610_v61  ;;  %v895_v60 = vld [vmem:[#allocation10 + $0xea0] sm:$0xff]  ;;  %v897_v61 = vld [vmem:[#allocation10 + $0xeb0] sm:$0xff] }
 0x215   :  { %1174 = vmatpush1.msra.mxu0 %v607_v62  ;;  %1245 = vmatpush1.msra.mxu1 %v609_v63  ;;  %v880_v62 = vld [vmem:[#allocation10 + $0xe28] sm:$0xff]  ;;  %v882_v63 = vld [vmem:[#allocation10 + $0xe38] sm:$0xff] }
 0x216   :  { %1175 = vmatprep.subr.mxu0 %v592_v1  ;;  %1246 = vmatprep.subr.mxu1 %v594_v2  ;;  %v879_v1 = vld [vmem:[#allocation10 + $0xe20] sm:$0xff]  ;;  %v881_v2 = vld [vmem:[#allocation10 + $0xe30] sm:$0xff] }
 0x217   :  { %1176 = vmatpush1.msra.mxu0 %v591_v3  ;;  %1247 = vmatpush1.msra.mxu1 %v593_v4  ;;  %v864_v3 = vld [vmem:[#allocation10 + $0xda8] sm:$0xff]  ;;  %v866_v4 = vld [vmem:[#allocation10 + $0xdb8] sm:$0xff] }
 0x218   :  { %1177 = vmatprep.subr.mxu0 %v576_v5  ;;  %1248 = vmatprep.subr.mxu1 %v578_v6  ;;  %v863_v5 = vld [vmem:[#allocation10 + $0xda0] sm:$0xff]  ;;  %v865_v6 = vld [vmem:[#allocation10 + $0xdb0] sm:$0xff] }
 0x219   :  { %1178 = vmatpush1.msra.mxu0 %v575_v7  ;;  %1249 = vmatpush1.msra.mxu1 %v577_v8  ;;  %v848_v7 = vld [vmem:[#allocation10 + $0xd28] sm:$0xff]  ;;  %v850_v8 = vld [vmem:[#allocation10 + $0xd38] sm:$0xff] }
 0x21a   :  { %1179 = vmatprep.subr.mxu0 %v560_v9  ;;  %1250 = vmatprep.subr.mxu1 %v562_v10  ;;  %v847_v9 = vld [vmem:[#allocation10 + $0xd20] sm:$0xff]  ;;  %v849_v10 = vld [vmem:[#allocation10 + $0xd30] sm:$0xff] }
 0x21b   :  { %1180 = vmatpush1.msra.mxu0 %v559_v11  ;;  %1251 = vmatpush1.msra.mxu1 %v561_v12  ;;  %v832_v11 = vld [vmem:[#allocation10 + $0xca8] sm:$0xff]  ;;  %v834_v12 = vld [vmem:[#allocation10 + $0xcb8] sm:$0xff] }
 0x21c   :  { %1181 = vmatprep.subr.mxu0 %v544_v13  ;;  %1252 = vmatprep.subr.mxu1 %v546_v14  ;;  %v831_v13 = vld [vmem:[#allocation10 + $0xca0] sm:$0xff]  ;;  %v833_v14 = vld [vmem:[#allocation10 + $0xcb0] sm:$0xff] }
 0x21d   :  { %1182 = vmatpush1.msra.mxu0 %v543_v15  ;;  %1253 = vmatpush1.msra.mxu1 %v545_v16  ;;  %v816_v15 = vld [vmem:[#allocation10 + $0xc28] sm:$0xff]  ;;  %v818_v16 = vld [vmem:[#allocation10 + $0xc38] sm:$0xff] }
 0x21e   :  { %1183 = vmatprep.subr.mxu0 %v528_v17  ;;  %1254 = vmatprep.subr.mxu1 %v530_v18  ;;  %v815_v17 = vld [vmem:[#allocation10 + $0xc20] sm:$0xff]  ;;  %v817_v18 = vld [vmem:[#allocation10 + $0xc30] sm:$0xff] }
 0x21f   :  { %1184 = vmatpush1.msra.mxu0 %v527_v19  ;;  %1255 = vmatpush1.msra.mxu1 %v529_v20  ;;  %v800_v19 = vld [vmem:[#allocation10 + $0xba8] sm:$0xff]  ;;  %v802_v20 = vld [vmem:[#allocation10 + $0xbb8] sm:$0xff] }
 0x220   :  { %1185 = vmatprep.subr.mxu0 %v512_v21  ;;  %1256 = vmatprep.subr.mxu1 %v514_v22  ;;  %v799_v21 = vld [vmem:[#allocation10 + $0xba0] sm:$0xff]  ;;  %v801_v22 = vld [vmem:[#allocation10 + $0xbb0] sm:$0xff] }
 0x221   :  { %1186 = vmatpush1.msra.mxu0 %v511_v23  ;;  %1257 = vmatpush1.msra.mxu1 %v513_v24  ;;  %v784_v23 = vld [vmem:[#allocation10 + $0xb28] sm:$0xff]  ;;  %v786_v24 = vld [vmem:[#allocation10 + $0xb38] sm:$0xff] }
 0x222   :  { %1187 = vmatprep.subr.mxu0 %v496_v25  ;;  %1258 = vmatprep.subr.mxu1 %v498_v26  ;;  %v783_v25 = vld [vmem:[#allocation10 + $0xb20] sm:$0xff]  ;;  %v785_v26 = vld [vmem:[#allocation10 + $0xb30] sm:$0xff] }
 0x223   :  { %1188 = vmatpush1.msra.mxu0 %v495_v27  ;;  %1259 = vmatpush1.msra.mxu1 %v497_v28  ;;  %v768_v27 = vld [vmem:[#allocation10 + $0xaa8] sm:$0xff]  ;;  %v770_v28 = vld [vmem:[#allocation10 + $0xab8] sm:$0xff] }
 0x224   :  { %1189 = vmatprep.subr.mxu0 %v480_v29  ;;  %1260 = vmatprep.subr.mxu1 %v482_v30  ;;  %v767_v29 = vld [vmem:[#allocation10 + $0xaa0] sm:$0xff]  ;;  %v769_v30 = vld [vmem:[#allocation10 + $0xab0] sm:$0xff] }
 0x225   :  { %1190 = vmatpush1.msra.mxu0 %v479_v31  ;;  %1261 = vmatpush1.msra.mxu1 %v481_v32  ;;  %v752_v31 = vld [vmem:[#allocation10 + $0xa28] sm:$0xff]  ;;  %v754_v32 = vld [vmem:[#allocation10 + $0xa38] sm:$0xff] }
 0x226   :  { %1191 = vmatprep.subr.mxu0 %v464_v35  ;;  %1262 = vmatprep.subr.mxu1 %v466_v37  ;;  %v751_v35 = vld [vmem:[#allocation10 + $0xa20] sm:$0xff]  ;;  %v753_v37 = vld [vmem:[#allocation10 + $0xa30] sm:$0xff] }
 0x227   :  { %1192 = vmatpush1.msra.mxu0 %v463_v38  ;;  %1263 = vmatpush1.msra.mxu1 %v465_v39  ;;  %v736_v38 = vld [vmem:[#allocation10 + $0x9a8] sm:$0xff]  ;;  %v738_v39 = vld [vmem:[#allocation10 + $0x9b8] sm:$0xff] }
 0x228   :  { %1193 = vmatprep.subr.mxu0 %v448_v40  ;;  %1264 = vmatprep.subr.mxu1 %v450_v41  ;;  %v735_v40 = vld [vmem:[#allocation10 + $0x9a0] sm:$0xff]  ;;  %v737_v41 = vld [vmem:[#allocation10 + $0x9b0] sm:$0xff] }
 0x229   :  { %1194 = vmatpush1.msra.mxu0 %v447_v42  ;;  %1265 = vmatpush1.msra.mxu1 %v449_v43  ;;  %v720_v42 = vld [vmem:[#allocation10 + $0x928] sm:$0xff]  ;;  %v722_v43 = vld [vmem:[#allocation10 + $0x938] sm:$0xff] }
 0x22a   :  { %1195 = vmatprep.subr.mxu0 %v432_v46  ;;  %1266 = vmatprep.subr.mxu1 %v434_v47  ;;  %v719_v46 = vld [vmem:[#allocation10 + $0x920] sm:$0xff]  ;;  %v721_v47 = vld [vmem:[#allocation10 + $0x930] sm:$0xff] }
 0x22b   :  { %1196 = vmatpush1.msra.mxu0 %v431_v48  ;;  %1267 = vmatpush1.msra.mxu1 %v433_v49  ;;  %v704_v48 = vld [vmem:[#allocation10 + $0x8a8] sm:$0xff]  ;;  %v706_v49 = vld [vmem:[#allocation10 + $0x8b8] sm:$0xff] }
 0x22c   :  { %1197 = vmatprep.subr.mxu0 %v928_v50  ;;  %1268 = vmatprep.subr.mxu1 %v930_v51  ;;  %v703_v50 = vld [vmem:[#allocation10 + $0x8a0] sm:$0xff]  ;;  %v705_v51 = vld [vmem:[#allocation10 + $0x8b0] sm:$0xff] }
 0x22d   :  { %1198 = vmatpush2.msra.mxu0 %v927_v52  ;;  %1269 = vmatpush2.msra.mxu1 %v929_v53  ;;  %v688_v52 = vld [vmem:[#allocation10 + $0x828] sm:$0xff]  ;;  %v690_v53 = vld [vmem:[#allocation10 + $0x838] sm:$0xff] }
 0x22e   :  { %1199 = vmatprep.subr.mxu0 %v912_v54  ;;  %1270 = vmatprep.subr.mxu1 %v914_v55  ;;  %v687_v54 = vld [vmem:[#allocation10 + $0x820] sm:$0xff]  ;;  %v689_v55 = vld [vmem:[#allocation10 + $0x830] sm:$0xff] }
 0x22f   :  { %1200 = vmatpush2.msra.mxu0 %v911_v56  ;;  %1271 = vmatpush2.msra.mxu1 %v913_v57  ;;  %v676_v56 = vld [vmem:[#allocation10 + $0x7c8] sm:$0xff]  ;;  %v678_v57 = vld [vmem:[#allocation10 + $0x7d8] sm:$0xff] }
 0x230   :  { %1201 = vmatprep.subr.mxu0 %v896_v58  ;;  %1272 = vmatprep.subr.mxu1 %v898_v59  ;;  %v675_v58 = vld [vmem:[#allocation10 + $0x7c0] sm:$0xff]  ;;  %v677_v59 = vld [vmem:[#allocation10 + $0x7d0] sm:$0xff] }
 0x231   :  { %1202 = vmatpush2.msra.mxu0 %v895_v60  ;;  %1273 = vmatpush2.msra.mxu1 %v897_v61  ;;  %v660_v60 = vld [vmem:[#allocation10 + $0x748] sm:$0xff]  ;;  %v662_v61 = vld [vmem:[#allocation10 + $0x758] sm:$0xff] }
 0x232   :  { %1203 = vmatprep.subr.mxu0 %v880_v62  ;;  %1274 = vmatprep.subr.mxu1 %v882_v63  ;;  %v659_v62 = vld [vmem:[#allocation10 + $0x740] sm:$0xff]  ;;  %v661_v63 = vld [vmem:[#allocation10 + $0x750] sm:$0xff] }
 0x233   :  { %1204 = vmatpush2.msra.mxu0 %v879_v1  ;;  %1275 = vmatpush2.msra.mxu1 %v881_v2  ;;  %v644_v1 = vld [vmem:[#allocation10 + $0x6c8] sm:$0xff]  ;;  %v646_v2 = vld [vmem:[#allocation10 + $0x6d8] sm:$0xff] }
 0x234   :  { %1205 = vmatprep.subr.mxu0 %v864_v3  ;;  %1276 = vmatprep.subr.mxu1 %v866_v4  ;;  %v643_v3 = vld [vmem:[#allocation10 + $0x6c0] sm:$0xff]  ;;  %v645_v4 = vld [vmem:[#allocation10 + $0x6d0] sm:$0xff] }
 0x235   :  { %1206 = vmatpush2.msra.mxu0 %v863_v5  ;;  %1277 = vmatpush2.msra.mxu1 %v865_v6  ;;  %v628_v5 = vld [vmem:[#allocation10 + $0x648] sm:$0xff]  ;;  %v630_v6 = vld [vmem:[#allocation10 + $0x658] sm:$0xff] }
 0x236   :  { %1207 = vmatprep.subr.mxu0 %v848_v7  ;;  %1278 = vmatprep.subr.mxu1 %v850_v8  ;;  %v627_v7 = vld [vmem:[#allocation10 + $0x640] sm:$0xff]  ;;  %v629_v8 = vld [vmem:[#allocation10 + $0x650] sm:$0xff] }
 0x237   :  { %1208 = vmatpush2.msra.mxu0 %v847_v9  ;;  %1279 = vmatpush2.msra.mxu1 %v849_v10  ;;  %v612_v9 = vld [vmem:[#allocation10 + $0x5c8] sm:$0xff]  ;;  %v614_v10 = vld [vmem:[#allocation10 + $0x5d8] sm:$0xff] }
 0x238   :  { %1209 = vmatprep.subr.mxu0 %v832_v11  ;;  %1280 = vmatprep.subr.mxu1 %v834_v12  ;;  %v611_v11 = vld [vmem:[#allocation10 + $0x5c0] sm:$0xff]  ;;  %v613_v12 = vld [vmem:[#allocation10 + $0x5d0] sm:$0xff] }
 0x239   :  { %1210 = vmatpush2.msra.mxu0 %v831_v13  ;;  %1281 = vmatpush2.msra.mxu1 %v833_v14  ;;  %v596_v13 = vld [vmem:[#allocation10 + $0x548] sm:$0xff]  ;;  %v598_v14 = vld [vmem:[#allocation10 + $0x558] sm:$0xff] }
 0x23a   :  { %1211 = vmatprep.subr.mxu0 %v816_v15  ;;  %1282 = vmatprep.subr.mxu1 %v818_v16  ;;  %v595_v15 = vld [vmem:[#allocation10 + $0x540] sm:$0xff]  ;;  %v597_v16 = vld [vmem:[#allocation10 + $0x550] sm:$0xff] }
 0x23b   :  { %1212 = vmatpush2.msra.mxu0 %v815_v17  ;;  %1283 = vmatpush2.msra.mxu1 %v817_v18  ;;  %v580_v17 = vld [vmem:[#allocation10 + $0x4c8] sm:$0xff]  ;;  %v582_v18 = vld [vmem:[#allocation10 + $0x4d8] sm:$0xff] }
 0x23c   :  { %1213 = vmatprep.subr.mxu0 %v800_v19  ;;  %1284 = vmatprep.subr.mxu1 %v802_v20  ;;  %v579_v19 = vld [vmem:[#allocation10 + $0x4c0] sm:$0xff]  ;;  %v581_v20 = vld [vmem:[#allocation10 + $0x4d0] sm:$0xff] }
 0x23d   :  { %1214 = vmatpush2.msra.mxu0 %v799_v21  ;;  %1285 = vmatpush2.msra.mxu1 %v801_v22  ;;  %v564_v21 = vld [vmem:[#allocation10 + $0x448] sm:$0xff]  ;;  %v566_v22 = vld [vmem:[#allocation10 + $0x458] sm:$0xff] }
 0x23e   :  { %1215 = vmatprep.subr.mxu0 %v784_v23  ;;  %1286 = vmatprep.subr.mxu1 %v786_v24  ;;  %v563_v23 = vld [vmem:[#allocation10 + $0x440] sm:$0xff]  ;;  %v565_v24 = vld [vmem:[#allocation10 + $0x450] sm:$0xff] }
 0x23f   :  { %1216 = vmatpush2.msra.mxu0 %v783_v25  ;;  %1287 = vmatpush2.msra.mxu1 %v785_v26  ;;  %v548_v25 = vld [vmem:[#allocation10 + $0x3c8] sm:$0xff]  ;;  %v550_v26 = vld [vmem:[#allocation10 + $0x3d8] sm:$0xff] }
 0x240   :  { %1217 = vmatprep.subr.mxu0 %v768_v27  ;;  %1288 = vmatprep.subr.mxu1 %v770_v28  ;;  %v547_v27 = vld [vmem:[#allocation10 + $0x3c0] sm:$0xff]  ;;  %v549_v28 = vld [vmem:[#allocation10 + $0x3d0] sm:$0xff] }
 0x241   :  { %1218 = vmatpush2.msra.mxu0 %v767_v29  ;;  %1289 = vmatpush2.msra.mxu1 %v769_v30  ;;  %v532_v29 = vld [vmem:[#allocation10 + $0x348] sm:$0xff]  ;;  %v534_v30 = vld [vmem:[#allocation10 + $0x358] sm:$0xff] }
 0x242   :  { %1219 = vmatprep.subr.mxu0 %v752_v31  ;;  %1290 = vmatprep.subr.mxu1 %v754_v32  ;;  %v531_v31 = vld [vmem:[#allocation10 + $0x340] sm:$0xff]  ;;  %v533_v32 = vld [vmem:[#allocation10 + $0x350] sm:$0xff] }
 0x243   :  { %1220 = vmatpush2.msra.mxu0 %v751_v35  ;;  %1291 = vmatpush2.msra.mxu1 %v753_v37  ;;  %v516_v35 = vld [vmem:[#allocation10 + $0x2c8] sm:$0xff]  ;;  %v518_v37 = vld [vmem:[#allocation10 + $0x2d8] sm:$0xff] }
 0x244   :  { %1221 = vmatprep.subr.mxu0 %v736_v38  ;;  %1292 = vmatprep.subr.mxu1 %v738_v39  ;;  %v515_v38 = vld [vmem:[#allocation10 + $0x2c0] sm:$0xff]  ;;  %v517_v39 = vld [vmem:[#allocation10 + $0x2d0] sm:$0xff] }
 0x245   :  { %1222 = vmatpush2.msra.mxu0 %v735_v40  ;;  %1293 = vmatpush2.msra.mxu1 %v737_v41  ;;  %v500_v40 = vld [vmem:[#allocation10 + $0x248] sm:$0xff]  ;;  %v502_v41 = vld [vmem:[#allocation10 + $0x258] sm:$0xff] }
 0x246   :  { %1223 = vmatprep.subr.mxu0 %v720_v42  ;;  %1294 = vmatprep.subr.mxu1 %v722_v43  ;;  %v499_v42 = vld [vmem:[#allocation10 + $0x240] sm:$0xff]  ;;  %v501_v43 = vld [vmem:[#allocation10 + $0x250] sm:$0xff] }
 0x247   :  { %1224 = vmatpush2.msra.mxu0 %v719_v46  ;;  %1295 = vmatpush2.msra.mxu1 %v721_v47  ;;  %v484_v46 = vld [vmem:[#allocation10 + $0x1c8] sm:$0xff]  ;;  %v486_v47 = vld [vmem:[#allocation10 + $0x1d8] sm:$0xff] }
 0x248   :  { %1225 = vmatprep.subr.mxu0 %v704_v48  ;;  %1296 = vmatprep.subr.mxu1 %v706_v49  ;;  %v483_v48 = vld [vmem:[#allocation10 + $0x1c0] sm:$0xff]  ;;  %v485_v49 = vld [vmem:[#allocation10 + $0x1d0] sm:$0xff] }
 0x249   :  { %1226 = vmatpush2.msra.mxu0 %v703_v50  ;;  %1297 = vmatpush2.msra.mxu1 %v705_v51  ;;  %v468_v50 = vld [vmem:[#allocation10 + $0x148] sm:$0xff]  ;;  %v470_v51 = vld [vmem:[#allocation10 + $0x158] sm:$0xff] }
 0x24a   :  { %1227 = vmatprep.subr.mxu0 %v688_v52  ;;  %1298 = vmatprep.subr.mxu1 %v690_v53  ;;  %v467_v52 = vld [vmem:[#allocation10 + $0x140] sm:$0xff]  ;;  %v469_v53 = vld [vmem:[#allocation10 + $0x150] sm:$0xff] }
 0x24b   :  { %1228 = vmatpush2.msra.mxu0 %v687_v54  ;;  %1299 = vmatpush2.msra.mxu1 %v689_v55  ;;  %v452_v54 = vld [vmem:[#allocation10 + $0xc8] sm:$0xff]  ;;  %v454_v55 = vld [vmem:[#allocation10 + $0xd8] sm:$0xff] }
 0x24c   :  { %1230 = vmatmul.mubr.f32.vlgmr.msra.gmra.mxu0 %v7093_v45  ;;  %1301 = vmatmul.mubr.f32.vlgmr.msra.gmra.mxu1 %v7093_v45 }
 0x24d   :  { %1307 = vmatprep.subr.mxu0 %v676_v56  ;;  %1378 = vmatprep.subr.mxu1 %v678_v57  ;;  %v451_v56 = vld [vmem:[#allocation10 + $0xc0] sm:$0xff]  ;;  %v453_v57 = vld [vmem:[#allocation10 + $0xd0] sm:$0xff] }
 0x24e   :  { %1308 = vmatpush1.msra.mxu0 %v675_v58  ;;  %1371 = vmatprep.mubr.f32.mxu0 %v7091_v44  ;;  %v436_v58 = vld [vmem:[#allocation10 + $0x48] sm:$0xff] }
 0x24f   :  { %1379 = vmatpush1.msra.mxu1 %v677_v59  ;;  %1442 = vmatprep.mubr.f32.mxu1 %v7091_v44  ;;  %v438_v59 = vld [vmem:[#allocation10 + $0x58] sm:$0xff] }
 0x250   :  { %1309 = vmatprep.subr.mxu0 %v660_v60  ;;  %1380 = vmatprep.subr.mxu1 %v662_v61  ;;  %v435_v60 = vld [vmem:[#allocation10 + $0x40] sm:$0xff]  ;;  %v437_v61 = vld [vmem:[#allocation10 + $0x50] sm:$0xff] }
 0x251   :  { %1310 = vmatpush1.msra.mxu0 %v659_v62  ;;  %1381 = vmatpush1.msra.mxu1 %v661_v63  ;;  %v932_v62 = vld [vmem:[#allocation10 + $0xfc8] sm:$0xff]  ;;  %v934_v63 = vld [vmem:[#allocation10 + $0xfd8] sm:$0xff] }
 0x252   :  { %1311 = vmatprep.subr.mxu0 %v644_v1  ;;  %1382 = vmatprep.subr.mxu1 %v646_v2  ;;  %v931_v1 = vld [vmem:[#allocation10 + $0xfc0] sm:$0xff]  ;;  %v933_v2 = vld [vmem:[#allocation10 + $0xfd0] sm:$0xff] }
 0x253   :  { %1312 = vmatpush1.msra.mxu0 %v643_v3  ;;  %1383 = vmatpush1.msra.mxu1 %v645_v4  ;;  %v916_v3 = vld [vmem:[#allocation10 + $0xf48] sm:$0xff]  ;;  %v918_v4 = vld [vmem:[#allocation10 + $0xf58] sm:$0xff] }
 0x254   :  { %1313 = vmatprep.subr.mxu0 %v628_v5  ;;  %1384 = vmatprep.subr.mxu1 %v630_v6  ;;  %v915_v5 = vld [vmem:[#allocation10 + $0xf40] sm:$0xff]  ;;  %v917_v6 = vld [vmem:[#allocation10 + $0xf50] sm:$0xff] }
 0x255   :  { %1314 = vmatpush1.msra.mxu0 %v627_v7  ;;  %1385 = vmatpush1.msra.mxu1 %v629_v8  ;;  %v900_v7 = vld [vmem:[#allocation10 + $0xec8] sm:$0xff]  ;;  %v902_v8 = vld [vmem:[#allocation10 + $0xed8] sm:$0xff] }
 0x256   :  { %1315 = vmatprep.subr.mxu0 %v612_v9  ;;  %1386 = vmatprep.subr.mxu1 %v614_v10  ;;  %v899_v9 = vld [vmem:[#allocation10 + $0xec0] sm:$0xff]  ;;  %v901_v10 = vld [vmem:[#allocation10 + $0xed0] sm:$0xff] }
 0x257   :  { %1316 = vmatpush1.msra.mxu0 %v611_v11  ;;  %1387 = vmatpush1.msra.mxu1 %v613_v12  ;;  %v884_v11 = vld [vmem:[#allocation10 + $0xe48] sm:$0xff]  ;;  %v886_v12 = vld [vmem:[#allocation10 + $0xe58] sm:$0xff] }
 0x258   :  { %1317 = vmatprep.subr.mxu0 %v596_v13  ;;  %1388 = vmatprep.subr.mxu1 %v598_v14  ;;  %v883_v13 = vld [vmem:[#allocation10 + $0xe40] sm:$0xff]  ;;  %v885_v14 = vld [vmem:[#allocation10 + $0xe50] sm:$0xff] }
 0x259   :  { %1318 = vmatpush1.msra.mxu0 %v595_v15  ;;  %1389 = vmatpush1.msra.mxu1 %v597_v16  ;;  %v868_v15 = vld [vmem:[#allocation10 + $0xdc8] sm:$0xff]  ;;  %v870_v16 = vld [vmem:[#allocation10 + $0xdd8] sm:$0xff] }
 0x25a   :  { %1319 = vmatprep.subr.mxu0 %v580_v17  ;;  %1390 = vmatprep.subr.mxu1 %v582_v18  ;;  %v867_v17 = vld [vmem:[#allocation10 + $0xdc0] sm:$0xff]  ;;  %v869_v18 = vld [vmem:[#allocation10 + $0xdd0] sm:$0xff] }
 0x25b   :  { %1320 = vmatpush1.msra.mxu0 %v579_v19  ;;  %1391 = vmatpush1.msra.mxu1 %v581_v20  ;;  %v852_v19 = vld [vmem:[#allocation10 + $0xd48] sm:$0xff]  ;;  %v854_v20 = vld [vmem:[#allocation10 + $0xd58] sm:$0xff] }
 0x25c   :  { %1321 = vmatprep.subr.mxu0 %v564_v21  ;;  %1392 = vmatprep.subr.mxu1 %v566_v22  ;;  %v851_v21 = vld [vmem:[#allocation10 + $0xd40] sm:$0xff]  ;;  %v853_v22 = vld [vmem:[#allocation10 + $0xd50] sm:$0xff] }
 0x25d   :  { %1322 = vmatpush1.msra.mxu0 %v563_v23  ;;  %1393 = vmatpush1.msra.mxu1 %v565_v24  ;;  %v836_v23 = vld [vmem:[#allocation10 + $0xcc8] sm:$0xff]  ;;  %v838_v24 = vld [vmem:[#allocation10 + $0xcd8] sm:$0xff] }
 0x25e   :  { %1323 = vmatprep.subr.mxu0 %v548_v25  ;;  %1394 = vmatprep.subr.mxu1 %v550_v26  ;;  %v835_v25 = vld [vmem:[#allocation10 + $0xcc0] sm:$0xff]  ;;  %v837_v26 = vld [vmem:[#allocation10 + $0xcd0] sm:$0xff] }
 0x25f   :  { %1324 = vmatpush1.msra.mxu0 %v547_v27  ;;  %1395 = vmatpush1.msra.mxu1 %v549_v28  ;;  %v820_v27 = vld [vmem:[#allocation10 + $0xc48] sm:$0xff]  ;;  %v822_v28 = vld [vmem:[#allocation10 + $0xc58] sm:$0xff] }
 0x260   :  { %1325 = vmatprep.subr.mxu0 %v532_v29  ;;  %1396 = vmatprep.subr.mxu1 %v534_v30  ;;  %v819_v29 = vld [vmem:[#allocation10 + $0xc40] sm:$0xff]  ;;  %v821_v30 = vld [vmem:[#allocation10 + $0xc50] sm:$0xff] }
 0x261   :  { %1326 = vmatpush1.msra.mxu0 %v531_v31  ;;  %1397 = vmatpush1.msra.mxu1 %v533_v32  ;;  %v804_v31 = vld [vmem:[#allocation10 + $0xbc8] sm:$0xff]  ;;  %v806_v32 = vld [vmem:[#allocation10 + $0xbd8] sm:$0xff] }
 0x262   :  { %1327 = vmatprep.subr.mxu0 %v516_v35  ;;  %1398 = vmatprep.subr.mxu1 %v518_v37  ;;  %v803_v35 = vld [vmem:[#allocation10 + $0xbc0] sm:$0xff]  ;;  %v805_v37 = vld [vmem:[#allocation10 + $0xbd0] sm:$0xff] }
 0x263   :  { %1328 = vmatpush1.msra.mxu0 %v515_v38  ;;  %1399 = vmatpush1.msra.mxu1 %v517_v39  ;;  %v788_v38 = vld [vmem:[#allocation10 + $0xb48] sm:$0xff]  ;;  %v790_v39 = vld [vmem:[#allocation10 + $0xb58] sm:$0xff] }
 0x264   :  { %1329 = vmatprep.subr.mxu0 %v500_v40  ;;  %1400 = vmatprep.subr.mxu1 %v502_v41  ;;  %v787_v40 = vld [vmem:[#allocation10 + $0xb40] sm:$0xff]  ;;  %v789_v41 = vld [vmem:[#allocation10 + $0xb50] sm:$0xff] }
 0x265   :  { %1330 = vmatpush1.msra.mxu0 %v499_v42  ;;  %1401 = vmatpush1.msra.mxu1 %v501_v43  ;;  %v772_v42 = vld [vmem:[#allocation10 + $0xac8] sm:$0xff]  ;;  %v774_v43 = vld [vmem:[#allocation10 + $0xad8] sm:$0xff] }
 0x266   :  { %1331 = vmatprep.subr.mxu0 %v484_v46  ;;  %1402 = vmatprep.subr.mxu1 %v486_v47  ;;  %v771_v46 = vld [vmem:[#allocation10 + $0xac0] sm:$0xff]  ;;  %v773_v47 = vld [vmem:[#allocation10 + $0xad0] sm:$0xff] }
 0x267   :  { %1332 = vmatpush1.msra.mxu0 %v483_v48  ;;  %1403 = vmatpush1.msra.mxu1 %v485_v49  ;;  %v756_v48 = vld [vmem:[#allocation10 + $0xa48] sm:$0xff]  ;;  %v758_v49 = vld [vmem:[#allocation10 + $0xa58] sm:$0xff] }
 0x268   :  { %1333 = vmatprep.subr.mxu0 %v468_v50  ;;  %1404 = vmatprep.subr.mxu1 %v470_v51  ;;  %v755_v50 = vld [vmem:[#allocation10 + $0xa40] sm:$0xff]  ;;  %v757_v51 = vld [vmem:[#allocation10 + $0xa50] sm:$0xff] }
 0x269   :  { %1334 = vmatpush1.msra.mxu0 %v467_v52  ;;  %1405 = vmatpush1.msra.mxu1 %v469_v53  ;;  %v740_v52 = vld [vmem:[#allocation10 + $0x9c8] sm:$0xff]  ;;  %v742_v53 = vld [vmem:[#allocation10 + $0x9d8] sm:$0xff] }
 0x26a   :  { %1335 = vmatprep.subr.mxu0 %v452_v54  ;;  %1406 = vmatprep.subr.mxu1 %v454_v55  ;;  %v739_v54 = vld [vmem:[#allocation10 + $0x9c0] sm:$0xff]  ;;  %v741_v55 = vld [vmem:[#allocation10 + $0x9d0] sm:$0xff] }
 0x26b   :  { %1336 = vmatpush1.msra.mxu0 %v451_v56  ;;  %1407 = vmatpush1.msra.mxu1 %v453_v57  ;;  %v724_v56 = vld [vmem:[#allocation10 + $0x948] sm:$0xff]  ;;  %v726_v57 = vld [vmem:[#allocation10 + $0x958] sm:$0xff] }
 0x26c   :  { %1337 = vmatprep.subr.mxu0 %v436_v58  ;;  %1408 = vmatprep.subr.mxu1 %v438_v59  ;;  %v723_v58 = vld [vmem:[#allocation10 + $0x940] sm:$0xff]  ;;  %v725_v59 = vld [vmem:[#allocation10 + $0x950] sm:$0xff] }
 0x26d   :  { %1338 = vmatpush1.msra.mxu0 %v435_v60  ;;  %1409 = vmatpush1.msra.mxu1 %v437_v61  ;;  %v708_v60 = vld [vmem:[#allocation10 + $0x8c8] sm:$0xff]  ;;  %v710_v61 = vld [vmem:[#allocation10 + $0x8d8] sm:$0xff] }
 0x26e   :  { %1339 = vmatprep.subr.mxu0 %v932_v62  ;;  %1410 = vmatprep.subr.mxu1 %v934_v63  ;;  %v707_v62 = vld [vmem:[#allocation10 + $0x8c0] sm:$0xff]  ;;  %v709_v63 = vld [vmem:[#allocation10 + $0x8d0] sm:$0xff] }
 0x26f   :  { %1340 = vmatpush2.msra.mxu0 %v931_v1  ;;  %1411 = vmatpush2.msra.mxu1 %v933_v2  ;;  %v692_v1 = vld [vmem:[#allocation10 + $0x848] sm:$0xff]  ;;  %v694_v2 = vld [vmem:[#allocation10 + $0x858] sm:$0xff] }
 0x270   :  { %1341 = vmatprep.subr.mxu0 %v916_v3  ;;  %1412 = vmatprep.subr.mxu1 %v918_v4  ;;  %v691_v3 = vld [vmem:[#allocation10 + $0x840] sm:$0xff]  ;;  %v693_v4 = vld [vmem:[#allocation10 + $0x850] sm:$0xff] }
 0x271   :  { %1342 = vmatpush2.msra.mxu0 %v915_v5  ;;  %1413 = vmatpush2.msra.mxu1 %v917_v6  ;;  %v680_v5 = vld [vmem:[#allocation10 + $0x7e8] sm:$0xff]  ;;  %v682_v6 = vld [vmem:[#allocation10 + $0x7f8] sm:$0xff] }
 0x272   :  { %1343 = vmatprep.subr.mxu0 %v900_v7  ;;  %1414 = vmatprep.subr.mxu1 %v902_v8  ;;  %v679_v7 = vld [vmem:[#allocation10 + $0x7e0] sm:$0xff]  ;;  %v681_v8 = vld [vmem:[#allocation10 + $0x7f0] sm:$0xff] }
 0x273   :  { %1344 = vmatpush2.msra.mxu0 %v899_v9  ;;  %1415 = vmatpush2.msra.mxu1 %v901_v10  ;;  %v664_v9 = vld [vmem:[#allocation10 + $0x768] sm:$0xff]  ;;  %v666_v10 = vld [vmem:[#allocation10 + $0x778] sm:$0xff] }
 0x274   :  { %1345 = vmatprep.subr.mxu0 %v884_v11  ;;  %1416 = vmatprep.subr.mxu1 %v886_v12  ;;  %v663_v11 = vld [vmem:[#allocation10 + $0x760] sm:$0xff]  ;;  %v665_v12 = vld [vmem:[#allocation10 + $0x770] sm:$0xff] }
 0x275   :  { %1346 = vmatpush2.msra.mxu0 %v883_v13  ;;  %1417 = vmatpush2.msra.mxu1 %v885_v14  ;;  %v648_v13 = vld [vmem:[#allocation10 + $0x6e8] sm:$0xff]  ;;  %v650_v14 = vld [vmem:[#allocation10 + $0x6f8] sm:$0xff] }
 0x276   :  { %1347 = vmatprep.subr.mxu0 %v868_v15  ;;  %1418 = vmatprep.subr.mxu1 %v870_v16  ;;  %v647_v15 = vld [vmem:[#allocation10 + $0x6e0] sm:$0xff]  ;;  %v649_v16 = vld [vmem:[#allocation10 + $0x6f0] sm:$0xff] }
 0x277   :  { %1348 = vmatpush2.msra.mxu0 %v867_v17  ;;  %1419 = vmatpush2.msra.mxu1 %v869_v18  ;;  %v632_v17 = vld [vmem:[#allocation10 + $0x668] sm:$0xff]  ;;  %v634_v18 = vld [vmem:[#allocation10 + $0x678] sm:$0xff] }
 0x278   :  { %1349 = vmatprep.subr.mxu0 %v852_v19  ;;  %1420 = vmatprep.subr.mxu1 %v854_v20  ;;  %v631_v19 = vld [vmem:[#allocation10 + $0x660] sm:$0xff]  ;;  %v633_v20 = vld [vmem:[#allocation10 + $0x670] sm:$0xff] }
 0x279   :  { %1350 = vmatpush2.msra.mxu0 %v851_v21  ;;  %1421 = vmatpush2.msra.mxu1 %v853_v22  ;;  %v616_v21 = vld [vmem:[#allocation10 + $0x5e8] sm:$0xff]  ;;  %v618_v22 = vld [vmem:[#allocation10 + $0x5f8] sm:$0xff] }
 0x27a   :  { %1351 = vmatprep.subr.mxu0 %v836_v23  ;;  %1422 = vmatprep.subr.mxu1 %v838_v24  ;;  %v615_v23 = vld [vmem:[#allocation10 + $0x5e0] sm:$0xff]  ;;  %v617_v24 = vld [vmem:[#allocation10 + $0x5f0] sm:$0xff] }
 0x27b   :  { %1352 = vmatpush2.msra.mxu0 %v835_v25  ;;  %1423 = vmatpush2.msra.mxu1 %v837_v26  ;;  %v600_v25 = vld [vmem:[#allocation10 + $0x568] sm:$0xff]  ;;  %v602_v26 = vld [vmem:[#allocation10 + $0x578] sm:$0xff] }
 0x27c   :  { %1353 = vmatprep.subr.mxu0 %v820_v27  ;;  %1424 = vmatprep.subr.mxu1 %v822_v28  ;;  %v599_v27 = vld [vmem:[#allocation10 + $0x560] sm:$0xff]  ;;  %v601_v28 = vld [vmem:[#allocation10 + $0x570] sm:$0xff] }
 0x27d   :  { %1354 = vmatpush2.msra.mxu0 %v819_v29  ;;  %1425 = vmatpush2.msra.mxu1 %v821_v30  ;;  %v584_v29 = vld [vmem:[#allocation10 + $0x4e8] sm:$0xff]  ;;  %v586_v30 = vld [vmem:[#allocation10 + $0x4f8] sm:$0xff] }
 0x27e   :  { %1355 = vmatprep.subr.mxu0 %v804_v31  ;;  %1426 = vmatprep.subr.mxu1 %v806_v32  ;;  %v583_v31 = vld [vmem:[#allocation10 + $0x4e0] sm:$0xff]  ;;  %v585_v32 = vld [vmem:[#allocation10 + $0x4f0] sm:$0xff] }
 0x27f   :  { %1356 = vmatpush2.msra.mxu0 %v803_v35  ;;  %1427 = vmatpush2.msra.mxu1 %v805_v37  ;;  %v568_v35 = vld [vmem:[#allocation10 + $0x468] sm:$0xff]  ;;  %v570_v37 = vld [vmem:[#allocation10 + $0x478] sm:$0xff] }
 0x280   :  { %1357 = vmatprep.subr.mxu0 %v788_v38  ;;  %1428 = vmatprep.subr.mxu1 %v790_v39  ;;  %v567_v38 = vld [vmem:[#allocation10 + $0x460] sm:$0xff]  ;;  %v569_v39 = vld [vmem:[#allocation10 + $0x470] sm:$0xff] }
 0x281   :  { %1358 = vmatpush2.msra.mxu0 %v787_v40  ;;  %1429 = vmatpush2.msra.mxu1 %v789_v41  ;;  %v552_v40 = vld [vmem:[#allocation10 + $0x3e8] sm:$0xff]  ;;  %v554_v41 = vld [vmem:[#allocation10 + $0x3f8] sm:$0xff] }
 0x282   :  { %1359 = vmatprep.subr.mxu0 %v772_v42  ;;  %1430 = vmatprep.subr.mxu1 %v774_v43  ;;  %v551_v42 = vld [vmem:[#allocation10 + $0x3e0] sm:$0xff]  ;;  %v553_v43 = vld [vmem:[#allocation10 + $0x3f0] sm:$0xff] }
 0x283   :  { %1360 = vmatpush2.msra.mxu0 %v771_v46  ;;  %1431 = vmatpush2.msra.mxu1 %v773_v47  ;;  %v536_v46 = vld [vmem:[#allocation10 + $0x368] sm:$0xff]  ;;  %v538_v47 = vld [vmem:[#allocation10 + $0x378] sm:$0xff] }
 0x284   :  { %1361 = vmatprep.subr.mxu0 %v756_v48  ;;  %1432 = vmatprep.subr.mxu1 %v758_v49  ;;  %v535_v48 = vld [vmem:[#allocation10 + $0x360] sm:$0xff]  ;;  %v537_v49 = vld [vmem:[#allocation10 + $0x370] sm:$0xff] }
 0x285   :  { %1362 = vmatpush2.msra.mxu0 %v755_v50  ;;  %1433 = vmatpush2.msra.mxu1 %v757_v51  ;;  %v520_v50 = vld [vmem:[#allocation10 + $0x2e8] sm:$0xff]  ;;  %v522_v51 = vld [vmem:[#allocation10 + $0x2f8] sm:$0xff] }
 0x286   :  { %1363 = vmatprep.subr.mxu0 %v740_v52  ;;  %1434 = vmatprep.subr.mxu1 %v742_v53  ;;  %v519_v52 = vld [vmem:[#allocation10 + $0x2e0] sm:$0xff]  ;;  %v521_v53 = vld [vmem:[#allocation10 + $0x2f0] sm:$0xff] }
 0x287   :  { %1364 = vmatpush2.msra.mxu0 %v739_v54  ;;  %1435 = vmatpush2.msra.mxu1 %v741_v55  ;;  %v504_v54 = vld [vmem:[#allocation10 + $0x268] sm:$0xff]  ;;  %v506_v55 = vld [vmem:[#allocation10 + $0x278] sm:$0xff] }
 0x288   :  { %1365 = vmatprep.subr.mxu0 %v724_v56  ;;  %1436 = vmatprep.subr.mxu1 %v726_v57  ;;  %v503_v56 = vld [vmem:[#allocation10 + $0x260] sm:$0xff]  ;;  %v505_v57 = vld [vmem:[#allocation10 + $0x270] sm:$0xff] }
 0x289   :  { %1366 = vmatpush2.msra.mxu0 %v723_v58  ;;  %1437 = vmatpush2.msra.mxu1 %v725_v59  ;;  %v488_v58 = vld [vmem:[#allocation10 + $0x1e8] sm:$0xff]  ;;  %v490_v59 = vld [vmem:[#allocation10 + $0x1f8] sm:$0xff] }
 0x28a   :  { %1367 = vmatprep.subr.mxu0 %v708_v60  ;;  %1438 = vmatprep.subr.mxu1 %v710_v61  ;;  %v487_v60 = vld [vmem:[#allocation10 + $0x1e0] sm:$0xff]  ;;  %v489_v61 = vld [vmem:[#allocation10 + $0x1f0] sm:$0xff] }
 0x28b   :  { %1368 = vmatpush2.msra.mxu0 %v707_v62  ;;  %1439 = vmatpush2.msra.mxu1 %v709_v63  ;;  %v472_v62 = vld [vmem:[#allocation10 + $0x168] sm:$0xff]  ;;  %v474_v63 = vld [vmem:[#allocation10 + $0x178] sm:$0xff] }
 0x28c   :  { %1369 = vmatprep.subr.mxu0 %v692_v1  ;;  %1440 = vmatprep.subr.mxu1 %v694_v2  ;;  %v471_v1 = vld [vmem:[#allocation10 + $0x160] sm:$0xff]  ;;  %v473_v2 = vld [vmem:[#allocation10 + $0x170] sm:$0xff] }
 0x28d   :  { %1370 = vmatpush2.msra.mxu0 %v691_v3  ;;  %1441 = vmatpush2.msra.mxu1 %v693_v4  ;;  %v456_v3 = vld [vmem:[#allocation10 + $0xe8] sm:$0xff]  ;;  %v458_v4 = vld [vmem:[#allocation10 + $0xf8] sm:$0xff] }
 0x28e   :  { %1372 = vmatmul.mubr.f32.vlgmr.msra.gmra.mxu0 %v7093_v45  ;;  %1443 = vmatmul.mubr.f32.vlgmr.msra.gmra.mxu1 %v7093_v45 }
 0x28f   :  { %1449 = vmatprep.subr.mxu0 %v680_v5  ;;  %1520 = vmatprep.subr.mxu1 %v682_v6  ;;  %v455_v5 = vld [vmem:[#allocation10 + $0xe0] sm:$0xff]  ;;  %v457_v6 = vld [vmem:[#allocation10 + $0xf0] sm:$0xff] }
 0x290   :  { %1450 = vmatpush1.msra.mxu0 %v679_v7  ;;  %1513 = vmatprep.mubr.f32.mxu0 %v7091_v44  ;;  %v440_v7 = vld [vmem:[#allocation10 + $0x68] sm:$0xff] }
 0x291   :  { %1521 = vmatpush1.msra.mxu1 %v681_v8  ;;  %1584 = vmatprep.mubr.f32.mxu1 %v7091_v44  ;;  %v442_v8 = vld [vmem:[#allocation10 + $0x78] sm:$0xff] }
 0x292   :  { %1451 = vmatprep.subr.mxu0 %v664_v9  ;;  %1522 = vmatprep.subr.mxu1 %v666_v10  ;;  %v439_v9 = vld [vmem:[#allocation10 + $0x60] sm:$0xff]  ;;  %v441_v10 = vld [vmem:[#allocation10 + $0x70] sm:$0xff] }
 0x293   :  { %1452 = vmatpush1.msra.mxu0 %v663_v11  ;;  %1523 = vmatpush1.msra.mxu1 %v665_v12  ;;  %v936_v11 = vld [vmem:[#allocation10 + $0xfe8] sm:$0xff]  ;;  %v938_v12 = vld [vmem:[#allocation10 + $0xff8] sm:$0xff] }
 0x294   :  { %1453 = vmatprep.subr.mxu0 %v648_v13  ;;  %1524 = vmatprep.subr.mxu1 %v650_v14  ;;  %v935_v13 = vld [vmem:[#allocation10 + $0xfe0] sm:$0xff]  ;;  %v937_v14 = vld [vmem:[#allocation10 + $0xff0] sm:$0xff] }
 0x295   :  { %1454 = vmatpush1.msra.mxu0 %v647_v15  ;;  %1525 = vmatpush1.msra.mxu1 %v649_v16  ;;  %v920_v15 = vld [vmem:[#allocation10 + $0xf68] sm:$0xff]  ;;  %v922_v16 = vld [vmem:[#allocation10 + $0xf78] sm:$0xff] }
 0x296   :  { %1455 = vmatprep.subr.mxu0 %v632_v17  ;;  %1526 = vmatprep.subr.mxu1 %v634_v18  ;;  %v919_v17 = vld [vmem:[#allocation10 + $0xf60] sm:$0xff]  ;;  %v921_v18 = vld [vmem:[#allocation10 + $0xf70] sm:$0xff] }
 0x297   :  { %1456 = vmatpush1.msra.mxu0 %v631_v19  ;;  %1527 = vmatpush1.msra.mxu1 %v633_v20  ;;  %v904_v19 = vld [vmem:[#allocation10 + $0xee8] sm:$0xff]  ;;  %v906_v20 = vld [vmem:[#allocation10 + $0xef8] sm:$0xff] }
 0x298   :  { %1457 = vmatprep.subr.mxu0 %v616_v21  ;;  %1528 = vmatprep.subr.mxu1 %v618_v22  ;;  %v903_v21 = vld [vmem:[#allocation10 + $0xee0] sm:$0xff]  ;;  %v905_v22 = vld [vmem:[#allocation10 + $0xef0] sm:$0xff] }
 0x299   :  { %1458 = vmatpush1.msra.mxu0 %v615_v23  ;;  %1529 = vmatpush1.msra.mxu1 %v617_v24  ;;  %v888_v23 = vld [vmem:[#allocation10 + $0xe68] sm:$0xff]  ;;  %v890_v24 = vld [vmem:[#allocation10 + $0xe78] sm:$0xff] }
 0x29a   :  { %1459 = vmatprep.subr.mxu0 %v600_v25  ;;  %1530 = vmatprep.subr.mxu1 %v602_v26  ;;  %v887_v25 = vld [vmem:[#allocation10 + $0xe60] sm:$0xff]  ;;  %v889_v26 = vld [vmem:[#allocation10 + $0xe70] sm:$0xff] }
 0x29b   :  { %1460 = vmatpush1.msra.mxu0 %v599_v27  ;;  %1531 = vmatpush1.msra.mxu1 %v601_v28  ;;  %v872_v27 = vld [vmem:[#allocation10 + $0xde8] sm:$0xff]  ;;  %v874_v28 = vld [vmem:[#allocation10 + $0xdf8] sm:$0xff] }
 0x29c   :  { %1461 = vmatprep.subr.mxu0 %v584_v29  ;;  %1532 = vmatprep.subr.mxu1 %v586_v30  ;;  %v871_v29 = vld [vmem:[#allocation10 + $0xde0] sm:$0xff]  ;;  %v873_v30 = vld [vmem:[#allocation10 + $0xdf0] sm:$0xff] }
 0x29d   :  { %1462 = vmatpush1.msra.mxu0 %v583_v31  ;;  %1533 = vmatpush1.msra.mxu1 %v585_v32  ;;  %v856_v31 = vld [vmem:[#allocation10 + $0xd68] sm:$0xff]  ;;  %v858_v32 = vld [vmem:[#allocation10 + $0xd78] sm:$0xff] }
 0x29e   :  { %1463 = vmatprep.subr.mxu0 %v568_v35  ;;  %1534 = vmatprep.subr.mxu1 %v570_v37  ;;  %v855_v35 = vld [vmem:[#allocation10 + $0xd60] sm:$0xff]  ;;  %v857_v37 = vld [vmem:[#allocation10 + $0xd70] sm:$0xff] }
 0x29f   :  { %1464 = vmatpush1.msra.mxu0 %v567_v38  ;;  %1535 = vmatpush1.msra.mxu1 %v569_v39  ;;  %v840_v38 = vld [vmem:[#allocation10 + $0xce8] sm:$0xff]  ;;  %v842_v39 = vld [vmem:[#allocation10 + $0xcf8] sm:$0xff] }
 0x2a0   :  { %1465 = vmatprep.subr.mxu0 %v552_v40  ;;  %1536 = vmatprep.subr.mxu1 %v554_v41  ;;  %v839_v40 = vld [vmem:[#allocation10 + $0xce0] sm:$0xff]  ;;  %v841_v41 = vld [vmem:[#allocation10 + $0xcf0] sm:$0xff] }
 0x2a1   :  { %1466 = vmatpush1.msra.mxu0 %v551_v42  ;;  %1537 = vmatpush1.msra.mxu1 %v553_v43  ;;  %v824_v42 = vld [vmem:[#allocation10 + $0xc68] sm:$0xff]  ;;  %v826_v43 = vld [vmem:[#allocation10 + $0xc78] sm:$0xff] }
 0x2a2   :  { %1467 = vmatprep.subr.mxu0 %v536_v46  ;;  %1538 = vmatprep.subr.mxu1 %v538_v47  ;;  %v823_v46 = vld [vmem:[#allocation10 + $0xc60] sm:$0xff]  ;;  %v825_v47 = vld [vmem:[#allocation10 + $0xc70] sm:$0xff] }
 0x2a3   :  { %1468 = vmatpush1.msra.mxu0 %v535_v48  ;;  %1539 = vmatpush1.msra.mxu1 %v537_v49  ;;  %v808_v48 = vld [vmem:[#allocation10 + $0xbe8] sm:$0xff]  ;;  %v810_v49 = vld [vmem:[#allocation10 + $0xbf8] sm:$0xff] }
 0x2a4   :  { %1469 = vmatprep.subr.mxu0 %v520_v50  ;;  %1540 = vmatprep.subr.mxu1 %v522_v51  ;;  %v807_v50 = vld [vmem:[#allocation10 + $0xbe0] sm:$0xff]  ;;  %v809_v51 = vld [vmem:[#allocation10 + $0xbf0] sm:$0xff] }
 0x2a5   :  { %1470 = vmatpush1.msra.mxu0 %v519_v52  ;;  %1541 = vmatpush1.msra.mxu1 %v521_v53  ;;  %v792_v52 = vld [vmem:[#allocation10 + $0xb68] sm:$0xff]  ;;  %v794_v53 = vld [vmem:[#allocation10 + $0xb78] sm:$0xff] }
 0x2a6   :  { %1471 = vmatprep.subr.mxu0 %v504_v54  ;;  %1542 = vmatprep.subr.mxu1 %v506_v55  ;;  %v791_v54 = vld [vmem:[#allocation10 + $0xb60] sm:$0xff]  ;;  %v793_v55 = vld [vmem:[#allocation10 + $0xb70] sm:$0xff] }
 0x2a7   :  { %1472 = vmatpush1.msra.mxu0 %v503_v56  ;;  %1543 = vmatpush1.msra.mxu1 %v505_v57  ;;  %v776_v56 = vld [vmem:[#allocation10 + $0xae8] sm:$0xff]  ;;  %v778_v57 = vld [vmem:[#allocation10 + $0xaf8] sm:$0xff] }
 0x2a8   :  { %1473 = vmatprep.subr.mxu0 %v488_v58  ;;  %1544 = vmatprep.subr.mxu1 %v490_v59  ;;  %v775_v58 = vld [vmem:[#allocation10 + $0xae0] sm:$0xff]  ;;  %v777_v59 = vld [vmem:[#allocation10 + $0xaf0] sm:$0xff] }
 0x2a9   :  { %1474 = vmatpush1.msra.mxu0 %v487_v60  ;;  %1545 = vmatpush1.msra.mxu1 %v489_v61  ;;  %v760_v60 = vld [vmem:[#allocation10 + $0xa68] sm:$0xff]  ;;  %v762_v61 = vld [vmem:[#allocation10 + $0xa78] sm:$0xff] }
 0x2aa   :  { %1475 = vmatprep.subr.mxu0 %v472_v62  ;;  %1546 = vmatprep.subr.mxu1 %v474_v63  ;;  %v759_v62 = vld [vmem:[#allocation10 + $0xa60] sm:$0xff]  ;;  %v761_v63 = vld [vmem:[#allocation10 + $0xa70] sm:$0xff] }
 0x2ab   :  { %1476 = vmatpush1.msra.mxu0 %v471_v1  ;;  %1547 = vmatpush1.msra.mxu1 %v473_v2  ;;  %v744_v1 = vld [vmem:[#allocation10 + $0x9e8] sm:$0xff]  ;;  %v746_v2 = vld [vmem:[#allocation10 + $0x9f8] sm:$0xff] }
 0x2ac   :  { %1477 = vmatprep.subr.mxu0 %v456_v3  ;;  %1548 = vmatprep.subr.mxu1 %v458_v4  ;;  %v743_v3 = vld [vmem:[#allocation10 + $0x9e0] sm:$0xff]  ;;  %v745_v4 = vld [vmem:[#allocation10 + $0x9f0] sm:$0xff] }
 0x2ad   :  { %1478 = vmatpush1.msra.mxu0 %v455_v5  ;;  %1549 = vmatpush1.msra.mxu1 %v457_v6  ;;  %v728_v5 = vld [vmem:[#allocation10 + $0x968] sm:$0xff]  ;;  %v730_v6 = vld [vmem:[#allocation10 + $0x978] sm:$0xff] }
 0x2ae   :  { %1479 = vmatprep.subr.mxu0 %v440_v7  ;;  %1550 = vmatprep.subr.mxu1 %v442_v8  ;;  %v727_v7 = vld [vmem:[#allocation10 + $0x960] sm:$0xff]  ;;  %v729_v8 = vld [vmem:[#allocation10 + $0x970] sm:$0xff] }
 0x2af   :  { %1480 = vmatpush1.msra.mxu0 %v439_v9  ;;  %1551 = vmatpush1.msra.mxu1 %v441_v10  ;;  %v712_v9 = vld [vmem:[#allocation10 + $0x8e8] sm:$0xff]  ;;  %v714_v10 = vld [vmem:[#allocation10 + $0x8f8] sm:$0xff] }
 0x2b0   :  { %1481 = vmatprep.subr.mxu0 %v936_v11  ;;  %1552 = vmatprep.subr.mxu1 %v938_v12  ;;  %v711_v11 = vld [vmem:[#allocation10 + $0x8e0] sm:$0xff]  ;;  %v713_v12 = vld [vmem:[#allocation10 + $0x8f0] sm:$0xff] }
 0x2b1   :  { %1482 = vmatpush2.msra.mxu0 %v935_v13  ;;  %1553 = vmatpush2.msra.mxu1 %v937_v14  ;;  %v696_v13 = vld [vmem:[#allocation10 + $0x868] sm:$0xff]  ;;  %v698_v14 = vld [vmem:[#allocation10 + $0x878] sm:$0xff] }
 0x2b2   :  { %1483 = vmatprep.subr.mxu0 %v920_v15  ;;  %1554 = vmatprep.subr.mxu1 %v922_v16  ;;  %v695_v15 = vld [vmem:[#allocation10 + $0x860] sm:$0xff]  ;;  %v697_v16 = vld [vmem:[#allocation10 + $0x870] sm:$0xff] }
 0x2b3   :  { %1484 = vmatpush2.msra.mxu0 %v919_v17  ;;  %1555 = vmatpush2.msra.mxu1 %v921_v18  ;;  %v1652_v17 = vld [vmem:[%s10944_s10 + $0x1e8] sm:$0xff]  ;;  %v1654_v18 = vld [vmem:[%s10944_s10 + $0x1f8] sm:$0xff] }
 0x2b4   :  { %1485 = vmatprep.subr.mxu0 %v904_v19  ;;  %1556 = vmatprep.subr.mxu1 %v906_v20  ;;  %v1651_v19 = vld [vmem:[%s10944_s10 + $0x1e0] sm:$0xff]  ;;  %v1653_v20 = vld [vmem:[%s10944_s10 + $0x1f0] sm:$0xff] }
 0x2b5   :  { %1486 = vmatpush2.msra.mxu0 %v903_v21  ;;  %1557 = vmatpush2.msra.mxu1 %v905_v22  ;;  %v1648_v21 = vld [vmem:[%s10944_s10 + $0x1c8] sm:$0xff]  ;;  %v1650_v22 = vld [vmem:[%s10944_s10 + $0x1d8] sm:$0xff] }
 0x2b6   :  { %1487 = vmatprep.subr.mxu0 %v888_v23  ;;  %1558 = vmatprep.subr.mxu1 %v890_v24  ;;  %v1647_v23 = vld [vmem:[%s10944_s10 + $0x1c0] sm:$0xff]  ;;  %v1649_v24 = vld [vmem:[%s10944_s10 + $0x1d0] sm:$0xff] }
 0x2b7   :  { %1488 = vmatpush2.msra.mxu0 %v887_v25  ;;  %1559 = vmatpush2.msra.mxu1 %v889_v26  ;;  %v1644_v25 = vld [vmem:[%s10944_s10 + $0x1a8] sm:$0xff]  ;;  %v1646_v26 = vld [vmem:[%s10944_s10 + $0x1b8] sm:$0xff] }
 0x2b8   :  { %1489 = vmatprep.subr.mxu0 %v872_v27  ;;  %1560 = vmatprep.subr.mxu1 %v874_v28  ;;  %v1643_v27 = vld [vmem:[%s10944_s10 + $0x1a0] sm:$0xff]  ;;  %v1645_v28 = vld [vmem:[%s10944_s10 + $0x1b0] sm:$0xff] }
 0x2b9   :  { %1490 = vmatpush2.msra.mxu0 %v871_v29  ;;  %1561 = vmatpush2.msra.mxu1 %v873_v30  ;;  %v1642_v29 = vld [vmem:[%s10944_s10 + $0x198] sm:$0xff]  ;;  %v1639_v30 = vld [vmem:[%s10944_s10 + $0x180] sm:$0xff] }
 0x2ba   :  { %1491 = vmatprep.subr.mxu0 %v856_v31  ;;  %1562 = vmatprep.subr.mxu1 %v858_v32  ;;  %v1641_v31 = vld [vmem:[%s10944_s10 + $0x190] sm:$0xff]  ;;  %v1636_v32 = vld [vmem:[%s10944_s10 + $0x168] sm:$0xff] }
 0x2bb   :  { %1492 = vmatpush2.msra.mxu0 %v855_v35  ;;  %1563 = vmatpush2.msra.mxu1 %v857_v37  ;;  %v1638_v35 = vld [vmem:[%s10944_s10 + $0x178] sm:$0xff]  ;;  %v1635_v37 = vld [vmem:[%s10944_s10 + $0x160] sm:$0xff] }
 0x2bc   :  { %1493 = vmatprep.subr.mxu0 %v840_v38  ;;  %1564 = vmatprep.subr.mxu1 %v842_v39  ;;  %v1637_v38 = vld [vmem:[%s10944_s10 + $0x170] sm:$0xff]  ;;  %v1632_v39 = vld [vmem:[%s10944_s10 + $0x148] sm:$0xff] }
 0x2bd   :  { %1494 = vmatpush2.msra.mxu0 %v839_v40  ;;  %1565 = vmatpush2.msra.mxu1 %v841_v41  ;;  %v1634_v40 = vld [vmem:[%s10944_s10 + $0x158] sm:$0xff]  ;;  %v1631_v41 = vld [vmem:[%s10944_s10 + $0x140] sm:$0xff] }
 0x2be   :  { %1495 = vmatprep.subr.mxu0 %v824_v42  ;;  %1566 = vmatprep.subr.mxu1 %v826_v43  ;;  %v1633_v42 = vld [vmem:[%s10944_s10 + $0x150] sm:$0xff]  ;;  %v1628_v43 = vld [vmem:[%s10944_s10 + $0x128] sm:$0xff] }
 0x2bf   :  { %1496 = vmatpush2.msra.mxu0 %v823_v46  ;;  %1567 = vmatpush2.msra.mxu1 %v825_v47  ;;  %v1630_v46 = vld [vmem:[%s10944_s10 + $0x138] sm:$0xff]  ;;  %v1627_v47 = vld [vmem:[%s10944_s10 + $0x120] sm:$0xff] }
 0x2c0   :  { %1497 = vmatprep.subr.mxu0 %v808_v48  ;;  %1568 = vmatprep.subr.mxu1 %v810_v49  ;;  %v1629_v48 = vld [vmem:[%s10944_s10 + $0x130] sm:$0xff]  ;;  %v1624_v49 = vld [vmem:[%s10944_s10 + $0x108] sm:$0xff] }
 0x2c1   :  { %1498 = vmatpush2.msra.mxu0 %v807_v50  ;;  %1569 = vmatpush2.msra.mxu1 %v809_v51  ;;  %v1626_v50 = vld [vmem:[%s10944_s10 + $0x118] sm:$0xff]  ;;  %v1623_v51 = vld [vmem:[%s10944_s10 + $0x100] sm:$0xff] }
 0x2c2   :  { %1499 = vmatprep.subr.mxu0 %v792_v52  ;;  %1570 = vmatprep.subr.mxu1 %v794_v53  ;;  %v1625_v52 = vld [vmem:[%s10944_s10 + $0x110] sm:$0xff]  ;;  %v1620_v53 = vld [vmem:[%s10944_s10 + $0xe8] sm:$0xff] }
 0x2c3   :  { %1500 = vmatpush2.msra.mxu0 %v791_v54  ;;  %1571 = vmatpush2.msra.mxu1 %v793_v55  ;;  %v1622_v54 = vld [vmem:[%s10944_s10 + $0xf8] sm:$0xff]  ;;  %v1619_v55 = vld [vmem:[%s10944_s10 + $0xe0] sm:$0xff] }
 0x2c4   :  { %1501 = vmatprep.subr.mxu0 %v776_v56  ;;  %1572 = vmatprep.subr.mxu1 %v778_v57  ;;  %v1621_v56 = vld [vmem:[%s10944_s10 + $0xf0] sm:$0xff]  ;;  %v1616_v57 = vld [vmem:[%s10944_s10 + $0xc8] sm:$0xff] }
 0x2c5   :  { %1502 = vmatpush2.msra.mxu0 %v775_v58  ;;  %1573 = vmatpush2.msra.mxu1 %v777_v59  ;;  %v1618_v58 = vld [vmem:[%s10944_s10 + $0xd8] sm:$0xff]  ;;  %v1615_v59 = vld [vmem:[%s10944_s10 + $0xc0] sm:$0xff] }
 0x2c6   :  { %1503 = vmatprep.subr.mxu0 %v760_v60  ;;  %1574 = vmatprep.subr.mxu1 %v762_v61  ;;  %v1617_v60 = vld [vmem:[%s10944_s10 + $0xd0] sm:$0xff]  ;;  %v1612_v61 = vld [vmem:[%s10944_s10 + $0xa8] sm:$0xff] }
 0x2c7   :  { %1504 = vmatpush2.msra.mxu0 %v759_v62  ;;  %1575 = vmatpush2.msra.mxu1 %v761_v63  ;;  %v1614_v62 = vld [vmem:[%s10944_s10 + $0xb8] sm:$0xff]  ;;  %v1611_v63 = vld [vmem:[%s10944_s10 + $0xa0] sm:$0xff] }
 0x2c8   :  { %1505 = vmatprep.subr.mxu0 %v744_v1  ;;  %1576 = vmatprep.subr.mxu1 %v746_v2  ;;  %v1613_v1 = vld [vmem:[%s10944_s10 + $0xb0] sm:$0xff]  ;;  %v1608_v2 = vld [vmem:[%s10944_s10 + $0x88] sm:$0xff] }
 0x2c9   :  { %1506 = vmatpush2.msra.mxu0 %v743_v3  ;;  %1577 = vmatpush2.msra.mxu1 %v745_v4  ;;  %v1610_v3 = vld [vmem:[%s10944_s10 + $0x98] sm:$0xff]  ;;  %v1607_v4 = vld [vmem:[%s10944_s10 + $0x80] sm:$0xff] }
 0x2ca   :  { %1507 = vmatprep.subr.mxu0 %v728_v5  ;;  %1578 = vmatprep.subr.mxu1 %v730_v6  ;;  %v1609_v5 = vld [vmem:[%s10944_s10 + $0x90] sm:$0xff]  ;;  %v1604_v6 = vld [vmem:[%s10944_s10 + $0x68] sm:$0xff] }
 0x2cb   :  { %1508 = vmatpush2.msra.mxu0 %v727_v7  ;;  %1579 = vmatpush2.msra.mxu1 %v729_v8  ;;  %v1606_v7 = vld [vmem:[%s10944_s10 + $0x78] sm:$0xff]  ;;  %v1603_v8 = vld [vmem:[%s10944_s10 + $0x60] sm:$0xff] }
 0x2cc   :  { %1509 = vmatprep.subr.mxu0 %v712_v9  ;;  %1580 = vmatprep.subr.mxu1 %v714_v10  ;;  %v1605_v9 = vld [vmem:[%s10944_s10 + $0x70] sm:$0xff]  ;;  %v1600_v10 = vld [vmem:[%s10944_s10 + $0x48] sm:$0xff] }
 0x2cd   :  { %1510 = vmatpush2.msra.mxu0 %v711_v11  ;;  %1581 = vmatpush2.msra.mxu1 %v713_v12  ;;  %v1602_v11 = vld [vmem:[%s10944_s10 + $0x58] sm:$0xff]  ;;  %v1599_v12 = vld [vmem:[%s10944_s10 + $0x40] sm:$0xff] }
 0x2ce   :  { %1511 = vmatprep.subr.mxu0 %v696_v13  ;;  %1582 = vmatprep.subr.mxu1 %v698_v14  ;;  %v1601_v13 = vld [vmem:[%s10944_s10 + $0x50] sm:$0xff]  ;;  %v1596_v14 = vld [vmem:[%s10944_s10 + $0x28] sm:$0xff] }
 0x2cf   :  { %1512 = vmatpush2.msra.mxu0 %v695_v15  ;;  %1583 = vmatpush2.msra.mxu1 %v697_v16  ;;  %v1598_v15 = vld [vmem:[%s10944_s10 + $0x38] sm:$0xff]  ;;  %v1595_v16 = vld [vmem:[%s10944_s10 + $0x20] sm:$0xff] }
 0x2d0   :  { %1514 = vmatmul.mubr.f32.vlgmr.msra.gmra.mxu0 %v7093_v45  ;;  %1585 = vmatmul.mubr.f32.vlgmr.msra.gmra.mxu1 %v7093_v45 }
 0x2d1   :  { %1741 = vmatprep.subr.mxu0 %v1652_v17  ;;  %1812 = vmatprep.subr.mxu1 %v1654_v18  ;;  %v1597_v17 = vld [vmem:[%s10944_s10 + $0x30] sm:$0xff]  ;;  %v1592_v18 = vld [vmem:[%s10944_s10 + $0x8] sm:$0xff] }
 0x2d2   :  { %1742 = vmatpush1.msra.mxu0 %v1651_v19  ;;  %1805 = vmatprep.mubr.f32.mxu0 %v7091_v44  ;;  %v1594_v19 = vld [vmem:[%s10944_s10 + $0x18] sm:$0xff] }
 0x2d3   :  { %1813 = vmatpush1.msra.mxu1 %v1653_v20  ;;  %1876 = vmatprep.mubr.f32.mxu1 %v7091_v44  ;;  %v1640_v44 = vld [vmem:[%s10944_s10 + $0x188] sm:$0xff]  ;;  %v1591_v20 = vld [vmem:[%s10944_s10] sm:$0xff] }
 0x2d4   :  { %1743 = vmatprep.subr.mxu0 %v1648_v21  ;;  %1814 = vmatprep.subr.mxu1 %v1650_v22  ;;  %v1593_v21 = vld [vmem:[%s10944_s10 + $0x10] sm:$0xff]  ;;  %v1716_v22 = vld [vmem:[%s10944_s10 + $0x3e8] sm:$0xff] }
 0x2d5   :  { %1744 = vmatpush1.msra.mxu0 %v1647_v23  ;;  %1815 = vmatpush1.msra.mxu1 %v1649_v24  ;;  %v1718_v23 = vld [vmem:[%s10944_s10 + $0x3f8] sm:$0xff]  ;;  %v1715_v24 = vld [vmem:[%s10944_s10 + $0x3e0] sm:$0xff] }
 0x2d6   :  { %1745 = vmatprep.subr.mxu0 %v1644_v25  ;;  %1816 = vmatprep.subr.mxu1 %v1646_v26  ;;  %v1717_v25 = vld [vmem:[%s10944_s10 + $0x3f0] sm:$0xff]  ;;  %v1712_v26 = vld [vmem:[%s10944_s10 + $0x3c8] sm:$0xff] }
 0x2d7   :  { %1746 = vmatpush1.msra.mxu0 %v1643_v27  ;;  %1817 = vmatpush1.msra.mxu1 %v1645_v28  ;;  %v1714_v27 = vld [vmem:[%s10944_s10 + $0x3d8] sm:$0xff]  ;;  %v1711_v28 = vld [vmem:[%s10944_s10 + $0x3c0] sm:$0xff] }
 0x2d8   :  { %1747 = vmatprep.subr.mxu0 %v1640_v44  ;;  %1818 = vmatprep.subr.mxu1 %v1642_v29  ;;  %v1713_v44 = vld [vmem:[%s10944_s10 + $0x3d0] sm:$0xff]  ;;  %v1708_v29 = vld [vmem:[%s10944_s10 + $0x3a8] sm:$0xff] }
 0x2d9   :  { %1748 = vmatpush1.msra.mxu0 %v1639_v30  ;;  %1819 = vmatpush1.msra.mxu1 %v1641_v31  ;;  %v1710_v30 = vld [vmem:[%s10944_s10 + $0x3b8] sm:$0xff]  ;;  %v1707_v31 = vld [vmem:[%s10944_s10 + $0x3a0] sm:$0xff] }
 0x2da   :  { %1749 = vmatprep.subr.mxu0 %v1636_v32  ;;  %1820 = vmatprep.subr.mxu1 %v1638_v35  ;;  %v1709_v32 = vld [vmem:[%s10944_s10 + $0x3b0] sm:$0xff]  ;;  %v1704_v35 = vld [vmem:[%s10944_s10 + $0x388] sm:$0xff] }
 0x2db   :  { %1750 = vmatpush1.msra.mxu0 %v1635_v37  ;;  %1821 = vmatpush1.msra.mxu1 %v1637_v38  ;;  %v1706_v37 = vld [vmem:[%s10944_s10 + $0x398] sm:$0xff]  ;;  %v1703_v38 = vld [vmem:[%s10944_s10 + $0x380] sm:$0xff] }
 0x2dc   :  { %1751 = vmatprep.subr.mxu0 %v1632_v39  ;;  %1822 = vmatprep.subr.mxu1 %v1634_v40  ;;  %v1705_v39 = vld [vmem:[%s10944_s10 + $0x390] sm:$0xff]  ;;  %v1700_v40 = vld [vmem:[%s10944_s10 + $0x368] sm:$0xff] }
 0x2dd   :  { %1752 = vmatpush1.msra.mxu0 %v1631_v41  ;;  %1823 = vmatpush1.msra.mxu1 %v1633_v42  ;;  %v1702_v41 = vld [vmem:[%s10944_s10 + $0x378] sm:$0xff]  ;;  %v1699_v42 = vld [vmem:[%s10944_s10 + $0x360] sm:$0xff] }
 0x2de   :  { %1753 = vmatprep.subr.mxu0 %v1628_v43  ;;  %1824 = vmatprep.subr.mxu1 %v1630_v46  ;;  %v1701_v43 = vld [vmem:[%s10944_s10 + $0x370] sm:$0xff]  ;;  %v1696_v46 = vld [vmem:[%s10944_s10 + $0x348] sm:$0xff] }
 0x2df   :  { %1754 = vmatpush1.msra.mxu0 %v1627_v47  ;;  %1825 = vmatpush1.msra.mxu1 %v1629_v48  ;;  %v1698_v47 = vld [vmem:[%s10944_s10 + $0x358] sm:$0xff]  ;;  %v1695_v48 = vld [vmem:[%s10944_s10 + $0x340] sm:$0xff] }
 0x2e0   :  { %1755 = vmatprep.subr.mxu0 %v1624_v49  ;;  %1826 = vmatprep.subr.mxu1 %v1626_v50  ;;  %v1697_v49 = vld [vmem:[%s10944_s10 + $0x350] sm:$0xff]  ;;  %v1692_v50 = vld [vmem:[%s10944_s10 + $0x328] sm:$0xff] }
 0x2e1   :  { %1756 = vmatpush1.msra.mxu0 %v1623_v51  ;;  %1827 = vmatpush1.msra.mxu1 %v1625_v52  ;;  %v1694_v51 = vld [vmem:[%s10944_s10 + $0x338] sm:$0xff]  ;;  %v1691_v52 = vld [vmem:[%s10944_s10 + $0x320] sm:$0xff] }
 0x2e2   :  { %1757 = vmatprep.subr.mxu0 %v1620_v53  ;;  %1828 = vmatprep.subr.mxu1 %v1622_v54  ;;  %v1693_v53 = vld [vmem:[%s10944_s10 + $0x330] sm:$0xff]  ;;  %v1688_v54 = vld [vmem:[%s10944_s10 + $0x308] sm:$0xff] }
 0x2e3   :  { %1758 = vmatpush1.msra.mxu0 %v1619_v55  ;;  %1829 = vmatpush1.msra.mxu1 %v1621_v56  ;;  %v1690_v55 = vld [vmem:[%s10944_s10 + $0x318] sm:$0xff]  ;;  %v1687_v56 = vld [vmem:[%s10944_s10 + $0x300] sm:$0xff] }
 0x2e4   :  { %1759 = vmatprep.subr.mxu0 %v1616_v57  ;;  %1830 = vmatprep.subr.mxu1 %v1618_v58  ;;  %v1689_v57 = vld [vmem:[%s10944_s10 + $0x310] sm:$0xff]  ;;  %v1684_v58 = vld [vmem:[%s10944_s10 + $0x2e8] sm:$0xff] }
 0x2e5   :  { %1760 = vmatpush1.msra.mxu0 %v1615_v59  ;;  %1831 = vmatpush1.msra.mxu1 %v1617_v60  ;;  %v1686_v59 = vld [vmem:[%s10944_s10 + $0x2f8] sm:$0xff]  ;;  %v1683_v60 = vld [vmem:[%s10944_s10 + $0x2e0] sm:$0xff] }
 0x2e6   :  { %1761 = vmatprep.subr.mxu0 %v1612_v61  ;;  %1832 = vmatprep.subr.mxu1 %v1614_v62  ;;  %v1685_v61 = vld [vmem:[%s10944_s10 + $0x2f0] sm:$0xff]  ;;  %v1680_v62 = vld [vmem:[%s10944_s10 + $0x2c8] sm:$0xff] }
 0x2e7   :  { %1762 = vmatpush1.msra.mxu0 %v1611_v63  ;;  %1833 = vmatpush1.msra.mxu1 %v1613_v1  ;;  %v1682_v63 = vld [vmem:[%s10944_s10 + $0x2d8] sm:$0xff]  ;;  %v1679_v1 = vld [vmem:[%s10944_s10 + $0x2c0] sm:$0xff] }
 0x2e8   :  { %1763 = vmatprep.subr.mxu0 %v1608_v2  ;;  %1834 = vmatprep.subr.mxu1 %v1610_v3  ;;  %v1681_v2 = vld [vmem:[%s10944_s10 + $0x2d0] sm:$0xff]  ;;  %v1676_v3 = vld [vmem:[%s10944_s10 + $0x2a8] sm:$0xff] }
 0x2e9   :  { %1764 = vmatpush1.msra.mxu0 %v1607_v4  ;;  %1835 = vmatpush1.msra.mxu1 %v1609_v5  ;;  %v1678_v4 = vld [vmem:[%s10944_s10 + $0x2b8] sm:$0xff]  ;;  %v1675_v5 = vld [vmem:[%s10944_s10 + $0x2a0] sm:$0xff] }
 0x2ea   :  { %1765 = vmatprep.subr.mxu0 %v1604_v6  ;;  %1836 = vmatprep.subr.mxu1 %v1606_v7  ;;  %v1677_v6 = vld [vmem:[%s10944_s10 + $0x2b0] sm:$0xff]  ;;  %v1672_v7 = vld [vmem:[%s10944_s10 + $0x288] sm:$0xff] }
 0x2eb   :  { %1766 = vmatpush1.msra.mxu0 %v1603_v8  ;;  %1837 = vmatpush1.msra.mxu1 %v1605_v9  ;;  %v1674_v8 = vld [vmem:[%s10944_s10 + $0x298] sm:$0xff]  ;;  %v1671_v9 = vld [vmem:[%s10944_s10 + $0x280] sm:$0xff] }
 0x2ec   :  { %1767 = vmatprep.subr.mxu0 %v1600_v10  ;;  %1838 = vmatprep.subr.mxu1 %v1602_v11  ;;  %v1673_v10 = vld [vmem:[%s10944_s10 + $0x290] sm:$0xff]  ;;  %v1668_v11 = vld [vmem:[%s10944_s10 + $0x268] sm:$0xff] }
 0x2ed   :  { %1768 = vmatpush1.msra.mxu0 %v1599_v12  ;;  %1839 = vmatpush1.msra.mxu1 %v1601_v13  ;;  %v1670_v12 = vld [vmem:[%s10944_s10 + $0x278] sm:$0xff]  ;;  %v1667_v13 = vld [vmem:[%s10944_s10 + $0x260] sm:$0xff] }
 0x2ee   :  { %1769 = vmatprep.subr.mxu0 %v1596_v14  ;;  %1840 = vmatprep.subr.mxu1 %v1598_v15  ;;  %v1669_v14 = vld [vmem:[%s10944_s10 + $0x270] sm:$0xff]  ;;  %v1664_v15 = vld [vmem:[%s10944_s10 + $0x248] sm:$0xff] }
 0x2ef   :  { %1770 = vmatpush1.msra.mxu0 %v1595_v16  ;;  %1841 = vmatpush1.msra.mxu1 %v1597_v17  ;;  %v1666_v16 = vld [vmem:[%s10944_s10 + $0x258] sm:$0xff]  ;;  %v1663_v17 = vld [vmem:[%s10944_s10 + $0x240] sm:$0xff] }
 0x2f0   :  { %1771 = vmatprep.subr.mxu0 %v1592_v18  ;;  %1842 = vmatprep.subr.mxu1 %v1594_v19  ;;  %v1665_v18 = vld [vmem:[%s10944_s10 + $0x250] sm:$0xff]  ;;  %v1660_v19 = vld [vmem:[%s10944_s10 + $0x228] sm:$0xff] }
 0x2f1   :  { %1772 = vmatpush1.msra.mxu0 %v1591_v20  ;;  %1843 = vmatpush1.msra.mxu1 %v1593_v21  ;;  %v1662_v20 = vld [vmem:[%s10944_s10 + $0x238] sm:$0xff]  ;;  %v1659_v21 = vld [vmem:[%s10944_s10 + $0x220] sm:$0xff] }
 0x2f2   :  { %1773 = vmatprep.subr.mxu0 %v1716_v22  ;;  %1844 = vmatprep.subr.mxu1 %v1718_v23  ;;  %v1661_v22 = vld [vmem:[%s10944_s10 + $0x230] sm:$0xff]  ;;  %v1656_v23 = vld [vmem:[%s10944_s10 + $0x208] sm:$0xff] }
 0x2f3   :  { %1774 = vmatpush2.msra.mxu0 %v1715_v24  ;;  %1845 = vmatpush2.msra.mxu1 %v1717_v25  ;;  %v1658_v24 = vld [vmem:[%s10944_s10 + $0x218] sm:$0xff]  ;;  %v1655_v25 = vld [vmem:[%s10944_s10 + $0x200] sm:$0xff] }
 0x2f4   :  { %1775 = vmatprep.subr.mxu0 %v1712_v26  ;;  %1846 = vmatprep.subr.mxu1 %v1714_v27  ;;  %v1657_v26 = vld [vmem:[%s10944_s10 + $0x210] sm:$0xff]  ;;  %v1996_v27 = vld [vmem:[%s10946_s12 + $0xf8] sm:$0xff] }
 0x2f5   :  { %1776 = vmatpush2.msra.mxu0 %v1711_v28  ;;  %1847 = vmatpush2.msra.mxu1 %v1713_v44  ;;  %v2028_v28 = vld [vmem:[%s10946_s12 + $0x1f8] sm:$0xff] }
 0x2f6   :  { %1777 = vmatprep.subr.mxu0 %v1708_v29  ;;  %1848 = vmatprep.subr.mxu1 %v1710_v30  ;;  %v1980_v44 = vld [vmem:[%s10946_s12 + $0x78] sm:$0xff]  ;;  %v2027_v30 = vld [vmem:[%s10946_s12 + $0x1f0] sm:$0xff] }
 0x2f7   :  { %1778 = vmatpush2.msra.mxu0 %v1707_v31  ;;  %1849 = vmatpush2.msra.mxu1 %v1709_v32  ;;  %v2012_v29 = vld [vmem:[%s10946_s12 + $0x178] sm:$0xff]  ;;  %v1979_v31 = vld [vmem:[%s10946_s12 + $0x70] sm:$0xff] }
 0x2f8   :  { %1779 = vmatprep.subr.mxu0 %v1704_v35  ;;  %1850 = vmatprep.subr.mxu1 %v1706_v37  ;;  %v2011_v32 = vld [vmem:[%s10946_s12 + $0x170] sm:$0xff]  ;;  %v1994_v35 = vld [vmem:[%s10946_s12 + $0xe8] sm:$0xff] }
 0x2f9   :  { %1780 = vmatpush2.msra.mxu0 %v1703_v38  ;;  %1851 = vmatpush2.msra.mxu1 %v1705_v39  ;;  %v2026_v37 = vld [vmem:[%s10946_s12 + $0x1e8] sm:$0xff] }
 0x2fa   :  { %1781 = vmatprep.subr.mxu0 %v1700_v40  ;;  %1852 = vmatprep.subr.mxu1 %v1702_v41  ;;  %v1978_v38 = vld [vmem:[%s10946_s12 + $0x68] sm:$0xff]  ;;  %v1993_v40 = vld [vmem:[%s10946_s12 + $0xe0] sm:$0xff] }
 0x2fb   :  { %1782 = vmatpush2.msra.mxu0 %v1699_v42  ;;  %1853 = vmatpush2.msra.mxu1 %v1701_v43  ;;  %v2010_v39 = vld [vmem:[%s10946_s12 + $0x168] sm:$0xff]  ;;  %v2025_v41 = vld [vmem:[%s10946_s12 + $0x1e0] sm:$0xff] }
 0x2fc   :  { %1783 = vmatprep.subr.mxu0 %v1696_v46  ;;  %1854 = vmatprep.subr.mxu1 %v1698_v47  ;;  %v1977_v42 = vld [vmem:[%s10946_s12 + $0x60] sm:$0xff]  ;;  %v1992_v46 = vld [vmem:[%s10946_s12 + $0xd8] sm:$0xff] }
 0x2fd   :  { %1784 = vmatpush2.msra.mxu0 %v1695_v48  ;;  %1855 = vmatpush2.msra.mxu1 %v1697_v49  ;;  %v2009_v43 = vld [vmem:[%s10946_s12 + $0x160] sm:$0xff]  ;;  %v2024_v47 = vld [vmem:[%s10946_s12 + $0x1d8] sm:$0xff] }
 0x2fe   :  { %1785 = vmatprep.subr.mxu0 %v1692_v50  ;;  %1856 = vmatprep.subr.mxu1 %v1694_v51  ;;  %v1976_v48 = vld [vmem:[%s10946_s12 + $0x58] sm:$0xff]  ;;  %v1991_v50 = vld [vmem:[%s10946_s12 + $0xd0] sm:$0xff] }
 0x2ff   :  { %1786 = vmatpush2.msra.mxu0 %v1691_v52  ;;  %1857 = vmatpush2.msra.mxu1 %v1693_v53  ;;  %v2008_v49 = vld [vmem:[%s10946_s12 + $0x158] sm:$0xff]  ;;  %v2023_v51 = vld [vmem:[%s10946_s12 + $0x1d0] sm:$0xff] }
 0x300   :  { %1787 = vmatprep.subr.mxu0 %v1688_v54  ;;  %1858 = vmatprep.subr.mxu1 %v1690_v55  ;;  %v1975_v52 = vld [vmem:[%s10946_s12 + $0x50] sm:$0xff]  ;;  %v1990_v54 = vld [vmem:[%s10946_s12 + $0xc8] sm:$0xff] }
 0x301   :  { %1788 = vmatpush2.msra.mxu0 %v1687_v56  ;;  %1859 = vmatpush2.msra.mxu1 %v1689_v57  ;;  %v2007_v53 = vld [vmem:[%s10946_s12 + $0x150] sm:$0xff]  ;;  %v2022_v55 = vld [vmem:[%s10946_s12 + $0x1c8] sm:$0xff] }
 0x302   :  { %1789 = vmatprep.subr.mxu0 %v1684_v58  ;;  %1860 = vmatprep.subr.mxu1 %v1686_v59  ;;  %v1974_v56 = vld [vmem:[%s10946_s12 + $0x48] sm:$0xff]  ;;  %v1089_v58 = vpop.f32.mrf.mxu0  ;;  %v1160_v59 = vpop.f32.mrf.mxu1 }
 0x303   :  { %1790 = vmatpush2.msra.mxu0 %v1683_v60  ;;  %1861 = vmatpush2.msra.mxu1 %v1685_v61  ;;  %v2006_v57 = vld [vmem:[%s10946_s12 + $0x148] sm:$0xff] }
 0x304   :  { %1791 = vmatprep.subr.mxu0 %v1680_v62  ;;  %1862 = vmatprep.subr.mxu1 %v1682_v63  ;;  %v1091_v60 = vpop.f32.mrf.mxu0  ;;  %v1162_v61 = vpop.f32.mrf.mxu1 }
 0x305   :  { %1792 = vmatpush2.msra.mxu0 %v1679_v1  ;;  %1863 = vmatpush2.msra.mxu1 %v1681_v2  ;;  %v7584_v1 = vsub.s32 2, %v7081_v33  ;;  %v961_v2 = vsub.s32 4, %v7081_v33 }
 0x306   :  { %1793 = vmatprep.subr.mxu0 %v1676_v3  ;;  %1864 = vmatprep.subr.mxu1 %v1678_v4  ;;  %v969_v3 = vsub.s32 6, %v7081_v33  ;;  %v939_v4 = vld [vmem:[#allocation12] sm:$0xff] }
 0x307   :  { %1794 = vmatpush2.msra.mxu0 %v1675_v5  ;;  %1865 = vmatpush2.msra.mxu1 %v1677_v6  ;;  %v965_v5 = vsub.s32 5, %v7081_v33  ;;  %v973_v6 = vsub.s32 7, %v7081_v33 }
 0x308   :  { %1795 = vmatprep.subr.mxu0 %v1672_v7  ;;  %1866 = vmatprep.subr.mxu1 %v1674_v8  ;;  %v7591_v7 = vsub.s32 3, %v7081_v33 }
 0x309   :  { %1796 = vmatpush2.msra.mxu0 %v1671_v9  ;;  %1867 = vmatpush2.msra.mxu1 %v1673_v10  ;;  %v940_v10 = vld [vmem:[#allocation12 + $0x8] sm:$0xff] }
 0x30a   :  { %1797 = vmatprep.subr.mxu0 %v1668_v11  ;;  %1868 = vmatprep.subr.mxu1 %v1670_v12  ;;  %v946_v11 = vrot.slane %v939_v4, %v7087_v36  ;;  %v954_v12 = vrot.slane %v939_v4, %v7584_v1  ;;  %v978_v33 = vrot.slane %v940_v10, %v7087_v36 }
 0x30b   :  { %1798 = vmatpush2.msra.mxu0 %v1667_v13  ;;  %1869 = vmatpush2.msra.mxu1 %v1669_v14  ;;  %v962_v13 = vrot.slane %v939_v4, %v961_v2  ;;  %v970_v14 = vrot.slane %v939_v4, %v969_v3 }
 0x30c   :  { %1799 = vmatprep.subr.mxu0 %v1664_v15  ;;  %1870 = vmatprep.subr.mxu1 %v1666_v16  ;;  %v1231_v62 = vpop.f32.mrf.mxu0  ;;  %v1302_v63 = vpop.f32.mrf.mxu1 }
 0x30d   :  { %1800 = vmatpush2.msra.mxu0 %v1663_v17  ;;  %1871 = vmatpush2.msra.mxu1 %v1665_v18  ;;  %v966_v17 = vrot.slane %v939_v4, %v965_v5  ;;  %v974_v18 = vrot.slane %v939_v4, %v973_v6 }
 0x30e   :  { %1801 = vmatprep.subr.mxu0 %v1660_v19  ;;  %1872 = vmatprep.subr.mxu1 %v1662_v20  ;;  %v1233_v8 = vpop.f32.mrf.mxu0  ;;  %v1304_v9 = vpop.f32.mrf.mxu1  ;;  %v950_v19 = vrot.slane %v939_v4, %v7084_v34  ;;  %v958_v20 = vrot.slane %v939_v4, %v7591_v7 }
 0x30f   :  { %1802 = vmatpush2.msra.mxu0 %v1659_v21  ;;  %1873 = vmatpush2.msra.mxu1 %v1661_v22  ;;  %v986_v21 = vrot.slane %v940_v10, %v7584_v1  ;;  %v982_v22 = vrot.slane %v940_v10, %v7084_v34 }
 0x310   :  { %1803 = vmatprep.subr.mxu0 %v1656_v23  ;;  %1874 = vmatprep.subr.mxu1 %v1658_v24  ;;  %v990_v23 = vrot.slane %v940_v10, %v7591_v7  ;;  %v7601_v24 = vadd.f32 %v1089_v58, %v946_v11 }
 0x311   :  { %1804 = vmatpush2.msra.mxu0 %v1655_v25  ;;  %1875 = vmatpush2.msra.mxu1 %v1657_v26  ;;  %v7603_v25 = vadd.f32 %v1160_v59, %v954_v12  ;;  %v7605_v26 = vadd.f32 %v1231_v62, %v962_v13 }
 0x312   :  { %1806 = vmatmul.mubr.f32.vlgmr.msra.gmra.mxu0 %v7093_v45  ;;  %1877 = vmatmul.mubr.f32.vlgmr.msra.gmra.mxu1 %v7093_v45  ;;  %v1995_v45 = vld [vmem:[%s10946_s12 + $0xf0] sm:$0xff] }
 0x313   :  { %5395 = vmatprep.subr.mxu0 %v1996_v27  ;;  %5430 = vmatprep.subr.mxu1 %v2028_v28  ;;  %v7607_v27 = vadd.f32 %v1302_v63, %v970_v14 }
 0x314   :  { %5396 = vmatpush3.msra.mxu0 %v1980_v44  ;;  %5431 = vmatpush3.msra.mxu1 %v2012_v29  ;;  %v7609_v29 = vadd.f32 %v1233_v8, %v966_v17 }
 0x315   :  { %5397 = vmatprep.subr.mxu0 %v1995_v45  ;;  %5432 = vmatprep.subr.mxu1 %v2027_v30  ;;  %v7611_v45 = vadd.f32 %v1304_v9, %v974_v18  ;;  %v7613_v30 = vadd.f32 %v1091_v60, %v950_v19 }
 0x316   :  { %5398 = vmatpush3.msra.mxu0 %v1979_v31  ;;  %5433 = vmatpush3.msra.mxu1 %v2011_v32  ;;  %v7615_v31 = vadd.f32 %v1162_v61, %v958_v20 }
 0x317   :  { %5399 = vmatprep.subr.mxu0 %v1994_v35  ;;  %5434 = vmatprep.subr.mxu1 %v2026_v37 }
 0x318   :  { %5400 = vmatpush3.msra.mxu0 %v1978_v38  ;;  %5435 = vmatpush3.msra.mxu1 %v2010_v39  ;;  %v994_v39 = vrot.slane %v940_v10, %v961_v2 }
 0x319   :  { %5401 = vmatprep.subr.mxu0 %v1993_v40  ;;  %5436 = vmatprep.subr.mxu1 %v2025_v41  ;;  %v1002_v40 = vrot.slane %v940_v10, %v969_v3  ;;  %v1884_v41 = vsel %vm1883_vm4, %v7601_v24, -inf }
 0x31a   :  { %5402 = vmatpush3.msra.mxu0 %v1977_v42  ;;  %5437 = vmatpush3.msra.mxu1 %v2009_v43  ;;  %v1886_v42 = vsel %vm1883_vm4, %v7603_v25, -inf  ;;  %v1888_v43 = vsel %vm1883_vm4, %v7605_v26, -inf }
 0x31b   :  { %5403 = vmatprep.subr.mxu0 %v1992_v46  ;;  %5438 = vmatprep.subr.mxu1 %v2024_v47  ;;  %v1892_v46 = vsel %vm1883_vm4, %v7607_v27, -inf  ;;  %v1890_v47 = vsel %vm1883_vm4, %v7609_v29, -inf  ;;  %v1889_v61 = vmax.f32 %v1884_v41, %v1888_v43  ;;  %v1972_v41 = vld [vmem:[%s10946_s12 + $0x38] sm:$0xff]  ;;  %v1987_v43 = vld [vmem:[%s10946_s12 + $0xb0] sm:$0xff] }
 0x31c   :  { %5404 = vmatpush3.msra.mxu0 %v1976_v48  ;;  %5439 = vmatpush3.msra.mxu1 %v2008_v49  ;;  %v1894_v48 = vsel %vm1883_vm4, %v7611_v45, -inf  ;;  %v998_v49 = vrot.slane %v940_v10, %v965_v5  ;;  %v1893_v62 = vmax.f32 %v1886_v42, %v1892_v46  ;;  %v2004_v42 = vld [vmem:[%s10946_s12 + $0x138] sm:$0xff]  ;;  %v2019_v46 = vld [vmem:[%s10946_s12 + $0x1b0] sm:$0xff] }
 0x31d   :  { %5405 = vmatprep.subr.mxu0 %v1991_v50  ;;  %5440 = vmatprep.subr.mxu1 %v2023_v51  ;;  %v1006_v50 = vrot.slane %v940_v10, %v973_v6  ;;  %v1885_v51 = vsel %vm1883_vm4, %v7613_v30, -inf }
 0x31e   :  { %5406 = vmatpush3.msra.mxu0 %v1975_v52  ;;  %5441 = vmatpush3.msra.mxu1 %v2007_v53  ;;  %v1887_v52 = vsel %vm1883_vm4, %v7615_v31, -inf  ;;  %v1891_v63 = vmax.f32 %v1885_v51, %v1890_v47  ;;  %v1971_v47 = vld [vmem:[%s10946_s12 + $0x30] sm:$0xff]  ;;  %v1970_v51 = vld [vmem:[%s10946_s12 + $0x28] sm:$0xff] }
 0x31f   :  { %5407 = vmatprep.subr.mxu0 %v1990_v54  ;;  %5442 = vmatprep.subr.mxu1 %v2022_v55  ;;  %v1895_v2 = vmax.f32 %v1887_v52, %v1894_v48  ;;  %v2003_v48 = vld [vmem:[%s10946_s12 + $0x130] sm:$0xff]  ;;  %v2002_v52 = vld [vmem:[%s10946_s12 + $0x128] sm:$0xff] }
 0x320   :  { %5408 = vmatpush3.msra.mxu0 %v1974_v56  ;;  %5443 = vmatpush3.msra.mxu1 %v2006_v57 }
 0x34e   :  { %v1373_v15 = vpop.f32.mrf.mxu0  ;;  %v1444_v16 = vpop.f32.mrf.mxu1 }
 0x34f   :  { %v7617_v32 = vadd.f32 %v1373_v15, %v978_v33  ;;  %v7619_v35 = vadd.f32 %v1444_v16, %v986_v21 }
 0x350   :  { %v1375_v28 = vpop.f32.mrf.mxu0  ;;  %v1446_v44 = vpop.f32.mrf.mxu1 }
 0x351   :  { %v7621_v37 = vadd.f32 %v1375_v28, %v982_v22  ;;  %v7623_v38 = vadd.f32 %v1446_v44, %v990_v23  ;;  %v1896_v53 = vsel %vm1883_vm4, %v7617_v32, -inf  ;;  %v1900_v54 = vsel %vm1883_vm4, %v7619_v35, -inf  ;;  %v1989_v22 = vld [vmem:[%s10946_s12 + $0xc0] sm:$0xff] }
 0x352   :  { %v1897_v10 = vmax.f32 %v1889_v61, %v1896_v53  ;;  %v1901_v11 = vmax.f32 %v1893_v62, %v1900_v54  ;;  %v2021_v23 = vld [vmem:[%s10946_s12 + $0x1c0] sm:$0xff]  ;;  %5409 = vmatprep.subr.mxu0 %v1989_v22  ;;  %v1968_v61 = vld [vmem:[%s10946_s12 + $0x18] sm:$0xff] }
 0x353   :  { %v1898_v57 = vsel %vm1883_vm4, %v7621_v37, -inf  ;;  %v1902_v58 = vsel %vm1883_vm4, %v7623_v38, -inf  ;;  %v1973_v28 = vld [vmem:[%s10946_s12 + $0x40] sm:$0xff]  ;;  %5444 = vmatprep.subr.mxu1 %v2021_v23  ;;  %v2000_v62 = vld [vmem:[%s10946_s12 + $0x118] sm:$0xff] }
 0x354   :  { %v1899_v12 = vmax.f32 %v1891_v63, %v1898_v57  ;;  %v1903_v13 = vmax.f32 %v1895_v2, %v1902_v58  ;;  %v2005_v44 = vld [vmem:[%s10946_s12 + $0x140] sm:$0xff]  ;;  %5410 = vmatpush3.msra.mxu0 %v1973_v28  ;;  %v1984_v57 = vld [vmem:[%s10946_s12 + $0x98] sm:$0xff]  ;;  %v1983_v63 = vld [vmem:[%s10946_s12 + $0x90] sm:$0xff] }
 0x355   :  { %5445 = vmatpush3.msra.mxu1 %v2005_v44  ;;  %v1985_v53 = vld [vmem:[%s10946_s12 + $0xa0] sm:$0xff]  ;;  %v2016_v58 = vld [vmem:[%s10946_s12 + $0x198] sm:$0xff]  ;;  %v2015_v2 = vld [vmem:[%s10946_s12 + $0x190] sm:$0xff] }
 0x356   :  { %v2017_v54 = vld [vmem:[%s10946_s12 + $0x1a0] sm:$0xff] }
 0x390   :  { %v1515_v55 = vpop.f32.mrf.mxu0  ;;  %v1586_v56 = vpop.f32.mrf.mxu1 }
 0x391   :  { %v7649_v59 = vadd.f32 %v1515_v55, %v994_v39  ;;  %v7651_v60 = vadd.f32 %v1586_v56, %v1002_v40  ;;  %v1988_v39 = vld [vmem:[%s10946_s12 + $0xb8] sm:$0xff]  ;;  %v1969_v55 = vld [vmem:[%s10946_s12 + $0x20] sm:$0xff] }
 0x392   :  { %v1517_v3 = vpop.f32.mrf.mxu0  ;;  %v1588_v4 = vpop.f32.mrf.mxu1  ;;  %v2020_v40 = vld [vmem:[%s10946_s12 + $0x1b8] sm:$0xff]  ;;  %5411 = vmatprep.subr.mxu0 %v1988_v39  ;;  %v2001_v56 = vld [vmem:[%s10946_s12 + $0x120] sm:$0xff] }
 0x393   :  { %v1904_v5 = vsel %vm1883_vm4, %v7649_v59, -inf  ;;  %v1908_v6 = vsel %vm1883_vm4, %v7651_v60, -inf  ;;  %v7657_v8 = vadd.f32 %v1517_v3, %v998_v49  ;;  %v7659_v9 = vadd.f32 %v1588_v4, %v1006_v50  ;;  %5446 = vmatprep.subr.mxu1 %v2020_v40  ;;  %5412 = vmatpush3.msra.mxu0 %v1972_v41  ;;  %v1986_v49 = vld [vmem:[%s10946_s12 + $0xa8] sm:$0xff]  ;;  %v1967_v3 = vld [vmem:[%s10946_s12 + $0x10] sm:$0xff] }
 0x394   :  { %v1905_v16 = vmax.f32 %v1897_v10, %v1904_v5  ;;  %v1909_v17 = vmax.f32 %v1901_v11, %v1908_v6  ;;  %5447 = vmatpush3.msra.mxu1 %v2004_v42  ;;  %v2018_v50 = vld [vmem:[%s10946_s12 + $0x1a8] sm:$0xff]  ;;  %5413 = vmatprep.subr.mxu0 %v1987_v43  ;;  %v1999_v4 = vld [vmem:[%s10946_s12 + $0x110] sm:$0xff] }
 0x395   :  { %v1906_v14 = vsel %vm1883_vm4, %v7657_v8, -inf  ;;  %v1910_v15 = vsel %vm1883_vm4, %v7659_v9, -inf  ;;  %5448 = vmatprep.subr.mxu1 %v2019_v46  ;;  %5414 = vmatpush3.msra.mxu0 %v1971_v47  ;;  %v1982_v5 = vld [vmem:[%s10946_s12 + $0x88] sm:$0xff] }
 0x396   :  { %v1907_v18 = vmax.f32 %v1899_v12, %v1906_v14  ;;  %v1911_v19 = vmax.f32 %v1903_v13, %v1910_v15  ;;  %5449 = vmatpush3.msra.mxu1 %v2003_v48  ;;  %5415 = vmatprep.subr.mxu0 %v1986_v49  ;;  %v2014_v6 = vld [vmem:[%s10946_s12 + $0x188] sm:$0xff]  ;;  %v1981_v12 = vld [vmem:[%s10946_s12 + $0x80] sm:$0xff] }
 0x397   :  { %5450 = vmatprep.subr.mxu1 %v2018_v50  ;;  %5416 = vmatpush3.msra.mxu0 %v1970_v51  ;;  %v1966_v10 = vld [vmem:[%s10946_s12 + $0x8] sm:$0xff]  ;;  %v2013_v13 = vld [vmem:[%s10946_s12 + $0x180] sm:$0xff] }
 0x398   :  { %v1912_v20 = vmax.f32 %v1905_v16, %v1907_v18  ;;  %v1913_v33 = vmax.f32 %v1909_v17, %v1911_v19  ;;  %5451 = vmatpush3.msra.mxu1 %v2002_v52  ;;  %5417 = vmatprep.subr.mxu0 %v1985_v53  ;;  %v1998_v11 = vld [vmem:[%s10946_s12 + $0x108] sm:$0xff]  ;;  %v1965_v14 = vld [vmem:[%s10946_s12] sm:$0xff]  ;;  %v2060_v16 = vld [vmem:[%s10946_s12 + $0x2f8] sm:$0xff] }
 0x399   :  { %5452 = vmatprep.subr.mxu1 %v2017_v54  ;;  %5418 = vmatpush3.msra.mxu0 %v1969_v55  ;;  %v1997_v15 = vld [vmem:[%s10946_s12 + $0x100] sm:$0xff]  ;;  %v2092_v17 = vld [vmem:[%s10946_s12 + $0x3f8] sm:$0xff] }
 0x39a   :  { %v1914_v21 = vmax.f32 %v1912_v20, %v1913_v33  ;;  %5453 = vmatpush3.msra.mxu1 %v2001_v56  ;;  %5419 = vmatprep.subr.mxu0 %v1984_v57  ;;  %v1719_v18 = vld [vmem:[#allocation13] sm:$0xf] }
 0x39b   :  { %5454 = vmatprep.subr.mxu1 %v2016_v58  ;;  %5420 = vmatpush3.msra.mxu0 %v1968_v61  ;;  %v1724_v19 = vrot.slane %v1719_v18, %v7087_v36  ;;  %v1732_v20 = vrot.slane %v1719_v18, %v7584_v1  ;;  %v1728_v33 = vrot.slane %v1719_v18, %v7084_v34 }
 0x39c   :  { %1915 = vmax.xlane.f32.xlu0 %v1914_v21  ;;  %5455 = vmatpush3.msra.mxu1 %v2000_v62  ;;  %v1736_v21 = vrot.slane %v1719_v18, %v7591_v7 }
 0x39d   :  { %5421 = vmatprep.subr.mxu0 %v1983_v63  ;;  %5456 = vmatprep.subr.mxu1 %v2015_v2 }
 0x39e   :  { %5422 = vmatpush3.msra.mxu0 %v1967_v3  ;;  %5457 = vmatpush3.msra.mxu1 %v1999_v4 }
 0x39f   :  { %5423 = vmatprep.subr.mxu0 %v1982_v5  ;;  %5458 = vmatprep.subr.mxu1 %v2014_v6 }
 0x3a0   :  { %5424 = vmatpush3.msra.mxu0 %v1966_v10  ;;  %5459 = vmatpush3.msra.mxu1 %v1998_v11 }
 0x3a1   :  { %5425 = vmatprep.subr.mxu0 %v1981_v12  ;;  %5460 = vmatprep.subr.mxu1 %v2013_v13  ;;  %v2076_v12 = vld [vmem:[%s10946_s12 + $0x378] sm:$0xff]  ;;  %v2059_v13 = vld [vmem:[%s10946_s12 + $0x2f0] sm:$0xff] }
 0x3a2   :  { %5426 = vmatpush3.msra.mxu0 %v1965_v14  ;;  %5461 = vmatpush3.msra.mxu1 %v1997_v15 }
 0x3a3   :  { %5465 = vmatprep.subr.mxu0 %v2060_v16  ;;  %5500 = vmatprep.subr.mxu1 %v2092_v17  ;;  %v2091_v17 = vld [vmem:[%s10946_s12 + $0x3f0] sm:$0xff] }
 0x3d2   :  { %v1807_v22 = vpop.f32.mrf.mxu0  ;;  %v1878_v23 = vpop.f32.mrf.mxu1 }
 0x3d3   :  { %v7783_v28 = vadd.f32 %v1807_v22, %v1724_v19  ;;  %v7785_v44 = vadd.f32 %v1878_v23, %v1732_v20 }
 0x3d4   :  { %v1809_v39 = vpop.f32.mrf.mxu0  ;;  %v1880_v40 = vpop.f32.mrf.mxu1 }
 0x3d5   :  { %v7787_v41 = vadd.f32 %v1809_v39, %v1728_v33  ;;  %v7789_v42 = vadd.f32 %v1880_v40, %v1736_v21  ;;  %v2782_v43 = vsel %vm1883_vm4, %v7783_v28, -inf  ;;  %v2784_v1 = vsel %vm1883_vm4, %v7785_v44, -inf  ;;  %v2043_v33 = vld [vmem:[%s10946_s12 + $0x270] sm:$0xff]  ;;  %v2058_v40 = vld [vmem:[%s10946_s12 + $0x2e8] sm:$0xff] }
 0x3d6   :  { %v2075_v39 = vld [vmem:[%s10946_s12 + $0x370] sm:$0xff] }
 0x3d7   :  { %v2783_v7 = vsel %vm1883_vm4, %v7787_v41, -inf  ;;  %v2785_v46 = vsel %vm1883_vm4, %v7789_v42, -inf }
 0x3d8   :  { %v2786_v47 = vmax.f32 %v2782_v43, %v2783_v7  ;;  %v2787_v48 = vmax.f32 %v2784_v1, %v2785_v46 }
 0x3da   :  { %v2788_v49 = vmax.f32 %v2786_v47, %v2787_v48  ;;  %v2090_v47 = vld [vmem:[%s10946_s12 + $0x3e8] sm:$0xff] }
 0x3db   :  { %v2042_v48 = vld [vmem:[%s10946_s12 + $0x268] sm:$0xff] }
 0x3dc   :  { %2789 = vmax.xlane.f32.xlu0 %v2788_v49 }
 0x425   :  { %v7799_v50 = vpop.xlane.xlu0 %1915 }
 0x426   :  { %v1918_v51 = vsub.f32 %v7613_v30, %v7799_v50  ;;  %v1920_v52 = vsub.f32 %v7615_v31, %v7799_v50  ;;  %v1917_v53 = vsub.f32 %v7601_v24, %v7799_v50  ;;  %v1919_v54 = vsub.f32 %v7603_v25, %v7799_v50 }
 0x427   :  { %v1922_v55 = vsub.f32 %v7609_v29, %v7799_v50  ;;  %v1924_v56 = vsub.f32 %v7611_v45, %v7799_v50  ;;  %v1921_v30 = vsub.f32 %v7605_v26, %v7799_v50  ;;  %v1923_v31 = vsub.f32 %v7607_v27, %v7799_v50 }
 0x428   :  { %v1935_v57 = vmul.f32 1.442695, %v1918_v51  ;;  %v1939_v58 = vmul.f32 1.442695, %v1920_v52  ;;  %v1933_v61 = vmul.f32 1.442695, %v1917_v53  ;;  %v1926_v25 = vsub.f32 %v7621_v37, %v7799_v50 }
 0x429   :  { %v1937_v62 = vmul.f32 1.442695, %v1919_v54  ;;  %v1943_v24 = vmul.f32 1.442695, %v1922_v55  ;;  %v1947_v29 = vmul.f32 1.442695, %v1924_v56  ;;  %v1928_v45 = vsub.f32 %v7623_v38, %v7799_v50 }
 0x42a   :  { %6471 = vpow2.f32 %v1935_v57  ;;  %v1941_v63 = vmul.f32 1.442695, %v1921_v30  ;;  %v1925_v2 = vsub.f32 %v7617_v32, %v7799_v50  ;;  %v1945_v26 = vmul.f32 1.442695, %v1923_v31  ;;  %v2044_v32 = vld [vmem:[%s10946_s12 + $0x278] sm:$0xff]  ;;  %v2074_v54 = vld [vmem:[%s10946_s12 + $0x368] sm:$0xff] }
 0x42b   :  { %6473 = vpow2.f32 %v1939_v58  ;;  %v1927_v27 = vsub.f32 %v7619_v35, %v7799_v50  ;;  %v1951_v3 = vmul.f32 1.442695, %v1926_v25  ;;  %v1955_v4 = vmul.f32 1.442695, %v1928_v45  ;;  %v2057_v55 = vld [vmem:[%s10946_s12 + $0x2e0] sm:$0xff] }
 0x42c   :  { %6475 = vpow2.f32 %v1933_v61  ;;  %v1949_v37 = vmul.f32 1.442695, %v1925_v2  ;;  %v2089_v58 = vld [vmem:[%s10946_s12 + $0x3e0] sm:$0xff]  ;;  %v2040_v2 = vld [vmem:[%s10946_s12 + $0x258] sm:$0xff] }
 0x42d   :  { %6477 = vpow2.f32 %v1937_v62  ;;  %v1953_v5 = vmul.f32 1.442695, %v1927_v27  ;;  %v2041_v61 = vld [vmem:[%s10946_s12 + $0x260] sm:$0xff] }
 0x42e   :  { %6479 = vpow2.f32 %v1943_v24  ;;  %v2073_v31 = vld [vmem:[%s10946_s12 + $0x360] sm:$0xff]  ;;  %v2056_v24 = vld [vmem:[%s10946_s12 + $0x2d8] sm:$0xff] }
 0x42f   :  { %6481 = vpow2.f32 %v1947_v29 }
 0x430   :  { %6483 = vpow2.f32 %v1941_v63  ;;  %v2088_v63 = vld [vmem:[%s10946_s12 + $0x3d8] sm:$0xff] }
 0x431   :  { %6485 = vpow2.f32 %v1945_v26 }
 0x432   :  { %6487 = vpow2.f32 %v1951_v3 }
 0x433   :  { %6489 = vpow2.f32 %v1955_v4  ;;  %v2072_v4 = vld [vmem:[%s10946_s12 + $0x358] sm:$0xff] }
 0x434   :  { %6491 = vpow2.f32 %v1949_v37  ;;  %v2055_v37 = vld [vmem:[%s10946_s12 + $0x2d0] sm:$0xff] }
 0x435   :  { %6493 = vpow2.f32 %v1953_v5 }
 0x437   :  { %v6472_v38 = vpop.eup %6471 }
 0x438   :  { %v6474_v6 = vpop.eup %6473  ;;  %2285 = vmatprep.mubr.f32.mxu0 %v6472_v38  ;;  %v3023_v35 = vrot.slane %v6472_v38, %v7087_v36  ;;  %v4042_v10 = vrot.slane %v6472_v38, %v7084_v34  ;;  %v2087_v38 = vld [vmem:[%s10946_s12 + $0x3d0] sm:$0xff] }
 0x439   :  { %v6476_v11 = vpop.eup %6475  ;;  %2355 = vmatprep.mubr.f32.mxu1 %v6474_v6  ;;  %v3031_v14 = vrot.slane %v6474_v6, %v7087_v36  ;;  %v4050_v15 = vrot.slane %v6474_v6, %v7084_v34  ;;  %v2039_v6 = vld [vmem:[%s10946_s12 + $0x250] sm:$0xff] }
 0x43a   :  { %v6478_v16 = vpop.eup %6477  ;;  %2286 = vmatmul.mubr.f32.vlgmr.msra.gmra.mxu0 %v6476_v11  ;;  %v3019_v18 = vrot.slane %v6476_v11, %v7087_v36  ;;  %v4038_v19 = vrot.slane %v6476_v11, %v7084_v34 }
 0x43b   :  { %v7843_v20 = vpop.eup %6479  ;;  %2356 = vmatmul.mubr.f32.vlgmr.msra.gmra.mxu1 %v6478_v16  ;;  %5466 = vmatpush3.msra.mxu0 %v2044_v32  ;;  %v3027_v21 = vrot.slane %v6478_v16, %v7087_v36  ;;  %v4046_v22 = vrot.slane %v6478_v16, %v7084_v34  ;;  %v2053_v16 = vld [vmem:[%s10946_s12 + $0x2c0] sm:$0xff] }
 0x43c   :  { %v7850_v23 = vpop.eup %6481  ;;  %5501 = vmatpush3.msra.mxu1 %v2076_v12  ;;  %5467 = vmatprep.subr.mxu0 %v2059_v13  ;;  %v7858_v43 = vcombine.low %v3019_v18, %v3023_v35  ;;  %v3039_v1 = vrot.slane %v7843_v20, %v7087_v36  ;;  %v7862_v7 = vcombine.low %v4038_v19, %v4042_v10  ;;  %v2071_v35 = vld [vmem:[%s10946_s12 + $0x350] sm:$0xff]  ;;  %v2054_v10 = vld [vmem:[%s10946_s12 + $0x2c8] sm:$0xff]  ;;  %v2085_v18 = vld [vmem:[%s10946_s12 + $0x3c0] sm:$0xff] }
 0x43d   :  { %v7864_v46 = vpop.eup %6483  ;;  %2425 = vmatprep.mubr.f32.mxu0 %v7843_v20  ;;  %5502 = vmatprep.subr.mxu1 %v2091_v17  ;;  %v7873_v49 = vcombine.low %v3027_v21, %v3031_v14  ;;  %v3047_v51 = vrot.slane %v7850_v23, %v7087_v36  ;;  %v7877_v52 = vcombine.low %v4046_v22, %v4050_v15  ;;  %v2086_v12 = vld [vmem:[%s10946_s12 + $0x3c8] sm:$0xff]  ;;  %v2037_v19 = vld [vmem:[%s10946_s12 + $0x240] sm:$0xff]  ;;  %v2052_v22 = vld [vmem:[%s10946_s12 + $0x2b8] sm:$0xff] }
 0x43e   :  { %11011 = vst [vmem:[#allocation22_spill] sm:$0xff] %v7862_v7  ;;  %v7879_v53 = vpop.eup %6485  ;;  %2495 = vmatprep.mubr.f32.mxu1 %v7850_v23  ;;  %5468 = vmatpush3.msra.mxu0 %v2043_v33  ;;  %v3035_v56 = vrot.slane %v7864_v46, %v7087_v36  ;;  %v2038_v13 = vld [vmem:[%s10946_s12 + $0x248] sm:$0xff]  ;;  %v4054_v17 = vrot.slane %v7864_v46, %v7084_v34  ;;  %v2069_v21 = vld [vmem:[%s10946_s12 + $0x340] sm:$0xff] }
 0x43f   :  { %11012 = vst [vmem:[#allocation23_spill] sm:$0xff] %v7877_v52  ;;  %v7890_v57 = vpop.eup %6487  ;;  %5503 = vmatpush3.msra.mxu1 %v2075_v39  ;;  %5469 = vmatprep.subr.mxu0 %v2058_v40  ;;  %v3043_v30 = vrot.slane %v7879_v53, %v7087_v36  ;;  %v2070_v15 = vld [vmem:[%s10946_s12 + $0x348] sm:$0xff]  ;;  %v4058_v33 = vrot.slane %v7843_v20, %v7084_v34  ;;  %v2084_v40 = vld [vmem:[%s10946_s12 + $0x3b8] sm:$0xff] }
 0x440   :  { %v7900_v62 = vpop.eup %6489  ;;  %5504 = vmatprep.subr.mxu1 %v2090_v47  ;;  %5470 = vmatpush3.msra.mxu0 %v2042_v48  ;;  %v7908_v25 = vcombine.low %v3035_v56, %v3039_v1  ;;  %v3055_v29 = vrot.slane %v7890_v57, %v7087_v36  ;;  %v4062_v39 = vrot.slane %v7879_v53, %v7084_v34  ;;  %v2036_v20 = vld [vmem:[%s10946_s12 + $0x238] sm:$0xff]  ;;  %v2051_v48 = vld [vmem:[%s10946_s12 + $0x2b0] sm:$0xff] }
 0x441   :  { %v7912_v45 = vpop.eup %6491  ;;  %5505 = vmatpush3.msra.mxu1 %v2074_v54  ;;  %5471 = vmatprep.subr.mxu0 %v2057_v55  ;;  %v7920_v26 = vcombine.low %v3043_v30, %v3047_v51  ;;  %v3063_v27 = vrot.slane %v7900_v62, %v7087_v36  ;;  %v7988_v1 = vcombine.low %v4054_v17, %v4058_v33  ;;  %v2068_v47 = vld [vmem:[%s10946_s12 + $0x338] sm:$0xff]  ;;  %v2083_v55 = vld [vmem:[%s10946_s12 + $0x3b0] sm:$0xff]  ;;  %v2030_v33 = vld [vmem:[%s10946_s12 + $0x208] sm:$0xff] }
 0x442   :  { %v7924_v3 = vpop.eup %6493  ;;  %5506 = vmatprep.subr.mxu1 %v2089_v58  ;;  %5472 = vmatpush3.msra.mxu0 %v2041_v61  ;;  %v3051_v5 = vrot.slane %v7912_v45, %v7087_v36  ;;  %v4066_v51 = vrot.slane %v7850_v23, %v7084_v34  ;;  %v4070_v54 = vrot.slane %v7912_v45, %v7084_v34  ;;  %v2035_v56 = vld [vmem:[%s10946_s12 + $0x230] sm:$0xff]  ;;  %v2050_v61 = vld [vmem:[%s10946_s12 + $0x2a8] sm:$0xff]  ;;  %v2818_v52 = vld [vmem:[%s10947_s13 + $0x78] sm:$0xff] }
 0x443   :  { %5507 = vmatpush3.msra.mxu1 %v2073_v31  ;;  %5473 = vmatprep.subr.mxu0 %v2056_v24  ;;  %v3059_v32 = vrot.slane %v7924_v3, %v7087_v36  ;;  %11013 = vst [vmem:[#allocation24_spill] sm:$0xff] %v7988_v1  ;;  %v4074_v58 = vrot.slane %v7890_v57, %v7084_v34  ;;  %v2067_v23 = vld [vmem:[%s10946_s12 + $0x330] sm:$0xff]  ;;  %v2082_v24 = vld [vmem:[%s10946_s12 + $0x3a8] sm:$0xff]  ;;  %v8651_v1 = vld [vmem:[%s10947_s13 + $0x1f8] sm:$0xff] }
 0x444   :  { %5508 = vmatprep.subr.mxu1 %v2088_v63  ;;  %5474 = vmatpush3.msra.mxu0 %v2040_v2  ;;  %v7948_v11 = vcombine.low %v3051_v5, %v3055_v29  ;;  %v8014_v30 = vcombine.low %v4062_v39, %v4066_v51  ;;  %v4078_v31 = vrot.slane %v7924_v3, %v7084_v34  ;;  %v2034_v29 = vld [vmem:[%s10946_s12 + $0x228] sm:$0xff]  ;;  %v2033_v5 = vld [vmem:[%s10946_s12 + $0x220] sm:$0xff]  ;;  %v2063_v17 = vld [vmem:[%s10946_s12 + $0x310] sm:$0xff] }
 0x445   :  { %5509 = vmatpush3.msra.mxu1 %v2072_v4  ;;  %5475 = vmatprep.subr.mxu0 %v2055_v37  ;;  %v7956_v14 = vcombine.low %v3059_v32, %v3063_v27  ;;  %v8024_v63 = vcombine.low %v4070_v54, %v4074_v58  ;;  %v2066_v2 = vld [vmem:[%s10946_s12 + $0x328] sm:$0xff]  ;;  %v2049_v27 = vld [vmem:[%s10946_s12 + $0x2a0] sm:$0xff]  ;;  %v4082_v4 = vrot.slane %v7900_v62, %v7084_v34  ;;  %v2108_v51 = vld [vmem:[%s10946_s12 + $0x478] sm:$0xff] }
 0x446   :  { %5510 = vmatprep.subr.mxu1 %v2087_v38  ;;  %5476 = vmatpush3.msra.mxu0 %v2039_v6  ;;  %11014 = vst [vmem:[#allocation25_spill] sm:$0xff] %v8014_v30  ;;  %v2081_v37 = vld [vmem:[%s10946_s12 + $0x3a0] sm:$0xff]  ;;  %v2048_v6 = vld [vmem:[%s10946_s12 + $0x298] sm:$0xff]  ;;  %v2122_v58 = vld [vmem:[%s10946_s12 + $0x4e8] sm:$0xff] }
 0x447   :  { %5511 = vmatpush3.msra.mxu1 %v2071_v35  ;;  %5477 = vmatprep.subr.mxu0 %v2054_v10  ;;  %11015 = vst [vmem:[#allocation26_spill] sm:$0xff] %v8024_v63  ;;  %v2065_v38 = vld [vmem:[%s10946_s12 + $0x320] sm:$0xff]  ;;  %v8046_v32 = vcombine.low %v4078_v31, %v4082_v4  ;;  %v2080_v35 = vld [vmem:[%s10946_s12 + $0x398] sm:$0xff]  ;;  %11024 = vst [vmem:[#allocation35_spill] sm:$0xff] %v8651_v1 }
 0x448   :  { %5512 = vmatprep.subr.mxu1 %v2086_v12  ;;  %5478 = vmatpush3.msra.mxu0 %v2038_v13  ;;  %v2032_v10 = vld [vmem:[%s10946_s12 + $0x218] sm:$0xff]  ;;  %v2047_v13 = vld [vmem:[%s10946_s12 + $0x290] sm:$0xff]  ;;  %v2077_v39 = vld [vmem:[%s10946_s12 + $0x380] sm:$0xff] }
 0x449   :  { %5513 = vmatpush3.msra.mxu1 %v2070_v15  ;;  %5479 = vmatprep.subr.mxu0 %v2053_v16  ;;  %11016 = vst [vmem:[#allocation27_spill] sm:$0xff] %v8046_v32  ;;  %v2064_v12 = vld [vmem:[%s10946_s12 + $0x318] sm:$0xff]  ;;  %v2079_v15 = vld [vmem:[%s10946_s12 + $0x390] sm:$0xff]  ;;  %v2121_v31 = vld [vmem:[%s10946_s12 + $0x4e0] sm:$0xff] }
 0x44a   :  { %5514 = vmatprep.subr.mxu1 %v2085_v18  ;;  %5480 = vmatpush3.msra.mxu0 %v2037_v19  ;;  %v2031_v16 = vld [vmem:[%s10946_s12 + $0x210] sm:$0xff]  ;;  %v2046_v18 = vld [vmem:[%s10946_s12 + $0x288] sm:$0xff]  ;;  %v2140_v54 = vld [vmem:[%s10946_s12 + $0x578] sm:$0xff] }
 0x44b   :  { %5515 = vmatpush3.msra.mxu1 %v2069_v21  ;;  %5481 = vmatprep.subr.mxu0 %v2052_v22  ;;  %v2078_v19 = vld [vmem:[%s10946_s12 + $0x388] sm:$0xff]  ;;  %v2045_v22 = vld [vmem:[%s10946_s12 + $0x280] sm:$0xff]  ;;  %v2104_v4 = vld [vmem:[%s10946_s12 + $0x458] sm:$0xff] }
 0x44c   :  { %5516 = vmatprep.subr.mxu1 %v2084_v40  ;;  %5482 = vmatpush3.msra.mxu0 %v2036_v20  ;;  %v2062_v21 = vld [vmem:[%s10946_s12 + $0x308] sm:$0xff]  ;;  %v2029_v40 = vld [vmem:[%s10946_s12 + $0x200] sm:$0xff]  ;;  %v2834_v63 = vld [vmem:[%s10947_s13 + $0xf8] sm:$0xff] }
 0x44d   :  { %5517 = vmatpush3.msra.mxu1 %v2068_v47  ;;  %5483 = vmatprep.subr.mxu0 %v2051_v48  ;;  %v2061_v20 = vld [vmem:[%s10946_s12 + $0x300] sm:$0xff]  ;;  %v2124_v47 = vld [vmem:[%s10946_s12 + $0x4f8] sm:$0xff] }
 0x44e   :  { %5518 = vmatprep.subr.mxu1 %v2083_v55  ;;  %5484 = vmatpush3.msra.mxu0 %v2035_v56  ;;  %v2156_v48 = vld [vmem:[%s10946_s12 + $0x5f8] sm:$0xff]  ;;  %v2123_v55 = vld [vmem:[%s10946_s12 + $0x4f0] sm:$0xff]  ;;  %v8630_v34 = vld [vmem:[%s10946_s12 + $0x600] sm:$0xff] }
 0x44f   :  { %5519 = vmatpush3.msra.mxu1 %v2067_v23  ;;  %5485 = vmatprep.subr.mxu0 %v2050_v61  ;;  %v2155_v56 = vld [vmem:[%s10946_s12 + $0x5f0] sm:$0xff]  ;;  %v2154_v23 = vld [vmem:[%s10946_s12 + $0x5e8] sm:$0xff]  ;;  %11022 = vst [vmem:[#allocation33_spill] sm:$0xff] %v8630_v34  ;;  %v8637_v32 = vld [vmem:[%s10946_s12 + $0x700] sm:$0xff] }
 0x450   :  { %5520 = vmatprep.subr.mxu1 %v2082_v24  ;;  %5486 = vmatpush3.msra.mxu0 %v2034_v29  ;;  %v2138_v61 = vld [vmem:[%s10946_s12 + $0x568] sm:$0xff]  ;;  %v2105_v24 = vld [vmem:[%s10946_s12 + $0x460] sm:$0xff]  ;;  %11023 = vst [vmem:[#allocation34_spill] sm:$0xff] %v8637_v32 }
 0x451   :  { %5521 = vmatpush3.msra.mxu1 %v2066_v2  ;;  %5487 = vmatprep.subr.mxu0 %v2049_v27  ;;  %v2137_v29 = vld [vmem:[%s10946_s12 + $0x560] sm:$0xff]  ;;  %v2120_v2 = vld [vmem:[%s10946_s12 + $0x4d8] sm:$0xff] }
 0x452   :  { %5522 = vmatprep.subr.mxu1 %v2081_v37  ;;  %5488 = vmatpush3.msra.mxu0 %v2033_v5  ;;  %v2152_v27 = vld [vmem:[%s10946_s12 + $0x5d8] sm:$0xff]  ;;  %v2119_v5 = vld [vmem:[%s10946_s12 + $0x4d0] sm:$0xff] }
 0x453   :  { %5523 = vmatpush3.msra.mxu1 %v2065_v38  ;;  %5489 = vmatprep.subr.mxu0 %v2048_v6  ;;  %v2136_v37 = vld [vmem:[%s10946_s12 + $0x558] sm:$0xff]  ;;  %v2151_v38 = vld [vmem:[%s10946_s12 + $0x5d0] sm:$0xff] }
 0x454   :  { %5524 = vmatprep.subr.mxu1 %v2080_v35  ;;  %5490 = vmatpush3.msra.mxu0 %v2032_v10  ;;  %v2103_v6 = vld [vmem:[%s10946_s12 + $0x450] sm:$0xff]  ;;  %v2118_v10 = vld [vmem:[%s10946_s12 + $0x4c8] sm:$0xff] }
 0x455   :  { %5525 = vmatpush3.msra.mxu1 %v2064_v12  ;;  %5491 = vmatprep.subr.mxu0 %v2047_v13  ;;  %v2135_v35 = vld [vmem:[%s10946_s12 + $0x550] sm:$0xff]  ;;  %v2150_v12 = vld [vmem:[%s10946_s12 + $0x5c8] sm:$0xff] }
 0x456   :  { %5526 = vmatprep.subr.mxu1 %v2079_v15  ;;  %5492 = vmatpush3.msra.mxu0 %v2031_v16  ;;  %v2102_v13 = vld [vmem:[%s10946_s12 + $0x448] sm:$0xff]  ;;  %v2117_v16 = vld [vmem:[%s10946_s12 + $0x4c0] sm:$0xff] }
 0x457   :  { %5527 = vmatpush3.msra.mxu1 %v2063_v17  ;;  %5493 = vmatprep.subr.mxu0 %v2046_v18  ;;  %v2134_v15 = vld [vmem:[%s10946_s12 + $0x548] sm:$0xff]  ;;  %v2149_v17 = vld [vmem:[%s10946_s12 + $0x5c0] sm:$0xff] }
 0x458   :  { %5528 = vmatprep.subr.mxu1 %v2078_v19  ;;  %5494 = vmatpush3.msra.mxu0 %v2030_v33  ;;  %v2101_v18 = vld [vmem:[%s10946_s12 + $0x440] sm:$0xff]  ;;  %v2116_v33 = vld [vmem:[%s10946_s12 + $0x4b8] sm:$0xff] }
 0x459   :  { %5529 = vmatpush3.msra.mxu1 %v2062_v21  ;;  %5495 = vmatprep.subr.mxu0 %v2045_v22  ;;  %v2133_v19 = vld [vmem:[%s10946_s12 + $0x540] sm:$0xff]  ;;  %v1930_v21 = vsub.f32 %v7657_v8, %v7799_v50  ;;  %v2148_v22 = vld [vmem:[%s10946_s12 + $0x5b8] sm:$0xff]  ;;  %v2115_v8 = vld [vmem:[%s10946_s12 + $0x4b0] sm:$0xff] }
 0x45a   :  { %5530 = vmatprep.subr.mxu1 %v2077_v39  ;;  %5496 = vmatpush3.msra.mxu0 %v2029_v40  ;;  %v2100_v39 = vld [vmem:[%s10946_s12 + $0x438] sm:$0xff]  ;;  %v1932_v40 = vsub.f32 %v7659_v9, %v7799_v50  ;;  %v2099_v9 = vld [vmem:[%s10946_s12 + $0x430] sm:$0xff] }
 0x45b   :  { %5531 = vmatpush3.msra.mxu1 %v2061_v20  ;;  %2426 = vmatmul.mubr.f32.vlgmr.msra.gmra.mxu0 %v7864_v46  ;;  %v2107_v46 = vld [vmem:[%s10946_s12 + $0x470] sm:$0xff]  ;;  %v2132_v20 = vld [vmem:[%s10946_s12 + $0x538] sm:$0xff] }
 0x45c   :  { %2496 = vmatmul.mubr.f32.vlgmr.msra.gmra.mxu1 %v7879_v53  ;;  %5535 = vmatprep.subr.mxu0 %v2124_v47  ;;  %v2139_v53 = vld [vmem:[%s10946_s12 + $0x570] sm:$0xff] }
 0x45d   :  { %5570 = vmatprep.subr.mxu1 %v2156_v48  ;;  %5536 = vmatpush3.msra.mxu0 %v2108_v51  ;;  %v2147_v47 = vld [vmem:[%s10946_s12 + $0x5b0] sm:$0xff]  ;;  %v2114_v51 = vld [vmem:[%s10946_s12 + $0x4a8] sm:$0xff] }
 0x45e   :  { %2565 = vmatprep.mubr.f32.mxu0 %v7890_v57  ;;  %5571 = vmatpush3.msra.mxu1 %v2140_v54  ;;  %v2106_v57 = vld [vmem:[%s10946_s12 + $0x468] sm:$0xff]  ;;  %v2131_v48 = vld [vmem:[%s10946_s12 + $0x530] sm:$0xff]  ;;  %v1959_v54 = vmul.f32 1.442695, %v1930_v21 }
 0x45f   :  { %2635 = vmatprep.mubr.f32.mxu1 %v7900_v62  ;;  %5537 = vmatprep.subr.mxu0 %v2123_v55  ;;  %v2153_v62 = vld [vmem:[%s10946_s12 + $0x5e0] sm:$0xff]  ;;  %v2146_v55 = vld [vmem:[%s10946_s12 + $0x5a8] sm:$0xff] }
 0x460   :  { %5572 = vmatprep.subr.mxu1 %v2155_v56  ;;  %5538 = vmatpush3.msra.mxu0 %v2107_v46  ;;  %v2098_v56 = vld [vmem:[%s10946_s12 + $0x428] sm:$0xff]  ;;  %v1963_v46 = vmul.f32 1.442695, %v1932_v40  ;;  %6495 = vpow2.f32 %v1959_v54  ;;  %v2201_v54 = vld [vmem:[%s10946_s12 + $0x760] sm:$0xff] }
 0x461   :  { %5573 = vmatpush3.msra.mxu1 %v2139_v53  ;;  %5539 = vmatprep.subr.mxu0 %v2122_v58  ;;  %v2130_v53 = vld [vmem:[%s10946_s12 + $0x528] sm:$0xff]  ;;  %v2113_v58 = vld [vmem:[%s10946_s12 + $0x4a0] sm:$0xff] }
 0x462   :  { %5574 = vmatprep.subr.mxu1 %v2154_v23  ;;  %5540 = vmatpush3.msra.mxu0 %v2106_v57  ;;  %v2145_v23 = vld [vmem:[%s10946_s12 + $0x5a0] sm:$0xff]  ;;  %6497 = vpow2.f32 %v1963_v46  ;;  %v2186_v40 = vld [vmem:[%s10946_s12 + $0x6e8] sm:$0xff]  ;;  %v8360_v46 = vld [vmem:[%s10946_s12 + $0x658] sm:$0xff] }
 0x463   :  { %5575 = vmatpush3.msra.mxu1 %v2138_v61  ;;  %5541 = vmatprep.subr.mxu0 %v2121_v31  ;;  %v2097_v57 = vld [vmem:[%s10946_s12 + $0x420] sm:$0xff]  ;;  %v2112_v31 = vld [vmem:[%s10946_s12 + $0x498] sm:$0xff] }
 0x464   :  { %5576 = vmatprep.subr.mxu1 %v2153_v62  ;;  %5542 = vmatpush3.msra.mxu0 %v2105_v24  ;;  %v2129_v61 = vld [vmem:[%s10946_s12 + $0x520] sm:$0xff]  ;;  %v2144_v62 = vld [vmem:[%s10946_s12 + $0x598] sm:$0xff] }
 0x465   :  { %5577 = vmatpush3.msra.mxu1 %v2137_v29  ;;  %5543 = vmatprep.subr.mxu0 %v2120_v2  ;;  %v2096_v24 = vld [vmem:[%s10946_s12 + $0x418] sm:$0xff]  ;;  %v2111_v2 = vld [vmem:[%s10946_s12 + $0x490] sm:$0xff] }
 0x466   :  { %5578 = vmatprep.subr.mxu1 %v2152_v27  ;;  %5544 = vmatpush3.msra.mxu0 %v2104_v4  ;;  %v2128_v29 = vld [vmem:[%s10946_s12 + $0x518] sm:$0xff]  ;;  %v2143_v27 = vld [vmem:[%s10946_s12 + $0x590] sm:$0xff] }
 0x467   :  { %5579 = vmatpush3.msra.mxu1 %v2136_v37  ;;  %5545 = vmatprep.subr.mxu0 %v2119_v5  ;;  %v2095_v4 = vld [vmem:[%s10946_s12 + $0x410] sm:$0xff]  ;;  %v2110_v5 = vld [vmem:[%s10946_s12 + $0x488] sm:$0xff] }
 0x468   :  { %5580 = vmatprep.subr.mxu1 %v2151_v38  ;;  %5546 = vmatpush3.msra.mxu0 %v2103_v6  ;;  %v2127_v37 = vld [vmem:[%s10946_s12 + $0x510] sm:$0xff]  ;;  %v2142_v38 = vld [vmem:[%s10946_s12 + $0x588] sm:$0xff] }
 0x469   :  { %5581 = vmatpush3.msra.mxu1 %v2135_v35  ;;  %5547 = vmatprep.subr.mxu0 %v2118_v10  ;;  %v2094_v6 = vld [vmem:[%s10946_s12 + $0x408] sm:$0xff]  ;;  %v2109_v10 = vld [vmem:[%s10946_s12 + $0x480] sm:$0xff] }
 0x46a   :  { %5582 = vmatprep.subr.mxu1 %v2150_v12  ;;  %5548 = vmatpush3.msra.mxu0 %v2102_v13  ;;  %v2126_v35 = vld [vmem:[%s10946_s12 + $0x508] sm:$0xff]  ;;  %v2141_v12 = vld [vmem:[%s10946_s12 + $0x580] sm:$0xff] }
 0x46b   :  { %5583 = vmatpush3.msra.mxu1 %v2134_v15  ;;  %5549 = vmatprep.subr.mxu0 %v2117_v16  ;;  %v2093_v13 = vld [vmem:[%s10946_s12 + $0x400] sm:$0xff]  ;;  %v2188_v16 = vld [vmem:[%s10946_s12 + $0x6f8] sm:$0xff] }
 0x46c   :  { %5584 = vmatprep.subr.mxu1 %v2149_v17  ;;  %5550 = vmatpush3.msra.mxu0 %v2101_v18  ;;  %v2125_v15 = vld [vmem:[%s10946_s12 + $0x500] sm:$0xff]  ;;  %v2220_v17 = vld [vmem:[%s10946_s12 + $0x7f8] sm:$0xff] }
 0x46d   :  { %5585 = vmatpush3.msra.mxu1 %v2133_v19  ;;  %5551 = vmatprep.subr.mxu0 %v2116_v33  ;;  %v2172_v18 = vld [vmem:[%s10946_s12 + $0x678] sm:$0xff]  ;;  %v2187_v33 = vld [vmem:[%s10946_s12 + $0x6f0] sm:$0xff]  ;;  %v8310_v21 = vpop.eup %6495 }
 0x46e   :  { %5586 = vmatprep.subr.mxu1 %v2148_v22  ;;  %5552 = vmatpush3.msra.mxu0 %v2100_v39  ;;  %v2204_v19 = vld [vmem:[%s10946_s12 + $0x778] sm:$0xff]  ;;  %v2219_v22 = vld [vmem:[%s10946_s12 + $0x7f0] sm:$0xff] }
 0x46f   :  { %5587 = vmatpush3.msra.mxu1 %v2132_v20  ;;  %5553 = vmatprep.subr.mxu0 %v2115_v8  ;;  %v8318_v39 = vpop.eup %6497  ;;  %v2218_v20 = vld [vmem:[%s10946_s12 + $0x7e8] sm:$0xff] }
 0x470   :  { %5588 = vmatprep.subr.mxu1 %v2147_v47  ;;  %5554 = vmatpush3.msra.mxu0 %v2099_v9  ;;  %v2170_v8 = vld [vmem:[%s10946_s12 + $0x668] sm:$0xff]  ;;  %v2185_v9 = vld [vmem:[%s10946_s12 + $0x6e0] sm:$0xff] }
 0x471   :  { %5589 = vmatpush3.msra.mxu1 %v2131_v48  ;;  %5555 = vmatprep.subr.mxu0 %v2114_v51  ;;  %v2202_v47 = vld [vmem:[%s10946_s12 + $0x768] sm:$0xff]  ;;  %v2217_v48 = vld [vmem:[%s10946_s12 + $0x7e0] sm:$0xff] }
 0x472   :  { %5590 = vmatprep.subr.mxu1 %v2146_v55  ;;  %5556 = vmatpush3.msra.mxu0 %v2098_v56  ;;  %v2169_v51 = vld [vmem:[%s10946_s12 + $0x660] sm:$0xff]  ;;  %v2184_v55 = vld [vmem:[%s10946_s12 + $0x6d8] sm:$0xff] }
 0x473   :  { %5591 = vmatpush3.msra.mxu1 %v2130_v53  ;;  %5557 = vmatprep.subr.mxu0 %v2113_v58  ;;  %v8355_v56 = vld [vmem:[%s10946_s12 + $0x7d8] sm:$0xff]  ;;  %v8370_v58 = vld [vmem:[%s10946_s12 + $0x6d0] sm:$0xff] }
 0x474   :  { %5592 = vmatprep.subr.mxu1 %v2145_v23  ;;  %5558 = vmatpush3.msra.mxu0 %v2097_v57  ;;  %v8365_v53 = vld [vmem:[%s10946_s12 + $0x758] sm:$0xff]  ;;  %v8375_v23 = vld [vmem:[%s10946_s12 + $0x7d0] sm:$0xff] }
 0x475   :  { %5593 = vmatpush3.msra.mxu1 %v2129_v61  ;;  %5559 = vmatprep.subr.mxu0 %v2112_v31  ;;  %v8380_v57 = vld [vmem:[%s10946_s12 + $0x650] sm:$0xff]  ;;  %v8392_v31 = vld [vmem:[%s10946_s12 + $0x6c8] sm:$0xff] }
 0x476   :  { %5594 = vmatprep.subr.mxu1 %v2144_v62  ;;  %5560 = vmatpush3.msra.mxu0 %v2096_v24  ;;  %v8387_v61 = vld [vmem:[%s10946_s12 + $0x750] sm:$0xff]  ;;  %v8394_v62 = vpop.xlane.xlu0 %2789  ;;  %v8401_v24 = vld [vmem:[%s10946_s12 + $0x7c8] sm:$0xff] }
 0x477   :  { %5595 = vmatpush3.msra.mxu1 %v2128_v29  ;;  %5561 = vmatprep.subr.mxu0 %v2111_v2  ;;  %v8406_v29 = vld [vmem:[%s10946_s12 + $0x648] sm:$0xff]  ;;  %v1929_v2 = vsub.f32 %v7649_v59, %v7799_v50  ;;  %v8429_v59 = vld [vmem:[%s10946_s12 + $0x7c0] sm:$0xff] }
 0x478   :  { %5596 = vmatprep.subr.mxu1 %v2143_v27  ;;  %5562 = vmatpush3.msra.mxu0 %v2095_v4  ;;  %v8415_v27 = vld [vmem:[%s10946_s12 + $0x748] sm:$0xff]  ;;  %v8420_v4 = vld [vmem:[%s10946_s12 + $0x6c0] sm:$0xff] }
 0x479   :  { %5597 = vmatpush3.msra.mxu1 %v2127_v37  ;;  %5563 = vmatprep.subr.mxu0 %v2110_v5  ;;  %v1931_v37 = vsub.f32 %v7651_v60, %v7799_v50  ;;  %v8434_v5 = vld [vmem:[%s10946_s12 + $0x640] sm:$0xff]  ;;  %v8448_v50 = vld [vmem:[%s10946_s12 + $0x6b8] sm:$0xff] }
 0x47a   :  { %5598 = vmatprep.subr.mxu1 %v2142_v38  ;;  %5564 = vmatpush3.msra.mxu0 %v2094_v6  ;;  %v2792_v38 = vsub.f32 %v7787_v41, %v8394_v62  ;;  %v8443_v60 = vld [vmem:[%s10946_s12 + $0x740] sm:$0xff]  ;;  %v2794_v6 = vsub.f32 %v7789_v42, %v8394_v62  ;;  %v8457_v41 = vld [vmem:[%s10946_s12 + $0x7b8] sm:$0xff] }
 0x47b   :  { %5599 = vmatpush3.msra.mxu1 %v2126_v35  ;;  %5565 = vmatprep.subr.mxu0 %v2109_v10  ;;  %v8462_v35 = vld [vmem:[%s10946_s12 + $0x638] sm:$0xff]  ;;  %v1957_v10 = vmul.f32 1.442695, %v1929_v2  ;;  %v8577_v2 = vld [vmem:[%s10946_s12 + $0x790] sm:$0xff] }
 0x47c   :  { %5600 = vmatprep.subr.mxu1 %v2141_v12  ;;  %5566 = vmatpush3.msra.mxu0 %v2093_v13  ;;  %v8469_v42 = vld [vmem:[%s10946_s12 + $0x738] sm:$0xff]  ;;  %v8474_v12 = vld [vmem:[%s10946_s12 + $0x6b0] sm:$0xff]  ;;  %v1961_v13 = vmul.f32 1.442695, %v1931_v37 }
 0x47d   :  { %5601 = vmatpush3.msra.mxu1 %v2125_v15  ;;  %2566 = vmatmul.mubr.f32.vlgmr.msra.gmra.mxu0 %v7912_v45  ;;  %v2171_v45 = vld [vmem:[%s10946_s12 + $0x670] sm:$0xff]  ;;  %6499 = vpow2.f32 %v1957_v10  ;;  %v8601_v10 = vld [vmem:[%s10946_s12 + $0x788] sm:$0xff] }
 0x47e   :  { %2636 = vmatmul.mubr.f32.vlgmr.msra.gmra.mxu1 %v7924_v3  ;;  %5605 = vmatprep.subr.mxu0 %v2188_v16  ;;  %v2203_v3 = vld [vmem:[%s10946_s12 + $0x770] sm:$0xff]  ;;  %6501 = vpow2.f32 %v1961_v13  ;;  %11017 = vst [vmem:[#allocation28_spill] sm:$0xff] %v8601_v10  ;;  %v8606_v13 = vld [vmem:[%s10946_s12 + $0x608] sm:$0xff] }
 0x47f   :  { %5640 = vmatprep.subr.mxu1 %v2220_v17  ;;  %5606 = vmatpush3.msra.mxu0 %v2172_v18  ;;  %v8481_v15 = vld [vmem:[%s10946_s12 + $0x7b0] sm:$0xff]  ;;  %v2797_v17 = vmul.f32 1.442695, %v2792_v38  ;;  %11018 = vst [vmem:[#allocation29_spill] sm:$0xff] %v8606_v13 }
 0x480   :  { %2705 = vmatprep.mubr.f32.mxu0 %v8310_v21  ;;  %5641 = vmatpush3.msra.mxu1 %v2204_v19  ;;  %v8486_v16 = vld [vmem:[%s10946_s12 + $0x630] sm:$0xff]  ;;  %v8498_v19 = vld [vmem:[%s10946_s12 + $0x6a8] sm:$0xff] }
 0x481   :  { %2775 = vmatprep.mubr.f32.mxu1 %v8318_v39  ;;  %5607 = vmatprep.subr.mxu0 %v2187_v33  ;;  %v8493_v18 = vld [vmem:[%s10946_s12 + $0x730] sm:$0xff]  ;;  %v2801_v33 = vmul.f32 1.442695, %v2794_v6  ;;  %6503 = vpow2.f32 %v2797_v17  ;;  %v8594_v6 = vld [vmem:[%s10946_s12 + $0x688] sm:$0xff] }
 0x482   :  { %5642 = vmatprep.subr.mxu1 %v2219_v22  ;;  %5608 = vmatpush3.msra.mxu0 %v2171_v45  ;;  %v8505_v22 = vld [vmem:[%s10946_s12 + $0x7a8] sm:$0xff]  ;;  %v8582_v37 = vld [vmem:[%s10946_s12 + $0x610] sm:$0xff] }
 0x483   :  { %5643 = vmatpush3.msra.mxu1 %v2203_v3  ;;  %5609 = vmatprep.subr.mxu0 %v2186_v40  ;;  %v8510_v45 = vld [vmem:[%s10946_s12 + $0x628] sm:$0xff]  ;;  %v8522_v40 = vld [vmem:[%s10946_s12 + $0x6a0] sm:$0xff]  ;;  %6505 = vpow2.f32 %v2801_v33  ;;  %v8589_v38 = vld [vmem:[%s10946_s12 + $0x710] sm:$0xff] }
 0x484   :  { %5644 = vmatprep.subr.mxu1 %v2218_v20  ;;  %5610 = vmatpush3.msra.mxu0 %v2170_v8  ;;  %v8517_v3 = vld [vmem:[%s10946_s12 + $0x728] sm:$0xff]  ;;  %v8529_v20 = vld [vmem:[%s10946_s12 + $0x7a0] sm:$0xff] }
 0x485   :  { %5645 = vmatpush3.msra.mxu1 %v2202_v47  ;;  %5611 = vmatprep.subr.mxu0 %v2185_v9  ;;  %v8534_v8 = vld [vmem:[%s10946_s12 + $0x620] sm:$0xff]  ;;  %v8546_v9 = vld [vmem:[%s10946_s12 + $0x698] sm:$0xff]  ;;  %v8613_v17 = vld [vmem:[%s10946_s12 + $0x708] sm:$0xff] }
 0x486   :  { %5646 = vmatprep.subr.mxu1 %v2217_v48  ;;  %5612 = vmatpush3.msra.mxu0 %v2169_v51  ;;  %v8541_v47 = vld [vmem:[%s10946_s12 + $0x720] sm:$0xff]  ;;  %v8553_v48 = vld [vmem:[%s10946_s12 + $0x798] sm:$0xff]  ;;  %11019 = vst [vmem:[#allocation30_spill] sm:$0xff] %v8613_v17 }
 0x487   :  { %5647 = vmatpush3.msra.mxu1 %v2201_v54  ;;  %5613 = vmatprep.subr.mxu0 %v2184_v55  ;;  %v8558_v51 = vld [vmem:[%s10946_s12 + $0x618] sm:$0xff]  ;;  %v8570_v55 = vld [vmem:[%s10946_s12 + $0x690] sm:$0xff]  ;;  %v8618_v33 = vld [vmem:[%s10946_s12 + $0x680] sm:$0xff] }
 0x488   :  { %5648 = vmatprep.subr.mxu1 %v8355_v56  ;;  %5614 = vmatpush3.msra.mxu0 %v8360_v46  ;;  %v8565_v54 = vld [vmem:[%s10946_s12 + $0x718] sm:$0xff]  ;;  %11020 = vst [vmem:[#allocation31_spill] sm:$0xff] %v8618_v33 }
 0x489   :  { %5649 = vmatpush3.msra.mxu1 %v8365_v53  ;;  %5615 = vmatprep.subr.mxu0 %v8370_v58 }
 0x48a   :  { %5650 = vmatprep.subr.mxu1 %v8375_v23  ;;  %5616 = vmatpush3.msra.mxu0 %v8380_v57  ;;  %v8644_v30 = vpop.eup %6499 }
 0x48b   :  { %5651 = vmatpush3.msra.mxu1 %v8387_v61  ;;  %5617 = vmatprep.subr.mxu0 %v8392_v31  ;;  %v8656_v7 = vpop.eup %6501 }
 0x48c   :  { %5652 = vmatprep.subr.mxu1 %v8401_v24  ;;  %5618 = vmatpush3.msra.mxu0 %v8406_v29 }
 0x48d   :  { %5653 = vmatpush3.msra.mxu1 %v8415_v27  ;;  %5619 = vmatprep.subr.mxu0 %v8420_v4 }
 0x48e   :  { %5654 = vmatprep.subr.mxu1 %v8429_v59  ;;  %5620 = vmatpush3.msra.mxu0 %v8434_v5 }
 0x48f   :  { %5655 = vmatpush3.msra.mxu1 %v8443_v60  ;;  %5621 = vmatprep.subr.mxu0 %v8448_v50 }
 0x490   :  { %5656 = vmatprep.subr.mxu1 %v8457_v41  ;;  %5622 = vmatpush3.msra.mxu0 %v8462_v35 }
 0x491   :  { %5657 = vmatpush3.msra.mxu1 %v8469_v42  ;;  %5623 = vmatprep.subr.mxu0 %v8474_v12 }
 0x492   :  { %5658 = vmatprep.subr.mxu1 %v8481_v15  ;;  %5624 = vmatpush3.msra.mxu0 %v8486_v16 }
 0x493   :  { %5659 = vmatpush3.msra.mxu1 %v8493_v18  ;;  %5625 = vmatprep.subr.mxu0 %v8498_v19 }
 0x494   :  { %5660 = vmatprep.subr.mxu1 %v8505_v22  ;;  %5626 = vmatpush3.msra.mxu0 %v8510_v45 }
 0x495   :  { %5661 = vmatpush3.msra.mxu1 %v8517_v3  ;;  %5627 = vmatprep.subr.mxu0 %v8522_v40 }
 0x496   :  { %5662 = vmatprep.subr.mxu1 %v8529_v20  ;;  %5628 = vmatpush3.msra.mxu0 %v8534_v8 }
 0x497   :  { %5663 = vmatpush3.msra.mxu1 %v8541_v47  ;;  %5629 = vmatprep.subr.mxu0 %v8546_v9 }
 0x498   :  { %5664 = vmatprep.subr.mxu1 %v8553_v48  ;;  %5630 = vmatpush3.msra.mxu0 %v8558_v51 }
 0x499   :  { %5665 = vmatpush3.msra.mxu1 %v8565_v54  ;;  %5631 = vmatprep.subr.mxu0 %v8570_v55 }
 0x49a   :  { %5666 = vmatprep.subr.mxu1 %v8577_v2  ;;  %5632 = vmatpush3.msra.mxu0 %v8582_v37 }
 0x49b   :  { %5667 = vmatpush3.msra.mxu1 %v8589_v38  ;;  %5633 = vmatprep.subr.mxu0 %v8594_v6 }
 0x49c   :  { %5668 = vmatprep.subr.mxu1 %v8601_v10  ;;  %5634 = vmatpush3.msra.mxu0 %v8606_v13  ;;  %v2793_v10 = vsub.f32 %v7785_v44, %v8394_v62  ;;  %v2811_v44 = vld [vmem:[%s10947_s13 + $0x40] sm:$0xff] }
 0x49d   :  { %5669 = vmatpush3.msra.mxu1 %v8613_v17  ;;  %5635 = vmatprep.subr.mxu0 %v8618_v33  ;;  %v8669_v33 = vpop.eup %6503  ;;  %v2817_v17 = vld [vmem:[%s10947_s13 + $0x70] sm:$0xff] }
 0x49e   :  { %5670 = vmatprep.subr.mxu1 %v8625_v0  ;;  %5636 = vmatpush3.msra.mxu0 %v8630_v34  ;;  %v8663_v0 = vld [vmem:[%s10947_s13 + $0x178] sm:$0xff]  ;;  %v2833_v34 = vld [vmem:[%s10947_s13 + $0xf0] sm:$0xff]  ;;  %11026 = vst [vmem:[#allocation37_spill] sm:$0xff] %v8669_v33  ;;  %v8680_v13 = vpop.eup %6505 }
 0x49f   :  { %5671 = vmatpush3.msra.mxu1 %v8637_v32  ;;  %2706 = vmatmul.mubr.f32.vlgmr.msra.gmra.mxu0 %v8644_v30  ;;  %11025 = vst [vmem:[#allocation36_spill] sm:$0xff] %v8663_v0  ;;  %v8675_v32 = vld [vmem:[%s10947_s13 + $0x1f0] sm:$0xff]  ;;  %11028 = vst [vmem:[#allocation39_spill] sm:$0xff] %v8680_v13 }
 0x4a0   :  { %2776 = vmatmul.mubr.f32.vlgmr.msra.gmra.mxu1 %v8656_v7  ;;  %5675 = vmatprep.subr.mxu0 %v2834_v63  ;;  %11027 = vst [vmem:[#allocation38_spill] sm:$0xff] %v8675_v32  ;;  %v8687_v63 = vld [vmem:[%s10947_s13 + $0x170] sm:$0xff] }
 0x4a1   :  { %5710 = vmatprep.subr.mxu1 %v8651_v1  ;;  %5676 = vmatpush3.msra.mxu0 %v2818_v52  ;;  %11029 = vst [vmem:[#allocation40_spill] sm:$0xff] %v8687_v63  ;;  %v2832_v52 = vld [vmem:[%s10947_s13 + $0xe8] sm:$0xff] }
 0x4a2   :  { %2931 = vmatprep.mubr.f32.mxu0 %v8669_v33  ;;  %5711 = vmatpush3.msra.mxu1 %v8663_v0  ;;  %v8696_v1 = vld [vmem:[%s10947_s13 + $0x1e8] sm:$0xff] }
 0x4a3   :  { %3001 = vmatprep.mubr.f32.mxu1 %v8680_v13  ;;  %5677 = vmatprep.subr.mxu0 %v2833_v34  ;;  %11030 = vst [vmem:[#allocation41_spill] sm:$0xff] %v8696_v1  ;;  %v2816_v33 = vld [vmem:[%s10947_s13 + $0x68] sm:$0xff]  ;;  %v2831_v34 = vld [vmem:[%s10947_s13 + $0xe0] sm:$0xff] }
 0x4a4   :  { %5712 = vmatprep.subr.mxu1 %v8675_v32  ;;  %5678 = vmatpush3.msra.mxu0 %v2817_v17  ;;  %v8705_v0 = vld [vmem:[%s10947_s13 + $0x168] sm:$0xff]  ;;  %v8714_v13 = vld [vmem:[%s10947_s13 + $0x1e0] sm:$0xff] }
 0x4a5   :  { %11031 = vst [vmem:[#allocation42_spill] sm:$0xff] %v8705_v0  ;;  %5713 = vmatpush3.msra.mxu1 %v8687_v63  ;;  %5679 = vmatprep.subr.mxu0 %v2832_v52  ;;  %11032 = vst [vmem:[#allocation43_spill] sm:$0xff] %v8714_v13  ;;  %v2815_v17 = vld [vmem:[%s10947_s13 + $0x60] sm:$0xff]  ;;  %v2830_v52 = vld [vmem:[%s10947_s13 + $0xd8] sm:$0xff] }
 0x4a6   :  { %5714 = vmatprep.subr.mxu1 %v8696_v1  ;;  %5680 = vmatpush3.msra.mxu0 %v2816_v33  ;;  %v8723_v32 = vld [vmem:[%s10947_s13 + $0x160] sm:$0xff]  ;;  %v8732_v63 = vld [vmem:[%s10947_s13 + $0x1d8] sm:$0xff] }
 0x4a7   :  { %11033 = vst [vmem:[#allocation44_spill] sm:$0xff] %v8723_v32  ;;  %5715 = vmatpush3.msra.mxu1 %v8705_v0  ;;  %5681 = vmatprep.subr.mxu0 %v2831_v34  ;;  %11034 = vst [vmem:[#allocation45_spill] sm:$0xff] %v8732_v63  ;;  %v2814_v33 = vld [vmem:[%s10947_s13 + $0x58] sm:$0xff]  ;;  %v2829_v34 = vld [vmem:[%s10947_s13 + $0xd0] sm:$0xff] }
 0x4a8   :  { %5716 = vmatprep.subr.mxu1 %v8714_v13  ;;  %5682 = vmatpush3.msra.mxu0 %v2815_v17  ;;  %v8741_v1 = vld [vmem:[%s10947_s13 + $0x158] sm:$0xff]  ;;  %v8750_v0 = vld [vmem:[%s10947_s13 + $0x1d0] sm:$0xff] }
 0x4a9   :  { %11035 = vst [vmem:[#allocation46_spill] sm:$0xff] %v8741_v1  ;;  %5717 = vmatpush3.msra.mxu1 %v8723_v32  ;;  %5683 = vmatprep.subr.mxu0 %v2830_v52  ;;  %v2813_v17 = vld [vmem:[%s10947_s13 + $0x50] sm:$0xff]  ;;  %v2828_v52 = vld [vmem:[%s10947_s13 + $0xc8] sm:$0xff]  ;;  %v2791_v32 = vsub.f32 %v7783_v28, %v8394_v62  ;;  %v8799_v62 = vld [vmem:[%s10947_s13 + $0x140] sm:$0xff] }
 0x4aa   :  { %5718 = vmatprep.subr.mxu1 %v8732_v63  ;;  %5684 = vmatpush3.msra.mxu0 %v2814_v33  ;;  %v8759_v13 = vld [vmem:[%s10947_s13 + $0x150] sm:$0xff]  ;;  %v8770_v63 = vld [vmem:[%s10947_s13 + $0x1c8] sm:$0xff]  ;;  %11040 = vst [vmem:[#allocation51_spill] sm:$0xff] %v8799_v62 }
 0x4ab   :  { %11036 = vst [vmem:[#allocation47_spill] sm:$0xff] %v8759_v13  ;;  %5719 = vmatpush3.msra.mxu1 %v8741_v1  ;;  %5685 = vmatprep.subr.mxu0 %v2829_v34  ;;  %11037 = vst [vmem:[#allocation48_spill] sm:$0xff] %v8770_v63  ;;  %v2812_v33 = vld [vmem:[%s10947_s13 + $0x48] sm:$0xff]  ;;  %v2827_v34 = vld [vmem:[%s10947_s13 + $0xc0] sm:$0xff] }
 0x4ac   :  { %5720 = vmatprep.subr.mxu1 %v8750_v0  ;;  %5686 = vmatpush3.msra.mxu0 %v2813_v17  ;;  %v8781_v28 = vld [vmem:[%s10947_s13 + $0x148] sm:$0xff]  ;;  %v8790_v1 = vld [vmem:[%s10947_s13 + $0x1c0] sm:$0xff]  ;;  %v2826_v17 = vld [vmem:[%s10947_s13 + $0xb8] sm:$0xff] }
 0x4ad   :  { %11038 = vst [vmem:[#allocation49_spill] sm:$0xff] %v8781_v28  ;;  %5721 = vmatpush3.msra.mxu1 %v8759_v13  ;;  %5687 = vmatprep.subr.mxu0 %v2828_v52  ;;  %11039 = vst [vmem:[#allocation50_spill] sm:$0xff] %v8790_v1  ;;  %v2795_v52 = vmul.f32 1.442695, %v2791_v32  ;;  %v8808_v13 = vld [vmem:[%s10947_s13 + $0x1b8] sm:$0xff] }
 0x4ae   :  { %5722 = vmatprep.subr.mxu1 %v8770_v63  ;;  %5688 = vmatpush3.msra.mxu0 %v2812_v33  ;;  %11041 = vst [vmem:[#allocation52_spill] sm:$0xff] %v8808_v13  ;;  %v8813_v33 = vld [vmem:[%s10947_s13 + $0x38] sm:$0xff]  ;;  %v2799_v63 = vmul.f32 1.442695, %v2793_v10  ;;  %v8830_v10 = vld [vmem:[%s10947_s13 + $0x1b0] sm:$0xff] }
 0x4af   :  { %5723 = vmatpush3.msra.mxu1 %v8781_v28  ;;  %5689 = vmatprep.subr.mxu0 %v2827_v34  ;;  %11042 = vst [vmem:[#allocation53_spill] sm:$0xff] %v8813_v33  ;;  %v8819_v32 = vld [vmem:[%s10947_s13 + $0x138] sm:$0xff]  ;;  %v8824_v34 = vld [vmem:[%s10947_s13 + $0xb0] sm:$0xff]  ;;  %11045 = vst [vmem:[#allocation56_spill] sm:$0xff] %v8830_v10  ;;  %6507 = vpow2.f32 %v2795_v52 }
 0x4b0   :  { %5724 = vmatprep.subr.mxu1 %v8790_v1  ;;  %5690 = vmatpush3.msra.mxu0 %v2811_v44  ;;  %11043 = vst [vmem:[#allocation54_spill] sm:$0xff] %v8819_v32  ;;  %11044 = vst [vmem:[#allocation55_spill] sm:$0xff] %v8824_v34  ;;  %v8835_v44 = vld [vmem:[%s10947_s13 + $0x30] sm:$0xff]  ;;  %6509 = vpow2.f32 %v2799_v63  ;;  %v8866_v52 = vld [vmem:[%s10947_s13 + $0x128] sm:$0xff] }
 0x4b1   :  { %5725 = vmatpush3.msra.mxu1 %v8799_v62  ;;  %5691 = vmatprep.subr.mxu0 %v2826_v17  ;;  %11046 = vst [vmem:[#allocation57_spill] sm:$0xff] %v8835_v44  ;;  %v8842_v1 = vld [vmem:[%s10947_s13 + $0x130] sm:$0xff]  ;;  %v8847_v17 = vld [vmem:[%s10947_s13 + $0xa8] sm:$0xff]  ;;  %11051 = vst [vmem:[#allocation62_spill] sm:$0xff] %v8866_v52 }
 0x4b2   :  { %5726 = vmatprep.subr.mxu1 %v8808_v13  ;;  %5692 = vmatpush3.msra.mxu0 %v8813_v33  ;;  %11047 = vst [vmem:[#allocation58_spill] sm:$0xff] %v8842_v1  ;;  %11048 = vst [vmem:[#allocation59_spill] sm:$0xff] %v8847_v17  ;;  %v8854_v13 = vld [vmem:[%s10947_s13 + $0x1a8] sm:$0xff]  ;;  %v8878_v63 = vld [vmem:[%s10947_s13 + $0x1a0] sm:$0xff] }
 0x4b3   :  { %5727 = vmatpush3.msra.mxu1 %v8819_v32  ;;  %5693 = vmatprep.subr.mxu0 %v8824_v34  ;;  %11049 = vst [vmem:[#allocation60_spill] sm:$0xff] %v8854_v13  ;;  %v8859_v33 = vld [vmem:[%s10947_s13 + $0x28] sm:$0xff]  ;;  %v8871_v34 = vld [vmem:[%s10947_s13 + $0xa0] sm:$0xff]  ;;  %11053 = vst [vmem:[#allocation64_spill] sm:$0xff] %v8878_v63 }
 0x4b4   :  { %11050 = vst [vmem:[#allocation61_spill] sm:$0xff] %v8859_v33  ;;  %5728 = vmatprep.subr.mxu1 %v8830_v10  ;;  %5694 = vmatpush3.msra.mxu0 %v8835_v44  ;;  %11052 = vst [vmem:[#allocation63_spill] sm:$0xff] %v8871_v34  ;;  %v8883_v44 = vld [vmem:[%s10947_s13 + $0x20] sm:$0xff]  ;;  %v3009_v32 = vld [vmem:[%s10936_s2 + $0x8] sm:$0x77] }
 0x4b5   :  { %5729 = vmatpush3.msra.mxu1 %v8842_v1  ;;  %5695 = vmatprep.subr.mxu0 %v8847_v17  ;;  %11054 = vst [vmem:[#allocation65_spill] sm:$0xff] %v8883_v44  ;;  %v8890_v1 = vld [vmem:[%s10947_s13 + $0x120] sm:$0xff]  ;;  %v8895_v17 = vld [vmem:[%s10947_s13 + $0x98] sm:$0xff]  ;;  %v9000_v62 = vmul.f32 %v7873_v49, %v3009_v32 }
 0x4b6   :  { %5730 = vmatprep.subr.mxu1 %v8854_v13  ;;  %5696 = vmatpush3.msra.mxu0 %v8859_v33  ;;  %11055 = vst [vmem:[#allocation66_spill] sm:$0xff] %v8890_v1  ;;  %11056 = vst [vmem:[#allocation67_spill] sm:$0xff] %v8895_v17  ;;  %v8902_v13 = vld [vmem:[%s10947_s13 + $0x198] sm:$0xff]  ;;  %v3008_v10 = vld [vmem:[%s10936_s2] sm:$0x77] }
 0x4b7   :  { %5731 = vmatpush3.msra.mxu1 %v8866_v52  ;;  %5697 = vmatprep.subr.mxu0 %v8871_v34  ;;  %11057 = vst [vmem:[#allocation68_spill] sm:$0xff] %v8902_v13  ;;  %v8907_v33 = vld [vmem:[%s10947_s13 + $0x18] sm:$0xff]  ;;  %v8919_v34 = vld [vmem:[%s10947_s13 + $0x90] sm:$0xff] }
 0x4b8   :  { %11058 = vst [vmem:[#allocation69_spill] sm:$0xff] %v8907_v33  ;;  %5732 = vmatprep.subr.mxu1 %v8878_v63  ;;  %5698 = vmatpush3.msra.mxu0 %v8883_v44  ;;  %v8914_v52 = vld [vmem:[%s10947_s13 + $0x118] sm:$0xff]  ;;  %11060 = vst [vmem:[#allocation71_spill] sm:$0xff] %v8919_v34  ;;  %v8926_v63 = vld [vmem:[%s10947_s13 + $0x190] sm:$0xff] }
 0x4b9   :  { %11059 = vst [vmem:[#allocation70_spill] sm:$0xff] %v8914_v52  ;;  %5733 = vmatpush3.msra.mxu1 %v8890_v1  ;;  %5699 = vmatprep.subr.mxu0 %v8895_v17  ;;  %11061 = vst [vmem:[#allocation72_spill] sm:$0xff] %v8926_v63  ;;  %v8931_v44 = vld [vmem:[%s10947_s13 + $0x10] sm:$0xff]  ;;  %v8943_v17 = vld [vmem:[%s10947_s13 + $0x88] sm:$0xff] }
 0x4ba   :  { %11062 = vst [vmem:[#allocation73_spill] sm:$0xff] %v8931_v44  ;;  %5734 = vmatprep.subr.mxu1 %v8902_v13  ;;  %5700 = vmatpush3.msra.mxu0 %v8907_v33  ;;  %v8938_v1 = vld [vmem:[%s10947_s13 + $0x110] sm:$0xff]  ;;  %11064 = vst [vmem:[#allocation75_spill] sm:$0xff] %v8943_v17  ;;  %v8950_v13 = vld [vmem:[%s10947_s13 + $0x188] sm:$0xff] }
 0x4bb   :  { %11063 = vst [vmem:[#allocation74_spill] sm:$0xff] %v8938_v1  ;;  %5735 = vmatpush3.msra.mxu1 %v8914_v52  ;;  %5701 = vmatprep.subr.mxu0 %v8919_v34  ;;  %v8955_v33 = vld [vmem:[%s10947_s13 + $0x8] sm:$0xff]  ;;  %v8970_v52 = vld [vmem:[%s10947_s13 + $0x80] sm:$0xff]  ;;  %v6516_v32 = vld [vmem:[%s10946_s12 + $0x1f8] sm:$0xff] }
 0x4bc   :  { %11065 = vst [vmem:[#allocation76_spill] sm:$0xff] %v8955_v33  ;;  %5736 = vmatprep.subr.mxu1 %v8926_v63  ;;  %5702 = vmatpush3.msra.mxu0 %v8931_v44  ;;  %v8965_v34 = vld [vmem:[%s10947_s13 + $0x108] sm:$0xff]  ;;  %v8980_v44 = vld [vmem:[%s10947_s13 + $0x180] sm:$0xff]  ;;  %v9002_v28 = vpop.eup %6507 }
 0x4bd   :  { %5737 = vmatpush3.msra.mxu1 %v8938_v1  ;;  %5703 = vmatprep.subr.mxu0 %v8943_v17  ;;  %v8985_v63 = vld [vmem:[%s10947_s13] sm:$0xff]  ;;  %v8995_v17 = vmul.f32 %v7858_v43, %v3008_v10  ;;  %11067 = vst [vmem:[#allocation78_spill] sm:$0xff] %v9002_v28  ;;  %v6515_v43 = vld [vmem:[%s10946_s12 + $0xf8] sm:$0xff] }
 0x4be   :  { %11066 = vst [vmem:[#allocation77_spill] sm:$0xff] %v8985_v63  ;;  %5738 = vmatprep.subr.mxu1 %v8950_v13  ;;  %5704 = vmatpush3.msra.mxu0 %v8955_v33  ;;  %v8992_v1 = vld [vmem:[%s10947_s13 + $0x100] sm:$0xff]  ;;  %v9006_v33 = vpop.eup %6509  ;;  %v6517_v10 = vld [vmem:[%s10946_s12 + $0x78] sm:$0xff] }
 0x4bf   :  { %5739 = vmatpush3.msra.mxu1 %v8965_v34  ;;  %5705 = vmatprep.subr.mxu0 %v8970_v52  ;;  %11068 = vst [vmem:[#allocation79_spill] sm:$0xff] %v9006_v33  ;;  %v3128_v49 = vcombine.high %v8995_v17, %v8995_v17 }
 0x4c0   :  { %5740 = vmatprep.subr.mxu1 %v8980_v44  ;;  %5706 = vmatpush3.msra.mxu0 %v8985_v63 }
 0x4c1   :  { %5741 = vmatpush3.msra.mxu1 %v8992_v1  ;;  %2932 = vmatmul.mubr.f32.vlgmr.msra.gmra.mxu0 %v9002_v28  ;;  %v6519_v28 = vld [vmem:[%s10946_s12 + $0xf0] sm:$0xff] }
 0x4c2   :  { %3002 = vmatmul.mubr.f32.vlgmr.msra.gmra.mxu1 %v9006_v33  ;;  %5745 = vmatprep.subr.mxu0 %v6515_v43  ;;  %v3129_v33 = vcombine.high %v9000_v62, %v9000_v62  ;;  %v6518_v43 = vld [vmem:[%s10946_s12 + $0x178] sm:$0xff] }
 0x4c3   :  { %5780 = vmatprep.subr.mxu1 %v6516_v32  ;;  %5746 = vmatpush3.msra.mxu0 %v6517_v10  ;;  %v6520_v32 = vld [vmem:[%s10946_s12 + $0x1f0] sm:$0xff] }
 0x4c4   :  { %3208 = vmatprep.mubr.f32.mxu0 %v3128_v49  ;;  %5781 = vmatpush3.msra.mxu1 %v6518_v43  ;;  %v6521_v49 = vld [vmem:[%s10946_s12 + $0x70] sm:$0xff]  ;;  %v6525_v43 = vld [vmem:[%s10946_s12 + $0x68] sm:$0xff] }
 0x4c5   :  { %3278 = vmatprep.mubr.f32.mxu1 %v3129_v33  ;;  %5747 = vmatprep.subr.mxu0 %v6519_v28  ;;  %v6522_v10 = vld [vmem:[%s10946_s12 + $0x170] sm:$0xff]  ;;  %v6523_v33 = vld [vmem:[%s10946_s12 + $0xe8] sm:$0xff] }
 0x4c6   :  { %5782 = vmatprep.subr.mxu1 %v6520_v32  ;;  %5748 = vmatpush3.msra.mxu0 %v6521_v49  ;;  %v6524_v28 = vld [vmem:[%s10946_s12 + $0x1e8] sm:$0xff]  ;;  %v6527_v49 = vld [vmem:[%s10946_s12 + $0xe0] sm:$0xff] }
 0x4c7   :  { %5783 = vmatpush3.msra.mxu1 %v6522_v10  ;;  %5749 = vmatprep.subr.mxu0 %v6523_v33  ;;  %v6526_v32 = vld [vmem:[%s10946_s12 + $0x168] sm:$0xff]  ;;  %v6528_v10 = vld [vmem:[%s10946_s12 + $0x1e0] sm:$0xff] }
 0x4c8   :  { %5784 = vmatprep.subr.mxu1 %v6524_v28  ;;  %5750 = vmatpush3.msra.mxu0 %v6525_v43  ;;  %v6529_v33 = vld [vmem:[%s10946_s12 + $0x60] sm:$0xff]  ;;  %v6531_v43 = vld [vmem:[%s10946_s12 + $0xd8] sm:$0xff] }
 0x4c9   :  { %5785 = vmatpush3.msra.mxu1 %v6526_v32  ;;  %5751 = vmatprep.subr.mxu0 %v6527_v49  ;;  %v6530_v28 = vld [vmem:[%s10946_s12 + $0x160] sm:$0xff]  ;;  %v6532_v32 = vld [vmem:[%s10946_s12 + $0x1d8] sm:$0xff] }
 0x4ca   :  { %5786 = vmatprep.subr.mxu1 %v6528_v10  ;;  %5752 = vmatpush3.msra.mxu0 %v6529_v33  ;;  %v6533_v49 = vld [vmem:[%s10946_s12 + $0x58] sm:$0xff]  ;;  %v6535_v33 = vld [vmem:[%s10946_s12 + $0xd0] sm:$0xff] }
 0x4cb   :  { %5787 = vmatpush3.msra.mxu1 %v6530_v28  ;;  %5753 = vmatprep.subr.mxu0 %v6531_v43  ;;  %v6534_v10 = vld [vmem:[%s10946_s12 + $0x158] sm:$0xff]  ;;  %v6536_v28 = vld [vmem:[%s10946_s12 + $0x1d0] sm:$0xff] }
 0x4cc   :  { %5788 = vmatprep.subr.mxu1 %v6532_v32  ;;  %5754 = vmatpush3.msra.mxu0 %v6533_v49  ;;  %v6537_v43 = vld [vmem:[%s10946_s12 + $0x50] sm:$0xff]  ;;  %v6539_v49 = vld [vmem:[%s10946_s12 + $0xc8] sm:$0xff] }
 0x4cd   :  { %5789 = vmatpush3.msra.mxu1 %v6534_v10  ;;  %5755 = vmatprep.subr.mxu0 %v6535_v33  ;;  %v6538_v32 = vld [vmem:[%s10946_s12 + $0x150] sm:$0xff]  ;;  %v6540_v10 = vld [vmem:[%s10946_s12 + $0x1c8] sm:$0xff] }
 0x4ce   :  { %5790 = vmatprep.subr.mxu1 %v6536_v28  ;;  %5756 = vmatpush3.msra.mxu0 %v6537_v43  ;;  %v6541_v33 = vld [vmem:[%s10946_s12 + $0x48] sm:$0xff]  ;;  %v6543_v43 = vld [vmem:[%s10946_s12 + $0xc0] sm:$0xff] }
 0x4cf   :  { %5791 = vmatpush3.msra.mxu1 %v6538_v32  ;;  %5757 = vmatprep.subr.mxu0 %v6539_v49  ;;  %v6542_v28 = vld [vmem:[%s10946_s12 + $0x148] sm:$0xff]  ;;  %v6544_v32 = vld [vmem:[%s10946_s12 + $0x1c0] sm:$0xff] }
 0x4d0   :  { %5792 = vmatprep.subr.mxu1 %v6540_v10  ;;  %5758 = vmatpush3.msra.mxu0 %v6541_v33  ;;  %v6545_v49 = vld [vmem:[%s10946_s12 + $0x40] sm:$0xff]  ;;  %v6547_v33 = vld [vmem:[%s10946_s12 + $0xb8] sm:$0xff] }
 0x4d1   :  { %5793 = vmatpush3.msra.mxu1 %v6542_v28  ;;  %5759 = vmatprep.subr.mxu0 %v6543_v43  ;;  %v6546_v10 = vld [vmem:[%s10946_s12 + $0x140] sm:$0xff]  ;;  %v6548_v28 = vld [vmem:[%s10946_s12 + $0x1b8] sm:$0xff] }
 0x4d2   :  { %5794 = vmatprep.subr.mxu1 %v6544_v32  ;;  %5760 = vmatpush3.msra.mxu0 %v6545_v49  ;;  %v6549_v43 = vld [vmem:[%s10946_s12 + $0x38] sm:$0xff]  ;;  %v6551_v49 = vld [vmem:[%s10946_s12 + $0xb0] sm:$0xff] }
 0x4d3   :  { %5795 = vmatpush3.msra.mxu1 %v6546_v10  ;;  %5761 = vmatprep.subr.mxu0 %v6547_v33  ;;  %v6550_v32 = vld [vmem:[%s10946_s12 + $0x138] sm:$0xff]  ;;  %v6552_v10 = vld [vmem:[%s10946_s12 + $0x1b0] sm:$0xff] }
 0x4d4   :  { %5796 = vmatprep.subr.mxu1 %v6548_v28  ;;  %5762 = vmatpush3.msra.mxu0 %v6549_v43  ;;  %v6553_v33 = vld [vmem:[%s10946_s12 + $0x30] sm:$0xff]  ;;  %v6555_v43 = vld [vmem:[%s10946_s12 + $0xa8] sm:$0xff] }
 0x4d5   :  { %5797 = vmatpush3.msra.mxu1 %v6550_v32  ;;  %5763 = vmatprep.subr.mxu0 %v6551_v49  ;;  %v6554_v28 = vld [vmem:[%s10946_s12 + $0x130] sm:$0xff]  ;;  %v6556_v32 = vld [vmem:[%s10946_s12 + $0x1a8] sm:$0xff] }
 0x4d6   :  { %5798 = vmatprep.subr.mxu1 %v6552_v10  ;;  %5764 = vmatpush3.msra.mxu0 %v6553_v33  ;;  %v6557_v49 = vld [vmem:[%s10946_s12 + $0x28] sm:$0xff]  ;;  %v6559_v33 = vld [vmem:[%s10946_s12 + $0xa0] sm:$0xff] }
 0x4d7   :  { %5799 = vmatpush3.msra.mxu1 %v6554_v28  ;;  %5765 = vmatprep.subr.mxu0 %v6555_v43  ;;  %v6558_v10 = vld [vmem:[%s10946_s12 + $0x128] sm:$0xff]  ;;  %v6560_v28 = vld [vmem:[%s10946_s12 + $0x1a0] sm:$0xff] }
 0x4d8   :  { %5800 = vmatprep.subr.mxu1 %v6556_v32  ;;  %5766 = vmatpush3.msra.mxu0 %v6557_v49  ;;  %v6561_v43 = vld [vmem:[%s10946_s12 + $0x20] sm:$0xff]  ;;  %v6563_v49 = vld [vmem:[%s10946_s12 + $0x98] sm:$0xff] }
 0x4d9   :  { %5801 = vmatpush3.msra.mxu1 %v6558_v10  ;;  %5767 = vmatprep.subr.mxu0 %v6559_v33  ;;  %v6562_v32 = vld [vmem:[%s10946_s12 + $0x120] sm:$0xff]  ;;  %v6564_v10 = vld [vmem:[%s10946_s12 + $0x198] sm:$0xff] }
 0x4da   :  { %5802 = vmatprep.subr.mxu1 %v6560_v28  ;;  %5768 = vmatpush3.msra.mxu0 %v6561_v43  ;;  %v6565_v33 = vld [vmem:[%s10946_s12 + $0x18] sm:$0xff]  ;;  %v6567_v43 = vld [vmem:[%s10946_s12 + $0x90] sm:$0xff] }
 0x4db   :  { %5803 = vmatpush3.msra.mxu1 %v6562_v32  ;;  %5769 = vmatprep.subr.mxu0 %v6563_v49  ;;  %v6566_v28 = vld [vmem:[%s10946_s12 + $0x118] sm:$0xff]  ;;  %v3010_v32 = vld [vmem:[%s10936_s2 + $0x10] sm:$0x77] }
 0x4dc   :  { %5804 = vmatprep.subr.mxu1 %v6564_v10  ;;  %5770 = vmatpush3.msra.mxu0 %v6565_v33  ;;  %v6568_v49 = vld [vmem:[%s10946_s12 + $0x190] sm:$0xff]  ;;  %v3011_v33 = vld [vmem:[%s10936_s2 + $0x18] sm:$0x77]  ;;  %v9199_v63 = vmul.f32 %v7908_v25, %v3010_v32  ;;  %v6577_v25 = vld [vmem:[%s10946_s12] sm:$0xff] }
 0x4dd   :  { %5805 = vmatpush3.msra.mxu1 %v6566_v28  ;;  %5771 = vmatprep.subr.mxu0 %v6567_v43  ;;  %v6569_v10 = vld [vmem:[%s10946_s12 + $0x10] sm:$0xff]  ;;  %v6571_v43 = vld [vmem:[%s10946_s12 + $0x88] sm:$0xff]  ;;  %v6578_v32 = vld [vmem:[%s10946_s12 + $0x100] sm:$0xff] }
 0x4de   :  { %5806 = vmatprep.subr.mxu1 %v6568_v49  ;;  %5772 = vmatpush3.msra.mxu0 %v6569_v10  ;;  %v6570_v28 = vld [vmem:[%s10946_s12 + $0x110] sm:$0xff]  ;;  %v6572_v49 = vld [vmem:[%s10946_s12 + $0x188] sm:$0xff] }
 0x4df   :  { %5807 = vmatpush3.msra.mxu1 %v6570_v28  ;;  %5773 = vmatprep.subr.mxu0 %v6571_v43  ;;  %v6573_v10 = vld [vmem:[%s10946_s12 + $0x8] sm:$0xff]  ;;  %v6575_v43 = vld [vmem:[%s10946_s12 + $0x80] sm:$0xff] }
 0x4e0   :  { %5808 = vmatprep.subr.mxu1 %v6572_v49  ;;  %5774 = vmatpush3.msra.mxu0 %v6573_v10  ;;  %v6574_v28 = vld [vmem:[%s10946_s12 + $0x108] sm:$0xff]  ;;  %v9208_v49 = vmul.f32 %v7920_v26, %v3011_v33  ;;  %v6576_v10 = vld [vmem:[%s10946_s12 + $0x180] sm:$0xff]  ;;  %v6579_v26 = vld [vmem:[%s10946_s12 + $0x2f8] sm:$0xff]  ;;  %v3130_v33 = vcombine.high %v9199_v63, %v9199_v63 }
 0x4e1   :  { %5809 = vmatpush3.msra.mxu1 %v6574_v28  ;;  %5775 = vmatprep.subr.mxu0 %v6575_v43  ;;  %v6580_v28 = vld [vmem:[%s10946_s12 + $0x3f8] sm:$0xff] }
 0x4e2   :  { %5810 = vmatprep.subr.mxu1 %v6576_v10  ;;  %5776 = vmatpush3.msra.mxu0 %v6577_v25  ;;  %v6581_v43 = vld [vmem:[%s10946_s12 + $0x278] sm:$0xff]  ;;  %v6583_v10 = vld [vmem:[%s10946_s12 + $0x2f0] sm:$0xff] }
 0x4e3   :  { %5811 = vmatpush3.msra.mxu1 %v6578_v32  ;;  %3209 = vmatmul.mubr.f32.vlgmr.msra.gmra.mxu0 %v8995_v17  ;;  %v6582_v17 = vld [vmem:[%s10946_s12 + $0x378] sm:$0xff]  ;;  %v6584_v25 = vld [vmem:[%s10946_s12 + $0x3f0] sm:$0xff] }
 0x4e4   :  { %3279 = vmatmul.mubr.f32.vlgmr.msra.gmra.mxu1 %v9000_v62  ;;  %5815 = vmatprep.subr.mxu0 %v6579_v26  ;;  %v3131_v62 = vcombine.high %v9208_v49, %v9208_v49  ;;  %v6585_v32 = vld [vmem:[%s10946_s12 + $0x270] sm:$0xff] }
 0x4e5   :  { %5850 = vmatprep.subr.mxu1 %v6580_v28  ;;  %5816 = vmatpush3.msra.mxu0 %v6581_v43  ;;  %v6586_v26 = vld [vmem:[%s10946_s12 + $0x370] sm:$0xff]  ;;  %v6588_v28 = vld [vmem:[%s10946_s12 + $0x3e8] sm:$0xff] }
 0x4e6   :  { %3348 = vmatprep.mubr.f32.mxu0 %v3130_v33  ;;  %5851 = vmatpush3.msra.mxu1 %v6582_v17  ;;  %v6587_v33 = vld [vmem:[%s10946_s12 + $0x2e8] sm:$0xff]  ;;  %v6591_v17 = vld [vmem:[%s10946_s12 + $0x2e0] sm:$0xff] }
 0x4e7   :  { %3418 = vmatprep.mubr.f32.mxu1 %v3131_v62  ;;  %5817 = vmatprep.subr.mxu0 %v6583_v10  ;;  %v6589_v43 = vld [vmem:[%s10946_s12 + $0x268] sm:$0xff]  ;;  %v6592_v10 = vld [vmem:[%s10946_s12 + $0x3e0] sm:$0xff] }
 0x4e8   :  { %5852 = vmatprep.subr.mxu1 %v6584_v25  ;;  %5818 = vmatpush3.msra.mxu0 %v6585_v32  ;;  %v6590_v62 = vld [vmem:[%s10946_s12 + $0x368] sm:$0xff]  ;;  %v6593_v25 = vld [vmem:[%s10946_s12 + $0x260] sm:$0xff] }
 0x4e9   :  { %5853 = vmatpush3.msra.mxu1 %v6586_v26  ;;  %5819 = vmatprep.subr.mxu0 %v6587_v33  ;;  %v6594_v32 = vld [vmem:[%s10946_s12 + $0x360] sm:$0xff]  ;;  %v6595_v26 = vld [vmem:[%s10946_s12 + $0x2d8] sm:$0xff] }
 0x4ea   :  { %5854 = vmatprep.subr.mxu1 %v6588_v28  ;;  %5820 = vmatpush3.msra.mxu0 %v6589_v43  ;;  %v6596_v33 = vld [vmem:[%s10946_s12 + $0x3d8] sm:$0xff] }
 0x4eb   :  { %5855 = vmatpush3.msra.mxu1 %v6590_v62  ;;  %5821 = vmatprep.subr.mxu0 %v6591_v17  ;;  %v6597_v28 = vld [vmem:[%s10946_s12 + $0x258] sm:$0xff]  ;;  %v6599_v62 = vld [vmem:[%s10946_s12 + $0x2d0] sm:$0xff] }
 0x4ec   :  { %5856 = vmatprep.subr.mxu1 %v6592_v10  ;;  %5822 = vmatpush3.msra.mxu0 %v6593_v25  ;;  %v6598_v43 = vld [vmem:[%s10946_s12 + $0x358] sm:$0xff]  ;;  %v6600_v17 = vld [vmem:[%s10946_s12 + $0x3d0] sm:$0xff] }
 0x4ed   :  { %5857 = vmatpush3.msra.mxu1 %v6594_v32  ;;  %5823 = vmatprep.subr.mxu0 %v6595_v26  ;;  %v6601_v10 = vld [vmem:[%s10946_s12 + $0x250] sm:$0xff]  ;;  %v6603_v32 = vld [vmem:[%s10946_s12 + $0x2c8] sm:$0xff] }
 0x4ee   :  { %5858 = vmatprep.subr.mxu1 %v6596_v33  ;;  %5824 = vmatpush3.msra.mxu0 %v6597_v28  ;;  %v6602_v25 = vld [vmem:[%s10946_s12 + $0x350] sm:$0xff]  ;;  %v6604_v26 = vld [vmem:[%s10946_s12 + $0x3c8] sm:$0xff] }
 0x4ef   :  { %5859 = vmatpush3.msra.mxu1 %v6598_v43  ;;  %5825 = vmatprep.subr.mxu0 %v6599_v62  ;;  %v6605_v33 = vld [vmem:[%s10946_s12 + $0x248] sm:$0xff]  ;;  %v6607_v43 = vld [vmem:[%s10946_s12 + $0x2c0] sm:$0xff] }
 0x4f0   :  { %5860 = vmatprep.subr.mxu1 %v6600_v17  ;;  %5826 = vmatpush3.msra.mxu0 %v6601_v10  ;;  %v6606_v28 = vld [vmem:[%s10946_s12 + $0x348] sm:$0xff]  ;;  %v6608_v62 = vld [vmem:[%s10946_s12 + $0x3c0] sm:$0xff] }
 0x4f1   :  { %5861 = vmatpush3.msra.mxu1 %v6602_v25  ;;  %5827 = vmatprep.subr.mxu0 %v6603_v32  ;;  %v6609_v17 = vld [vmem:[%s10946_s12 + $0x240] sm:$0xff]  ;;  %v6611_v25 = vld [vmem:[%s10946_s12 + $0x2b8] sm:$0xff] }
 0x4f2   :  { %5862 = vmatprep.subr.mxu1 %v6604_v26  ;;  %5828 = vmatpush3.msra.mxu0 %v6605_v33  ;;  %v6610_v10 = vld [vmem:[%s10946_s12 + $0x340] sm:$0xff]  ;;  %v6612_v32 = vld [vmem:[%s10946_s12 + $0x3b8] sm:$0xff] }
 0x4f3   :  { %5863 = vmatpush3.msra.mxu1 %v6606_v28  ;;  %5829 = vmatprep.subr.mxu0 %v6607_v43  ;;  %v6613_v26 = vld [vmem:[%s10946_s12 + $0x238] sm:$0xff]  ;;  %v6615_v28 = vld [vmem:[%s10946_s12 + $0x2b0] sm:$0xff] }
 0x4f4   :  { %5864 = vmatprep.subr.mxu1 %v6608_v62  ;;  %5830 = vmatpush3.msra.mxu0 %v6609_v17  ;;  %v6614_v33 = vld [vmem:[%s10946_s12 + $0x338] sm:$0xff]  ;;  %v6616_v43 = vld [vmem:[%s10946_s12 + $0x3b0] sm:$0xff] }
 0x4f5   :  { %5865 = vmatpush3.msra.mxu1 %v6610_v10  ;;  %5831 = vmatprep.subr.mxu0 %v6611_v25  ;;  %v6617_v62 = vld [vmem:[%s10946_s12 + $0x230] sm:$0xff]  ;;  %v6619_v10 = vld [vmem:[%s10946_s12 + $0x2a8] sm:$0xff] }
 0x4f6   :  { %5866 = vmatprep.subr.mxu1 %v6612_v32  ;;  %5832 = vmatpush3.msra.mxu0 %v6613_v26  ;;  %v6618_v17 = vld [vmem:[%s10946_s12 + $0x330] sm:$0xff]  ;;  %v6620_v25 = vld [vmem:[%s10946_s12 + $0x3a8] sm:$0xff] }
 0x4f7   :  { %5867 = vmatpush3.msra.mxu1 %v6614_v33  ;;  %5833 = vmatprep.subr.mxu0 %v6615_v28  ;;  %v6621_v32 = vld [vmem:[%s10946_s12 + $0x228] sm:$0xff]  ;;  %v6623_v33 = vld [vmem:[%s10946_s12 + $0x2a0] sm:$0xff] }
 0x4f8   :  { %5868 = vmatprep.subr.mxu1 %v6616_v43  ;;  %5834 = vmatpush3.msra.mxu0 %v6617_v62  ;;  %v6622_v26 = vld [vmem:[%s10946_s12 + $0x328] sm:$0xff]  ;;  %v6624_v28 = vld [vmem:[%s10946_s12 + $0x3a0] sm:$0xff] }
 0x4f9   :  { %5869 = vmatpush3.msra.mxu1 %v6618_v17  ;;  %5835 = vmatprep.subr.mxu0 %v6619_v10  ;;  %v6625_v43 = vld [vmem:[%s10946_s12 + $0x220] sm:$0xff]  ;;  %v6627_v17 = vld [vmem:[%s10946_s12 + $0x298] sm:$0xff] }
 0x4fa   :  { %5870 = vmatprep.subr.mxu1 %v6620_v25  ;;  %5836 = vmatpush3.msra.mxu0 %v6621_v32  ;;  %v6626_v62 = vld [vmem:[%s10946_s12 + $0x320] sm:$0xff]  ;;  %v6628_v10 = vld [vmem:[%s10946_s12 + $0x398] sm:$0xff] }
 0x4fb   :  { %5871 = vmatpush3.msra.mxu1 %v6622_v26  ;;  %5837 = vmatprep.subr.mxu0 %v6623_v33  ;;  %v6629_v25 = vld [vmem:[%s10946_s12 + $0x218] sm:$0xff]  ;;  %v6631_v26 = vld [vmem:[%s10946_s12 + $0x290] sm:$0xff]  ;;  %v3012_v33 = vld [vmem:[%s10936_s2 + $0x20] sm:$0x77] }
 0x4fc   :  { %5872 = vmatprep.subr.mxu1 %v6624_v28  ;;  %5838 = vmatpush3.msra.mxu0 %v6625_v43  ;;  %v6630_v32 = vld [vmem:[%s10946_s12 + $0x318] sm:$0xff]  ;;  %v6632_v28 = vld [vmem:[%s10946_s12 + $0x390] sm:$0xff] }
 0x4fd   :  { %5873 = vmatpush3.msra.mxu1 %v6626_v62  ;;  %5839 = vmatprep.subr.mxu0 %v6627_v17  ;;  %v6633_v43 = vld [vmem:[%s10946_s12 + $0x210] sm:$0xff]  ;;  %v3013_v62 = vld [vmem:[%s10936_s2 + $0x28] sm:$0x77] }
 0x4fe   :  { %5874 = vmatprep.subr.mxu1 %v6628_v10  ;;  %5840 = vmatpush3.msra.mxu0 %v6629_v25  ;;  %v6634_v17 = vld [vmem:[%s10946_s12 + $0x310] sm:$0xff]  ;;  %v6635_v10 = vld [vmem:[%s10946_s12 + $0x288] sm:$0xff] }
 0x4ff   :  { %5875 = vmatpush3.msra.mxu1 %v6630_v32  ;;  %5841 = vmatprep.subr.mxu0 %v6631_v26  ;;  %v6636_v25 = vld [vmem:[%s10946_s12 + $0x388] sm:$0xff]  ;;  %v9409_v26 = vmul.f32 %v7948_v11, %v3012_v33  ;;  %v6641_v11 = vld [vmem:[%s10946_s12 + $0x200] sm:$0xff] }
 0x500   :  { %5876 = vmatprep.subr.mxu1 %v6632_v28  ;;  %5842 = vmatpush3.msra.mxu0 %v6633_v43  ;;  %v6637_v32 = vld [vmem:[%s10946_s12 + $0x208] sm:$0xff]  ;;  %v6639_v43 = vld [vmem:[%s10946_s12 + $0x280] sm:$0xff] }
 0x501   :  { %5877 = vmatpush3.msra.mxu1 %v6634_v17  ;;  %5843 = vmatprep.subr.mxu0 %v6635_v10  ;;  %v6638_v28 = vld [vmem:[%s10946_s12 + $0x308] sm:$0xff]  ;;  %v9418_v17 = vmul.f32 %v7956_v14, %v3013_v62  ;;  %v6640_v10 = vld [vmem:[%s10946_s12 + $0x380] sm:$0xff]  ;;  %v6643_v14 = vld [vmem:[%s10946_s12 + $0x4f8] sm:$0xff]  ;;  %v3132_v62 = vcombine.high %v9409_v26, %v9409_v26 }
 0x502   :  { %5878 = vmatprep.subr.mxu1 %v6636_v25  ;;  %5844 = vmatpush3.msra.mxu0 %v6637_v32  ;;  %v6642_v33 = vld [vmem:[%s10946_s12 + $0x300] sm:$0xff]  ;;  %v6644_v25 = vld [vmem:[%s10946_s12 + $0x5f8] sm:$0xff] }
 0x503   :  { %5879 = vmatpush3.msra.mxu1 %v6638_v28  ;;  %5845 = vmatprep.subr.mxu0 %v6639_v43  ;;  %v6645_v32 = vld [vmem:[%s10946_s12 + $0x478] sm:$0xff]  ;;  %v6647_v28 = vld [vmem:[%s10946_s12 + $0x4f0] sm:$0xff] }
 0x504   :  { %5880 = vmatprep.subr.mxu1 %v6640_v10  ;;  %5846 = vmatpush3.msra.mxu0 %v6641_v11  ;;  %v6648_v43 = vld [vmem:[%s10946_s12 + $0x5f0] sm:$0xff] }
 0x505   :  { %5881 = vmatpush3.msra.mxu1 %v6642_v33  ;;  %3349 = vmatmul.mubr.f32.vlgmr.msra.gmra.mxu0 %v9199_v63  ;;  %v3133_v63 = vcombine.high %v9418_v17, %v9418_v17  ;;  %v6649_v10 = vld [vmem:[%s10946_s12 + $0x470] sm:$0xff]  ;;  %v6651_v33 = vld [vmem:[%s10946_s12 + $0x4e8] sm:$0xff] }
 0x506   :  { %3419 = vmatmul.mubr.f32.vlgmr.msra.gmra.mxu1 %v9208_v49  ;;  %5885 = vmatprep.subr.mxu0 %v6643_v14  ;;  %v6646_v49 = vld [vmem:[%s10946_s12 + $0x578] sm:$0xff]  ;;  %v6650_v11 = vld [vmem:[%s10946_s12 + $0x570] sm:$0xff]  ;;  %v6652_v14 = vld [vmem:[%s10946_s12 + $0x5e8] sm:$0xff] }
 0x507   :  { %5920 = vmatprep.subr.mxu1 %v6644_v25  ;;  %5886 = vmatpush3.msra.mxu0 %v6645_v32  ;;  %v6654_v25 = vld [vmem:[%s10946_s12 + $0x568] sm:$0xff]  ;;  %v6655_v32 = vld [vmem:[%s10946_s12 + $0x4e0] sm:$0xff] }
 0x508   :  { %3488 = vmatprep.mubr.f32.mxu0 %v3132_v62  ;;  %5921 = vmatpush3.msra.mxu1 %v6646_v49  ;;  %v6653_v62 = vld [vmem:[%s10946_s12 + $0x468] sm:$0xff]  ;;  %v6657_v49 = vld [vmem:[%s10946_s12 + $0x460] sm:$0xff] }
 0x509   :  { %3558 = vmatprep.mubr.f32.mxu1 %v3133_v63  ;;  %5887 = vmatprep.subr.mxu0 %v6647_v28  ;;  %v6656_v63 = vld [vmem:[%s10946_s12 + $0x5e0] sm:$0xff] }
 0x50a   :  { %5922 = vmatprep.subr.mxu1 %v6648_v43  ;;  %5888 = vmatpush3.msra.mxu0 %v6649_v10  ;;  %v6658_v28 = vld [vmem:[%s10946_s12 + $0x560] sm:$0xff]  ;;  %v6659_v43 = vld [vmem:[%s10946_s12 + $0x4d8] sm:$0xff] }
 0x50b   :  { %5923 = vmatpush3.msra.mxu1 %v6650_v11  ;;  %5889 = vmatprep.subr.mxu0 %v6651_v33  ;;  %v6660_v10 = vld [vmem:[%s10946_s12 + $0x5d8] sm:$0xff] }
 0x50c   :  { %5924 = vmatprep.subr.mxu1 %v6652_v14  ;;  %5890 = vmatpush3.msra.mxu0 %v6653_v62  ;;  %v6661_v11 = vld [vmem:[%s10946_s12 + $0x458] sm:$0xff]  ;;  %v6663_v14 = vld [vmem:[%s10946_s12 + $0x4d0] sm:$0xff] }
 0x50d   :  { %5925 = vmatpush3.msra.mxu1 %v6654_v25  ;;  %5891 = vmatprep.subr.mxu0 %v6655_v32  ;;  %v6662_v33 = vld [vmem:[%s10946_s12 + $0x558] sm:$0xff]  ;;  %v6664_v62 = vld [vmem:[%s10946_s12 + $0x5d0] sm:$0xff] }
 0x50e   :  { %5926 = vmatprep.subr.mxu1 %v6656_v63  ;;  %5892 = vmatpush3.msra.mxu0 %v6657_v49  ;;  %v6665_v25 = vld [vmem:[%s10946_s12 + $0x450] sm:$0xff]  ;;  %v6667_v63 = vld [vmem:[%s10946_s12 + $0x4c8] sm:$0xff] }
 0x50f   :  { %5927 = vmatpush3.msra.mxu1 %v6658_v28  ;;  %5893 = vmatprep.subr.mxu0 %v6659_v43  ;;  %v6666_v32 = vld [vmem:[%s10946_s12 + $0x550] sm:$0xff]  ;;  %v6668_v49 = vld [vmem:[%s10946_s12 + $0x5c8] sm:$0xff] }
 0x510   :  { %5928 = vmatprep.subr.mxu1 %v6660_v10  ;;  %5894 = vmatpush3.msra.mxu0 %v6661_v11  ;;  %v6669_v28 = vld [vmem:[%s10946_s12 + $0x448] sm:$0xff]  ;;  %v6671_v10 = vld [vmem:[%s10946_s12 + $0x4c0] sm:$0xff] }
 0x511   :  { %5929 = vmatpush3.msra.mxu1 %v6662_v33  ;;  %5895 = vmatprep.subr.mxu0 %v6663_v14  ;;  %v6670_v43 = vld [vmem:[%s10946_s12 + $0x548] sm:$0xff]  ;;  %v6672_v11 = vld [vmem:[%s10946_s12 + $0x5c0] sm:$0xff] }
 0x512   :  { %5930 = vmatprep.subr.mxu1 %v6664_v62  ;;  %5896 = vmatpush3.msra.mxu0 %v6665_v25  ;;  %v6673_v33 = vld [vmem:[%s10946_s12 + $0x440] sm:$0xff]  ;;  %v6675_v62 = vld [vmem:[%s10946_s12 + $0x4b8] sm:$0xff] }
 0x513   :  { %5931 = vmatpush3.msra.mxu1 %v6666_v32  ;;  %5897 = vmatprep.subr.mxu0 %v6667_v63  ;;  %v6674_v14 = vld [vmem:[%s10946_s12 + $0x540] sm:$0xff]  ;;  %v6676_v25 = vld [vmem:[%s10946_s12 + $0x5b8] sm:$0xff] }
 0x514   :  { %5932 = vmatprep.subr.mxu1 %v6668_v49  ;;  %5898 = vmatpush3.msra.mxu0 %v6669_v28  ;;  %v6677_v32 = vld [vmem:[%s10946_s12 + $0x438] sm:$0xff]  ;;  %v6679_v49 = vld [vmem:[%s10946_s12 + $0x4b0] sm:$0xff] }
 0x515   :  { %5933 = vmatpush3.msra.mxu1 %v6670_v43  ;;  %5899 = vmatprep.subr.mxu0 %v6671_v10  ;;  %v6678_v63 = vld [vmem:[%s10946_s12 + $0x538] sm:$0xff]  ;;  %v6680_v28 = vld [vmem:[%s10946_s12 + $0x5b0] sm:$0xff] }
 0x516   :  { %5934 = vmatprep.subr.mxu1 %v6672_v11  ;;  %5900 = vmatpush3.msra.mxu0 %v6673_v33  ;;  %v6681_v43 = vld [vmem:[%s10946_s12 + $0x430] sm:$0xff]  ;;  %v6683_v11 = vld [vmem:[%s10946_s12 + $0x4a8] sm:$0xff] }
 0x517   :  { %5935 = vmatpush3.msra.mxu1 %v6674_v14  ;;  %5901 = vmatprep.subr.mxu0 %v6675_v62  ;;  %v6682_v10 = vld [vmem:[%s10946_s12 + $0x530] sm:$0xff]  ;;  %v6684_v33 = vld [vmem:[%s10946_s12 + $0x5a8] sm:$0xff]  ;;  %v3067_v62 = vrot.slane %v8644_v30, %v7087_v36 }
 0x518   :  { %5936 = vmatprep.subr.mxu1 %v6676_v25  ;;  %5902 = vmatpush3.msra.mxu0 %v6677_v32  ;;  %v6685_v14 = vld [vmem:[%s10946_s12 + $0x428] sm:$0xff]  ;;  %v3071_v25 = vrot.slane %v8310_v21, %v7087_v36 }
 0x519   :  { %5937 = vmatpush3.msra.mxu1 %v6678_v63  ;;  %5903 = vmatprep.subr.mxu0 %v6679_v49  ;;  %v6686_v32 = vld [vmem:[%s10946_s12 + $0x528] sm:$0xff]  ;;  %v6687_v63 = vld [vmem:[%s10946_s12 + $0x4a0] sm:$0xff]  ;;  %v3075_v49 = vrot.slane %v8656_v7, %v7087_v36 }
 0x51a   :  { %5938 = vmatprep.subr.mxu1 %v6680_v28  ;;  %5904 = vmatpush3.msra.mxu0 %v6681_v43  ;;  %v3079_v28 = vrot.slane %v8318_v39, %v7087_v36  ;;  %v6688_v43 = vld [vmem:[%s10946_s12 + $0x5a0] sm:$0xff] }
 0x51b   :  { %5939 = vmatpush3.msra.mxu1 %v6682_v10  ;;  %5905 = vmatprep.subr.mxu0 %v6683_v11  ;;  %v6689_v10 = vld [vmem:[%s10946_s12 + $0x420] sm:$0xff] }
 0x51c   :  { %5940 = vmatprep.subr.mxu1 %v6684_v33  ;;  %5906 = vmatpush3.msra.mxu0 %v6685_v14  ;;  %v6690_v11 = vld [vmem:[%s10946_s12 + $0x520] sm:$0xff]  ;;  %v6691_v33 = vld [vmem:[%s10946_s12 + $0x498] sm:$0xff] }
 0x51d   :  { %5941 = vmatpush3.msra.mxu1 %v6686_v32  ;;  %5907 = vmatprep.subr.mxu0 %v6687_v63  ;;  %v6692_v14 = vld [vmem:[%s10946_s12 + $0x598] sm:$0xff]  ;;  %v3102_v63 = vcombine.low %v3067_v62, %v3071_v25  ;;  %v6697_v62 = vld [vmem:[%s10946_s12 + $0x410] sm:$0xff] }
 0x51e   :  { %5942 = vmatprep.subr.mxu1 %v6688_v43  ;;  %5908 = vmatpush3.msra.mxu0 %v6689_v10  ;;  %v6693_v32 = vld [vmem:[%s10946_s12 + $0x418] sm:$0xff]  ;;  %v6695_v10 = vld [vmem:[%s10946_s12 + $0x490] sm:$0xff] }
 0x51f   :  { %5943 = vmatpush3.msra.mxu1 %v6690_v11  ;;  %5909 = vmatprep.subr.mxu0 %v6691_v33  ;;  %v6694_v43 = vld [vmem:[%s10946_s12 + $0x518] sm:$0xff]  ;;  %v3014_v11 = vld [vmem:[%s10936_s2 + $0x30] sm:$0x77]  ;;  %v3103_v33 = vcombine.low %v3075_v49, %v3079_v28  ;;  %v6699_v49 = vld [vmem:[%s10946_s12 + $0x488] sm:$0xff] }
 0x520   :  { %5944 = vmatprep.subr.mxu1 %v6692_v14  ;;  %5910 = vmatpush3.msra.mxu0 %v6693_v32  ;;  %v6696_v14 = vld [vmem:[%s10946_s12 + $0x590] sm:$0xff]  ;;  %v3015_v25 = vld [vmem:[%s10936_s2 + $0x38] sm:$0x77]  ;;  %v6700_v28 = vld [vmem:[%s10946_s12 + $0x588] sm:$0xff] }
 0x521   :  { %5945 = vmatpush3.msra.mxu1 %v6694_v43  ;;  %5911 = vmatprep.subr.mxu0 %v6695_v10  ;;  %v6698_v32 = vld [vmem:[%s10946_s12 + $0x510] sm:$0xff]  ;;  %v6701_v43 = vld [vmem:[%s10946_s12 + $0x408] sm:$0xff]  ;;  %v9626_v10 = vmul.f32 %v3102_v63, %v3014_v11  ;;  %v6705_v63 = vld [vmem:[%s10946_s12 + $0x400] sm:$0xff] }
 0x522   :  { %5946 = vmatprep.subr.mxu1 %v6696_v14  ;;  %5912 = vmatpush3.msra.mxu0 %v6697_v62  ;;  %v6702_v14 = vld [vmem:[%s10946_s12 + $0x508] sm:$0xff]  ;;  %v6703_v62 = vld [vmem:[%s10946_s12 + $0x480] sm:$0xff] }
 0x523   :  { %5947 = vmatpush3.msra.mxu1 %v6698_v32  ;;  %5913 = vmatprep.subr.mxu0 %v6699_v49  ;;  %v9634_v32 = vmul.f32 %v3103_v33, %v3015_v25  ;;  %v6704_v49 = vld [vmem:[%s10946_s12 + $0x580] sm:$0xff]  ;;  %v6707_v33 = vld [vmem:[%s10946_s12 + $0x6f8] sm:$0xff]  ;;  %v3134_v25 = vcombine.high %v9626_v10, %v9626_v10 }
 0x524   :  { %5948 = vmatprep.subr.mxu1 %v6700_v28  ;;  %5914 = vmatpush3.msra.mxu0 %v6701_v43  ;;  %v6706_v11 = vld [vmem:[%s10946_s12 + $0x500] sm:$0xff]  ;;  %v6708_v28 = vld [vmem:[%s10946_s12 + $0x7f8] sm:$0xff] }
 0x525   :  { %5949 = vmatpush3.msra.mxu1 %v6702_v14  ;;  %5915 = vmatprep.subr.mxu0 %v6703_v62  ;;  %v6709_v43 = vld [vmem:[%s10946_s12 + $0x678] sm:$0xff]  ;;  %v6711_v14 = vld [vmem:[%s10946_s12 + $0x6f0] sm:$0xff] }
 0x526   :  { %5950 = vmatprep.subr.mxu1 %v6704_v49  ;;  %5916 = vmatpush3.msra.mxu0 %v6705_v63  ;;  %v6712_v62 = vld [vmem:[%s10946_s12 + $0x7f0] sm:$0xff] }
 0x527   :  { %5951 = vmatpush3.msra.mxu1 %v6706_v11  ;;  %3489 = vmatmul.mubr.f32.vlgmr.msra.gmra.mxu0 %v9409_v26  ;;  %v3135_v26 = vcombine.high %v9634_v32, %v9634_v32  ;;  %v6713_v49 = vld [vmem:[%s10946_s12 + $0x670] sm:$0xff]  ;;  %v6715_v11 = vld [vmem:[%s10946_s12 + $0x6e8] sm:$0xff] }
 0x528   :  { %3559 = vmatmul.mubr.f32.vlgmr.msra.gmra.mxu1 %v9418_v17  ;;  %5955 = vmatprep.subr.mxu0 %v6707_v33  ;;  %v6710_v17 = vld [vmem:[%s10946_s12 + $0x778] sm:$0xff]  ;;  %v6714_v63 = vld [vmem:[%s10946_s12 + $0x770] sm:$0xff]  ;;  %v6716_v33 = vld [vmem:[%s10946_s12 + $0x7e8] sm:$0xff] }
 0x529   :  { %5990 = vmatprep.subr.mxu1 %v6708_v28  ;;  %5956 = vmatpush3.msra.mxu0 %v6709_v43  ;;  %v6718_v28 = vld [vmem:[%s10946_s12 + $0x768] sm:$0xff]  ;;  %v6719_v43 = vld [vmem:[%s10946_s12 + $0x6e0] sm:$0xff] }
 0x52a   :  { %3628 = vmatprep.mubr.f32.mxu0 %v3134_v25  ;;  %5991 = vmatpush3.msra.mxu1 %v6710_v17  ;;  %v6717_v25 = vld [vmem:[%s10946_s12 + $0x668] sm:$0xff]  ;;  %v6721_v17 = vld [vmem:[%s10946_s12 + $0x660] sm:$0xff] }
 0x52b   :  { %3698 = vmatprep.mubr.f32.mxu1 %v3135_v26  ;;  %5957 = vmatprep.subr.mxu0 %v6711_v14  ;;  %v6720_v26 = vld [vmem:[%s10946_s12 + $0x7e0] sm:$0xff] }
 0x52c   :  { %5992 = vmatprep.subr.mxu1 %v6712_v62  ;;  %5958 = vmatpush3.msra.mxu0 %v6713_v49  ;;  %v6722_v14 = vld [vmem:[%s10946_s12 + $0x760] sm:$0xff]  ;;  %v6723_v62 = vld [vmem:[%s10946_s12 + $0x6d8] sm:$0xff] }
 0x52d   :  { %5993 = vmatpush3.msra.mxu1 %v6714_v63  ;;  %5959 = vmatprep.subr.mxu0 %v6715_v11 }
 0x52e   :  { %5994 = vmatprep.subr.mxu1 %v6716_v33  ;;  %5960 = vmatpush3.msra.mxu0 %v6717_v25 }
 0x52f   :  { %5995 = vmatpush3.msra.mxu1 %v6718_v28  ;;  %5961 = vmatprep.subr.mxu0 %v6719_v43 }
 0x530   :  { %5996 = vmatprep.subr.mxu1 %v6720_v26  ;;  %5962 = vmatpush3.msra.mxu0 %v6721_v17 }
 0x531   :  { %5997 = vmatpush3.msra.mxu1 %v6722_v14  ;;  %5963 = vmatprep.subr.mxu0 %v6723_v62 }
 0x532   :  { %5998 = vmatprep.subr.mxu1 %v8355_v56  ;;  %5964 = vmatpush3.msra.mxu0 %v8360_v46  ;;  %v11069_v56 = vld [vmem:[#allocation28_spill] sm:$0xff]  ;;  %v11070_v46 = vld [vmem:[#allocation29_spill] sm:$0xff] }
 0x533   :  { %5999 = vmatpush3.msra.mxu1 %v8365_v53  ;;  %5965 = vmatprep.subr.mxu0 %v8370_v58  ;;  %v11071_v53 = vld [vmem:[#allocation30_spill] sm:$0xff]  ;;  %v11072_v58 = vld [vmem:[#allocation31_spill] sm:$0xff] }
 0x534   :  { %6000 = vmatprep.subr.mxu1 %v8375_v23  ;;  %5966 = vmatpush3.msra.mxu0 %v8380_v57  ;;  %v11073_v23 = vld [vmem:[#allocation32_spill] sm:$0xff]  ;;  %v11074_v57 = vld [vmem:[#allocation33_spill] sm:$0xff] }
 0x535   :  { %6001 = vmatpush3.msra.mxu1 %v8387_v61  ;;  %5967 = vmatprep.subr.mxu0 %v8392_v31  ;;  %v11075_v61 = vld [vmem:[#allocation34_spill] sm:$0xff]  ;;  %v11076_v31 = vmov 0.0  }
 0x536   :  { %6002 = vmatprep.subr.mxu1 %v8401_v24  ;;  %5968 = vmatpush3.msra.mxu0 %v8406_v29  ;;  %v11077_v24 = vld [vmem:[#allocation35_spill] sm:$0xff]  ;;  %v11078_v29 = vld [vmem:[#allocation36_spill] sm:$0xff] }
 0x537   :  { %6003 = vmatpush3.msra.mxu1 %v8415_v27  ;;  %5969 = vmatprep.subr.mxu0 %v8420_v4  ;;  %v11079_v27 = vld [vmem:[#allocation38_spill] sm:$0xff]  ;;  %v11080_v4 = vld [vmem:[#allocation40_spill] sm:$0xff] }
 0x538   :  { %6004 = vmatprep.subr.mxu1 %v8429_v59  ;;  %5970 = vmatpush3.msra.mxu0 %v8434_v5  ;;  %v11081_v59 = vld [vmem:[#allocation41_spill] sm:$0xff]  ;;  %v11082_v5 = vld [vmem:[#allocation42_spill] sm:$0xff] }
 0x539   :  { %6005 = vmatpush3.msra.mxu1 %v8443_v60  ;;  %5971 = vmatprep.subr.mxu0 %v8448_v50  ;;  %v11083_v60 = vld [vmem:[#allocation43_spill] sm:$0xff]  ;;  %v11084_v50 = vld [vmem:[#allocation44_spill] sm:$0xff] }
 0x53a   :  { %6006 = vmatprep.subr.mxu1 %v8457_v41  ;;  %5972 = vmatpush3.msra.mxu0 %v8462_v35  ;;  %v11085_v41 = vld [vmem:[#allocation45_spill] sm:$0xff]  ;;  %v11086_v35 = vld [vmem:[#allocation46_spill] sm:$0xff] }
 0x53b   :  { %6007 = vmatpush3.msra.mxu1 %v8469_v42  ;;  %5973 = vmatprep.subr.mxu0 %v8474_v12  ;;  %v11087_v42 = vld [vmem:[#allocation47_spill] sm:$0xff]  ;;  %v11088_v12 = vld [vmem:[#allocation48_spill] sm:$0xff] }
 0x53c   :  { %6008 = vmatprep.subr.mxu1 %v8481_v15  ;;  %5974 = vmatpush3.msra.mxu0 %v8486_v16  ;;  %v11089_v15 = vld [vmem:[#allocation49_spill] sm:$0xff]  ;;  %v11090_v16 = vld [vmem:[#allocation50_spill] sm:$0xff] }
 0x53d   :  { %6009 = vmatpush3.msra.mxu1 %v8493_v18  ;;  %5975 = vmatprep.subr.mxu0 %v8498_v19  ;;  %v11091_v18 = vld [vmem:[#allocation51_spill] sm:$0xff]  ;;  %v11092_v19 = vld [vmem:[#allocation52_spill] sm:$0xff] }
 0x53e   :  { %6010 = vmatprep.subr.mxu1 %v8505_v22  ;;  %5976 = vmatpush3.msra.mxu0 %v8510_v45  ;;  %v11093_v22 = vld [vmem:[#allocation54_spill] sm:$0xff]  ;;  %v11094_v45 = vld [vmem:[#allocation56_spill] sm:$0xff] }
 0x53f   :  { %6011 = vmatpush3.msra.mxu1 %v8517_v3  ;;  %5977 = vmatprep.subr.mxu0 %v8522_v40  ;;  %v11095_v3 = vld [vmem:[#allocation58_spill] sm:$0xff]  ;;  %v11096_v40 = vld [vmem:[#allocation60_spill] sm:$0xff] }
 0x540   :  { %6012 = vmatprep.subr.mxu1 %v8529_v20  ;;  %5978 = vmatpush3.msra.mxu0 %v8534_v8  ;;  %v11098_v20 = vld [vmem:[#allocation64_spill] sm:$0xff]  ;;  %v11099_v8 = vld [vmem:[#allocation66_spill] sm:$0xff] }
 0x541   :  { %6013 = vmatpush3.msra.mxu1 %v8541_v47  ;;  %5979 = vmatprep.subr.mxu0 %v8546_v9  ;;  %v11100_v47 = vld [vmem:[#allocation68_spill] sm:$0xff]  ;;  %v11101_v9 = vld [vmem:[#allocation70_spill] sm:$0xff] }
 0x542   :  { %6014 = vmatprep.subr.mxu1 %v8553_v48  ;;  %5980 = vmatpush3.msra.mxu0 %v8558_v51  ;;  %v11102_v48 = vld [vmem:[#allocation72_spill] sm:$0xff]  ;;  %v11103_v51 = vld [vmem:[#allocation74_spill] sm:$0xff] }
 0x543   :  { %6015 = vmatpush3.msra.mxu1 %v8565_v54  ;;  %5981 = vmatprep.subr.mxu0 %v8570_v55  ;;  %v5427_v54 = vpop.f32.mrf.mxu0  ;;  %v5462_v55 = vpop.f32.mrf.mxu1 }
 0x544   :  { %6016 = vmatprep.subr.mxu1 %v8577_v2  ;;  %5982 = vmatpush3.msra.mxu0 %v8582_v37 }
 0x545   :  { %6017 = vmatpush3.msra.mxu1 %v8589_v38  ;;  %5983 = vmatprep.subr.mxu0 %v8594_v6  ;;  %v5428_v2 = vpop.f32.mrf.mxu0  ;;  %v5463_v37 = vpop.f32.mrf.mxu1 }
 0x546   :  { %6018 = vmatprep.subr.mxu1 %v11069_v56  ;;  %5984 = vmatpush3.msra.mxu0 %v11070_v46  ;;  %v3710_v56 = vld [vmem:[#allocation15 + $0x8] sm:$0xff]  ;;  %v3709_v46 = vld [vmem:[#allocation15] sm:$0xff] }
 0x547   :  { %6019 = vmatpush3.msra.mxu1 %v11071_v53  ;;  %5985 = vmatprep.subr.mxu0 %v11072_v58  ;;  %v5497_v38 = vpop.f32.mrf.mxu0  ;;  %v5532_v6 = vpop.f32.mrf.mxu1  ;;  %v3712_v53 = vld [vmem:[#allocation15 + $0x18] sm:$0xff]  ;;  %v5429_v58 = vadd.f32 %v5428_v2, %v5427_v54 }
 0x548   :  { %6020 = vmatprep.subr.mxu1 %v11073_v23  ;;  %5986 = vmatpush3.msra.mxu0 %v11074_v57  ;;  %v5464_v23 = vadd.f32 %v5463_v37, %v5462_v55 }
 0x549   :  { %6021 = vmatpush3.msra.mxu1 %v11075_v61  ;;  %3629 = vmatmul.mubr.f32.vlgmr.msra.gmra.mxu0 %v9626_v10  ;;  %v5498_v10 = vpop.f32.mrf.mxu0 }
 0x54a   :  { %3699 = vmatmul.mubr.f32.vlgmr.msra.gmra.mxu1 %v9634_v32  ;;  %3781 = vmatprep.mubr.f32.mxu0 %v11076_v31  ;;  %v5533_v32 = vpop.f32.mrf.mxu1  ;;  %v5499_v57 = vadd.f32 %v5498_v10, %v5497_v38  ;;  %v2358_v61 = vadd.f32 %v5464_v23, %v5429_v58  ;;  %v6730_v58 = vld [vmem:[%s10947_s13 + $0xe0] sm:$0xff] }
 0x54b   :  { %6060 = vmatprep.subr.mxu1 %v11077_v24  ;;  %v5567_v49 = vpop.f32.mrf.mxu0  ;;  %3747 = vmatprep.subr.mxu0 %v3710_v56  ;;  %v6727_v56 = vld [vmem:[%s10947_s13 + $0x70] sm:$0xff]  ;;  %v6731_v23 = vld [vmem:[%s10947_s13 + $0x60] sm:$0xff] }
 0x54c   :  { %6061 = vmatpush3.msra.mxu1 %v11078_v29  ;;  %v5602_v63 = vpop.f32.mrf.mxu1  ;;  %3748 = vmatpush1.msra.mxu0 %v3709_v46  ;;  %v2428_v24 = vadd.f32 %v5499_v57, %v2358_v61  ;;  %v5534_v29 = vadd.f32 %v5533_v32, %v5532_v6  ;;  %v6728_v46 = vld [vmem:[%s10947_s13 + $0xe8] sm:$0xff]  ;;  %v6732_v57 = vld [vmem:[%s10947_s13 + $0xd8] sm:$0xff] }
 0x54d   :  { %6062 = vmatprep.subr.mxu1 %v11079_v27  ;;  %v5568_v11 = vpop.f32.mrf.mxu0  ;;  %3818 = vmatprep.subr.mxu0 %v3712_v53  ;;  %v6729_v53 = vld [vmem:[%s10947_s13 + $0x68] sm:$0xff]  ;;  %v6733_v61 = vld [vmem:[%s10947_s13 + $0x58] sm:$0xff] }
 0x54e   :  { %6063 = vmatpush3.msra.mxu1 %v11080_v4  ;;  %v5603_v33 = vpop.f32.mrf.mxu1  ;;  %v5569_v27 = vadd.f32 %v5568_v11, %v5567_v49  ;;  %v2498_v4 = vadd.f32 %v5534_v29, %v2428_v24  ;;  %v6734_v24 = vld [vmem:[%s10947_s13 + $0xd0] sm:$0xff] }
 0x54f   :  { %6064 = vmatprep.subr.mxu1 %v11081_v59  ;;  %v6735_v29 = vld [vmem:[%s10947_s13 + $0x50] sm:$0xff] }
 0x550   :  { %6065 = vmatpush3.msra.mxu1 %v11082_v5  ;;  %v2568_v5 = vadd.f32 %v5569_v27, %v2498_v4  ;;  %v6736_v27 = vld [vmem:[%s10947_s13 + $0xc8] sm:$0xff] }
 0x551   :  { %6066 = vmatprep.subr.mxu1 %v11083_v60  ;;  %v5604_v60 = vadd.f32 %v5603_v33, %v5602_v63  ;;  %v6737_v4 = vld [vmem:[%s10947_s13 + $0x48] sm:$0xff] }
 0x552   :  { %6067 = vmatpush3.msra.mxu1 %v11084_v50 }
 0x553   :  { %6068 = vmatprep.subr.mxu1 %v11085_v41 }
 0x554   :  { %6069 = vmatpush3.msra.mxu1 %v11086_v35 }
 0x555   :  { %6070 = vmatprep.subr.mxu1 %v8750_v0  ;;  %v11097_v0 = vld [vmem:[#allocation62_spill] sm:$0xff] }
 0x556   :  { %6071 = vmatpush3.msra.mxu1 %v11087_v42  ;;  %v2638_v42 = vadd.f32 %v5604_v60, %v2568_v5  ;;  %v6739_v5 = vld [vmem:[%s10947_s13 + $0x40] sm:$0xff]  ;;  %v6740_v60 = vld [vmem:[%s10947_s13 + $0xb8] sm:$0xff] }
 0x557   :  { %6072 = vmatprep.subr.mxu1 %v11088_v12 }
 0x558   :  { %6073 = vmatpush3.msra.mxu1 %v11089_v15 }
 0x559   :  { %6074 = vmatprep.subr.mxu1 %v11090_v16 }
 0x55a   :  { %6075 = vmatpush3.msra.mxu1 %v11091_v18 }
 0x55b   :  { %6076 = vmatprep.subr.mxu1 %v11092_v19 }
 0x55c   :  { %6077 = vmatpush3.msra.mxu1 %v11093_v22 }
 0x55d   :  { %6078 = vmatprep.subr.mxu1 %v11094_v45 }
 0x55e   :  { %6079 = vmatpush3.msra.mxu1 %v11095_v3 }
 0x55f   :  { %6080 = vmatprep.subr.mxu1 %v11096_v40  ;;  %v5637_v25 = vpop.f32.mrf.mxu0 }
 0x560   :  { %6081 = vmatpush3.msra.mxu1 %v11097_v0 }
 0x561   :  { %6082 = vmatprep.subr.mxu1 %v11098_v20  ;;  %v5638_v28 = vpop.f32.mrf.mxu0 }
 0x562   :  { %6083 = vmatpush3.msra.mxu1 %v11099_v8  ;;  %v5639_v50 = vadd.f32 %v5638_v28, %v5637_v25 }
 0x563   :  { %6084 = vmatprep.subr.mxu1 %v11100_v47 }
 0x564   :  { %6085 = vmatpush3.msra.mxu1 %v11101_v9  ;;  %v2708_v15 = vadd.f32 %v5639_v50, %v2638_v42  ;;  %v11104_v50 = vld [vmem:[#allocation53_spill] sm:$0xff]  ;;  %v11107_v42 = vld [vmem:[#allocation59_spill] sm:$0xff] }
 0x565   :  { %6086 = vmatprep.subr.mxu1 %v11102_v48 }
 0x566   :  { %6087 = vmatpush3.msra.mxu1 %v11103_v51 }
 0x567   :  { %6088 = vmatprep.subr.mxu1 %v8950_v13  ;;  %v5672_v13 = vpop.f32.mrf.mxu1 }
 0x568   :  { %6089 = vmatpush3.msra.mxu1 %v8965_v34 }
 0x569   :  { %6090 = vmatprep.subr.mxu1 %v8980_v44  ;;  %v5673_v34 = vpop.f32.mrf.mxu1 }
 0x56a   :  { %6091 = vmatpush3.msra.mxu1 %v8992_v1  ;;  %v5674_v18 = vadd.f32 %v5673_v34, %v5672_v13 }
 0x56c   :  { %v2778_v22 = vadd.f32 %v5674_v18, %v2708_v15  ;;  %v11109_v15 = vld [vmem:[#allocation63_spill] sm:$0xff] }
 0x56d   :  { %v11111_v18 = vld [vmem:[#allocation67_spill] sm:$0xff] }
 0x56e   :  { %6511 = vrcp.f32 %v2778_v22  ;;  %v11113_v22 = vld [vmem:[#allocation71_spill] sm:$0xff] }
 0x57b   :  { %v9786_v25 = vpop.eup %6511 }
 0x581   :  { %v5707_v43 = vpop.f32.mrf.mxu0 }
 0x582   :  { %v5742_v26 = vpop.f32.mrf.mxu1 }
 0x583   :  { %v5708_v44 = vpop.f32.mrf.mxu0 }
 0x584   :  { %v5709_v17 = vadd.f32 %v5708_v44, %v5707_v43  ;;  %v5743_v14 = vpop.f32.mrf.mxu1  ;;  %v3707_v43 = vrot.slane %v9786_v25, %v7087_v36  ;;  %v3711_v44 = vld [vmem:[#allocation15 + $0x10] sm:$0xff] }
 0x585   :  { %v5744_v1 = vadd.f32 %v5743_v14, %v5742_v26  ;;  %v6725_v14 = vld [vmem:[%s10947_s13 + $0x78] sm:$0xff] }
 0x587   :  { %v9784_v62 = vadd.f32 %v5744_v1, %v5709_v17  ;;  %v6724_v17 = vld [vmem:[%s10947_s13 + $0xf8] sm:$0xff]  ;;  %v6726_v1 = vld [vmem:[%s10947_s13 + $0xf0] sm:$0xff] }
 0x589   :  { %6513 = vrcp.f32 %v9784_v62  ;;  %v4987_v62 = vld [vmem:[#allocation15 + $0x18] sm:$0xff] }
 0x5a3   :  { %v5777_v59 = vpop.f32.mrf.mxu0 }
 0x5a4   :  { %v5812_v41 = vpop.f32.mrf.mxu1 }
 0x5a5   :  { %v5778_v35 = vpop.f32.mrf.mxu0 }
 0x5a6   :  { %v5813_v16 = vpop.f32.mrf.mxu1  ;;  %v5779_v45 = vadd.f32 %v5778_v35, %v5777_v59  ;;  %v6738_v59 = vld [vmem:[%s10947_s13 + $0xc0] sm:$0xff] }
 0x5a7   :  { %v5814_v3 = vadd.f32 %v5813_v16, %v5812_v41  ;;  %v11105_v41 = vld [vmem:[#allocation55_spill] sm:$0xff]  ;;  %v11106_v35 = vld [vmem:[#allocation57_spill] sm:$0xff] }
 0x5a8   :  { %v11110_v16 = vld [vmem:[#allocation65_spill] sm:$0xff] }
 0x5a9   :  { %v3281_v8 = vadd.f32 %v5814_v3, %v5779_v45  ;;  %v11114_v45 = vld [vmem:[#allocation73_spill] sm:$0xff]  ;;  %v11115_v3 = vld [vmem:[#allocation75_spill] sm:$0xff] }
 0x5c5   :  { %v5847_v12 = vpop.f32.mrf.mxu0 }
 0x5c6   :  { %v5882_v40 = vpop.f32.mrf.mxu1 }
 0x5c7   :  { %v5848_v19 = vpop.f32.mrf.mxu0 }
 0x5c8   :  { %v5849_v20 = vadd.f32 %v5848_v19, %v5847_v12  ;;  %v5883_v47 = vpop.f32.mrf.mxu1  ;;  %v11108_v12 = vld [vmem:[#allocation61_spill] sm:$0xff] }
 0x5c9   :  { %v5884_v54 = vadd.f32 %v5883_v47, %v5882_v40  ;;  %v11112_v19 = vld [vmem:[#allocation69_spill] sm:$0xff]  ;;  %v11116_v40 = vld [vmem:[#allocation76_spill] sm:$0xff] }
 0x5ca   :  { %v3351_v48 = vadd.f32 %v5849_v20, %v3281_v8  ;;  %v4170_v20 = vld [vmem:[%s10946_s12 + $0xf8] sm:$0xff]  ;;  %v5379_v47 = vld [vmem:[%s10936_s2 + $0x40] sm:$0x77] }
 0x5cb   :  { %v4202_v8 = vld [vmem:[%s10946_s12 + $0x1f8] sm:$0xff] }
 0x5cc   :  { %v3421_v2 = vadd.f32 %v5884_v54, %v3351_v48  ;;  %6130 = vmatprep.subr.mxu1 %v4202_v8  ;;  %v11118_v48 = vld [vmem:[#allocation37_spill] sm:$0xff] }
 0x5cd   :  { %v4195_v8 = vld [vmem:[%s10946_s12 + $0x1c0] sm:$0xff] }
 0x5e7   :  { %v5917_v0 = vpop.f32.mrf.mxu0 }
 0x5e8   :  { %v5952_v51 = vpop.f32.mrf.mxu1 }
 0x5e9   :  { %v5918_v9 = vpop.f32.mrf.mxu0 }
 0x5ea   :  { %v5919_v55 = vadd.f32 %v5918_v9, %v5917_v0  ;;  %v5953_v37 = vpop.f32.mrf.mxu1  ;;  %v11117_v0 = vld [vmem:[#allocation77_spill] sm:$0xff] }
 0x5eb   :  { %v5954_v10 = vadd.f32 %v5953_v37, %v5952_v51  ;;  %v11119_v51 = vld [vmem:[#allocation22_spill] sm:$0xff] }
 0x5ec   :  { %v3491_v38 = vadd.f32 %v5919_v55, %v3421_v2  ;;  %v9871_v54 = vmul.f32 %v5379_v47, %v11119_v51  ;;  %v11120_v55 = vld [vmem:[#allocation78_spill] sm:$0xff]  ;;  %v4145_v47 = vld [vmem:[%s10946_s12 + $0x30] sm:$0xff]  ;;  %v4194_v51 = vld [vmem:[%s10946_s12 + $0x1b8] sm:$0xff] }
 0x5ed   :  { %v3862_v2 = vrot.slane %v11120_v55, %v7087_v36 }
 0x5ee   :  { %v3561_v63 = vadd.f32 %v5954_v10, %v3491_v38 }
 0x609   :  { %v5987_v6 = vpop.f32.mrf.mxu0 }
 0x60a   :  { %v6022_v32 = vpop.f32.mrf.mxu1 }
 0x60b   :  { %v5988_v49 = vpop.f32.mrf.mxu0 }
 0x60c   :  { %v5989_v11 = vadd.f32 %v5988_v49, %v5987_v6  ;;  %v6023_v33 = vpop.f32.mrf.mxu1  ;;  %v5380_v49 = vld [vmem:[%s10936_s2 + $0x48] sm:$0x77] }
 0x60d   :  { %v6024_v28 = vadd.f32 %v6023_v33, %v6022_v32  ;;  %v4154_v32 = vld [vmem:[%s10946_s12 + $0x78] sm:$0xff]  ;;  %v4169_v33 = vld [vmem:[%s10946_s12 + $0xf0] sm:$0xff] }
 0x60e   :  { %v3631_v13 = vadd.f32 %v5989_v11, %v3561_v63  ;;  %v11121_v63 = vld [vmem:[#allocation39_spill] sm:$0xff] }
 0x60f   :  { %v3874_v11 = vrot.slane %v11121_v63, %v7087_v36 }
 0x610   :  { %v3701_v34 = vadd.f32 %v6024_v28, %v3631_v13  ;;  %v4403_v13 = vcombine.high %v9871_v54, %v9871_v54  ;;  %v11122_v28 = vld [vmem:[#allocation79_spill] sm:$0xff] }
 0x612   :  { %v3708_v26 = vmul.f32 %v3707_v43, %v3701_v34  ;;  %v3870_v34 = vrot.slane %v11122_v28, %v7087_v36 }
 0x614   :  { %5377 = vmatmul.mubr.msk.f32.vlgmr.msra.gmra.mxu0 %vm3713_vm5, %v3708_v26 }
 0x615   :  { %3819 = vmatpush1.msra.mxu0 %v3711_v44  ;;  %3852 = vmatprep.mubr.f32.mxu0 %v11076_v31 }
 0x616   :  { %6025 = vmatprep.subr.mxu0 %v6724_v17  ;;  %v4168_v17 = vld [vmem:[%s10946_s12 + $0xe8] sm:$0xff] }
 0x618   :  { %5378 = vmatmul.mubr.msk.f32.vlgmr.msra.gmra.mxu0 %vm3713_vm5, %v3708_v26  ;;  %v4153_v26 = vld [vmem:[%s10946_s12 + $0x70] sm:$0xff] }
 0x619   :  { %6026 = vmatpush3.msra.mxu0 %v6725_v14  ;;  %v11123_v14 = vld [vmem:[#allocation23_spill] sm:$0xff] }
 0x61a   :  { %6027 = vmatprep.subr.mxu0 %v6726_v1  ;;  %v9897_v1 = vmul.f32 %v5380_v49, %v11123_v14  ;;  %v4158_v49 = vld [vmem:[%s10946_s12 + $0x98] sm:$0xff] }
 0x61b   :  { %6028 = vmatpush3.msra.mxu0 %v6727_v56  ;;  %v4190_v14 = vld [vmem:[%s10946_s12 + $0x198] sm:$0xff] }
 0x61c   :  { %6029 = vmatprep.subr.mxu0 %v6728_v46  ;;  %v4152_v46 = vld [vmem:[%s10946_s12 + $0x68] sm:$0xff] }
 0x61d   :  { %6030 = vmatpush3.msra.mxu0 %v6729_v53  ;;  %v4186_v53 = vld [vmem:[%s10946_s12 + $0x178] sm:$0xff] }
 0x61e   :  { %6031 = vmatprep.subr.mxu0 %v6730_v58  ;;  %v4167_v58 = vld [vmem:[%s10946_s12 + $0xe0] sm:$0xff] }
 0x61f   :  { %6032 = vmatpush3.msra.mxu0 %v6731_v23  ;;  %v4201_v23 = vld [vmem:[%s10946_s12 + $0x1f0] sm:$0xff] }
 0x620   :  { %6033 = vmatprep.subr.mxu0 %v6732_v57  ;;  %v4151_v57 = vld [vmem:[%s10946_s12 + $0x60] sm:$0xff] }
 0x621   :  { %6034 = vmatpush3.msra.mxu0 %v6733_v61  ;;  %v4404_v61 = vcombine.high %v9897_v1, %v9897_v1 }
 0x622   :  { %6035 = vmatprep.subr.mxu0 %v6734_v24  ;;  %v4185_v24 = vld [vmem:[%s10946_s12 + $0x170] sm:$0xff] }
 0x623   :  { %6036 = vmatpush3.msra.mxu0 %v6735_v29  ;;  %v4166_v29 = vld [vmem:[%s10946_s12 + $0xd8] sm:$0xff] }
 0x624   :  { %6037 = vmatprep.subr.mxu0 %v6736_v27  ;;  %v4200_v27 = vld [vmem:[%s10946_s12 + $0x1e8] sm:$0xff] }
 0x625   :  { %6038 = vmatpush3.msra.mxu0 %v6737_v4  ;;  %v4150_v4 = vld [vmem:[%s10946_s12 + $0x58] sm:$0xff] }
 0x626   :  { %6039 = vmatprep.subr.mxu0 %v6738_v59  ;;  %v4184_v59 = vld [vmem:[%s10946_s12 + $0x168] sm:$0xff] }
 0x627   :  { %6040 = vmatpush3.msra.mxu0 %v6739_v5  ;;  %v4165_v5 = vld [vmem:[%s10946_s12 + $0xd0] sm:$0xff] }
 0x628   :  { %6041 = vmatprep.subr.mxu0 %v6740_v60  ;;  %v4199_v60 = vld [vmem:[%s10946_s12 + $0x1e0] sm:$0xff] }
 0x629   :  { %6042 = vmatpush3.msra.mxu0 %v11104_v50  ;;  %v4149_v50 = vld [vmem:[%s10946_s12 + $0x50] sm:$0xff] }
 0x62a   :  { %6043 = vmatprep.subr.mxu0 %v11105_v41  ;;  %v4183_v41 = vld [vmem:[%s10946_s12 + $0x160] sm:$0xff] }
 0x62b   :  { %6044 = vmatpush3.msra.mxu0 %v11106_v35  ;;  %v4164_v35 = vld [vmem:[%s10946_s12 + $0xc8] sm:$0xff] }
 0x62c   :  { %6045 = vmatprep.subr.mxu0 %v11107_v42  ;;  %v4198_v42 = vld [vmem:[%s10946_s12 + $0x1d8] sm:$0xff] }
 0x62d   :  { %6046 = vmatpush3.msra.mxu0 %v11108_v12  ;;  %v4148_v12 = vld [vmem:[%s10946_s12 + $0x48] sm:$0xff] }
 0x62e   :  { %6047 = vmatprep.subr.mxu0 %v11109_v15  ;;  %v4182_v15 = vld [vmem:[%s10946_s12 + $0x158] sm:$0xff] }
 0x62f   :  { %6048 = vmatpush3.msra.mxu0 %v11110_v16  ;;  %v4163_v16 = vld [vmem:[%s10946_s12 + $0xc0] sm:$0xff] }
 0x630   :  { %6049 = vmatprep.subr.mxu0 %v11111_v18  ;;  %v4197_v18 = vld [vmem:[%s10946_s12 + $0x1d0] sm:$0xff] }
 0x631   :  { %6050 = vmatpush3.msra.mxu0 %v11112_v19  ;;  %v4147_v19 = vld [vmem:[%s10946_s12 + $0x40] sm:$0xff] }
 0x632   :  { %6051 = vmatprep.subr.mxu0 %v11113_v22  ;;  %v4181_v22 = vld [vmem:[%s10946_s12 + $0x150] sm:$0xff] }
 0x633   :  { %6052 = vmatpush3.msra.mxu0 %v11114_v45  ;;  %v4162_v45 = vld [vmem:[%s10946_s12 + $0xb8] sm:$0xff] }
 0x634   :  { %6053 = vmatprep.subr.mxu0 %v11115_v3  ;;  %v4196_v3 = vld [vmem:[%s10946_s12 + $0x1c8] sm:$0xff] }
 0x635   :  { %6054 = vmatpush3.msra.mxu0 %v11116_v40  ;;  %v4146_v40 = vld [vmem:[%s10946_s12 + $0x38] sm:$0xff] }
 0x636   :  { %6055 = vmatprep.subr.mxu0 %v8970_v52  ;;  %v3866_v52 = vrot.slane %v11118_v48, %v7087_v36 }
 0x637   :  { %6056 = vmatpush3.msra.mxu0 %v11117_v0  ;;  %v4180_v0 = vld [vmem:[%s10946_s12 + $0x148] sm:$0xff] }
 0x638   :  { %6095 = vmatprep.subr.mxu0 %v4170_v20  ;;  %v4161_v20 = vld [vmem:[%s10946_s12 + $0xb0] sm:$0xff] }
 0x6d4   :  { %v3783_v9 = vpop.f32.mrf.mxu0 }
 0x6d5   :  { %v3875_v6 = vmul.f32 %v3862_v2, %v3783_v9  ;;  %v4179_v9 = vld [vmem:[%s10946_s12 + $0x140] sm:$0xff]  ;;  %v4144_v2 = vld [vmem:[%s10946_s12 + $0x28] sm:$0xff] }
 0x6d6   :  { %v3785_v37 = vpop.f32.mrf.mxu0 }
 0x6d7   :  { %v3876_v38 = vmul.f32 %v3866_v52, %v3785_v37  ;;  %v4160_v52 = vld [vmem:[%s10946_s12 + $0xa8] sm:$0xff]  ;;  %v4178_v37 = vld [vmem:[%s10946_s12 + $0x138] sm:$0xff] }
 0x6d8   :  { %v3854_v10 = vpop.f32.mrf.mxu0 }
 0x6d9   :  { %3943 = vmatprep.mubr.f32.mxu0 %v3876_v38  ;;  %v3877_v56 = vmul.f32 %v3870_v34, %v3854_v10  ;;  %v4159_v38 = vld [vmem:[%s10946_s12 + $0xa0] sm:$0xff]  ;;  %v4157_v34 = vld [vmem:[%s10946_s12 + $0x90] sm:$0xff] }
 0x6da   :  { %v3856_v43 = vpop.f32.mrf.mxu0  ;;  %3944 = vmatmul.mubr.f32.vlgmr.msra.gmra.mxu0 %v3875_v6  ;;  %v4193_v6 = vld [vmem:[%s10946_s12 + $0x1b0] sm:$0xff]  ;;  %v4143_v10 = vld [vmem:[%s10946_s12 + $0x20] sm:$0xff] }
 0x6db   :  { %v3878_v44 = vmul.f32 %v3874_v11, %v3856_v43  ;;  %6096 = vmatpush3.msra.mxu0 %v4154_v32  ;;  %4483 = vmatprep.mubr.f32.mxu0 %v4403_v13  ;;  %v4177_v32 = vld [vmem:[%s10946_s12 + $0x130] sm:$0xff]  ;;  %v4192_v11 = vld [vmem:[%s10946_s12 + $0x1a8] sm:$0xff]  ;;  %v4191_v43 = vld [vmem:[%s10946_s12 + $0x1a0] sm:$0xff] }
 0x6dc   :  { %6097 = vmatprep.subr.mxu0 %v4169_v33  ;;  %v4142_v33 = vld [vmem:[%s10946_s12 + $0x18] sm:$0xff]  ;;  %v4176_v13 = vld [vmem:[%s10946_s12 + $0x128] sm:$0xff] }
 0x6dd   :  { %6098 = vmatpush3.msra.mxu0 %v4153_v26  ;;  %4013 = vmatprep.mubr.f32.mxu1 %v3878_v44  ;;  %v4141_v26 = vld [vmem:[%s10946_s12 + $0x10] sm:$0xff]  ;;  %v4175_v44 = vld [vmem:[%s10946_s12 + $0x120] sm:$0xff] }
 0x6de   :  { %6099 = vmatprep.subr.mxu0 %v4168_v17  ;;  %4014 = vmatmul.mubr.f32.vlgmr.msra.gmra.mxu1 %v3877_v56  ;;  %v4156_v17 = vld [vmem:[%s10946_s12 + $0x88] sm:$0xff] }
 0x6df   :  { %6100 = vmatpush3.msra.mxu0 %v4152_v46  ;;  %6131 = vmatpush3.msra.mxu1 %v4186_v53  ;;  %v4140_v56 = vld [vmem:[%s10946_s12 + $0x8] sm:$0xff]  ;;  %v5381_v46 = vld [vmem:[%s10936_s2 + $0x50] sm:$0x77]  ;;  %v4174_v53 = vld [vmem:[%s10946_s12 + $0x118] sm:$0xff] }
 0x6e0   :  { %6101 = vmatprep.subr.mxu0 %v4167_v58  ;;  %6132 = vmatprep.subr.mxu1 %v4201_v23  ;;  %v4155_v58 = vld [vmem:[%s10946_s12 + $0x80] sm:$0xff]  ;;  %v4189_v23 = vld [vmem:[%s10946_s12 + $0x190] sm:$0xff] }
 0x6e1   :  { %4553 = vmatprep.mubr.f32.mxu1 %v4404_v61  ;;  %6102 = vmatpush3.msra.mxu0 %v4151_v57  ;;  %v4139_v57 = vld [vmem:[%s10946_s12] sm:$0xff]  ;;  %v4173_v61 = vld [vmem:[%s10946_s12 + $0x110] sm:$0xff] }
 0x6e2   :  { %6133 = vmatpush3.msra.mxu1 %v4185_v24  ;;  %6103 = vmatprep.subr.mxu0 %v4166_v29  ;;  %v11124_v24 = vld [vmem:[#allocation24_spill] sm:$0xff] }
 0x6e3   :  { %6134 = vmatprep.subr.mxu1 %v4200_v27  ;;  %6104 = vmatpush3.msra.mxu0 %v4150_v4  ;;  %v10067_v29 = vmul.f32 %v5381_v46, %v11124_v24  ;;  %v4188_v27 = vld [vmem:[%s10946_s12 + $0x188] sm:$0xff]  ;;  %v4234_v4 = vld [vmem:[%s10946_s12 + $0x2f8] sm:$0xff]  ;;  %v4243_v46 = vld [vmem:[%s10946_s12 + $0x340] sm:$0xff] }
 0x6e4   :  { %6135 = vmatpush3.msra.mxu1 %v4184_v59  ;;  %6105 = vmatprep.subr.mxu0 %v4165_v5  ;;  %v4172_v59 = vld [vmem:[%s10946_s12 + $0x108] sm:$0xff]  ;;  %v4218_v5 = vld [vmem:[%s10946_s12 + $0x278] sm:$0xff]  ;;  %v4257_v24 = vld [vmem:[%s10946_s12 + $0x3b0] sm:$0xff] }
 0x6e5   :  { %6136 = vmatprep.subr.mxu1 %v4199_v60  ;;  %6106 = vmatpush3.msra.mxu0 %v4149_v50  ;;  %v5382_v60 = vld [vmem:[%s10936_s2 + $0x58] sm:$0x77]  ;;  %v4187_v50 = vld [vmem:[%s10946_s12 + $0x180] sm:$0xff] }
 0x6e6   :  { %6137 = vmatpush3.msra.mxu1 %v4183_v41  ;;  %6107 = vmatprep.subr.mxu0 %v4164_v35  ;;  %v4405_v41 = vcombine.high %v10067_v29, %v10067_v29  ;;  %v4233_v35 = vld [vmem:[%s10946_s12 + $0x2f0] sm:$0xff] }
 0x6e7   :  { %6138 = vmatprep.subr.mxu1 %v4198_v42  ;;  %6108 = vmatpush3.msra.mxu0 %v4148_v12  ;;  %v4171_v42 = vld [vmem:[%s10946_s12 + $0x100] sm:$0xff] }
 0x6e8   :  { %6139 = vmatpush3.msra.mxu1 %v4182_v15  ;;  %6109 = vmatprep.subr.mxu0 %v4163_v16  ;;  %v11125_v12 = vld [vmem:[#allocation25_spill] sm:$0xff]  ;;  %v4232_v16 = vld [vmem:[%s10946_s12 + $0x2e8] sm:$0xff] }
 0x6e9   :  { %6140 = vmatprep.subr.mxu1 %v4197_v18  ;;  %6110 = vmatpush3.msra.mxu0 %v4147_v19  ;;  %v10100_v15 = vmul.f32 %v5382_v60, %v11125_v12  ;;  %v4266_v18 = vld [vmem:[%s10946_s12 + $0x3f8] sm:$0xff]  ;;  %v4216_v19 = vld [vmem:[%s10946_s12 + $0x268] sm:$0xff] }
 0x6ea   :  { %6141 = vmatpush3.msra.mxu1 %v4181_v22  ;;  %6111 = vmatprep.subr.mxu0 %v4162_v45  ;;  %v4250_v22 = vld [vmem:[%s10946_s12 + $0x378] sm:$0xff]  ;;  %v4231_v45 = vld [vmem:[%s10946_s12 + $0x2e0] sm:$0xff]  ;;  %v4220_v12 = vld [vmem:[%s10946_s12 + $0x288] sm:$0xff] }
 0x6eb   :  { %6142 = vmatprep.subr.mxu1 %v4196_v3  ;;  %6112 = vmatpush3.msra.mxu0 %v4146_v40  ;;  %v4406_v3 = vcombine.high %v10100_v15, %v10100_v15  ;;  %v4265_v40 = vld [vmem:[%s10946_s12 + $0x3f0] sm:$0xff]  ;;  %v4206_v60 = vld [vmem:[%s10946_s12 + $0x218] sm:$0xff] }
 0x6ec   :  { %6143 = vmatpush3.msra.mxu1 %v4180_v0  ;;  %6113 = vmatprep.subr.mxu0 %v4161_v20  ;;  %v4215_v0 = vld [vmem:[%s10946_s12 + $0x260] sm:$0xff]  ;;  %v4230_v20 = vld [vmem:[%s10946_s12 + $0x2d8] sm:$0xff] }
 0x6ed   :  { %6144 = vmatprep.subr.mxu1 %v4195_v8  ;;  %6114 = vmatpush3.msra.mxu0 %v4145_v47  ;;  %v4264_v8 = vld [vmem:[%s10946_s12 + $0x3e8] sm:$0xff]  ;;  %v4214_v47 = vld [vmem:[%s10946_s12 + $0x258] sm:$0xff] }
 0x6ee   :  { %6145 = vmatpush3.msra.mxu1 %v4179_v9  ;;  %6115 = vmatprep.subr.mxu0 %v4160_v52  ;;  %v4248_v9 = vld [vmem:[%s10946_s12 + $0x368] sm:$0xff]  ;;  %v4229_v52 = vld [vmem:[%s10946_s12 + $0x2d0] sm:$0xff] }
 0x6ef   :  { %6146 = vmatprep.subr.mxu1 %v4194_v51  ;;  %6116 = vmatpush3.msra.mxu0 %v4144_v2  ;;  %v4263_v51 = vld [vmem:[%s10946_s12 + $0x3e0] sm:$0xff]  ;;  %v4213_v2 = vld [vmem:[%s10946_s12 + $0x250] sm:$0xff] }
 0x6f0   :  { %6147 = vmatpush3.msra.mxu1 %v4178_v37  ;;  %6117 = vmatprep.subr.mxu0 %v4159_v38  ;;  %v4247_v37 = vld [vmem:[%s10946_s12 + $0x360] sm:$0xff]  ;;  %v4228_v38 = vld [vmem:[%s10946_s12 + $0x2c8] sm:$0xff] }
 0x6f1   :  { %6148 = vmatprep.subr.mxu1 %v4193_v6  ;;  %6118 = vmatpush3.msra.mxu0 %v4143_v10  ;;  %v4262_v6 = vld [vmem:[%s10946_s12 + $0x3d8] sm:$0xff]  ;;  %v4212_v10 = vld [vmem:[%s10946_s12 + $0x248] sm:$0xff] }
 0x6f2   :  { %6149 = vmatpush3.msra.mxu1 %v4177_v32  ;;  %6119 = vmatprep.subr.mxu0 %v4158_v49  ;;  %v4246_v32 = vld [vmem:[%s10946_s12 + $0x358] sm:$0xff]  ;;  %v4227_v49 = vld [vmem:[%s10946_s12 + $0x2c0] sm:$0xff] }
 0x6f3   :  { %6150 = vmatprep.subr.mxu1 %v4192_v11  ;;  %6120 = vmatpush3.msra.mxu0 %v4142_v33  ;;  %v4261_v11 = vld [vmem:[%s10946_s12 + $0x3d0] sm:$0xff]  ;;  %v4211_v33 = vld [vmem:[%s10946_s12 + $0x240] sm:$0xff] }
 0x6f4   :  { %6151 = vmatpush3.msra.mxu1 %v4176_v13  ;;  %6121 = vmatprep.subr.mxu0 %v4157_v34  ;;  %v4245_v13 = vld [vmem:[%s10946_s12 + $0x350] sm:$0xff]  ;;  %v4226_v34 = vld [vmem:[%s10946_s12 + $0x2b8] sm:$0xff] }
 0x6f5   :  { %6152 = vmatprep.subr.mxu1 %v4191_v43  ;;  %6122 = vmatpush3.msra.mxu0 %v4141_v26  ;;  %v4260_v43 = vld [vmem:[%s10946_s12 + $0x3c8] sm:$0xff]  ;;  %v4210_v26 = vld [vmem:[%s10946_s12 + $0x238] sm:$0xff] }
 0x6f6   :  { %6153 = vmatpush3.msra.mxu1 %v4175_v44  ;;  %6123 = vmatprep.subr.mxu0 %v4156_v17  ;;  %v4244_v44 = vld [vmem:[%s10946_s12 + $0x348] sm:$0xff]  ;;  %v4225_v17 = vld [vmem:[%s10946_s12 + $0x2b0] sm:$0xff] }
 0x6f7   :  { %6154 = vmatprep.subr.mxu1 %v4190_v14  ;;  %6124 = vmatpush3.msra.mxu0 %v4140_v56  ;;  %v4259_v14 = vld [vmem:[%s10946_s12 + $0x3c0] sm:$0xff]  ;;  %v4209_v56 = vld [vmem:[%s10946_s12 + $0x230] sm:$0xff] }
 0x6f8   :  { %6155 = vmatpush3.msra.mxu1 %v4174_v53  ;;  %6125 = vmatprep.subr.mxu0 %v4155_v58  ;;  %v4224_v53 = vld [vmem:[%s10946_s12 + $0x2a8] sm:$0xff]  ;;  %v4258_v58 = vld [vmem:[%s10946_s12 + $0x3b8] sm:$0xff] }
 0x6f9   :  { %6156 = vmatprep.subr.mxu1 %v4189_v23  ;;  %6126 = vmatpush3.msra.mxu0 %v4139_v57  ;;  %v4208_v23 = vld [vmem:[%s10946_s12 + $0x228] sm:$0xff]  ;;  %v4242_v57 = vld [vmem:[%s10946_s12 + $0x338] sm:$0xff] }
 0x6fa   :  { %6157 = vmatpush3.msra.mxu1 %v4173_v61  ;;  %4484 = vmatmul.mubr.f32.vlgmr.msra.gmra.mxu0 %v9871_v54  ;;  %v4217_v54 = vld [vmem:[%s10946_s12 + $0x270] sm:$0xff]  ;;  %v4223_v61 = vld [vmem:[%s10946_s12 + $0x2a0] sm:$0xff] }
 0x6fb   :  { %6158 = vmatprep.subr.mxu1 %v4188_v27  ;;  %6165 = vmatprep.subr.mxu0 %v4234_v4  ;;  %v4207_v27 = vld [vmem:[%s10946_s12 + $0x220] sm:$0xff]  ;;  %v4241_v4 = vld [vmem:[%s10946_s12 + $0x330] sm:$0xff] }
 0x6fc   :  { %6159 = vmatpush3.msra.mxu1 %v4172_v59  ;;  %6166 = vmatpush3.msra.mxu0 %v4218_v5  ;;  %v4222_v59 = vld [vmem:[%s10946_s12 + $0x298] sm:$0xff]  ;;  %v4256_v5 = vld [vmem:[%s10946_s12 + $0x3a8] sm:$0xff] }
 0x6fd   :  { %4623 = vmatprep.mubr.f32.mxu0 %v4405_v41  ;;  %6160 = vmatprep.subr.mxu1 %v4187_v50  ;;  %v4240_v50 = vld [vmem:[%s10946_s12 + $0x328] sm:$0xff]  ;;  %v4221_v41 = vld [vmem:[%s10946_s12 + $0x290] sm:$0xff] }
 0x6fe   :  { %6167 = vmatprep.subr.mxu0 %v4233_v35  ;;  %6161 = vmatpush3.msra.mxu1 %v4171_v42  ;;  %v4255_v35 = vld [vmem:[%s10946_s12 + $0x3a0] sm:$0xff]  ;;  %v4205_v42 = vld [vmem:[%s10946_s12 + $0x210] sm:$0xff] }
 0x6ff   :  { %6168 = vmatpush3.msra.mxu0 %v4217_v54  ;;  %4554 = vmatmul.mubr.f32.vlgmr.msra.gmra.mxu1 %v9897_v1  ;;  %v4249_v1 = vld [vmem:[%s10946_s12 + $0x370] sm:$0xff]  ;;  %v4239_v54 = vld [vmem:[%s10946_s12 + $0x320] sm:$0xff] }
 0x700   :  { %6169 = vmatprep.subr.mxu0 %v4232_v16  ;;  %6200 = vmatprep.subr.mxu1 %v4266_v18  ;;  %v4254_v16 = vld [vmem:[%s10946_s12 + $0x398] sm:$0xff]  ;;  %v4204_v18 = vld [vmem:[%s10946_s12 + $0x208] sm:$0xff] }
 0x701   :  { %6170 = vmatpush3.msra.mxu0 %v4216_v19  ;;  %6201 = vmatpush3.msra.mxu1 %v4250_v22  ;;  %v5383_v19 = vld [vmem:[%s10936_s2 + $0x60] sm:$0x77]  ;;  %v4238_v22 = vld [vmem:[%s10946_s12 + $0x318] sm:$0xff] }
 0x702   :  { %4693 = vmatprep.mubr.f32.mxu1 %v4406_v3  ;;  %6171 = vmatprep.subr.mxu0 %v4231_v45  ;;  %v4219_v45 = vld [vmem:[%s10946_s12 + $0x280] sm:$0xff]  ;;  %v4253_v3 = vld [vmem:[%s10946_s12 + $0x390] sm:$0xff] }
 0x703   :  { %6202 = vmatprep.subr.mxu1 %v4265_v40  ;;  %6172 = vmatpush3.msra.mxu0 %v4215_v0  ;;  %v4203_v40 = vld [vmem:[%s10946_s12 + $0x200] sm:$0xff]  ;;  %v4237_v0 = vld [vmem:[%s10946_s12 + $0x310] sm:$0xff] }
 0x704   :  { %6203 = vmatpush3.msra.mxu1 %v4249_v1  ;;  %6173 = vmatprep.subr.mxu0 %v4230_v20  ;;  %v11126_v1 = vld [vmem:[#allocation26_spill] sm:$0xff] }
 0x705   :  { %6204 = vmatprep.subr.mxu1 %v4264_v8  ;;  %6174 = vmatpush3.msra.mxu0 %v4214_v47  ;;  %v10277_v20 = vmul.f32 %v5383_v19, %v11126_v1  ;;  %v4252_v8 = vld [vmem:[%s10946_s12 + $0x388] sm:$0xff]  ;;  %v4298_v47 = vld [vmem:[%s10946_s12 + $0x4f8] sm:$0xff]  ;;  %v4307_v19 = vld [vmem:[%s10946_s12 + $0x540] sm:$0xff] }
 0x706   :  { %6205 = vmatpush3.msra.mxu1 %v4248_v9  ;;  %6175 = vmatprep.subr.mxu0 %v4229_v52  ;;  %v4236_v9 = vld [vmem:[%s10946_s12 + $0x308] sm:$0xff]  ;;  %v4282_v52 = vld [vmem:[%s10946_s12 + $0x478] sm:$0xff]  ;;  %v4321_v1 = vld [vmem:[%s10946_s12 + $0x5b0] sm:$0xff] }
 0x707   :  { %6206 = vmatprep.subr.mxu1 %v4263_v51  ;;  %6176 = vmatpush3.msra.mxu0 %v4213_v2  ;;  %v5384_v51 = vld [vmem:[%s10936_s2 + $0x68] sm:$0x77]  ;;  %v4251_v2 = vld [vmem:[%s10946_s12 + $0x380] sm:$0xff] }
 0x708   :  { %6207 = vmatpush3.msra.mxu1 %v4247_v37  ;;  %6177 = vmatprep.subr.mxu0 %v4228_v38  ;;  %v4407_v37 = vcombine.high %v10277_v20, %v10277_v20  ;;  %v4297_v38 = vld [vmem:[%s10946_s12 + $0x4f0] sm:$0xff] }
 0x709   :  { %6208 = vmatprep.subr.mxu1 %v4262_v6  ;;  %6178 = vmatpush3.msra.mxu0 %v4212_v10  ;;  %v4235_v6 = vld [vmem:[%s10946_s12 + $0x300] sm:$0xff]  ;;  %v11127_v10 = vld [vmem:[#allocation27_spill] sm:$0xff] }
 0x70a   :  { %6209 = vmatpush3.msra.mxu1 %v4246_v32  ;;  %6179 = vmatprep.subr.mxu0 %v4227_v49  ;;  %v10310_v32 = vmul.f32 %v5384_v51, %v11127_v10  ;;  %v4296_v49 = vld [vmem:[%s10946_s12 + $0x4e8] sm:$0xff]  ;;  %v4303_v10 = vld [vmem:[%s10946_s12 + $0x520] sm:$0xff] }
 0x70b   :  { %6210 = vmatprep.subr.mxu1 %v4261_v11  ;;  %6180 = vmatpush3.msra.mxu0 %v4211_v33  ;;  %v4330_v11 = vld [vmem:[%s10946_s12 + $0x5f8] sm:$0xff]  ;;  %v4280_v33 = vld [vmem:[%s10946_s12 + $0x468] sm:$0xff] }
 0x70c   :  { %6211 = vmatpush3.msra.mxu1 %v4245_v13  ;;  %6181 = vmatprep.subr.mxu0 %v4226_v34  ;;  %v4314_v13 = vld [vmem:[%s10946_s12 + $0x578] sm:$0xff]  ;;  %v4295_v34 = vld [vmem:[%s10946_s12 + $0x4e0] sm:$0xff] }
 0x70d   :  { %6212 = vmatprep.subr.mxu1 %v4260_v43  ;;  %6182 = vmatpush3.msra.mxu0 %v4210_v26  ;;  %v4408_v43 = vcombine.high %v10310_v32, %v10310_v32  ;;  %v4329_v26 = vld [vmem:[%s10946_s12 + $0x5f0] sm:$0xff] }
 0x70e   :  { %6213 = vmatpush3.msra.mxu1 %v4244_v44  ;;  %6183 = vmatprep.subr.mxu0 %v4225_v17  ;;  %v4279_v44 = vld [vmem:[%s10946_s12 + $0x460] sm:$0xff]  ;;  %v4294_v17 = vld [vmem:[%s10946_s12 + $0x4d8] sm:$0xff] }
 0x70f   :  { %6214 = vmatprep.subr.mxu1 %v4259_v14  ;;  %6184 = vmatpush3.msra.mxu0 %v4209_v56  ;;  %v4328_v14 = vld [vmem:[%s10946_s12 + $0x5e8] sm:$0xff]  ;;  %v4278_v56 = vld [vmem:[%s10946_s12 + $0x458] sm:$0xff] }
 0x710   :  { %6215 = vmatpush3.msra.mxu1 %v4243_v46  ;;  %6185 = vmatprep.subr.mxu0 %v4224_v53  ;;  %v4312_v46 = vld [vmem:[%s10946_s12 + $0x568] sm:$0xff]  ;;  %v4293_v53 = vld [vmem:[%s10946_s12 + $0x4d0] sm:$0xff] }
 0x711   :  { %6216 = vmatprep.subr.mxu1 %v4258_v58  ;;  %6186 = vmatpush3.msra.mxu0 %v4208_v23  ;;  %v4327_v58 = vld [vmem:[%s10946_s12 + $0x5e0] sm:$0xff]  ;;  %v4277_v23 = vld [vmem:[%s10946_s12 + $0x450] sm:$0xff] }
 0x712   :  { %6217 = vmatpush3.msra.mxu1 %v4242_v57  ;;  %6187 = vmatprep.subr.mxu0 %v4223_v61  ;;  %v4311_v57 = vld [vmem:[%s10946_s12 + $0x560] sm:$0xff]  ;;  %v4292_v61 = vld [vmem:[%s10946_s12 + $0x4c8] sm:$0xff] }
 0x713   :  { %6218 = vmatprep.subr.mxu1 %v4257_v24  ;;  %6188 = vmatpush3.msra.mxu0 %v4207_v27  ;;  %v4326_v24 = vld [vmem:[%s10946_s12 + $0x5d8] sm:$0xff]  ;;  %v4276_v27 = vld [vmem:[%s10946_s12 + $0x448] sm:$0xff] }
 0x714   :  { %6219 = vmatpush3.msra.mxu1 %v4241_v4  ;;  %6189 = vmatprep.subr.mxu0 %v4222_v59  ;;  %v4310_v4 = vld [vmem:[%s10946_s12 + $0x558] sm:$0xff]  ;;  %v4291_v59 = vld [vmem:[%s10946_s12 + $0x4c0] sm:$0xff] }
 0x715   :  { %6220 = vmatprep.subr.mxu1 %v4256_v5  ;;  %6190 = vmatpush3.msra.mxu0 %v4206_v60  ;;  %v4325_v5 = vld [vmem:[%s10946_s12 + $0x5d0] sm:$0xff]  ;;  %v4275_v60 = vld [vmem:[%s10946_s12 + $0x440] sm:$0xff] }
 0x716   :  { %6221 = vmatpush3.msra.mxu1 %v4240_v50  ;;  %6191 = vmatprep.subr.mxu0 %v4221_v41  ;;  %v4309_v50 = vld [vmem:[%s10946_s12 + $0x550] sm:$0xff]  ;;  %v4290_v41 = vld [vmem:[%s10946_s12 + $0x4b8] sm:$0xff] }
 0x717   :  { %6222 = vmatprep.subr.mxu1 %v4255_v35  ;;  %6192 = vmatpush3.msra.mxu0 %v4205_v42  ;;  %v4324_v35 = vld [vmem:[%s10946_s12 + $0x5c8] sm:$0xff]  ;;  %v4274_v42 = vld [vmem:[%s10946_s12 + $0x438] sm:$0xff] }
 0x718   :  { %6223 = vmatpush3.msra.mxu1 %v4239_v54  ;;  %6193 = vmatprep.subr.mxu0 %v4220_v12  ;;  %v4308_v54 = vld [vmem:[%s10946_s12 + $0x548] sm:$0xff]  ;;  %v4289_v12 = vld [vmem:[%s10946_s12 + $0x4b0] sm:$0xff] }
 0x719   :  { %6224 = vmatprep.subr.mxu1 %v4254_v16  ;;  %6194 = vmatpush3.msra.mxu0 %v4204_v18  ;;  %v4323_v16 = vld [vmem:[%s10946_s12 + $0x5c0] sm:$0xff]  ;;  %v4273_v18 = vld [vmem:[%s10946_s12 + $0x430] sm:$0xff] }
 0x71a   :  { %6225 = vmatpush3.msra.mxu1 %v4238_v22  ;;  %6195 = vmatprep.subr.mxu0 %v4219_v45  ;;  %v4288_v22 = vld [vmem:[%s10946_s12 + $0x4a8] sm:$0xff]  ;;  %v4322_v45 = vld [vmem:[%s10946_s12 + $0x5b8] sm:$0xff] }
 0x71b   :  { %6226 = vmatprep.subr.mxu1 %v4253_v3  ;;  %6196 = vmatpush3.msra.mxu0 %v4203_v40  ;;  %v4272_v3 = vld [vmem:[%s10946_s12 + $0x428] sm:$0xff]  ;;  %v4306_v40 = vld [vmem:[%s10946_s12 + $0x538] sm:$0xff] }
 0x71c   :  { %6227 = vmatpush3.msra.mxu1 %v4237_v0  ;;  %4624 = vmatmul.mubr.f32.vlgmr.msra.gmra.mxu0 %v10067_v29  ;;  %v4281_v29 = vld [vmem:[%s10946_s12 + $0x470] sm:$0xff]  ;;  %v4287_v0 = vld [vmem:[%s10946_s12 + $0x4a0] sm:$0xff] }
 0x71d   :  { %6228 = vmatprep.subr.mxu1 %v4252_v8  ;;  %6235 = vmatprep.subr.mxu0 %v4298_v47  ;;  %v4271_v8 = vld [vmem:[%s10946_s12 + $0x420] sm:$0xff]  ;;  %v4305_v47 = vld [vmem:[%s10946_s12 + $0x530] sm:$0xff] }
 0x71e   :  { %6229 = vmatpush3.msra.mxu1 %v4236_v9  ;;  %6236 = vmatpush3.msra.mxu0 %v4282_v52  ;;  %v4286_v9 = vld [vmem:[%s10946_s12 + $0x498] sm:$0xff] }
 0x71f   :  { %4763 = vmatprep.mubr.f32.mxu0 %v4407_v37  ;;  %6230 = vmatprep.subr.mxu1 %v4251_v2  ;;  %v11128_v52 = vld [vmem:[#allocation21_spill] sm:$0xff]  ;;  %v4320_v37 = vld [vmem:[%s10946_s12 + $0x5a8] sm:$0xff] }
 0x720   :  { %6237 = vmatprep.subr.mxu0 %v4297_v38  ;;  %6231 = vmatpush3.msra.mxu1 %v4235_v6  ;;  %v4086_v51 = vrot.slane %v8644_v30, %v11128_v52  ;;  %v4090_v2 = vrot.slane %v8310_v21, %v11128_v52  ;;  %v4270_v38 = vld [vmem:[%s10946_s12 + $0x418] sm:$0xff]  ;;  %v4304_v6 = vld [vmem:[%s10946_s12 + $0x528] sm:$0xff]  ;;  %v4285_v30 = vld [vmem:[%s10946_s12 + $0x490] sm:$0xff] }
 0x721   :  { %6238 = vmatpush3.msra.mxu0 %v4281_v29  ;;  %4694 = vmatmul.mubr.f32.vlgmr.msra.gmra.mxu1 %v10100_v15  ;;  %v4313_v15 = vld [vmem:[%s10946_s12 + $0x570] sm:$0xff]  ;;  %v4319_v21 = vld [vmem:[%s10946_s12 + $0x5a0] sm:$0xff] }
 0x722   :  { %6239 = vmatprep.subr.mxu0 %v4296_v49  ;;  %6270 = vmatprep.subr.mxu1 %v4330_v11  ;;  %v4269_v29 = vld [vmem:[%s10946_s12 + $0x410] sm:$0xff]  ;;  %v4284_v49 = vld [vmem:[%s10946_s12 + $0x488] sm:$0xff]  ;;  %v4121_v11 = vcombine.low %v4086_v51, %v4090_v2  ;;  %v4355_v51 = vld [vmem:[%s10946_s12 + $0x6c0] sm:$0xff] }
 0x723   :  { %6240 = vmatpush3.msra.mxu0 %v4280_v33  ;;  %6271 = vmatpush3.msra.mxu1 %v4314_v13  ;;  %v4318_v33 = vld [vmem:[%s10946_s12 + $0x598] sm:$0xff]  ;;  %v4268_v13 = vld [vmem:[%s10946_s12 + $0x408] sm:$0xff]  ;;  %v4389_v2 = vld [vmem:[%s10946_s12 + $0x7d0] sm:$0xff] }
 0x724   :  { %4833 = vmatprep.mubr.f32.mxu1 %v4408_v43  ;;  %6241 = vmatprep.subr.mxu0 %v4295_v34  ;;  %v5385_v34 = vld [vmem:[%s10936_s2 + $0x70] sm:$0x77]  ;;  %v4094_v43 = vrot.slane %v8656_v7, %v11128_v52  ;;  %v4267_v7 = vld [vmem:[%s10946_s12 + $0x400] sm:$0xff] }
 0x725   :  { %6272 = vmatprep.subr.mxu1 %v4329_v26  ;;  %6242 = vmatpush3.msra.mxu0 %v4279_v44  ;;  %v4098_v26 = vrot.slane %v8318_v39, %v11128_v52  ;;  %v4302_v44 = vld [vmem:[%s10946_s12 + $0x518] sm:$0xff]  ;;  %v4301_v39 = vld [vmem:[%s10946_s12 + $0x510] sm:$0xff] }
 0x726   :  { %6273 = vmatpush3.msra.mxu1 %v4313_v15  ;;  %6243 = vmatprep.subr.mxu0 %v4294_v17  ;;  %v4283_v15 = vld [vmem:[%s10946_s12 + $0x480] sm:$0xff]  ;;  %v4317_v17 = vld [vmem:[%s10946_s12 + $0x590] sm:$0xff] }
 0x727   :  { %6274 = vmatprep.subr.mxu1 %v4328_v14  ;;  %6244 = vmatpush3.msra.mxu0 %v4278_v56  ;;  %v10494_v14 = vmul.f32 %v5385_v34, %v4121_v11  ;;  %v4316_v56 = vld [vmem:[%s10946_s12 + $0x588] sm:$0xff]  ;;  %v4337_v11 = vld [vmem:[%s10946_s12 + $0x630] sm:$0xff]  ;;  %v4386_v34 = vld [vmem:[%s10946_s12 + $0x7b8] sm:$0xff] }
 0x728   :  { %6275 = vmatpush3.msra.mxu1 %v4312_v46  ;;  %6245 = vmatprep.subr.mxu0 %v4293_v53  ;;  %v4362_v46 = vld [vmem:[%s10946_s12 + $0x6f8] sm:$0xff]  ;;  %v4122_v53 = vcombine.low %v4094_v43, %v4098_v26  ;;  %v4336_v43 = vld [vmem:[%s10946_s12 + $0x628] sm:$0xff] }
 0x729   :  { %6276 = vmatprep.subr.mxu1 %v4327_v58  ;;  %6246 = vmatpush3.msra.mxu0 %v4277_v23  ;;  %v4300_v58 = vld [vmem:[%s10946_s12 + $0x508] sm:$0xff]  ;;  %v4346_v23 = vld [vmem:[%s10946_s12 + $0x678] sm:$0xff] }
 0x72a   :  { %6277 = vmatpush3.msra.mxu1 %v4311_v57  ;;  %6247 = vmatprep.subr.mxu0 %v4292_v61  ;;  %v5386_v57 = vld [vmem:[%s10936_s2 + $0x78] sm:$0x77]  ;;  %v4315_v61 = vld [vmem:[%s10946_s12 + $0x580] sm:$0xff] }
 0x72b   :  { %6278 = vmatprep.subr.mxu1 %v4326_v24  ;;  %6248 = vmatpush3.msra.mxu0 %v4276_v27  ;;  %v4409_v24 = vcombine.high %v10494_v14, %v10494_v14  ;;  %v4361_v27 = vld [vmem:[%s10946_s12 + $0x6f0] sm:$0xff]  ;;  %v4370_v26 = vld [vmem:[%s10946_s12 + $0x738] sm:$0xff] }
 0x72c   :  { %6279 = vmatpush3.msra.mxu1 %v4310_v4  ;;  %6249 = vmatprep.subr.mxu0 %v4291_v59  ;;  %v4299_v4 = vld [vmem:[%s10946_s12 + $0x500] sm:$0xff]  ;;  %v10526_v59 = vmul.f32 %v5386_v57, %v4122_v53  ;;  %v4368_v53 = vld [vmem:[%s10946_s12 + $0x728] sm:$0xff]  ;;  %v4333_v57 = vld [vmem:[%s10946_s12 + $0x610] sm:$0xff] }
 0x72d   :  { %6280 = vmatprep.subr.mxu1 %v4325_v5  ;;  %6250 = vmatpush3.msra.mxu0 %v4275_v60  ;;  %v4360_v5 = vld [vmem:[%s10946_s12 + $0x6e8] sm:$0xff]  ;;  %v4394_v60 = vld [vmem:[%s10946_s12 + $0x7f8] sm:$0xff] }
 0x72e   :  { %6281 = vmatpush3.msra.mxu1 %v4309_v50  ;;  %6251 = vmatprep.subr.mxu0 %v4290_v41  ;;  %v4344_v50 = vld [vmem:[%s10946_s12 + $0x668] sm:$0xff]  ;;  %v4378_v41 = vld [vmem:[%s10946_s12 + $0x778] sm:$0xff] }
 0x72f   :  { %6282 = vmatprep.subr.mxu1 %v4324_v35  ;;  %6252 = vmatpush3.msra.mxu0 %v4274_v42  ;;  %v4359_v35 = vld [vmem:[%s10946_s12 + $0x6e0] sm:$0xff]  ;;  %v4410_v42 = vcombine.high %v10526_v59, %v10526_v59 }
 0x730   :  { %6283 = vmatpush3.msra.mxu1 %v4308_v54  ;;  %6253 = vmatprep.subr.mxu0 %v4289_v12  ;;  %v4393_v54 = vld [vmem:[%s10946_s12 + $0x7f0] sm:$0xff]  ;;  %v4343_v12 = vld [vmem:[%s10946_s12 + $0x660] sm:$0xff] }
 0x731   :  { %6284 = vmatprep.subr.mxu1 %v4323_v16  ;;  %6254 = vmatpush3.msra.mxu0 %v4273_v18  ;;  %v4358_v16 = vld [vmem:[%s10946_s12 + $0x6d8] sm:$0xff]  ;;  %v4392_v18 = vld [vmem:[%s10946_s12 + $0x7e8] sm:$0xff] }
 0x732   :  { %6285 = vmatpush3.msra.mxu1 %v4307_v19  ;;  %6255 = vmatprep.subr.mxu0 %v4288_v22  ;;  %v4342_v19 = vld [vmem:[%s10946_s12 + $0x658] sm:$0xff]  ;;  %v4376_v22 = vld [vmem:[%s10946_s12 + $0x768] sm:$0xff] }
 0x733   :  { %6286 = vmatprep.subr.mxu1 %v4322_v45  ;;  %6256 = vmatpush3.msra.mxu0 %v4272_v3  ;;  %v4357_v45 = vld [vmem:[%s10946_s12 + $0x6d0] sm:$0xff]  ;;  %v4391_v3 = vld [vmem:[%s10946_s12 + $0x7e0] sm:$0xff] }
 0x734   :  { %6287 = vmatpush3.msra.mxu1 %v4306_v40  ;;  %6257 = vmatprep.subr.mxu0 %v4287_v0  ;;  %v4341_v40 = vld [vmem:[%s10946_s12 + $0x650] sm:$0xff]  ;;  %v4375_v0 = vld [vmem:[%s10946_s12 + $0x760] sm:$0xff] }
 0x735   :  { %6288 = vmatprep.subr.mxu1 %v4321_v1  ;;  %6258 = vmatpush3.msra.mxu0 %v4271_v8  ;;  %v4356_v1 = vld [vmem:[%s10946_s12 + $0x6c8] sm:$0xff]  ;;  %v4390_v8 = vld [vmem:[%s10946_s12 + $0x7d8] sm:$0xff] }
 0x736   :  { %6289 = vmatpush3.msra.mxu1 %v4305_v47  ;;  %6259 = vmatprep.subr.mxu0 %v4286_v9  ;;  %v4340_v47 = vld [vmem:[%s10946_s12 + $0x648] sm:$0xff]  ;;  %v4374_v9 = vld [vmem:[%s10946_s12 + $0x758] sm:$0xff] }
 0x737   :  { %6290 = vmatprep.subr.mxu1 %v4320_v37  ;;  %6260 = vmatpush3.msra.mxu0 %v4270_v38  ;;  %v4339_v37 = vld [vmem:[%s10946_s12 + $0x640] sm:$0xff]  ;;  %v4373_v38 = vld [vmem:[%s10946_s12 + $0x750] sm:$0xff] }
 0x738   :  { %6291 = vmatpush3.msra.mxu1 %v4304_v6  ;;  %6261 = vmatprep.subr.mxu0 %v4285_v30  ;;  %v4354_v6 = vld [vmem:[%s10946_s12 + $0x6b8] sm:$0xff]  ;;  %v4388_v30 = vld [vmem:[%s10946_s12 + $0x7c8] sm:$0xff] }
 0x739   :  { %6292 = vmatprep.subr.mxu1 %v4319_v21  ;;  %6262 = vmatpush3.msra.mxu0 %v4269_v29  ;;  %v4338_v21 = vld [vmem:[%s10946_s12 + $0x638] sm:$0xff]  ;;  %v4372_v29 = vld [vmem:[%s10946_s12 + $0x748] sm:$0xff] }
 0x73a   :  { %6293 = vmatpush3.msra.mxu1 %v4303_v10  ;;  %6263 = vmatprep.subr.mxu0 %v4284_v49  ;;  %v4353_v10 = vld [vmem:[%s10946_s12 + $0x6b0] sm:$0xff]  ;;  %v4387_v49 = vld [vmem:[%s10946_s12 + $0x7c0] sm:$0xff] }
 0x73b   :  { %6294 = vmatprep.subr.mxu1 %v4318_v33  ;;  %6264 = vmatpush3.msra.mxu0 %v4268_v13  ;;  %v4371_v33 = vld [vmem:[%s10946_s12 + $0x740] sm:$0xff]  ;;  %v4352_v13 = vld [vmem:[%s10946_s12 + $0x6a8] sm:$0xff] }
 0x73c   :  { %6295 = vmatpush3.msra.mxu1 %v4302_v44  ;;  %6265 = vmatprep.subr.mxu0 %v4283_v15  ;;  %v4351_v44 = vld [vmem:[%s10946_s12 + $0x6a0] sm:$0xff]  ;;  %v4385_v15 = vld [vmem:[%s10946_s12 + $0x7b0] sm:$0xff] }
 0x73d   :  { %6296 = vmatprep.subr.mxu1 %v4317_v17  ;;  %6266 = vmatpush3.msra.mxu0 %v4267_v7  ;;  %v4335_v17 = vld [vmem:[%s10946_s12 + $0x620] sm:$0xff]  ;;  %v4369_v7 = vld [vmem:[%s10946_s12 + $0x730] sm:$0xff] }
 0x73e   :  { %6297 = vmatpush3.msra.mxu1 %v4301_v39  ;;  %4764 = vmatmul.mubr.f32.vlgmr.msra.gmra.mxu0 %v10277_v20  ;;  %v4345_v20 = vld [vmem:[%s10946_s12 + $0x670] sm:$0xff]  ;;  %v4350_v39 = vld [vmem:[%s10946_s12 + $0x698] sm:$0xff] }
 0x73f   :  { %6298 = vmatprep.subr.mxu1 %v4316_v56  ;;  %6305 = vmatprep.subr.mxu0 %v4362_v46  ;;  %v4384_v56 = vld [vmem:[%s10946_s12 + $0x7a8] sm:$0xff]  ;;  %v4334_v46 = vld [vmem:[%s10946_s12 + $0x618] sm:$0xff] }
 0x740   :  { %6299 = vmatpush3.msra.mxu1 %v4300_v58  ;;  %6306 = vmatpush3.msra.mxu0 %v4346_v23  ;;  %v4349_v58 = vld [vmem:[%s10946_s12 + $0x690] sm:$0xff]  ;;  %v4383_v23 = vld [vmem:[%s10946_s12 + $0x7a0] sm:$0xff] }
 0x741   :  { %4903 = vmatprep.mubr.f32.mxu0 %v4409_v24  ;;  %6300 = vmatprep.subr.mxu1 %v4315_v61  ;;  %v4367_v61 = vld [vmem:[%s10946_s12 + $0x720] sm:$0xff]  ;;  %v4348_v24 = vld [vmem:[%s10946_s12 + $0x688] sm:$0xff] }
 0x742   :  { %6307 = vmatprep.subr.mxu0 %v4361_v27  ;;  %6301 = vmatpush3.msra.mxu1 %v4299_v4  ;;  %v4382_v27 = vld [vmem:[%s10946_s12 + $0x798] sm:$0xff]  ;;  %v4332_v4 = vld [vmem:[%s10946_s12 + $0x608] sm:$0xff] }
 0x743   :  { %6308 = vmatpush3.msra.mxu0 %v4345_v20  ;;  %4834 = vmatmul.mubr.f32.vlgmr.msra.gmra.mxu1 %v10310_v32  ;;  %v4377_v32 = vld [vmem:[%s10946_s12 + $0x770] sm:$0xff]  ;;  %v4366_v20 = vld [vmem:[%s10946_s12 + $0x718] sm:$0xff] }
 0x744   :  { %6309 = vmatprep.subr.mxu0 %v4360_v5  ;;  %6340 = vmatprep.subr.mxu1 %v4394_v60  ;;  %v4347_v5 = vld [vmem:[%s10946_s12 + $0x680] sm:$0xff]  ;;  %v4381_v60 = vld [vmem:[%s10946_s12 + $0x790] sm:$0xff] }
 0x745   :  { %6310 = vmatpush3.msra.mxu0 %v4344_v50  ;;  %6341 = vmatpush3.msra.mxu1 %v4378_v41  ;;  %v4331_v50 = vld [vmem:[%s10946_s12 + $0x600] sm:$0xff]  ;;  %v4365_v41 = vld [vmem:[%s10946_s12 + $0x710] sm:$0xff] }
 0x746   :  { %4973 = vmatprep.mubr.f32.mxu1 %v4410_v42  ;;  %6311 = vmatprep.subr.mxu0 %v4359_v35  ;;  %v4380_v35 = vld [vmem:[%s10946_s12 + $0x788] sm:$0xff] }
 0x747   :  { %6342 = vmatprep.subr.mxu1 %v4393_v54  ;;  %6312 = vmatpush3.msra.mxu0 %v4343_v12  ;;  %v4364_v42 = vld [vmem:[%s10946_s12 + $0x708] sm:$0xff]  ;;  %v4379_v54 = vld [vmem:[%s10946_s12 + $0x780] sm:$0xff] }
 0x748   :  { %6343 = vmatpush3.msra.mxu1 %v4377_v32  ;;  %6313 = vmatprep.subr.mxu0 %v4358_v16  ;;  %v4363_v12 = vld [vmem:[%s10946_s12 + $0x700] sm:$0xff] }
 0x749   :  { %6344 = vmatprep.subr.mxu1 %v4392_v18  ;;  %6314 = vmatpush3.msra.mxu0 %v4342_v19  ;;  %v10716_v18 = vpop.eup %6513 }
 0x74a   :  { %6345 = vmatpush3.msra.mxu1 %v4376_v22  ;;  %6315 = vmatprep.subr.mxu0 %v4357_v45 }
 0x74b   :  { %6346 = vmatprep.subr.mxu1 %v4391_v3  ;;  %6316 = vmatpush3.msra.mxu0 %v4341_v40  ;;  %v4022_v40 = vrot.slane %v10716_v18, %v7087_v36  ;;  %v5216_v36 = vld [vmem:[%s10947_s13 + $0x1f8] sm:$0xff] }
 0x74c   :  { %6347 = vmatpush3.msra.mxu1 %v4375_v0  ;;  %6317 = vmatprep.subr.mxu0 %v4356_v1  ;;  %v4986_v1 = vld [vmem:[#allocation15 + $0x10] sm:$0xff] }
 0x74d   :  { %6348 = vmatprep.subr.mxu1 %v4390_v8  ;;  %6318 = vmatpush3.msra.mxu0 %v4340_v47  ;;  %v5184_v8 = vld [vmem:[%s10947_s13 + $0xf8] sm:$0xff] }
 0x74e   :  { %6349 = vmatpush3.msra.mxu1 %v4374_v9  ;;  %6319 = vmatprep.subr.mxu0 %v4355_v51 }
 0x74f   :  { %6350 = vmatprep.subr.mxu1 %v4389_v2  ;;  %6320 = vmatpush3.msra.mxu0 %v4339_v37 }
 0x750   :  { %6351 = vmatpush3.msra.mxu1 %v4373_v38  ;;  %6321 = vmatprep.subr.mxu0 %v4354_v6 }
 0x751   :  { %6352 = vmatprep.subr.mxu1 %v4388_v30  ;;  %6322 = vmatpush3.msra.mxu0 %v4338_v21 }
 0x752   :  { %6353 = vmatpush3.msra.mxu1 %v4372_v29  ;;  %6323 = vmatprep.subr.mxu0 %v4353_v10 }
 0x753   :  { %6354 = vmatprep.subr.mxu1 %v4387_v49  ;;  %6324 = vmatpush3.msra.mxu0 %v4337_v11 }
 0x754   :  { %6355 = vmatpush3.msra.mxu1 %v4371_v33  ;;  %6325 = vmatprep.subr.mxu0 %v4352_v13 }
 0x755   :  { %6356 = vmatprep.subr.mxu1 %v4386_v34  ;;  %6326 = vmatpush3.msra.mxu0 %v4336_v43 }
 0x756   :  { %6357 = vmatpush3.msra.mxu1 %v4370_v26  ;;  %6327 = vmatprep.subr.mxu0 %v4351_v44 }
 0x757   :  { %6358 = vmatprep.subr.mxu1 %v4385_v15  ;;  %6328 = vmatpush3.msra.mxu0 %v4335_v17 }
 0x758   :  { %6359 = vmatpush3.msra.mxu1 %v4369_v7  ;;  %6329 = vmatprep.subr.mxu0 %v4350_v39 }
 0x759   :  { %6360 = vmatprep.subr.mxu1 %v4384_v56  ;;  %6330 = vmatpush3.msra.mxu0 %v4334_v46 }
 0x75a   :  { %6361 = vmatpush3.msra.mxu1 %v4368_v53  ;;  %6331 = vmatprep.subr.mxu0 %v4349_v58 }
 0x75b   :  { %6362 = vmatprep.subr.mxu1 %v4383_v23  ;;  %6332 = vmatpush3.msra.mxu0 %v4333_v57 }
 0x75c   :  { %6363 = vmatpush3.msra.mxu1 %v4367_v61  ;;  %6333 = vmatprep.subr.mxu0 %v4348_v24 }
 0x75d   :  { %6364 = vmatprep.subr.mxu1 %v4382_v27  ;;  %6334 = vmatpush3.msra.mxu0 %v4332_v4  ;;  %v4982_v27 = vrot.slane %v9786_v25, %v11128_v52  ;;  %v5167_v25 = vld [vmem:[%s10947_s13 + $0x70] sm:$0xff] }
 0x75e   :  { %6365 = vmatpush3.msra.mxu1 %v4366_v20  ;;  %6335 = vmatprep.subr.mxu0 %v4347_v5  ;;  %v5168_v20 = vld [vmem:[%s10947_s13 + $0x78] sm:$0xff] }
 0x75f   :  { %6366 = vmatprep.subr.mxu1 %v4381_v60  ;;  %6336 = vmatpush3.msra.mxu0 %v4331_v50  ;;  %v5200_v5 = vld [vmem:[%s10947_s13 + $0x178] sm:$0xff]  ;;  %v5183_v60 = vld [vmem:[%s10947_s13 + $0xf0] sm:$0xff] }
 0x760   :  { %6367 = vmatpush3.msra.mxu1 %v4365_v41  ;;  %4904 = vmatmul.mubr.f32.vlgmr.msra.gmra.mxu0 %v10494_v14  ;;  %v5215_v50 = vld [vmem:[%s10947_s13 + $0x1f0] sm:$0xff] }
 0x761   :  { %6368 = vmatprep.subr.mxu1 %v4380_v35  ;;  %5055 = vmatprep.mubr.f32.mxu0 %v11076_v31  ;;  %v5199_v41 = vld [vmem:[%s10947_s13 + $0x170] sm:$0xff]  ;;  %v5182_v35 = vld [vmem:[%s10947_s13 + $0xe8] sm:$0xff] }
 0x762   :  { %6369 = vmatpush3.msra.mxu1 %v4364_v42  ;;  %v5214_v42 = vld [vmem:[%s10947_s13 + $0x1e8] sm:$0xff] }
 0x763   :  { %6370 = vmatprep.subr.mxu1 %v4379_v54  ;;  %v5166_v54 = vld [vmem:[%s10947_s13 + $0x68] sm:$0xff] }
 0x764   :  { %6371 = vmatpush3.msra.mxu1 %v4363_v12  ;;  %v5198_v12 = vld [vmem:[%s10947_s13 + $0x168] sm:$0xff] }
 0x765   :  { %4974 = vmatmul.mubr.f32.vlgmr.msra.gmra.mxu1 %v10526_v59  ;;  %5092 = vmatprep.subr.mxu1 %v4987_v62  ;;  %v4984_v59 = vld [vmem:[#allocation15] sm:$0xff]  ;;  %v5163_v62 = vld [vmem:[%s10947_s13 + $0x50] sm:$0xff] }
 0x766   :  { %5126 = vmatprep.mubr.f32.mxu1 %v11076_v31  ;;  %v4985_v31 = vld [vmem:[#allocation15 + $0x8] sm:$0xff]  ;;  %5093 = vmatpush1.msra.mxu1 %v4986_v1 }
 0x767   :  { %5021 = vmatprep.subr.mxu0 %v4985_v31  ;;  %6410 = vmatprep.subr.mxu1 %v5216_v36  ;;  %v5211_v31 = vld [vmem:[%s10947_s13 + $0x1d0] sm:$0xff]  ;;  %v5178_v1 = vld [vmem:[%s10947_s13 + $0xc8] sm:$0xff] }
 0x768   :  { %5022 = vmatpush1.msra.mxu0 %v4984_v59  ;;  %v5195_v59 = vld [vmem:[%s10947_s13 + $0x150] sm:$0xff]  ;;  %v5162_v36 = vld [vmem:[%s10947_s13 + $0x48] sm:$0xff] }
 0x769   :  { %6375 = vmatprep.subr.mxu0 %v5184_v8  ;;  %v5210_v8 = vld [vmem:[%s10947_s13 + $0x1c8] sm:$0xff] }
 0x79a   :  { %v6057_v14 = vpop.f32.mrf.mxu0 }
 0x79c   :  { %v6058_v32 = vpop.f32.mrf.mxu0 }
 0x79d   :  { %v6059_v22 = vadd.f32 %v6058_v32, %v6057_v14  ;;  %v5181_v14 = vld [vmem:[%s10947_s13 + $0xe0] sm:$0xff] }
 0x79e   :  { %v6092_v16 = vpop.f32.mrf.mxu1  ;;  %v5213_v32 = vld [vmem:[%s10947_s13 + $0x1e0] sm:$0xff] }
 0x7a0   :  { %v6093_v19 = vpop.f32.mrf.mxu1 }
 0x7a1   :  { %v6094_v45 = vadd.f32 %v6093_v19, %v6092_v16  ;;  %v5165_v16 = vld [vmem:[%s10947_s13 + $0x60] sm:$0xff] }
 0x7a2   :  { %v5197_v19 = vld [vmem:[%s10947_s13 + $0x160] sm:$0xff] }
 0x7a3   :  { %v4016_v3 = vadd.f32 %v6094_v45, %v6059_v22  ;;  %v5180_v22 = vld [vmem:[%s10947_s13 + $0xd8] sm:$0xff] }
 0x7a4   :  { %v5212_v45 = vld [vmem:[%s10947_s13 + $0x1d8] sm:$0xff] }
 0x7a5   :  { %v4023_v0 = vmul.f32 %v4022_v40, %v4016_v3  ;;  %v5164_v3 = vld [vmem:[%s10947_s13 + $0x58] sm:$0xff] }
 0x7a6   :  { %v5196_v40 = vld [vmem:[%s10947_s13 + $0x158] sm:$0xff] }
 0x7a7   :  { %4025 = vst.msk [vmem:[%s10949_s15] sm:$0x7] %vm4024_vm6, %v4023_v0  ;;  %v5179_v0 = vld [vmem:[%s10947_s13 + $0xd0] sm:$0xff] }
 0x7ba   :  { %v6127_v47 = vpop.f32.mrf.mxu0 }
 0x7bc   :  { %v6128_v51 = vpop.f32.mrf.mxu0 }
 0x7bd   :  { %v6129_v49 = vadd.f32 %v6128_v51, %v6127_v47  ;;  %v5194_v47 = vld [vmem:[%s10947_s13 + $0x148] sm:$0xff]  ;;  %v5209_v51 = vld [vmem:[%s10947_s13 + $0x1c0] sm:$0xff] }
 0x7bf   :  { %v6162_v9 = vpop.f32.mrf.mxu1 }
 0x7c1   :  { %v6163_v2 = vpop.f32.mrf.mxu1 }
 0x7c2   :  { %v6164_v29 = vadd.f32 %v6163_v2, %v6162_v9  ;;  %v5177_v9 = vld [vmem:[%s10947_s13 + $0xc0] sm:$0xff] }
 0x7c3   :  { %v5161_v2 = vld [vmem:[%s10947_s13 + $0x40] sm:$0xff] }
 0x7c4   :  { %v4556_v13 = vadd.f32 %v6164_v29, %v6129_v49  ;;  %v5175_v29 = vld [vmem:[%s10947_s13 + $0xb0] sm:$0xff] }
 0x7c5   :  { %v5159_v49 = vld [vmem:[%s10947_s13 + $0x30] sm:$0xff] }
 0x7dc   :  { %v6197_v37 = vpop.f32.mrf.mxu0 }
 0x7de   :  { %v6198_v6 = vpop.f32.mrf.mxu0 }
 0x7df   :  { %v6199_v11 = vadd.f32 %v6198_v6, %v6197_v37  ;;  %v5193_v37 = vld [vmem:[%s10947_s13 + $0x140] sm:$0xff]  ;;  %v5208_v6 = vld [vmem:[%s10947_s13 + $0x1b8] sm:$0xff] }
 0x7e1   :  { %v6232_v38 = vpop.f32.mrf.mxu1  ;;  %v4626_v26 = vadd.f32 %v6199_v11, %v4556_v13  ;;  %v5191_v11 = vld [vmem:[%s10947_s13 + $0x130] sm:$0xff]  ;;  %v5206_v13 = vld [vmem:[%s10947_s13 + $0x1a8] sm:$0xff] }
 0x7e3   :  { %v6233_v30 = vpop.f32.mrf.mxu1 }
 0x7e4   :  { %v6234_v34 = vadd.f32 %v6233_v30, %v6232_v38  ;;  %v5176_v38 = vld [vmem:[%s10947_s13 + $0xb8] sm:$0xff] }
 0x7e5   :  { %v5160_v30 = vld [vmem:[%s10947_s13 + $0x38] sm:$0xff] }
 0x7e6   :  { %v4696_v17 = vadd.f32 %v6234_v34, %v4626_v26  ;;  %v5158_v34 = vld [vmem:[%s10947_s13 + $0x28] sm:$0xff]  ;;  %v5173_v26 = vld [vmem:[%s10947_s13 + $0xa0] sm:$0xff] }
 0x7fe   :  { %v6267_v21 = vpop.f32.mrf.mxu0 }
 0x800   :  { %v6268_v33 = vpop.f32.mrf.mxu0 }
 0x801   :  { %v6269_v44 = vadd.f32 %v6268_v33, %v6267_v21  ;;  %v5192_v21 = vld [vmem:[%s10947_s13 + $0x138] sm:$0xff]  ;;  %v5174_v33 = vld [vmem:[%s10947_s13 + $0xa8] sm:$0xff] }
 0x803   :  { %v6302_v10 = vpop.f32.mrf.mxu1  ;;  %v4766_v56 = vadd.f32 %v6269_v44, %v4696_v17  ;;  %v5205_v44 = vld [vmem:[%s10947_s13 + $0x1a0] sm:$0xff] }
 0x804   :  { %v5189_v17 = vld [vmem:[%s10947_s13 + $0x120] sm:$0xff] }
 0x805   :  { %v6303_v43 = vpop.f32.mrf.mxu1 }
 0x806   :  { %v6304_v7 = vadd.f32 %v6303_v43, %v6302_v10  ;;  %v5207_v10 = vld [vmem:[%s10947_s13 + $0x1b0] sm:$0xff]  ;;  %v5190_v43 = vld [vmem:[%s10947_s13 + $0x128] sm:$0xff] }
 0x808   :  { %v4836_v58 = vadd.f32 %v6304_v7, %v4766_v56  ;;  %v5172_v7 = vld [vmem:[%s10947_s13 + $0x98] sm:$0xff] }
 0x809   :  { %v5156_v56 = vld [vmem:[%s10947_s13 + $0x18] sm:$0xff] }
 0x820   :  { %v6337_v15 = vpop.f32.mrf.mxu0 }
 0x822   :  { %v6338_v39 = vpop.f32.mrf.mxu0 }
 0x823   :  { %v6339_v46 = vadd.f32 %v6338_v39, %v6337_v15  ;;  %v5157_v15 = vld [vmem:[%s10947_s13 + $0x20] sm:$0xff]  ;;  %v5204_v39 = vld [vmem:[%s10947_s13 + $0x198] sm:$0xff] }
 0x825   :  { %v6372_v53 = vpop.f32.mrf.mxu1  ;;  %v4906_v57 = vadd.f32 %v6339_v46, %v4836_v58  ;;  %v5188_v46 = vld [vmem:[%s10947_s13 + $0x118] sm:$0xff]  ;;  %v5203_v58 = vld [vmem:[%s10947_s13 + $0x190] sm:$0xff] }
 0x827   :  { %v6373_v23 = vpop.f32.mrf.mxu1 }
 0x828   :  { %v6374_v61 = vadd.f32 %v6373_v23, %v6372_v53  ;;  %v5171_v53 = vld [vmem:[%s10947_s13 + $0x90] sm:$0xff] }
 0x829   :  { %v5155_v23 = vld [vmem:[%s10947_s13 + $0x10] sm:$0xff] }
 0x82a   :  { %v4976_v24 = vadd.f32 %v6374_v61, %v4906_v57  ;;  %v5187_v57 = vld [vmem:[%s10947_s13 + $0x110] sm:$0xff]  ;;  %v5170_v61 = vld [vmem:[%s10947_s13 + $0x88] sm:$0xff] }
 0x82c   :  { %v4983_v4 = vmul.f32 %v4982_v27, %v4976_v24  ;;  %v5202_v24 = vld [vmem:[%s10947_s13 + $0x188] sm:$0xff] }
 0x82d   :  { %v5154_v27 = vld [vmem:[%s10947_s13 + $0x8] sm:$0xff] }
 0x82e   :  { %5387 = vmatmul.mubr.msk.f32.vlgmr.msra.gmra.mxu0 %vm3713_vm5, %v4983_v4  ;;  %5388 = vmatmul.mubr.msk.f32.vlgmr.msra.gmra.mxu1 %vm3713_vm5, %v4983_v4  ;;  %v5186_v4 = vld [vmem:[%s10947_s13 + $0x108] sm:$0xff] }
 0x82f   :  { %6376 = vmatpush3.msra.mxu0 %v5168_v20  ;;  %6411 = vmatpush3.msra.mxu1 %v5200_v5  ;;  %v5169_v20 = vld [vmem:[%s10947_s13 + $0x80] sm:$0xff] }
 0x830   :  { %6377 = vmatprep.subr.mxu0 %v5183_v60  ;;  %6412 = vmatprep.subr.mxu1 %v5215_v50  ;;  %v5201_v5 = vld [vmem:[%s10947_s13 + $0x180] sm:$0xff] }
 0x831   :  { %6378 = vmatpush3.msra.mxu0 %v5167_v25  ;;  %6413 = vmatpush3.msra.mxu1 %v5199_v41  ;;  %v5153_v60 = vld [vmem:[%s10947_s13] sm:$0xff] }
 0x832   :  { %6379 = vmatprep.subr.mxu0 %v5182_v35  ;;  %6414 = vmatprep.subr.mxu1 %v5214_v42  ;;  %v5185_v50 = vld [vmem:[%s10947_s13 + $0x100] sm:$0xff]  ;;  %v5140_v35 = vrot.slane %v11118_v48, %v11128_v52  ;;  %v5148_v42 = vrot.slane %v11121_v63, %v11128_v52 }
 0x833   :  { %6380 = vmatpush3.msra.mxu0 %v5166_v54  ;;  %6415 = vmatpush3.msra.mxu1 %v5198_v12  ;;  %v5136_v54 = vrot.slane %v11120_v55, %v11128_v52  ;;  %v5144_v12 = vrot.slane %v11122_v28, %v11128_v52  ;;  %v5360_v28 = vrot.slane %v10716_v18, %v11128_v52 }
 0x834   :  { %6381 = vmatprep.subr.mxu0 %v5181_v14  ;;  %6416 = vmatprep.subr.mxu1 %v5213_v32 }
 0x835   :  { %6382 = vmatpush3.msra.mxu0 %v5165_v16  ;;  %6417 = vmatpush3.msra.mxu1 %v5197_v19 }
 0x836   :  { %6383 = vmatprep.subr.mxu0 %v5180_v22  ;;  %6418 = vmatprep.subr.mxu1 %v5212_v45 }
 0x837   :  { %6384 = vmatpush3.msra.mxu0 %v5164_v3  ;;  %6419 = vmatpush3.msra.mxu1 %v5196_v40 }
 0x838   :  { %6385 = vmatprep.subr.mxu0 %v5179_v0  ;;  %6420 = vmatprep.subr.mxu1 %v5211_v31 }
 0x839   :  { %6386 = vmatpush3.msra.mxu0 %v5163_v62  ;;  %6421 = vmatpush3.msra.mxu1 %v5195_v59 }
 0x83a   :  { %6387 = vmatprep.subr.mxu0 %v5178_v1  ;;  %6422 = vmatprep.subr.mxu1 %v5210_v8 }
 0x83b   :  { %6388 = vmatpush3.msra.mxu0 %v5162_v36  ;;  %6423 = vmatpush3.msra.mxu1 %v5194_v47 }
 0x83c   :  { %6389 = vmatprep.subr.mxu0 %v5177_v9  ;;  %6424 = vmatprep.subr.mxu1 %v5209_v51 }
 0x83d   :  { %6390 = vmatpush3.msra.mxu0 %v5161_v2  ;;  %6425 = vmatpush3.msra.mxu1 %v5193_v37 }
 0x83e   :  { %6391 = vmatprep.subr.mxu0 %v5176_v38  ;;  %6426 = vmatprep.subr.mxu1 %v5208_v6 }
 0x83f   :  { %6392 = vmatpush3.msra.mxu0 %v5160_v30  ;;  %6427 = vmatpush3.msra.mxu1 %v5192_v21 }
 0x840   :  { %6393 = vmatprep.subr.mxu0 %v5175_v29  ;;  %6428 = vmatprep.subr.mxu1 %v5207_v10 }
 0x841   :  { %6394 = vmatpush3.msra.mxu0 %v5159_v49  ;;  %6429 = vmatpush3.msra.mxu1 %v5191_v11 }
 0x842   :  { %6395 = vmatprep.subr.mxu0 %v5174_v33  ;;  %6430 = vmatprep.subr.mxu1 %v5206_v13 }
 0x843   :  { %6396 = vmatpush3.msra.mxu0 %v5158_v34  ;;  %6431 = vmatpush3.msra.mxu1 %v5190_v43 }
 0x844   :  { %6397 = vmatprep.subr.mxu0 %v5173_v26  ;;  %6432 = vmatprep.subr.mxu1 %v5205_v44 }
 0x845   :  { %6398 = vmatpush3.msra.mxu0 %v5157_v15  ;;  %6433 = vmatpush3.msra.mxu1 %v5189_v17 }
 0x846   :  { %6399 = vmatprep.subr.mxu0 %v5172_v7  ;;  %6434 = vmatprep.subr.mxu1 %v5204_v39 }
 0x847   :  { %6400 = vmatpush3.msra.mxu0 %v5156_v56  ;;  %6435 = vmatpush3.msra.mxu1 %v5188_v46 }
 0x848   :  { %6401 = vmatprep.subr.mxu0 %v5171_v53  ;;  %6436 = vmatprep.subr.mxu1 %v5203_v58 }
 0x849   :  { %6402 = vmatpush3.msra.mxu0 %v5155_v23  ;;  %6437 = vmatpush3.msra.mxu1 %v5187_v57 }
 0x84a   :  { %6403 = vmatprep.subr.mxu0 %v5170_v61  ;;  %6438 = vmatprep.subr.mxu1 %v5202_v24 }
 0x84b   :  { %6404 = vmatpush3.msra.mxu0 %v5154_v27  ;;  %6439 = vmatpush3.msra.mxu1 %v5186_v4 }
 0x84c   :  { %6405 = vmatprep.subr.mxu0 %v5169_v20  ;;  %6440 = vmatprep.subr.mxu1 %v5201_v5 }
 0x84d   :  { %6406 = vmatpush3.msra.mxu0 %v5153_v60  ;;  %6441 = vmatpush3.msra.mxu1 %v5185_v50 }
 0x8ee   :  { %v5057_v25 = vpop.f32.mrf.mxu0  ;;  %v5128_v41 = vpop.f32.mrf.mxu1 }
 0x8ef   :  { %v5149_v22 = vmul.f32 %v5136_v54, %v5057_v25  ;;  %v5151_v45 = vmul.f32 %v5144_v12, %v5128_v41 }
 0x8f0   :  { %v5059_v14 = vpop.f32.mrf.mxu0  ;;  %v5130_v32 = vpop.f32.mrf.mxu1 }
 0x8f1   :  { %v5150_v16 = vmul.f32 %v5140_v35, %v5059_v14  ;;  %v5152_v19 = vmul.f32 %v5148_v42, %v5130_v32 }
 0x8f3   :  { %5281 = vmatprep.mubr.f32.mxu0 %v5150_v16  ;;  %5351 = vmatprep.mubr.f32.mxu1 %v5152_v19 }
 0x8f4   :  { %5282 = vmatmul.mubr.f32.vlgmr.msra.gmra.mxu0 %v5149_v22  ;;  %5352 = vmatmul.mubr.f32.vlgmr.msra.gmra.mxu1 %v5151_v45 }
 0x9b4   :  { %v6407_v48 = vpop.f32.mrf.mxu0  ;;  %v6442_v3 = vpop.f32.mrf.mxu1 }
 0x9b6   :  { %v6408_v40 = vpop.f32.mrf.mxu0  ;;  %v6443_v63 = vpop.f32.mrf.mxu1 }
 0x9b7   :  { %v6409_v0 = vadd.f32 %v6408_v40, %v6407_v48  ;;  %v6444_v31 = vadd.f32 %v6443_v63, %v6442_v3 }
 0x9b9   :  { %v5354_v55 = vadd.f32 %v6444_v31, %v6409_v0 }
 0x9bb   :  { %v5361_v62 = vmul.f32 %v5360_v28, %v5354_v55 }
 0x9bd   :  { %5389 = vst.msk [vmem:[%s10949_s15 + $0x4] sm:$0x7] %vm4024_vm6, %v5361_v62 }
 0x9be   :  { %5368 = vsyncpa [#allocation3], 1 }
 0x9bf   :  { %5369 = vsyncpa [#allocation5], 1 }
 0x9c0   :  { %5370 = vsyncpa [#allocation8], 1 }
 0x9c1   :  { %5371 = vsyncpa [#allocation11], 1 }
 0x9c2   :  { %5372 = vsyncpa [#allocation14], 1 }

</bundles_post_ra>
